<compile_context>
chip_gen: v7x
topology: tpu7x:2x2x1
jax: 0.10.0
libtpu: 0.0.40
codegen_flags: <defaults>
</compile_context>

<pallas_src>
import functools

import jax
import jax.numpy as jnp
from jax.experimental import pallas as pl
from jax.experimental.pallas import tpu as pltpu


# --------------------------------------------------------------------------- #
# Helpers
# --------------------------------------------------------------------------- #

def autopad(k, p=None, d=1):
    """Pad to 'same' shape outputs."""
    if d > 1:
        k = d * (k - 1) + 1 if isinstance(k, int) else [d * (x - 1) + 1 for x in k]
    if p is None:
        p = k // 2 if isinstance(k, int) else [x // 2 for x in k]
    return p


def _round_up(x, m):
    return ((x + m - 1) // m) * m


def _pick_band(ho2, cap=32):
    """Largest divisor of the output row count that is <= cap (keeps the
    per-step VMEM footprint bounded and avoids ragged output blocks)."""
    if ho2 <= cap:
        return ho2
    for b in range(cap, 0, -1):
        if ho2 % b == 0:
            return b
    return ho2


# --------------------------------------------------------------------------- #
# The fused EarlyFusion kernel
#   stage A:  ya = s1(conv1(x))            (k x k, stride s, 'same' pad)
#   stage B:  o  = SiLU(BN(s3(s2(ya))))    (3x3 valid conv + folded epilogue)
# --------------------------------------------------------------------------- #

def _early_fusion_kernel(x_ref, wa_ref, ba_ref, wb_ref, scale_ref, shift_ref,
                         o_ref, ya_ref, *, k, s, band, wo_c, wo2, wo2_c):
    j = pl.program_id(1)                 # output row-band index
    a_rows = band + 2                    # stage-A rows needed by this band
    row0 = j * band * s                  # first padded-input row of the band
    cin = x_ref.shape[3]
    na = wa_ref.shape[2]
    nb = wb_ref.shape[2]

    # ---- Stage A: conv1 (k x k, stride s, no bias) folded with s1 (1x1+bias)
    acc = jnp.zeros((a_rows * wo_c, na), jnp.float32)
    t = 0
    for kh in range(k):
        for kw in range(k):
            if s == 1:
                rows = pl.ds(row0 + kh, a_rows)
                cols = pl.ds(kw, wo_c)
            else:
                # TODO(synk): strided tap windows (s > 1) are expressed via
                # pl.ds(..., stride=s); only s == 1 is exercised by the demo.
                rows = pl.ds(row0 + kh, a_rows, stride=s)
                cols = pl.ds(kw, wo_c, stride=s)
            tap = x_ref[0, rows, cols, :]                     # [a_rows, wo_c, cin] bf16
            acc += jnp.dot(tap.reshape(a_rows * wo_c, cin), wa_ref[t],
                           preferred_element_type=jnp.float32)
            t += 1
    ya = (acc + ba_ref[...]).astype(ya_ref.dtype)
    ya_ref[...] = ya.reshape(a_rows, wo_c, na)                # stays in VMEM

    # ---- Stage B: s2 (3x3+bias) folded with s3 (1x1+bias), then BN + SiLU
    acc = jnp.zeros((band * wo2_c, nb), jnp.float32)
    t = 0
    for dh in range(3):
        for dw in range(3):
            tap = ya_ref[pl.ds(dh, band), pl.ds(dw, wo2_c), :]  # [band, wo2_c, na]
            acc += jnp.dot(tap.reshape(band * wo2_c, na), wb_ref[t],
                           preferred_element_type=jnp.float32)
            t += 1
    y = acc * scale_ref[...] + shift_ref[...]                 # folded bias + BN
    y = y * jax.nn.sigmoid(y)                                 # SiLU (f32, EUP)
    y = y.reshape(band, wo2_c, nb)[:, :wo2, :]                # drop pad columns
    o_ref[0] = y.astype(o_ref.dtype)


# --------------------------------------------------------------------------- #
# Weight folding (host side, run ONCE at model load)
# --------------------------------------------------------------------------- #

def _block_diag_taps(w_rgb, w_ir):
    """(O,I,kh,kw) conv weights -> [kh*kw, I_tot, O_tot] per-tap matmul
    weights, block-diagonal over rgb/ir branches (rgb channels first)."""
    wr = jnp.transpose(w_rgb, (2, 3, 1, 0)).astype(jnp.float32)   # (kh,kw,Ir,Or)
    if w_ir is None:
        kh, kw, I, O = wr.shape
        return wr.reshape(kh * kw, I, O)
    wi = jnp.transpose(w_ir, (2, 3, 1, 0)).astype(jnp.float32)    # (kh,kw,Ii,Oi)
    kh, kw, Ir, Or = wr.shape
    _, _, Ii, Oi = wi.shape
    W = jnp.zeros((kh, kw, Ir + Ii, Or + Oi), jnp.float32)
    W = W.at[:, :, :Ir, :Or].set(wr)
    W = W.at[:, :, Ir:, Or:].set(wi)
    return W.reshape(kh * kw, Ir + Ii, Or + Oi)


def build_fused_params(params, use_ir, eps=1e-3):
    """Fold conv1 -> s1 -> s2 -> s3 -> BN -> SiLU into two per-tap matmul
    weight stacks plus a (scale, shift) epilogue.  Valid because there is no
    nonlinearity between the four convolutions and BN uses inference
    (running) statistics.  Call once at model load, not per forward."""
    gi = (lambda n: params.get(f"ir_{n}")) if use_ir else (lambda n: None)

    W1 = _block_diag_taps(params["rgb_conv1_w"], gi("conv1_w"))    # [k*k, Ci, mid1]
    Ws1 = _block_diag_taps(params["rgb_s1_w"], gi("s1_w"))[0]      # [mid1, Na]
    Ws2 = _block_diag_taps(params["rgb_s2_w"], gi("s2_w"))         # [9, Na, mid2]
    Ws3 = _block_diag_taps(params["rgb_s3_w"], gi("s3_w"))[0]      # [mid2, Nbr]

    def _cat(rgb_key, ir_key):
        if use_ir:
            return jnp.concatenate([params[rgb_key], params[ir_key]])
        return params[rgb_key]

    b1 = _cat("rgb_s1_b", "ir_s1_b")
    b2 = _cat("rgb_s2_b", "ir_s2_b")
    b3 = _cat("rgb_s3_b", "ir_s3_b")
    gamma = _cat("bn_rgb_gamma", "bn_ir_gamma")
    beta = _cat("bn_rgb_beta", "bn_ir_beta")
    mean = _cat("bn_rgb_mean", "bn_ir_mean")
    var = _cat("bn_rgb_var", "bn_ir_var")

    Wa = jnp.einsum("tio,od->tid", W1, Ws1)           # [k*k, Cin, Na]
    Wb = jnp.einsum("tio,od->tid", Ws2, Ws3)          # [9, Na, Nbr]
    scale = gamma / jnp.sqrt(var + eps)               # inference-stats BN fold
    shift = scale * (b2 @ Ws3 + b3 - mean) + beta

    if not use_ir:
        # Missing IR branch: zero weight/scale/shift columns -> SiLU(0) = 0
        # produces the zero IR half directly inside the kernel.
        nbr = Wb.shape[2]
        Wb = jnp.pad(Wb, ((0, 0), (0, 0), (0, nbr)))
        scale = jnp.pad(scale, (0, nbr))
        shift = jnp.pad(shift, (0, nbr))

    return {
        "Wa": Wa.astype(jnp.bfloat16),
        "ba": b1.reshape(1, -1).astype(jnp.float32),
        "Wb": Wb.astype(jnp.bfloat16),
        "scale": scale.reshape(1, -1).astype(jnp.float32),
        "shift": shift.reshape(1, -1).astype(jnp.float32),
    }


# --------------------------------------------------------------------------- #
# EarlyFusion forward (fusion_mode = 0)
# --------------------------------------------------------------------------- #

def early_fusion_forward(fused, x_nchw, k, s, p=None, d=1,
                         out_dtype=jnp.float32):
    """x_nchw: [B, c1, H, W] -> [B, c2, H', W'] (NCHW at the module boundary).
    `fused` comes from build_fused_params (hoisted out of the per-call path).
    out_dtype=jnp.bfloat16 halves the output store traffic (useful on v5e)."""
    assert d == 1, "dilation != 1 not implemented (module defaults d=1, g=1)"
    # TODO(synk): BatchNorm uses running (inference) statistics; training-mode
    # batch-statistics BN is not reproduced here.
    pad = autopad(k, p, d)
    B, c1, H, W = x_nchw.shape
    use_ir = fused["Wa"].shape[1] > 3
    cin = fused["Wa"].shape[1]
    na = fused["Wa"].shape[2]
    nb = fused["Wb"].shape[2]

    # Conv geometry: stage A is a 'same' k x k stride-s conv, stage B a 3x3
    # valid conv (stride 1).
    Hp, Wp = H + 2 * pad, W + 2 * pad
    Ho = (Hp - k) // s + 1
    Wo = (Wp - k) // s + 1
    Ho2, Wo2 = Ho - 2, Wo - 2
    assert Ho2 > 0 and Wo2 > 0, "input too small for the 3x3 stem conv"

    # Layout-friendly *computed* widths (multiples of 16 so all in-kernel
    # row/width flattens are tile-trivial for bf16); extra columns only see
    # zero padding and are sliced away before the store.
    wo2_c = _round_up(Wo2, 16)
    wo_c = _round_up(wo2_c + 2, 16)
    wp_c = max((wo_c - 1) * s + k, Wp)
    band = _pick_band(Ho2)
    n_bands = Ho2 // band

    # NCHW -> NHWC at the module boundary; spatial zero pad; bf16 MXU operand.
    x = jnp.transpose(x_nchw, (0, 2, 3, 1))
    if not use_ir:
        x = x[..., :3]
    x = jnp.pad(x, ((0, 0), (pad, pad), (pad, wp_c - W - pad), (0, 0)))
    x = x.astype(jnp.bfloat16)                          # [B, Hp, wp_c, cin]
    # TODO(synk): with tiny channel counts the channels-on-lanes VMEM layout
    # is padded to 128 lanes; very large images would need an additional
    # width/row tiling of the input block (not required at these shapes).

    kernel = functools.partial(
        _early_fusion_kernel,
        k=k, s=s, band=band, wo_c=wo_c, wo2=Wo2, wo2_c=wo2_c)

    flops = 2 * B * Ho2 * Wo2 * (k * k * cin * na + 9 * na * nb)
    bytes_acc = (x.size * 2 + fused["Wa"].size * 2 + fused["Wb"].size * 2
                 + B * Ho2 * Wo2 * nb * jnp.dtype(out_dtype).itemsize)

    out = pl.pallas_call(
        kernel,
        out_shape=jax.ShapeDtypeStruct((B, Ho2, Wo2, nb), out_dtype),
        grid_spec=pltpu.PrefetchScalarGridSpec(
            num_scalar_prefetch=0,
            grid=(B, n_bands),
            in_specs=[
                # Full (small) padded image per batch; index constant across
                # the band axis -> DMA'd once per batch element.
                pl.BlockSpec((1, Hp, wp_c, cin), lambda b, j: (b, 0, 0, 0)),
                # Weights / bias / BN epilogue: full blocks, constant index
                # maps -> pinned resident in VMEM.
                pl.BlockSpec((k * k, cin, na), lambda b, j: (0, 0, 0)),
                pl.BlockSpec((1, na), lambda b, j: (0, 0)),
                pl.BlockSpec((9, na, nb), lambda b, j: (0, 0, 0)),
                pl.BlockSpec((1, nb), lambda b, j: (0, 0)),
                pl.BlockSpec((1, nb), lambda b, j: (0, 0)),
            ],
            out_specs=pl.BlockSpec((1, band, Wo2, nb),
                                   lambda b, j: (b, j, 0, 0)),
            scratch_shapes=[
                pltpu.VMEM((band + 2, wo_c, na), jnp.bfloat16),  # stage-A tile
            ],
        ),
        compiler_params=pltpu.CompilerParams(
            dimension_semantics=("parallel", "parallel"),
            vmem_limit_bytes=32 * 1024 * 1024,          # safe on v7x too
        ),
        cost_estimate=pl.CostEstimate(
            flops=flops,
            transcendentals=B * Ho2 * Wo2 * nb,
            bytes_accessed=bytes_acc),
    )(x, fused["Wa"], fused["ba"], fused["Wb"], fused["scale"], fused["shift"])

    # NHWC -> NCHW only at the true module boundary.
    # TODO(synk): skip this transpose when the downstream consumer takes NHWC.
    return jnp.transpose(out, (0, 3, 1, 2))


# --------------------------------------------------------------------------- #
# Parameter init + pure-JAX layer-by-layer reference
# --------------------------------------------------------------------------- #

def init_early_fusion_params(key, c1, c2, k):
    assert c2 % 2 == 0
    half = c2 // 2
    down = half // 2
    keys = jax.random.split(key, 32)

    def w(kk, shape, scale=0.1):
        return (scale * jax.random.normal(kk, shape)).astype(jnp.float32)

    params = {
        "rgb_conv1_w": w(keys[0], (half, 3, k, k)),
        "rgb_s1_w": w(keys[1], (down, half, 1, 1)), "rgb_s1_b": w(keys[2], (down,)),
        "rgb_s2_w": w(keys[3], (half, down, 3, 3)), "rgb_s2_b": w(keys[4], (half,)),
        "rgb_s3_w": w(keys[5], (half, half, 1, 1)), "rgb_s3_b": w(keys[6], (half,)),
        "bn_rgb_gamma": 1.0 + w(keys[7], (half,)),
        "bn_rgb_beta": w(keys[8], (half,)),
        "bn_rgb_mean": w(keys[9], (half,)),
        "bn_rgb_var": (1.0 + 0.1 * jnp.abs(jax.random.normal(keys[10], (half,)))
                       ).astype(jnp.float32),
    }
    if c1 > 3:
        params.update({
            "ir_conv1_w": w(keys[11], (half, c1 - 3, k, k)),
            "ir_s1_w": w(keys[12], (down, half, 1, 1)), "ir_s1_b": w(keys[13], (down,)),
            "ir_s2_w": w(keys[14], (half, down, 3, 3)), "ir_s2_b": w(keys[15], (half,)),
            "ir_s3_w": w(keys[16], (half, half, 1, 1)), "ir_s3_b": w(keys[17], (half,)),
            "bn_ir_gamma": 1.0 + w(keys[18], (half,)),
            "bn_ir_beta": w(keys[19], (half,)),
            "bn_ir_mean": w(keys[20], (half,)),
            "bn_ir_var": (1.0 + 0.1 * jnp.abs(jax.random.normal(keys[21], (half,)))
                          ).astype(jnp.float32),
        })
    return params


def _ref_conv_nchw(x, w, stride, pad):
    return jax.lax.conv_general_dilated(
        x, w, (stride, stride), [(pad, pad), (pad, pad)],
        dimension_numbers=("NCHW", "OIHW", "NCHW"))


def early_fusion_reference(params, x_nchw, k, s, p=None, d=1):
    pad = autopad(k, p, d)

    def branch(x_slice, prefix):
        y = _ref_conv_nchw(x_slice, params[f"{prefix}_conv1_w"], s, pad)
        y = _ref_conv_nchw(y, params[f"{prefix}_s1_w"], 1, 0) \
            + params[f"{prefix}_s1_b"][None, :, None, None]
        y = _ref_conv_nchw(y, params[f"{prefix}_s2_w"], 1, 0) \
            + params[f"{prefix}_s2_b"][None, :, None, None]
        y = _ref_conv_nchw(y, params[f"{prefix}_s3_w"], 1, 0) \
            + params[f"{prefix}_s3_b"][None, :, None, None]
        g = params[f"bn_{prefix}_gamma"][None, :, None, None]
        b = params[f"bn_{prefix}_beta"][None, :, None, None]
        m = params[f"bn_{prefix}_mean"][None, :, None, None]
        v = params[f"bn_{prefix}_var"][None, :, None, None]
        y = (y - m) / jnp.sqrt(v + 1e-3) * g + b
        return y * jax.nn.sigmoid(y)

    rgb = branch(x_nchw[:, :3], "rgb")
    if x_nchw.shape[1] > 3 and "ir_conv1_w" in params:
        ir = branch(x_nchw[:, 3:], "ir")
    else:
        ir = jnp.zeros_like(rgb)
    return jnp.concatenate([rgb, ir], axis=1)


# --------------------------------------------------------------------------- #

if __name__ == "__main__":
    B, c1, c2, H, W = 2, 4, 8, 16, 16        # 3 RGB + 1 IR channel
    k, s = 3, 1

    key = jax.random.PRNGKey(0)
    kp, kx = jax.random.split(key)
    params = init_early_fusion_params(kp, c1, c2, k)
    x = jax.random.normal(kx, (B, c1, H, W), dtype=jnp.float32)

    fused = build_fused_params(params, use_ir=(c1 > 3))   # hoisted weight fold

    out = jax.block_until_ready(early_fusion_forward(fused, x, k, s))
    ref = jax.block_until_ready(early_fusion_reference(params, x, k, s))

    assert out.shape == ref.shape == (B, c2, H - 2, W - 2), (out.shape, ref.shape)
    max_err = float(jnp.max(jnp.abs(out - ref)))
    # bf16 MXU operands (f32 accumulation) -> loosened tolerance vs f32 reference.
    assert jnp.allclose(out, ref, rtol=2e-2, atol=2e-2), f"max abs diff = {max_err}"

    print("KERNEL_OK")
</pallas_src>

<mosaic_0001>
module attributes {stable_mosaic.version = 11 : i64} {
  func.func @_early_fusion_kernel(%arg0: i32, %arg1: i32, %arg2: memref<1x18x34x4xbf16, #tpu.memory_space<vmem>>, %arg3: memref<9x4x4xbf16, #tpu.memory_space<vmem>>, %arg4: memref<1x4xf32, #tpu.memory_space<vmem>>, %arg5: memref<9x4x8xbf16, #tpu.memory_space<vmem>>, %arg6: memref<1x8xf32, #tpu.memory_space<vmem>>, %arg7: memref<1x8xf32, #tpu.memory_space<vmem>>, %arg8: memref<1x14x14x8xf32, #tpu.memory_space<vmem>>, %arg9: memref<16x32x4xbf16, #tpu.memory_space<vmem>>) attributes {dimension_semantics = [#tpu.dimension_semantics<parallel>, #tpu.dimension_semantics<parallel>], iteration_bounds = array<i64: 2, 1>, scalar_prefetch = 0 : i64, scratch_operands = 1 : i64, tpu.core_type = #tpu.core_type<tc>, window_params = [{transform_indices = @transform_0, window_bounds = array<i64: 1, 18, 34, 4>}, {pipeline_mode = #tpu.pipeline_mode<synchronous>, transform_indices = @transform_1, window_bounds = array<i64: 9, 4, 4>}, {pipeline_mode = #tpu.pipeline_mode<synchronous>, transform_indices = @transform_2, window_bounds = array<i64: 1, 4>}, {pipeline_mode = #tpu.pipeline_mode<synchronous>, transform_indices = @transform_3, window_bounds = array<i64: 9, 4, 8>}, {pipeline_mode = #tpu.pipeline_mode<synchronous>, transform_indices = @transform_4, window_bounds = array<i64: 1, 8>}, {pipeline_mode = #tpu.pipeline_mode<synchronous>, transform_indices = @transform_5, window_bounds = array<i64: 1, 8>}, {transform_indices = @transform_6, window_bounds = array<i64: 1, 14, 14, 8>}]} {
    %c14_i32 = arith.constant 14 : i32
    %0 = arith.muli %arg1, %c14_i32 : i32
    %c1_i32 = arith.constant 1 : i32
    %1 = arith.muli %0, %c1_i32 : i32
    %cst = arith.constant 0.000000e+00 : f32
    %2 = vector.broadcast %cst : f32 to vector<512x4xf32>
    %c0_i32 = arith.constant 0 : i32
    %3 = arith.addi %1, %c0_i32 : i32
    %c0 = arith.constant 0 : index
    %4 = arith.index_cast %3 : i32 to index
    %c0_0 = arith.constant 0 : index
    %c0_1 = arith.constant 0 : index
    %5 = vector.load %arg2[%c0, %4, %c0_0, %c0_1] : memref<1x18x34x4xbf16, #tpu.memory_space<vmem>>, vector<1x16x32x4xbf16>
    %6 = vector.shape_cast %5 : vector<1x16x32x4xbf16> to vector<16x32x4xbf16>
    %7 = vector.shape_cast %6 : vector<16x32x4xbf16> to vector<512x4xbf16>
    %c0_2 = arith.constant 0 : index
    %c0_3 = arith.constant 0 : index
    %c0_4 = arith.constant 0 : index
    %8 = vector.load %arg3[%c0_2, %c0_3, %c0_4] : memref<9x4x4xbf16, #tpu.memory_space<vmem>>, vector<1x4x4xbf16>
    %9 = vector.shape_cast %8 : vector<1x4x4xbf16> to vector<4x4xbf16>
    %cst_5 = arith.constant dense<0.000000e+00> : vector<512x4xf32>
    %10 = tpu.matmul %7, %9, %cst_5 {dimension_numbers = #tpu.dot_dimension_numbers<[1], [0], [0], [1], [0, 0, 1, 1], [], []>} : vector<512x4xbf16>, vector<4x4xbf16>, vector<512x4xf32> -> vector<512x4xf32>
    %11 = arith.addf %2, %10 : vector<512x4xf32>
    %c0_i32_6 = arith.constant 0 : i32
    %12 = arith.addi %1, %c0_i32_6 : i32
    %c0_7 = arith.constant 0 : index
    %13 = arith.index_cast %12 : i32 to index
    %c1 = arith.constant 1 : index
    %c0_8 = arith.constant 0 : index
    %14 = vector.load %arg2[%c0_7, %13, %c1, %c0_8] : memref<1x18x34x4xbf16, #tpu.memory_space<vmem>>, vector<1x16x32x4xbf16>
    %15 = vector.shape_cast %14 : vector<1x16x32x4xbf16> to vector<16x32x4xbf16>
    %16 = vector.shape_cast %15 : vector<16x32x4xbf16> to vector<512x4xbf16>
    %c1_9 = arith.constant 1 : index
    %c0_10 = arith.constant 0 : index
    %c0_11 = arith.constant 0 : index
    %17 = vector.load %arg3[%c1_9, %c0_10, %c0_11] : memref<9x4x4xbf16, #tpu.memory_space<vmem>>, vector<1x4x4xbf16>
    %18 = vector.shape_cast %17 : vector<1x4x4xbf16> to vector<4x4xbf16>
    %cst_12 = arith.constant dense<0.000000e+00> : vector<512x4xf32>
    %19 = tpu.matmul %16, %18, %cst_12 {dimension_numbers = #tpu.dot_dimension_numbers<[1], [0], [0], [1], [0, 0, 1, 1], [], []>} : vector<512x4xbf16>, vector<4x4xbf16>, vector<512x4xf32> -> vector<512x4xf32>
    %20 = arith.addf %11, %19 : vector<512x4xf32>
    %c0_i32_13 = arith.constant 0 : i32
    %21 = arith.addi %1, %c0_i32_13 : i32
    %c0_14 = arith.constant 0 : index
    %22 = arith.index_cast %21 : i32 to index
    %c2 = arith.constant 2 : index
    %c0_15 = arith.constant 0 : index
    %23 = vector.load %arg2[%c0_14, %22, %c2, %c0_15] : memref<1x18x34x4xbf16, #tpu.memory_space<vmem>>, vector<1x16x32x4xbf16>
    %24 = vector.shape_cast %23 : vector<1x16x32x4xbf16> to vector<16x32x4xbf16>
    %25 = vector.shape_cast %24 : vector<16x32x4xbf16> to vector<512x4xbf16>
    %c2_16 = arith.constant 2 : index
    %c0_17 = arith.constant 0 : index
    %c0_18 = arith.constant 0 : index
    %26 = vector.load %arg3[%c2_16, %c0_17, %c0_18] : memref<9x4x4xbf16, #tpu.memory_space<vmem>>, vector<1x4x4xbf16>
    %27 = vector.shape_cast %26 : vector<1x4x4xbf16> to vector<4x4xbf16>
    %cst_19 = arith.constant dense<0.000000e+00> : vector<512x4xf32>
    %28 = tpu.matmul %25, %27, %cst_19 {dimension_numbers = #tpu.dot_dimension_numbers<[1], [0], [0], [1], [0, 0, 1, 1], [], []>} : vector<512x4xbf16>, vector<4x4xbf16>, vector<512x4xf32> -> vector<512x4xf32>
    %29 = arith.addf %20, %28 : vector<512x4xf32>
    %c1_i32_20 = arith.constant 1 : i32
    %30 = arith.addi %1, %c1_i32_20 : i32
    %c0_21 = arith.constant 0 : index
    %31 = arith.index_cast %30 : i32 to index
    %c0_22 = arith.constant 0 : index
    %c0_23 = arith.constant 0 : index
    %32 = vector.load %arg2[%c0_21, %31, %c0_22, %c0_23] : memref<1x18x34x4xbf16, #tpu.memory_space<vmem>>, vector<1x16x32x4xbf16>
    %33 = vector.shape_cast %32 : vector<1x16x32x4xbf16> to vector<16x32x4xbf16>
    %34 = vector.shape_cast %33 : vector<16x32x4xbf16> to vector<512x4xbf16>
    %c3 = arith.constant 3 : index
    %c0_24 = arith.constant 0 : index
    %c0_25 = arith.constant 0 : index
    %35 = vector.load %arg3[%c3, %c0_24, %c0_25] : memref<9x4x4xbf16, #tpu.memory_space<vmem>>, vector<1x4x4xbf16>
    %36 = vector.shape_cast %35 : vector<1x4x4xbf16> to vector<4x4xbf16>
    %cst_26 = arith.constant dense<0.000000e+00> : vector<512x4xf32>
    %37 = tpu.matmul %34, %36, %cst_26 {dimension_numbers = #tpu.dot_dimension_numbers<[1], [0], [0], [1], [0, 0, 1, 1], [], []>} : vector<512x4xbf16>, vector<4x4xbf16>, vector<512x4xf32> -> vector<512x4xf32>
    %38 = arith.addf %29, %37 : vector<512x4xf32>
    %c1_i32_27 = arith.constant 1 : i32
    %39 = arith.addi %1, %c1_i32_27 : i32
    %c0_28 = arith.constant 0 : index
    %40 = arith.index_cast %39 : i32 to index
    %c1_29 = arith.constant 1 : index
    %c0_30 = arith.constant 0 : index
    %41 = vector.load %arg2[%c0_28, %40, %c1_29, %c0_30] : memref<1x18x34x4xbf16, #tpu.memory_space<vmem>>, vector<1x16x32x4xbf16>
    %42 = vector.shape_cast %41 : vector<1x16x32x4xbf16> to vector<16x32x4xbf16>
    %43 = vector.shape_cast %42 : vector<16x32x4xbf16> to vector<512x4xbf16>
    %c4 = arith.constant 4 : index
    %c0_31 = arith.constant 0 : index
    %c0_32 = arith.constant 0 : index
    %44 = vector.load %arg3[%c4, %c0_31, %c0_32] : memref<9x4x4xbf16, #tpu.memory_space<vmem>>, vector<1x4x4xbf16>
    %45 = vector.shape_cast %44 : vector<1x4x4xbf16> to vector<4x4xbf16>
    %cst_33 = arith.constant dense<0.000000e+00> : vector<512x4xf32>
    %46 = tpu.matmul %43, %45, %cst_33 {dimension_numbers = #tpu.dot_dimension_numbers<[1], [0], [0], [1], [0, 0, 1, 1], [], []>} : vector<512x4xbf16>, vector<4x4xbf16>, vector<512x4xf32> -> vector<512x4xf32>
    %47 = arith.addf %38, %46 : vector<512x4xf32>
    %c1_i32_34 = arith.constant 1 : i32
    %48 = arith.addi %1, %c1_i32_34 : i32
    %c0_35 = arith.constant 0 : index
    %49 = arith.index_cast %48 : i32 to index
    %c2_36 = arith.constant 2 : index
    %c0_37 = arith.constant 0 : index
    %50 = vector.load %arg2[%c0_35, %49, %c2_36, %c0_37] : memref<1x18x34x4xbf16, #tpu.memory_space<vmem>>, vector<1x16x32x4xbf16>
    %51 = vector.shape_cast %50 : vector<1x16x32x4xbf16> to vector<16x32x4xbf16>
    %52 = vector.shape_cast %51 : vector<16x32x4xbf16> to vector<512x4xbf16>
    %c5 = arith.constant 5 : index
    %c0_38 = arith.constant 0 : index
    %c0_39 = arith.constant 0 : index
    %53 = vector.load %arg3[%c5, %c0_38, %c0_39] : memref<9x4x4xbf16, #tpu.memory_space<vmem>>, vector<1x4x4xbf16>
    %54 = vector.shape_cast %53 : vector<1x4x4xbf16> to vector<4x4xbf16>
    %cst_40 = arith.constant dense<0.000000e+00> : vector<512x4xf32>
    %55 = tpu.matmul %52, %54, %cst_40 {dimension_numbers = #tpu.dot_dimension_numbers<[1], [0], [0], [1], [0, 0, 1, 1], [], []>} : vector<512x4xbf16>, vector<4x4xbf16>, vector<512x4xf32> -> vector<512x4xf32>
    %56 = arith.addf %47, %55 : vector<512x4xf32>
    %c2_i32 = arith.constant 2 : i32
    %57 = arith.addi %1, %c2_i32 : i32
    %c0_41 = arith.constant 0 : index
    %58 = arith.index_cast %57 : i32 to index
    %c0_42 = arith.constant 0 : index
    %c0_43 = arith.constant 0 : index
    %59 = vector.load %arg2[%c0_41, %58, %c0_42, %c0_43] : memref<1x18x34x4xbf16, #tpu.memory_space<vmem>>, vector<1x16x32x4xbf16>
    %60 = vector.shape_cast %59 : vector<1x16x32x4xbf16> to vector<16x32x4xbf16>
    %61 = vector.shape_cast %60 : vector<16x32x4xbf16> to vector<512x4xbf16>
    %c6 = arith.constant 6 : index
    %c0_44 = arith.constant 0 : index
    %c0_45 = arith.constant 0 : index
    %62 = vector.load %arg3[%c6, %c0_44, %c0_45] : memref<9x4x4xbf16, #tpu.memory_space<vmem>>, vector<1x4x4xbf16>
    %63 = vector.shape_cast %62 : vector<1x4x4xbf16> to vector<4x4xbf16>
    %cst_46 = arith.constant dense<0.000000e+00> : vector<512x4xf32>
    %64 = tpu.matmul %61, %63, %cst_46 {dimension_numbers = #tpu.dot_dimension_numbers<[1], [0], [0], [1], [0, 0, 1, 1], [], []>} : vector<512x4xbf16>, vector<4x4xbf16>, vector<512x4xf32> -> vector<512x4xf32>
    %65 = arith.addf %56, %64 : vector<512x4xf32>
    %c2_i32_47 = arith.constant 2 : i32
    %66 = arith.addi %1, %c2_i32_47 : i32
    %c0_48 = arith.constant 0 : index
    %67 = arith.index_cast %66 : i32 to index
    %c1_49 = arith.constant 1 : index
    %c0_50 = arith.constant 0 : index
    %68 = vector.load %arg2[%c0_48, %67, %c1_49, %c0_50] : memref<1x18x34x4xbf16, #tpu.memory_space<vmem>>, vector<1x16x32x4xbf16>
    %69 = vector.shape_cast %68 : vector<1x16x32x4xbf16> to vector<16x32x4xbf16>
    %70 = vector.shape_cast %69 : vector<16x32x4xbf16> to vector<512x4xbf16>
    %c7 = arith.constant 7 : index
    %c0_51 = arith.constant 0 : index
    %c0_52 = arith.constant 0 : index
    %71 = vector.load %arg3[%c7, %c0_51, %c0_52] : memref<9x4x4xbf16, #tpu.memory_space<vmem>>, vector<1x4x4xbf16>
    %72 = vector.shape_cast %71 : vector<1x4x4xbf16> to vector<4x4xbf16>
    %cst_53 = arith.constant dense<0.000000e+00> : vector<512x4xf32>
    %73 = tpu.matmul %70, %72, %cst_53 {dimension_numbers = #tpu.dot_dimension_numbers<[1], [0], [0], [1], [0, 0, 1, 1], [], []>} : vector<512x4xbf16>, vector<4x4xbf16>, vector<512x4xf32> -> vector<512x4xf32>
    %74 = arith.addf %65, %73 : vector<512x4xf32>
    %c2_i32_54 = arith.constant 2 : i32
    %75 = arith.addi %1, %c2_i32_54 : i32
    %c0_55 = arith.constant 0 : index
    %76 = arith.index_cast %75 : i32 to index
    %c2_56 = arith.constant 2 : index
    %c0_57 = arith.constant 0 : index
    %77 = vector.load %arg2[%c0_55, %76, %c2_56, %c0_57] : memref<1x18x34x4xbf16, #tpu.memory_space<vmem>>, vector<1x16x32x4xbf16>
    %78 = vector.shape_cast %77 : vector<1x16x32x4xbf16> to vector<16x32x4xbf16>
    %79 = vector.shape_cast %78 : vector<16x32x4xbf16> to vector<512x4xbf16>
    %c8 = arith.constant 8 : index
    %c0_58 = arith.constant 0 : index
    %c0_59 = arith.constant 0 : index
    %80 = vector.load %arg3[%c8, %c0_58, %c0_59] : memref<9x4x4xbf16, #tpu.memory_space<vmem>>, vector<1x4x4xbf16>
    %81 = vector.shape_cast %80 : vector<1x4x4xbf16> to vector<4x4xbf16>
    %cst_60 = arith.constant dense<0.000000e+00> : vector<512x4xf32>
    %82 = tpu.matmul %79, %81, %cst_60 {dimension_numbers = #tpu.dot_dimension_numbers<[1], [0], [0], [1], [0, 0, 1, 1], [], []>} : vector<512x4xbf16>, vector<4x4xbf16>, vector<512x4xf32> -> vector<512x4xf32>
    %83 = arith.addf %74, %82 : vector<512x4xf32>
    %c0_61 = arith.constant 0 : index
    %c0_62 = arith.constant 0 : index
    %84 = vector.load %arg4[%c0_61, %c0_62] : memref<1x4xf32, #tpu.memory_space<vmem>>, vector<1x4xf32>
    %85 = vector.broadcast %84 : vector<1x4xf32> to vector<512x4xf32>
    %86 = arith.addf %83, %85 : vector<512x4xf32>
    %87 = arith.truncf %86 : vector<512x4xf32> to vector<512x4xbf16>
    %88 = vector.shape_cast %87 : vector<512x4xbf16> to vector<16x32x4xbf16>
    %c0_63 = arith.constant 0 : index
    %c0_64 = arith.constant 0 : index
    %c0_65 = arith.constant 0 : index
    %89 = vector.load %arg9[%c0_63, %c0_64, %c0_65] : memref<16x32x4xbf16, #tpu.memory_space<vmem>>, vector<16x32x4xbf16>
    tpu.vector_store %arg9[%c0_63, %c0_64, %c0_65], %88 {strides = array<i32>} : memref<16x32x4xbf16, #tpu.memory_space<vmem>>, vector<16x32x4xbf16>,
    %cst_66 = arith.constant 0.000000e+00 : f32
    %90 = vector.broadcast %cst_66 : f32 to vector<224x8xf32>
    %c0_67 = arith.constant 0 : index
    %c0_68 = arith.constant 0 : index
    %c0_69 = arith.constant 0 : index
    %91 = vector.load %arg9[%c0_67, %c0_68, %c0_69] : memref<16x32x4xbf16, #tpu.memory_space<vmem>>, vector<14x16x4xbf16>
    %92 = vector.shape_cast %91 : vector<14x16x4xbf16> to vector<224x4xbf16>
    %c0_70 = arith.constant 0 : index
    %c0_71 = arith.constant 0 : index
    %c0_72 = arith.constant 0 : index
    %93 = vector.load %arg5[%c0_70, %c0_71, %c0_72] : memref<9x4x8xbf16, #tpu.memory_space<vmem>>, vector<1x4x8xbf16>
    %94 = vector.shape_cast %93 : vector<1x4x8xbf16> to vector<4x8xbf16>
    %cst_73 = arith.constant dense<0.000000e+00> : vector<224x8xf32>
    %95 = tpu.matmul %92, %94, %cst_73 {dimension_numbers = #tpu.dot_dimension_numbers<[1], [0], [0], [1], [0, 0, 1, 1], [], []>} : vector<224x4xbf16>, vector<4x8xbf16>, vector<224x8xf32> -> vector<224x8xf32>
    %96 = arith.addf %90, %95 : vector<224x8xf32>
    %c0_74 = arith.constant 0 : index
    %c1_75 = arith.constant 1 : index
    %c0_76 = arith.constant 0 : index
    %97 = vector.load %arg9[%c0_74, %c1_75, %c0_76] : memref<16x32x4xbf16, #tpu.memory_space<vmem>>, vector<14x16x4xbf16>
    %98 = vector.shape_cast %97 : vector<14x16x4xbf16> to vector<224x4xbf16>
    %c1_77 = arith.constant 1 : index
    %c0_78 = arith.constant 0 : index
    %c0_79 = arith.constant 0 : index
    %99 = vector.load %arg5[%c1_77, %c0_78, %c0_79] : memref<9x4x8xbf16, #tpu.memory_space<vmem>>, vector<1x4x8xbf16>
    %100 = vector.shape_cast %99 : vector<1x4x8xbf16> to vector<4x8xbf16>
    %cst_80 = arith.constant dense<0.000000e+00> : vector<224x8xf32>
    %101 = tpu.matmul %98, %100, %cst_80 {dimension_numbers = #tpu.dot_dimension_numbers<[1], [0], [0], [1], [0, 0, 1, 1], [], []>} : vector<224x4xbf16>, vector<4x8xbf16>, vector<224x8xf32> -> vector<224x8xf32>
    %102 = arith.addf %96, %101 : vector<224x8xf32>
    %c0_81 = arith.constant 0 : index
    %c2_82 = arith.constant 2 : index
    %c0_83 = arith.constant 0 : index
    %103 = vector.load %arg9[%c0_81, %c2_82, %c0_83] : memref<16x32x4xbf16, #tpu.memory_space<vmem>>, vector<14x16x4xbf16>
    %104 = vector.shape_cast %103 : vector<14x16x4xbf16> to vector<224x4xbf16>
    %c2_84 = arith.constant 2 : index
    %c0_85 = arith.constant 0 : index
    %c0_86 = arith.constant 0 : index
    %105 = vector.load %arg5[%c2_84, %c0_85, %c0_86] : memref<9x4x8xbf16, #tpu.memory_space<vmem>>, vector<1x4x8xbf16>
    %106 = vector.shape_cast %105 : vector<1x4x8xbf16> to vector<4x8xbf16>
    %cst_87 = arith.constant dense<0.000000e+00> : vector<224x8xf32>
    %107 = tpu.matmul %104, %106, %cst_87 {dimension_numbers = #tpu.dot_dimension_numbers<[1], [0], [0], [1], [0, 0, 1, 1], [], []>} : vector<224x4xbf16>, vector<4x8xbf16>, vector<224x8xf32> -> vector<224x8xf32>
    %108 = arith.addf %102, %107 : vector<224x8xf32>
    %c1_88 = arith.constant 1 : index
    %c0_89 = arith.constant 0 : index
    %c0_90 = arith.constant 0 : index
    %109 = vector.load %arg9[%c1_88, %c0_89, %c0_90] : memref<16x32x4xbf16, #tpu.memory_space<vmem>>, vector<14x16x4xbf16>
    %110 = vector.shape_cast %109 : vector<14x16x4xbf16> to vector<224x4xbf16>
    %c3_91 = arith.constant 3 : index
    %c0_92 = arith.constant 0 : index
    %c0_93 = arith.constant 0 : index
    %111 = vector.load %arg5[%c3_91, %c0_92, %c0_93] : memref<9x4x8xbf16, #tpu.memory_space<vmem>>, vector<1x4x8xbf16>
    %112 = vector.shape_cast %111 : vector<1x4x8xbf16> to vector<4x8xbf16>
    %cst_94 = arith.constant dense<0.000000e+00> : vector<224x8xf32>
    %113 = tpu.matmul %110, %112, %cst_94 {dimension_numbers = #tpu.dot_dimension_numbers<[1], [0], [0], [1], [0, 0, 1, 1], [], []>} : vector<224x4xbf16>, vector<4x8xbf16>, vector<224x8xf32> -> vector<224x8xf32>
    %114 = arith.addf %108, %113 : vector<224x8xf32>
    %c1_95 = arith.constant 1 : index
    %c1_96 = arith.constant 1 : index
    %c0_97 = arith.constant 0 : index
    %115 = vector.load %arg9[%c1_95, %c1_96, %c0_97] : memref<16x32x4xbf16, #tpu.memory_space<vmem>>, vector<14x16x4xbf16>
    %116 = vector.shape_cast %115 : vector<14x16x4xbf16> to vector<224x4xbf16>
    %c4_98 = arith.constant 4 : index
    %c0_99 = arith.constant 0 : index
    %c0_100 = arith.constant 0 : index
    %117 = vector.load %arg5[%c4_98, %c0_99, %c0_100] : memref<9x4x8xbf16, #tpu.memory_space<vmem>>, vector<1x4x8xbf16>
    %118 = vector.shape_cast %117 : vector<1x4x8xbf16> to vector<4x8xbf16>
    %cst_101 = arith.constant dense<0.000000e+00> : vector<224x8xf32>
    %119 = tpu.matmul %116, %118, %cst_101 {dimension_numbers = #tpu.dot_dimension_numbers<[1], [0], [0], [1], [0, 0, 1, 1], [], []>} : vector<224x4xbf16>, vector<4x8xbf16>, vector<224x8xf32> -> vector<224x8xf32>
    %120 = arith.addf %114, %119 : vector<224x8xf32>
    %c1_102 = arith.constant 1 : index
    %c2_103 = arith.constant 2 : index
    %c0_104 = arith.constant 0 : index
    %121 = vector.load %arg9[%c1_102, %c2_103, %c0_104] : memref<16x32x4xbf16, #tpu.memory_space<vmem>>, vector<14x16x4xbf16>
    %122 = vector.shape_cast %121 : vector<14x16x4xbf16> to vector<224x4xbf16>
    %c5_105 = arith.constant 5 : index
    %c0_106 = arith.constant 0 : index
    %c0_107 = arith.constant 0 : index
    %123 = vector.load %arg5[%c5_105, %c0_106, %c0_107] : memref<9x4x8xbf16, #tpu.memory_space<vmem>>, vector<1x4x8xbf16>
    %124 = vector.shape_cast %123 : vector<1x4x8xbf16> to vector<4x8xbf16>
    %cst_108 = arith.constant dense<0.000000e+00> : vector<224x8xf32>
    %125 = tpu.matmul %122, %124, %cst_108 {dimension_numbers = #tpu.dot_dimension_numbers<[1], [0], [0], [1], [0, 0, 1, 1], [], []>} : vector<224x4xbf16>, vector<4x8xbf16>, vector<224x8xf32> -> vector<224x8xf32>
    %126 = arith.addf %120, %125 : vector<224x8xf32>
    %c2_109 = arith.constant 2 : index
    %c0_110 = arith.constant 0 : index
    %c0_111 = arith.constant 0 : index
    %127 = vector.load %arg9[%c2_109, %c0_110, %c0_111] : memref<16x32x4xbf16, #tpu.memory_space<vmem>>, vector<14x16x4xbf16>
    %128 = vector.shape_cast %127 : vector<14x16x4xbf16> to vector<224x4xbf16>
    %c6_112 = arith.constant 6 : index
    %c0_113 = arith.constant 0 : index
    %c0_114 = arith.constant 0 : index
    %129 = vector.load %arg5[%c6_112, %c0_113, %c0_114] : memref<9x4x8xbf16, #tpu.memory_space<vmem>>, vector<1x4x8xbf16>
    %130 = vector.shape_cast %129 : vector<1x4x8xbf16> to vector<4x8xbf16>
    %cst_115 = arith.constant dense<0.000000e+00> : vector<224x8xf32>
    %131 = tpu.matmul %128, %130, %cst_115 {dimension_numbers = #tpu.dot_dimension_numbers<[1], [0], [0], [1], [0, 0, 1, 1], [], []>} : vector<224x4xbf16>, vector<4x8xbf16>, vector<224x8xf32> -> vector<224x8xf32>
    %132 = arith.addf %126, %131 : vector<224x8xf32>
    %c2_116 = arith.constant 2 : index
    %c1_117 = arith.constant 1 : index
    %c0_118 = arith.constant 0 : index
    %133 = vector.load %arg9[%c2_116, %c1_117, %c0_118] : memref<16x32x4xbf16, #tpu.memory_space<vmem>>, vector<14x16x4xbf16>
    %134 = vector.shape_cast %133 : vector<14x16x4xbf16> to vector<224x4xbf16>
    %c7_119 = arith.constant 7 : index
    %c0_120 = arith.constant 0 : index
    %c0_121 = arith.constant 0 : index
    %135 = vector.load %arg5[%c7_119, %c0_120, %c0_121] : memref<9x4x8xbf16, #tpu.memory_space<vmem>>, vector<1x4x8xbf16>
    %136 = vector.shape_cast %135 : vector<1x4x8xbf16> to vector<4x8xbf16>
    %cst_122 = arith.constant dense<0.000000e+00> : vector<224x8xf32>
    %137 = tpu.matmul %134, %136, %cst_122 {dimension_numbers = #tpu.dot_dimension_numbers<[1], [0], [0], [1], [0, 0, 1, 1], [], []>} : vector<224x4xbf16>, vector<4x8xbf16>, vector<224x8xf32> -> vector<224x8xf32>
    %138 = arith.addf %132, %137 : vector<224x8xf32>
    %c2_123 = arith.constant 2 : index
    %c2_124 = arith.constant 2 : index
    %c0_125 = arith.constant 0 : index
    %139 = vector.load %arg9[%c2_123, %c2_124, %c0_125] : memref<16x32x4xbf16, #tpu.memory_space<vmem>>, vector<14x16x4xbf16>
    %140 = vector.shape_cast %139 : vector<14x16x4xbf16> to vector<224x4xbf16>
    %c8_126 = arith.constant 8 : index
    %c0_127 = arith.constant 0 : index
    %c0_128 = arith.constant 0 : index
    %141 = vector.load %arg5[%c8_126, %c0_127, %c0_128] : memref<9x4x8xbf16, #tpu.memory_space<vmem>>, vector<1x4x8xbf16>
    %142 = vector.shape_cast %141 : vector<1x4x8xbf16> to vector<4x8xbf16>
    %cst_129 = arith.constant dense<0.000000e+00> : vector<224x8xf32>
    %143 = tpu.matmul %140, %142, %cst_129 {dimension_numbers = #tpu.dot_dimension_numbers<[1], [0], [0], [1], [0, 0, 1, 1], [], []>} : vector<224x4xbf16>, vector<4x8xbf16>, vector<224x8xf32> -> vector<224x8xf32>
    %144 = arith.addf %138, %143 : vector<224x8xf32>
    %c0_130 = arith.constant 0 : index
    %c0_131 = arith.constant 0 : index
    %145 = vector.load %arg6[%c0_130, %c0_131] : memref<1x8xf32, #tpu.memory_space<vmem>>, vector<1x8xf32>
    %146 = vector.broadcast %145 : vector<1x8xf32> to vector<224x8xf32>
    %147 = arith.mulf %144, %146 : vector<224x8xf32>
    %c0_132 = arith.constant 0 : index
    %c0_133 = arith.constant 0 : index
    %148 = vector.load %arg7[%c0_132, %c0_133] : memref<1x8xf32, #tpu.memory_space<vmem>>, vector<1x8xf32>
    %149 = vector.broadcast %148 : vector<1x8xf32> to vector<224x8xf32>
    %150 = arith.addf %147, %149 : vector<224x8xf32>
    %151 = arith.negf %150 : vector<224x8xf32>
    %152 = math.exp %151 : vector<224x8xf32>
    %cst_134 = arith.constant 1.000000e+00 : f32
    %153 = vector.broadcast %cst_134 : f32 to vector<224x8xf32>
    %154 = arith.addf %153, %152 : vector<224x8xf32>
    %155 = arith.divf %153, %154 : vector<224x8xf32>
    %156 = arith.mulf %150, %155 : vector<224x8xf32>
    %157 = vector.shape_cast %156 : vector<224x8xf32> to vector<14x16x8xf32>
    %158 = vector.extract_strided_slice %157 {offsets = [0, 0, 0], sizes = [14, 14, 8], strides = [1, 1, 1]} : vector<14x16x8xf32> to vector<14x14x8xf32>
    %c0_135 = arith.constant 0 : index
    %c0_136 = arith.constant 0 : index
    %c0_137 = arith.constant 0 : index
    %c0_138 = arith.constant 0 : index
    %159 = vector.load %arg8[%c0_135, %c0_136, %c0_137, %c0_138] : memref<1x14x14x8xf32, #tpu.memory_space<vmem>>, vector<1x14x14x8xf32>
    %160 = vector.shape_cast %159 : vector<1x14x14x8xf32> to vector<14x14x8xf32>
    %161 = vector.shape_cast %158 : vector<14x14x8xf32> to vector<1x14x14x8xf32>
    tpu.vector_store %arg8[%c0_135, %c0_136, %c0_137, %c0_138], %161 {strides = array<i32>} : memref<1x14x14x8xf32, #tpu.memory_space<vmem>>, vector<1x14x14x8xf32>,
    return
  }
  func.func @transform_0(%arg0: i32, %arg1: i32) -> (i32, i32, i32, i32) {
    %c0_i32 = arith.constant 0 : i32
    %c0_i32_0 = arith.constant 0 : i32
    %c0_i32_1 = arith.constant 0 : i32
    %c0_i32_2 = arith.constant 0 : i32
    return %arg0, %c0_i32, %c0_i32_0, %c0_i32_1 : i32, i32, i32, i32
  }
  func.func @transform_1(%arg0: i32, %arg1: i32) -> (i32, i32, i32) {
    %c0_i32 = arith.constant 0 : i32
    %c0_i32_0 = arith.constant 0 : i32
    %c0_i32_1 = arith.constant 0 : i32
    %c0_i32_2 = arith.constant 0 : i32
    return %c0_i32, %c0_i32_0, %c0_i32_1 : i32, i32, i32
  }
  func.func @transform_2(%arg0: i32, %arg1: i32) -> (i32, i32) {
    %c0_i32 = arith.constant 0 : i32
    %c0_i32_0 = arith.constant 0 : i32
    %c0_i32_1 = arith.constant 0 : i32
    return %c0_i32, %c0_i32_0 : i32, i32
  }
  func.func @transform_3(%arg0: i32, %arg1: i32) -> (i32, i32, i32) {
    %c0_i32 = arith.constant 0 : i32
    %c0_i32_0 = arith.constant 0 : i32
    %c0_i32_1 = arith.constant 0 : i32
    %c0_i32_2 = arith.constant 0 : i32
    return %c0_i32, %c0_i32_0, %c0_i32_1 : i32, i32, i32
  }
  func.func @transform_4(%arg0: i32, %arg1: i32) -> (i32, i32) {
    %c0_i32 = arith.constant 0 : i32
    %c0_i32_0 = arith.constant 0 : i32
    %c0_i32_1 = arith.constant 0 : i32
    return %c0_i32, %c0_i32_0 : i32, i32
  }
  func.func @transform_5(%arg0: i32, %arg1: i32) -> (i32, i32) {
    %c0_i32 = arith.constant 0 : i32
    %c0_i32_0 = arith.constant 0 : i32
    %c0_i32_1 = arith.constant 0 : i32
    return %c0_i32, %c0_i32_0 : i32, i32
  }
  func.func @transform_6(%arg0: i32, %arg1: i32) -> (i32, i32, i32, i32) {
    %c0_i32 = arith.constant 0 : i32
    %c0_i32_0 = arith.constant 0 : i32
    %c0_i32_1 = arith.constant 0 : i32
    return %arg0, %arg1, %c0_i32, %c0_i32_0 : i32, i32, i32, i32
  }
}

</mosaic_0001>

<bundles_post_ra>
// kernel: tpu_custom_call.1
= control target key start
LH: loop header
LB: loop body
LE: loop exit
PB: predicated region body
PF: predicated region fallthrough
CT: control target
= control target key end

     0   :  { %s15621_s21 = smov 0   ;;  %s15623_s22 = smov 0   ;;  %s19478_s0 = inlined_call_operand.vmem [shape: bf16[2,18,34,4], index: 0, kind: input, shape index: {}]   ;;  %s19479_s1 = inlined_call_operand.vmem [shape: bf16[9,4,4], index: 1, kind: input, shape index: {}]   ;;  %s19480_s2 = inlined_call_operand.vmem [shape: f32[1,4], index: 2, kind: input, shape index: {}]   ;;  %s19481_s3 = inlined_call_operand.vmem [shape: bf16[9,4,8], index: 3, kind: input, shape index: {}]   ;;  %s19482_s4 = inlined_call_operand.vmem [shape: f32[1,8], index: 4, kind: input, shape index: {}]   ;;  %s19483_s5 = inlined_call_operand.vmem [shape: f32[1,8], index: 5, kind: input, shape index: {}]   ;;  %s19484_s6 = inlined_call_operand.vmem [shape: f32[2,14,14,8], index: 6, kind: output, shape index: {}]  }
   0x1   :  { %s15625_s23 = smov 0  }
   0x2 LB: > { %s28_s24 = sadd.s32 1, %s15580_s22  ;;  %p11968_p0 = scmp.ge.s32.totalorder %s15584_s23, 1  ;;  %s15584_s23 = sphi %s15625_s23, %s16_s23   ;;  %s15580_s22 = sphi %s15623_s22, %s19572_s22   ;;  %s15576_s21 = sphi %s15621_s21, %s19571_s21  }
   0x3   : > { %p30_p1 = scmp.ge.s32.totalorder %s28_s24, 2  ;;  %p226_p2 = scmp.lt.s32.totalorder %s15584_s23, 3 }
   0x5   : > { %s19574_s24 = smov (%p30_p1, %s28_s24), 0  ;;  %p227_p3 = pnand %p11968_p0, %p226_p2 }
   0x7   : > { %230 = sbr.rel (%p227_p3) target bundleno = 1772 (0x6ec), region = 44 }
   0xe   : > { %vm1265_vm0 = vcmask 1041408   ;;  %v12116_v0 = vld [vmem:[%s19479_s1 + $0x4] sm:$0x3]  ;;  %p261_p4 = scmp.lt.s32.totalorder %s15576_s21, 1  ;;  %v12245_v2 = vld [vmem:[%s19479_s1 + $0x6] sm:$0x3] }
   0xf   : > { %15126 = vmatprep.subr.msk.bf16.mxu0 %vm1265_vm0, %v12116_v0  ;;  %v15644_v1 = vsel %vm1265_vm0, %v12116_v0, 0  ;;  %vm2154_vm1 = vcmask 1042432   ;;  %vm2155_vm2 = vcmask 1046532   ;;  %vm1168_vm3 = vcmask 31744   ;;  %v15694_v46 = vld [vmem:[%s19479_s1 + $0x8] sm:$0x3] }
  0x10   : > { %13655 = vmatpush3.bf16.msra.mxu0 %v15644_v1  ;;  %s19576_s21 = smov (!%p261_p4, %s15576_s21), 1  ;;  %vm15663_vm4 = vmor %vm2154_vm1, %vm2155_vm2  ;;  %v3242_v14 = vsel %vm1265_vm0, %v12245_v2, 0  ;;  %vm363_vm5 = vsmask.f32 3328  ;;  %vm364_vm6 = vsmask.f32 7440 }
  0x11   : > { %15128 = vmatprep.subr.msk.bf16.mxu0 %vm1265_vm0, %v12245_v2  ;;  %s15143_s29 = smul.u32 360, %s19576_s21  ;;  %vm15855_vm7 = vmor %vm363_vm5, %vm364_vm6  ;;  %v18478_v7 = vld [vmem:[%s19480_s2] ss:$0 sm:$0xff]  ;;  %vm8819_vm8 = vsmask.f32 7424  ;;  %vm9398_vm9 = vcmask 1046528  }
  0x12   : > { %s15144_s9 = smul.u32 224, %s19576_s21  ;;  %vm11837_vm10 = vcmask 64512   ;;  %vm11839_vm11 = vcmask 62464  }
  0x13   : > { %s15657_s8 = scalar_lea.vmem %s19478_s0, %s15143_s29 }
  0x14   : > { %v283_v3 = vld [vmem:[%s15657_s8 + $0x4] sm:$0xf]  ;;  %v284_v4 = vld [vmem:[%s15657_s8 + $0x8] sm:$0xf]  ;;  %v285_v5 = vld [vmem:[%s15657_s8 + $0xc] sm:$0xf]  ;;  %s19317_s11 = scalar_lea.vmem %s19484_s6, %s15144_s9 }
  0x15   : > { %v2106_v6 = vld [vmem:[%s15657_s8] sm:$0xe]  ;;  %v2159_v8 = vrot.slane %v283_v3, 5  ;;  %v2162_v9 = vrot.slane %v284_v4, 5  ;;  %v347_v10 = vld [vmem:[%s15657_s8 + $0x10] sm:$0x1] }
  0x16   : > { %v12100_v11 = vrot.slane %v2106_v6, 9  ;;  %v2165_v12 = vrot.slane %v285_v5, 5  ;;  %v2168_v13 = vrot.slane %v347_v10, 5  ;;  %v287_v15 = vld [vmem:[%s15657_s8 + $0x18] sm:$0xf] }
  0x17   : > { %v2161_v16 = vrot.slane %v2159_v8, 4  ;;  %v2164_v17 = vrot.slane %v2162_v9, 4  ;;  %v288_v18 = vld [vmem:[%s15657_s8 + $0x1c] sm:$0xf]  ;;  %v2107_v19 = vld [vmem:[%s15657_s8 + $0x14] sm:$0xe] }
  0x18   : > { %v2160_v20 = vsel %vm15663_vm4, %v12100_v11, %v2159_v8  ;;  %v2167_v21 = vrot.slane %v2165_v12, 4  ;;  %v12101_v22 = vrot.slane %v2107_v19, 9  ;;  %v2172_v23 = vrot.slane %v287_v15, 5  ;;  %v289_v24 = vld [vmem:[%s15657_s8 + $0x20] sm:$0xf] }
  0x19   : > { %v2163_v25 = vsel %vm15663_vm4, %v2161_v16, %v2162_v9  ;;  %v2166_v26 = vsel %vm15663_vm4, %v2164_v17, %v2165_v12  ;;  %v2175_v27 = vrot.slane %v288_v18, 5  ;;  %v348_v28 = vld [vmem:[%s15657_s8 + $0x24] sm:$0x1]  ;;  %v2178_v29 = vrot.slane %v289_v24, 5  ;;  %v291_v30 = vld [vmem:[%s15657_s8 + $0x2c] sm:$0xf] }
  0x1a   : > { %v12117_v31 = vcombine.low %v2160_v20, %v2163_v25  ;;  %v2169_v32 = vsel %vm15663_vm4, %v2167_v21, %v2168_v13  ;;  %v2173_v33 = vsel %vm15663_vm4, %v12101_v22, %v2172_v23  ;;  %v2174_v34 = vrot.slane %v2172_v23, 4  ;;  %v292_v35 = vld [vmem:[%s15657_s8 + $0x30] sm:$0xf]  ;;  %v2108_v36 = vld [vmem:[%s15657_s8 + $0x28] sm:$0xe] }
  0x1b   : > { %v12118_v37 = vcombine.low %v2166_v26, %v2169_v32  ;;  %v2177_v38 = vrot.slane %v2175_v27, 4  ;;  %v2180_v39 = vrot.slane %v2178_v29, 4  ;;  %v2181_v40 = vrot.slane %v348_v28, 5  ;;  %v293_v41 = vld [vmem:[%s15657_s8 + $0x34] sm:$0xf] }
  0x1c   : > { %13656 = vmatprep.mubr.msk.bf16.mxu0 %vm1168_vm3, %v12117_v31  ;;  %v2176_v42 = vsel %vm15663_vm4, %v2174_v34, %v2175_v27  ;;  %v12102_v43 = vrot.slane %v2108_v36, 9  ;;  %v2185_v44 = vrot.slane %v291_v30, 5  ;;  %v2188_v45 = vrot.slane %v292_v35, 5  ;;  %v295_v48 = vld [vmem:[%s15657_s8 + $0x40] sm:$0xf] }
  0x1d   : > { %13657 = vmatmul.mubr.msk.bf16.vlgmr.msra.gmra.mrb[0].mxu0 %vm1168_vm3, %v12118_v37  ;;  %v12119_v47 = vcombine.low %v2173_v33, %v2176_v42  ;;  %v2179_v49 = vsel %vm15663_vm4, %v2177_v38, %v2178_v29  ;;  %v2182_v50 = vsel %vm15663_vm4, %v2180_v39, %v2181_v40  ;;  %v2191_v52 = vrot.slane %v293_v41, 5  ;;  %v349_v54 = vld [vmem:[%s15657_s8 + $0x38] sm:$0x1]  ;;  %v296_v57 = vld [vmem:[%s15657_s8 + $0x44] sm:$0xf] }
  0x1e   : > { %13721 = vmatpush3.bf16.msra.mxu0 %v3242_v14  ;;  %v2187_v51 = vrot.slane %v2185_v44, 4  ;;  %v2186_v53 = vsel %vm15663_vm4, %v12102_v43, %v2185_v44  ;;  %v2198_v55 = vrot.slane %v295_v48, 5  ;;  %v2109_v58 = vld [vmem:[%s15657_s8 + $0x3c] sm:$0xe]  ;;  %v12120_v59 = vcombine.low %v2179_v49, %v2182_v50  ;;  %v297_v60 = vld [vmem:[%s15657_s8 + $0x48] sm:$0xf] }
  0x1f   : > { %13660 = vmatprep.mubr.msk.bf16.mxu0 %vm1168_vm3, %v12119_v47  ;;  %15129 = vmatprep.subr.msk.bf16.mxu0 %vm1265_vm0, %v15694_v46  ;;  %v2190_v62 = vrot.slane %v2188_v45, 4  ;;  %v2193_v63 = vrot.slane %v2191_v52, 4  ;;  %v2194_v0 = vrot.slane %v349_v54, 5  ;;  %v12103_v2 = vrot.slane %v2109_v58, 9  ;;  %v299_v6 = vld [vmem:[%s15657_s8 + $0x54] sm:$0xf] }
  0x20   : > { %v2189_v56 = vsel %vm15663_vm4, %v2187_v51, %v2188_v45  ;;  %v2200_v3 = vrot.slane %v2198_v55, 4  ;;  %v2201_v4 = vrot.slane %v296_v57, 5  ;;  %v2204_v5 = vrot.slane %v297_v60, 5  ;;  %v350_v10 = vld [vmem:[%s15657_s8 + $0x4c] sm:$0x1] }
  0x21   : > { %v12121_v61 = vcombine.low %v2186_v53, %v2189_v56  ;;  %v2192_v8 = vsel %vm15663_vm4, %v2190_v62, %v2191_v52  ;;  %v2195_v9 = vsel %vm15663_vm4, %v2193_v63, %v2194_v0  ;;  %v2199_v11 = vsel %vm15663_vm4, %v12103_v2, %v2198_v55  ;;  %v300_v13 = vld [vmem:[%s15657_s8 + $0x58] sm:$0xf]  ;;  %v301_v15 = vld [vmem:[%s15657_s8 + $0x5c] sm:$0xf]  ;;  %v2110_v18 = vld [vmem:[%s15657_s8 + $0x50] sm:$0xe] }
  0x22   : > { %v2202_v12 = vsel %vm15663_vm4, %v2200_v3, %v2201_v4  ;;  %v2211_v14 = vrot.slane %v299_v6, 5  ;;  %v2203_v16 = vrot.slane %v2201_v4, 4  ;;  %v2206_v17 = vrot.slane %v2204_v5, 4  ;;  %v303_v20 = vld [vmem:[%s15657_s8 + $0x68] sm:$0xf] }
  0x23   : > { %v12122_v19 = vcombine.low %v2192_v8, %v2195_v9  ;;  %v304_v21 = vld [vmem:[%s15657_s8 + $0x6c] sm:$0xf]  ;;  %v305_v22 = vld [vmem:[%s15657_s8 + $0x70] sm:$0xf]  ;;  %v12123_v23 = vcombine.low %v2199_v11, %v2202_v12  ;;  %v2207_v24 = vrot.slane %v350_v10, 5  ;;  %v2214_v25 = vrot.slane %v300_v13, 5 }
  0x24   : > { %v2217_v26 = vrot.slane %v301_v15, 5  ;;  %v12104_v27 = vrot.slane %v2110_v18, 9  ;;  %v2213_v28 = vrot.slane %v2211_v14, 4  ;;  %v351_v29 = vld [vmem:[%s15657_s8 + $0x60] sm:$0x1]  ;;  %v2224_v31 = vrot.slane %v303_v20, 5 }
  0x25   : > { %13661 = vmatmul.mubr.msk.bf16.gmra.mrb[4].mxu0 %vm1168_vm3, %v12120_v59  ;;  %v2111_v30 = vld [vmem:[%s15657_s8 + $0x64] sm:$0xe]  ;;  %v2227_v32 = vrot.slane %v304_v21, 5  ;;  %v2230_v33 = vrot.slane %v305_v22, 5  ;;  %v307_v34 = vld [vmem:[%s15657_s8 + $0x7c] sm:$0xf]  ;;  %v2205_v35 = vsel %vm15663_vm4, %v2203_v16, %v2204_v5  ;;  %v2208_v36 = vsel %vm15663_vm4, %v2206_v17, %v2207_v24 }
  0x26   : > { %13664 = vmatprep.mubr.msk.bf16.mxu0 %vm1168_vm3, %v12121_v61  ;;  %v2216_v37 = vrot.slane %v2214_v25, 4  ;;  %v2219_v38 = vrot.slane %v2217_v26, 4  ;;  %v2212_v39 = vsel %vm15663_vm4, %v12104_v27, %v2211_v14  ;;  %v2215_v40 = vsel %vm15663_vm4, %v2213_v28, %v2214_v25  ;;  %v352_v50 = vld [vmem:[%s15657_s8 + $0x74] sm:$0x1]  ;;  %v2112_v51 = vld [vmem:[%s15657_s8 + $0x78] sm:$0xe] }
  0x27   : > { %v2220_v41 = vrot.slane %v351_v29, 5  ;;  %v12105_v42 = vrot.slane %v2111_v30, 9  ;;  %v2226_v43 = vrot.slane %v2224_v31, 4  ;;  %v2229_v44 = vrot.slane %v2227_v32, 4  ;;  %v308_v54 = vld [vmem:[%s15657_s8 + $0x80] sm:$0xf] }
  0x28   : > { %v2232_v45 = vrot.slane %v2230_v33, 4  ;;  %v2237_v47 = vrot.slane %v307_v34, 5  ;;  %v12124_v48 = vcombine.low %v2205_v35, %v2208_v36  ;;  %v12125_v49 = vcombine.low %v2212_v39, %v2215_v40  ;;  %v309_v57 = vld [vmem:[%s15657_s8 + $0x84] sm:$0xf]  ;;  %v311_v62 = vld [vmem:[%s15657_s8 + $0x90] sm:$0xf] }
  0x29   : > { %v2218_v52 = vsel %vm15663_vm4, %v2216_v37, %v2217_v26  ;;  %v2221_v53 = vsel %vm15663_vm4, %v2219_v38, %v2220_v41  ;;  %v2225_v55 = vsel %vm15663_vm4, %v12105_v42, %v2224_v31  ;;  %v2228_v56 = vsel %vm15663_vm4, %v2226_v43, %v2227_v32  ;;  %v353_v2 = vld [vmem:[%s15657_s8 + $0x88] sm:$0x1]  ;;  %v312_v4 = vld [vmem:[%s15657_s8 + $0x94] sm:$0xf]  ;;  %v2113_v5 = vld [vmem:[%s15657_s8 + $0x8c] sm:$0xe] }
  0x2a   : > { %v12126_v58 = vcombine.low %v2218_v52, %v2221_v53  ;;  %v12127_v59 = vcombine.low %v2225_v55, %v2228_v56  ;;  %v2233_v60 = vrot.slane %v352_v50, 5  ;;  %v12106_v61 = vrot.slane %v2112_v51, 9  ;;  %v313_v9 = vld [vmem:[%s15657_s8 + $0x98] sm:$0xf]  ;;  %v354_v22 = vld [vmem:[%s15657_s8 + $0x9c] sm:$0x1] }
  0x2b   : > { %v2239_v63 = vrot.slane %v2237_v47, 4  ;;  %v2240_v0 = vrot.slane %v308_v54, 5  ;;  %v2243_v3 = vrot.slane %v309_v57, 5  ;;  %v2231_v6 = vsel %vm15663_vm4, %v2229_v44, %v2230_v33  ;;  %v15170_v35 = vld [vmem:[%s15657_s8 + $0x14] sm:$0xff]   ;;  %v15171_v36 = vld [vmem:[%s15657_s8 + $0x1c] sm:$0xff]   ;;  %v15172_v37 = vld [vmem:[%s15657_s8 + $0x28] sm:$0xff]  }
  0x2c   : > { %v2234_v8 = vsel %vm15663_vm4, %v2232_v45, %v2233_v60  ;;  %v2238_v10 = vsel %vm15663_vm4, %v12106_v61, %v2237_v47  ;;  %v2250_v12 = vrot.slane %v311_v62, 5  ;;  %v2246_v16 = vrot.slane %v353_v2, 5  ;;  %v15800_v39 = vld [vmem:[%s19479_s1 + $0xa] sm:$0x3]  ;;  %v15173_v40 = vld [vmem:[%s15657_s8 + $0x30] sm:$0xff]   ;;  %v15174_v41 = vld [vmem:[%s15657_s8 + $0x3c] sm:$0xff]  }
  0x2d   : > { %13665 = vmatmul.mubr.msk.bf16.gmra.mrb[8].mxu0 %vm1168_vm3, %v12122_v19  ;;  %v2241_v11 = vsel %vm15663_vm4, %v2239_v63, %v2240_v0  ;;  %v2242_v13 = vrot.slane %v2240_v0, 4  ;;  %v12128_v14 = vcombine.low %v2231_v6, %v2234_v8  ;;  %v2245_v15 = vrot.slane %v2243_v3, 4  ;;  %v12311_v42 = vld [vmem:[%s15657_s8 + $0x18] sm:$0xf]  ;;  %v12312_v43 = vld [vmem:[%s15657_s8 + $0x1c] sm:$0xf] }
  0x2e   : > { %13668 = vmatprep.mubr.msk.bf16.mxu0 %vm1168_vm3, %v12123_v23  ;;  %v12129_v17 = vcombine.low %v2238_v10, %v2241_v11  ;;  %v12107_v18 = vrot.slane %v2113_v5, 9  ;;  %v2253_v19 = vrot.slane %v312_v4, 5  ;;  %v2252_v20 = vrot.slane %v2250_v12, 4  ;;  %v15176_v50 = vld [vmem:[%s15657_s8 + $0x50] sm:$0xff]   ;;  %v12313_v51 = vld [vmem:[%s15657_s8 + $0x20] sm:$0xf] }
  0x2f   : > { %v2256_v21 = vrot.slane %v313_v9, 5  ;;  %v2244_v23 = vsel %vm15663_vm4, %v2242_v13, %v2243_v3  ;;  %v2247_v24 = vsel %vm15663_vm4, %v2245_v15, %v2246_v16  ;;  %v2259_v29 = vrot.slane %v354_v22, 5  ;;  %v12315_v52 = vld [vmem:[%s15657_s8 + $0x28] sm:$0xf]  ;;  %v12316_v55 = vld [vmem:[%s15657_s8 + $0x2c] sm:$0xf] }
  0x30   : > { %v2255_v25 = vrot.slane %v2253_v19, 4  ;;  %v2251_v26 = vsel %vm15663_vm4, %v12107_v18, %v2250_v12  ;;  %v2254_v27 = vsel %vm15663_vm4, %v2252_v20, %v2253_v19  ;;  %v12130_v30 = vcombine.low %v2244_v23, %v2247_v24  ;;  %v15177_v3 = vld [vmem:[%s15657_s8 + $0x58] sm:$0xff]   ;;  %v15178_v6 = vld [vmem:[%s15657_s8 + $0x64] sm:$0xff]   ;;  %v12317_v8 = vld [vmem:[%s15657_s8 + $0x30] sm:$0xf] }
  0x31   : > { %v2258_v28 = vrot.slane %v2256_v21, 4  ;;  %v12131_v31 = vcombine.low %v2251_v26, %v2254_v27  ;;  %v4576_v38 = vsel %vm1265_vm0, %v15694_v46, 0  ;;  %v12310_v46 = vld [vmem:[%s15657_s8 + $0x14] sm:$0xf]  ;;  %v3687_v47 = vshll.u32 %v12311_v42, 16 }
  0x32   : > { %v2257_v32 = vsel %vm15663_vm4, %v2255_v25, %v2256_v21  ;;  %v3678_v44 = vshrl.u32 %v12310_v46, 16  ;;  %v3681_v45 = vshll.u32 %v12310_v46, 16  ;;  %v3697_v53 = vshll.u32 %v12312_v43, 16  ;;  %v12314_v11 = vld [vmem:[%s15657_s8 + $0x24] sm:$0x1] }
  0x33   : > { %v2260_v33 = vsel %vm15663_vm4, %v2258_v28, %v2259_v29  ;;  %v3701_v54 = vshrl.u32 %v12312_v43, 16  ;;  %v3707_v60 = vshll.u32 %v12313_v51, 16  ;;  %v3711_v61 = vshrl.u32 %v12313_v51, 16  ;;  %v12320_v27 = vld [vmem:[%s15657_s8 + $0x3c] sm:$0xf] }
  0x34   : > { %v12132_v34 = vcombine.low %v2257_v32, %v2260_v33  ;;  %v3680_v56 = vrot.slane %v3678_v44, 4  ;;  %v3683_v57 = vrot.slane %v3681_v45, 5  ;;  %v3722_v62 = vshrl.u32 %v12315_v52, 16  ;;  %v12321_v32 = vld [vmem:[%s15657_s8 + $0x40] sm:$0xf]  ;;  %v15180_v45 = vld [vmem:[%s15657_s8 + $0x78] sm:$0xff]  }
  0x35   : > { %13669 = vmatmul.mubr.msk.bf16.gmra.mrb[12].mxu0 %vm1168_vm3, %v12124_v48  ;;  %v3691_v48 = vshrl.u32 %v12311_v42, 16  ;;  %v3725_v63 = vshll.u32 %v12315_v52, 16  ;;  %v3731_v0 = vshll.u32 %v12316_v55, 16  ;;  %v3735_v2 = vshrl.u32 %v12316_v55, 16  ;;  %v12322_v46 = vld [vmem:[%s15657_s8 + $0x44] sm:$0xf] }
  0x36   : > { %13672 = vmatprep.mubr.msk.bf16.mxu0 %vm1168_vm3, %v12125_v49  ;;  %v15175_v49 = vld [vmem:[%s15657_s8 + $0x44] sm:$0xff]   ;;  %v15823_v4 = vrot.slane %v3697_v53, 5  ;;  %v3703_v5 = vrot.slane %v3701_v54, 4  ;;  %v3684_v9 = vor.u32 %v3683_v57, %v3680_v56  ;;  %v15829_v12 = vrot.slane %v3707_v60, 5  ;;  %v12325_v57 = vld [vmem:[%s15657_s8 + $0x50] sm:$0xf] }
  0x37   : > { %v3713_v13 = vrot.slane %v3711_v61, 4  ;;  %v3724_v15 = vrot.slane %v3722_v62, 4  ;;  %v3727_v16 = vrot.slane %v3725_v63, 5  ;;  %v3737_v18 = vrot.slane %v3735_v2, 4  ;;  %v12323_v52 = vld [vmem:[%s15657_s8 + $0x48] sm:$0xf] }
  0x38   : > { %v3704_v19 = vor.u32 %v3703_v5, %v15823_v4  ;;  %v3741_v20 = vshll.u32 %v12317_v8, 16  ;;  %v3745_v21 = vshrl.u32 %v12317_v8, 16  ;;  %v15836_v24 = vrot.slane %v3684_v9, 4 }
  0x39   : > { %v3717_v26 = vshll.u32 %v12314_v11, 16  ;;  %v3714_v28 = vor.u32 %v3713_v13, %v15829_v12  ;;  %v3728_v29 = vor.u32 %v3727_v16, %v3724_v15  ;;  %v3769_v42 = vshll.u32 %v12320_v27, 16  ;;  %v12326_v13 = vld [vmem:[%s15657_s8 + $0x54] sm:$0xf]  ;;  %v15182_v15 = vld [vmem:[%s15657_s8 + $0x8c] sm:$0xff]  }
  0x3a   : > { %v3705_v33 = vrot.slane %v3704_v19, 4  ;;  %v3775_v43 = vshll.u32 %v12321_v32, 16  ;;  %v3779_v44 = vshrl.u32 %v12321_v32, 16  ;;  %v3785_v56 = vshll.u32 %v12322_v46, 16 }
  0x3b   : > { %v3789_v62 = vshrl.u32 %v12322_v46, 16  ;;  %v3799_v2 = vshrl.u32 %v12323_v52, 16  ;;  %v3813_v8 = vshll.u32 %v12325_v57, 16 }
  0x3c   : > { %v15864_v60 = vrot.slane %v3775_v43, 5  ;;  %v3781_v61 = vrot.slane %v3779_v44, 4  ;;  %v3710_v5 = vsel %vm15855_vm7, %v3705_v33, %v15829_v12  ;;  %v3787_v16 = vrot.slane %v3785_v56, 5  ;;  %v12331_v44 = vld [vmem:[%s15657_s8 + $0x68] sm:$0xf] }
  0x3d   : > { %13673 = vmatmul.mubr.msk.bf16.gmra.mrb[16].mxu0 %vm1168_vm3, %v12126_v58  ;;  %v15818_v58 = vrot.slane %v3687_v47, 5  ;;  %v15534_v47 = vld [vmem:[%s15657_s8 + $0x38] sm:$0x1] }
  0x3e   : > { %13676 = vmatprep.mubr.msk.bf16.mxu0 %vm1168_vm3, %v12127_v59  ;;  %v3693_v59 = vrot.slane %v3691_v48, 4  ;;  %v3715_v48 = vrot.slane %v3714_v28, 4 }
  0x3f   : > { %v3690_v63 = vsel %vm15855_vm7, %v15836_v24, %v15818_v58  ;;  %v3815_v24 = vrot.slane %v3813_v8, 5 }
  0x40   : > { %v3694_v10 = vor.u32 %v3693_v59, %v15818_v58  ;;  %v3771_v59 = vrot.slane %v3769_v42, 5 }
  0x42   : > { %v15838_v25 = vrot.slane %v3694_v10, 4 }
  0x45   : > { %13677 = vmatmul.mubr.msk.bf16.gmra.mrb[20].mxu0 %vm1168_vm3, %v12128_v14  ;;  %v12318_v14 = vld [vmem:[%s15657_s8 + $0x34] sm:$0xf] }
  0x46   : > { %13680 = vmatprep.mubr.msk.bf16.mxu0 %vm1168_vm3, %v12129_v17  ;;  %v15832_v17 = vrot.slane %v3731_v0, 5  ;;  %v3751_v22 = vshll.u32 %v12318_v14, 16  ;;  %v3755_v23 = vshrl.u32 %v12318_v14, 16  ;;  %v3795_v0 = vshll.u32 %v12323_v52, 16  ;;  %v15181_v14 = vld [vmem:[%s15657_s8 + $0x80] sm:$0xff]  }
  0x4d   : > { %13681 = vmatmul.mubr.msk.bf16.gmra.mrb[24].mxu0 %vm1168_vm3, %v12130_v30  ;;  %v3738_v30 = vor.u32 %v3737_v18, %v15832_v17  ;;  %v3791_v18 = vrot.slane %v3789_v62, 4  ;;  %v3863_v62 = vshll.u32 %v12331_v44, 16 }
  0x4e   : > { %13684 = vmatprep.mubr.msk.bf16.mxu0 %vm1168_vm3, %v12131_v31  ;;  %v12319_v31 = vld [vmem:[%s15657_s8 + $0x38] sm:$0x1] }
  0x4f   : > { %v3761_v51 = vshll.u32 %v12319_v31, 16  ;;  %v3792_v33 = vor.u32 %v3791_v18, %v3787_v16 }
  0x51   : > { %v3763_v11 = vrot.slane %v3761_v51, 5  ;;  %v15920_v52 = vrot.slane %v3792_v33, 4  ;;  %v15186_v33 = vld [vmem:[%s15657_s8 + $0xb4] sm:$0xff]  }
  0x55   : > { %13685 = vmatmul.mubr.msk.bf16.gmra.mrb[28].mxu0 %vm1168_vm3, %v12132_v34  ;;  %v15846_v34 = vrot.slane %v3741_v20, 5  ;;  %v3782_v20 = vor.u32 %v3781_v61, %v15864_v60 }
  0x56   : > { %13722 = vmatprep.mubr.msk.bf16.mxu0 %vm1168_vm3, %v15170_v35  ;;  %v15179_v35 = vld [vmem:[%s15657_s8 + $0x6c] sm:$0xff]  }
  0x5d   : > { %13723 = vmatmul.mubr.msk.bf16.vlgmr.msra.gmra.mrb[0].mxu0 %vm1168_vm3, %v15171_v36  ;;  %v3747_v36 = vrot.slane %v3745_v21, 4  ;;  %v12324_v21 = vld [vmem:[%s15657_s8 + $0x4c] sm:$0x1] }
  0x5e   : > { %13787 = vmatpush3.bf16.msra.mxu0 %v4576_v38  ;;  %13726 = vmatprep.mubr.msk.bf16.mxu0 %vm1168_vm3, %v15172_v37  ;;  %v15849_v37 = vrot.slane %v3751_v22, 5  ;;  %v3757_v38 = vrot.slane %v3755_v23, 4  ;;  %v15891_v22 = vrot.slane %v3795_v0, 5 }
  0x5f   : > { %15130 = vmatprep.subr.msk.bf16.mxu0 %vm1265_vm0, %v15800_v39  ;;  %v3748_v53 = vor.u32 %v3747_v36, %v15846_v34 }
  0x60   : > { %v3758_v54 = vor.u32 %v3757_v38, %v15849_v37  ;;  %v3783_v38 = vrot.slane %v3782_v20, 4 }
  0x61   : > { %v3749_v10 = vrot.slane %v3748_v53, 4 }
  0x62   : > { %v3759_v12 = vrot.slane %v3758_v54, 4  ;;  %v12329_v54 = vld [vmem:[%s15657_s8 + $0x60] sm:$0x1]  ;;  %v3788_v61 = vsel %vm15855_vm7, %v3783_v38, %v3787_v16  ;;  %v15952_v16 = vrot.slane %v3863_v62, 5 }
  0x63   : > { %v3754_v31 = vsel %vm15855_vm7, %v3749_v10, %v15849_v37  ;;  %v12333_v10 = vld [vmem:[%s15657_s8 + $0x70] sm:$0xf] }
  0x64   : > { %v3764_v32 = vsel %vm15855_vm7, %v3759_v12, %v3763_v11  ;;  %v12336_v12 = vld [vmem:[%s15657_s8 + $0x7c] sm:$0xf] }
  0x65   : > { %13727 = vmatmul.mubr.msk.bf16.gmra.mrb[4].mxu0 %vm1168_vm3, %v15173_v40  ;;  %v3766_v40 = vshrl.u32 %v12320_v27, 16 }
  0x66   : > { %13730 = vmatprep.mubr.msk.bf16.mxu0 %vm1168_vm3, %v15174_v41  ;;  %v3719_v41 = vrot.slane %v3717_v26, 5  ;;  %v3823_v26 = vshrl.u32 %v12326_v13, 16 }
  0x67   : > { %v3768_v55 = vrot.slane %v3766_v40, 4 }
  0x68   : > { %v3720_v9 = vsel %vm15855_vm7, %v3715_v48, %v3719_v41  ;;  %v12330_v41 = vld [vmem:[%s15657_s8 + $0x64] sm:$0xf]  ;;  %v3825_v42 = vrot.slane %v3823_v26, 4  ;;  %v15918_v48 = vcombine.low %v3754_v31, %v3764_v32  ;;  %v3911_v31 = vshrl.u32 %v12336_v12, 16  ;;  %v15185_v32 = vld [vmem:[%s15657_s8 + $0xa8] sm:$0xff]  }
  0x69   : > { %v3772_v19 = vor.u32 %v3771_v59, %v3768_v55  ;;  %v15895_v28 = vcombine.low %v3710_v5, %v3720_v9  ;;  %v3854_v55 = vshrl.u32 %v12330_v41, 16  ;;  %v3857_v56 = vshll.u32 %v12330_v41, 16 }
  0x6d   : > { %13731 = vmatmul.mubr.msk.bf16.gmra.mrb[8].mxu0 %vm1168_vm3, %v15175_v49  ;;  %v3729_v49 = vrot.slane %v3728_v29, 4  ;;  %v15899_v29 = vsel %vm1265_vm0, %v15800_v39, 0  ;;  %v3773_v39 = vrot.slane %v3772_v19, 4 }
  0x6e   : > { %13734 = vmatprep.mubr.msk.bf16.mxu0 %vm1168_vm3, %v15176_v50  ;;  %v3739_v50 = vrot.slane %v3738_v30, 4  ;;  %v12327_v30 = vld [vmem:[%s15657_s8 + $0x58] sm:$0xf] }
  0x6f   : > { %v3734_v58 = vsel %vm15855_vm7, %v3729_v49, %v15832_v17  ;;  %v3801_v17 = vrot.slane %v3799_v2, 4  ;;  %v3829_v43 = vshll.u32 %v12327_v30, 16  ;;  %v3833_v49 = vshrl.u32 %v12327_v30, 16 }
  0x70   : > { %v3778_v59 = vsel %vm15855_vm7, %v3773_v39, %v15864_v60  ;;  %v3907_v30 = vshll.u32 %v12336_v12, 16 }
  0x71   : > { %v3802_v40 = vor.u32 %v3801_v17, %v15891_v22  ;;  %v15936_v5 = vrot.slane %v3829_v43, 5  ;;  %v3835_v8 = vrot.slane %v3833_v49, 4  ;;  %v15943_v11 = vcombine.low %v3778_v59, %v3788_v61 }
  0x73   : > { %v15931_v0 = vrot.slane %v3802_v40, 4 }
  0x75   : > { %13735 = vmatmul.mubr.msk.bf16.gmra.mrb[12].mxu0 %vm1168_vm3, %v15177_v3  ;;  %v3700_v3 = vsel %vm15855_vm7, %v15838_v25, %v15823_v4  ;;  %v3744_v4 = vsel %vm15855_vm7, %v3739_v50, %v15846_v34  ;;  %v3819_v25 = vshll.u32 %v12326_v13, 16  ;;  %v3805_v34 = vshll.u32 %v12324_v21, 16 }
  0x76   : > { %13738 = vmatprep.mubr.msk.bf16.mxu0 %vm1168_vm3, %v15178_v6  ;;  %v3810_v6 = vshrl.u32 %v12325_v57, 16  ;;  %v15893_v27 = vcombine.low %v3690_v63, %v3700_v3  ;;  %v15910_v36 = vcombine.low %v3734_v58, %v3744_v4  ;;  %v15184_v57 = vld [vmem:[%s15657_s8 + $0xa0] sm:$0xff]   ;;  %v3867_v63 = vshrl.u32 %v12331_v44, 16  ;;  %v12335_v4 = vld [vmem:[%s15657_s8 + $0x78] sm:$0xf] }
  0x77   : > { %v15914_v37 = vrot.slane %v3819_v25, 5  ;;  %v15922_v53 = vrot.slane %v3805_v34, 5  ;;  %v3849_v58 = vshll.u32 %v12329_v54, 16  ;;  %v3798_v13 = vsel %vm15855_vm7, %v15920_v52, %v15891_v22  ;;  %v12338_v44 = vld [vmem:[%s15657_s8 + $0x84] sm:$0xf] }
  0x78   : > { %v3812_v23 = vrot.slane %v3810_v6, 4  ;;  %v12332_v6 = vld [vmem:[%s15657_s8 + $0x6c] sm:$0xf]  ;;  %v3869_v18 = vrot.slane %v3867_v63, 4  ;;  %v3883_v22 = vshll.u32 %v12333_v10, 16  ;;  %v3898_v25 = vshrl.u32 %v12335_v4, 16 }
  0x79   : > { %v3826_v3 = vor.u32 %v3825_v42, %v15914_v37  ;;  %v3873_v19 = vshll.u32 %v12332_v6, 16  ;;  %v3877_v20 = vshrl.u32 %v12332_v6, 16  ;;  %v3808_v21 = vsel %vm15855_vm7, %v15931_v0, %v15922_v53  ;;  %v12334_v42 = vld [vmem:[%s15657_s8 + $0x74] sm:$0x1] }
  0x7a   : > { %v3816_v46 = vor.u32 %v3815_v24, %v3812_v23  ;;  %v3887_v23 = vshrl.u32 %v12333_v10, 16  ;;  %v12337_v24 = vld [vmem:[%s15657_s8 + $0x80] sm:$0xf]  ;;  %v3901_v26 = vshll.u32 %v12335_v4, 16  ;;  %v15967_v38 = vrot.slane %v3849_v58, 5  ;;  %v15188_v4 = vld [vmem:[%s15657_s8 + $0xc8] sm:$0xff]  }
  0x7b   : > { %v3827_v17 = vrot.slane %v3826_v3, 4  ;;  %v3870_v41 = vor.u32 %v3869_v18, %v15952_v16  ;;  %v3879_v43 = vrot.slane %v3877_v20, 4  ;;  %v3900_v52 = vrot.slane %v3898_v25, 4 }
  0x7c   : > { %v15933_v2 = vrot.slane %v3816_v46, 4  ;;  %v15970_v46 = vrot.slane %v3873_v19, 5  ;;  %v3889_v49 = vrot.slane %v3887_v23, 4  ;;  %v3903_v53 = vrot.slane %v3901_v26, 5  ;;  %v12339_v23 = vld [vmem:[%s15657_s8 + $0x88] sm:$0x1] }
  0x7d   : > { %13739 = vmatmul.mubr.msk.bf16.gmra.mrb[16].mxu0 %vm1168_vm3, %v15179_v35  ;;  %v12328_v35 = vld [vmem:[%s15657_s8 + $0x5c] sm:$0xf]  ;;  %v15977_v54 = vrot.slane %v3907_v30, 5  ;;  %v3927_v59 = vshll.u32 %v12338_v44, 16  ;;  %v3931_v61 = vshrl.u32 %v12338_v44, 16  ;;  %v3893_v63 = vshll.u32 %v12334_v42, 16 }
  0x7e   : > { %13742 = vmatprep.mubr.msk.bf16.mxu0 %vm1168_vm3, %v15180_v45  ;;  %v15183_v45 = vld [vmem:[%s15657_s8 + $0x94] sm:$0xff]   ;;  %v3839_v50 = vshll.u32 %v12328_v35, 16  ;;  %v3843_v51 = vshrl.u32 %v12328_v35, 16  ;;  %v3822_v34 = vsel %vm15855_vm7, %v15933_v2, %v15914_v37  ;;  %v3836_v35 = vor.u32 %v3835_v8, %v15936_v5  ;;  %v12340_v37 = vld [vmem:[%s15657_s8 + $0x8c] sm:$0xf] }
  0x7f   : > { %v3942_v0 = vshrl.u32 %v12340_v37, 16  ;;  %v3945_v2 = vshll.u32 %v12340_v37, 16  ;;  %v3880_v3 = vor.u32 %v3879_v43, %v15970_v46  ;;  %v3871_v58 = vrot.slane %v3870_v41, 4  ;;  %v12343_v42 = vld [vmem:[%s15657_s8 + $0x98] sm:$0xf] }
  0x80   : > { %v15939_v9 = vrot.slane %v3839_v50, 5  ;;  %v3845_v60 = vrot.slane %v3843_v51, 4  ;;  %v3917_v50 = vshll.u32 %v12337_v24, 16  ;;  %v3921_v51 = vshrl.u32 %v12337_v24, 16  ;;  %v12341_v24 = vld [vmem:[%s15657_s8 + $0x90] sm:$0xf] }
  0x81   : > { %v3904_v10 = vor.u32 %v3903_v53, %v3900_v52  ;;  %v15989_v12 = vcombine.low %v3798_v13, %v3808_v21  ;;  %v15993_v19 = vrot.slane %v3927_v59, 5  ;;  %v3933_v20 = vrot.slane %v3931_v61, 4  ;;  %v15189_v52 = vld [vmem:[%s15657_s8 + $0xd0] sm:$0xff]   ;;  %v12345_v59 = vld [vmem:[%s15657_s8 + $0xa0] sm:$0xf] }
  0x82   : > { %v3846_v39 = vor.u32 %v3845_v60, %v15939_v9  ;;  %v3919_v8 = vrot.slane %v3917_v50, 5  ;;  %v3923_v60 = vrot.slane %v3921_v51, 4  ;;  %v3944_v25 = vrot.slane %v3942_v0, 4  ;;  %v12346_v0 = vld [vmem:[%s15657_s8 + $0xa4] sm:$0xf] }
  0x83   : > { %v3947_v26 = vrot.slane %v3945_v2, 5  ;;  %v3881_v13 = vrot.slane %v3880_v3, 4  ;;  %v3895_v30 = vrot.slane %v3893_v63, 5  ;;  %v3955_v41 = vshrl.u32 %v12341_v24, 16  ;;  %v15190_v2 = vld [vmem:[%s15657_s8 + $0xdc] sm:$0xff]  }
  0x84   : > { %v3847_v62 = vrot.slane %v3846_v39, 4  ;;  %v3934_v39 = vor.u32 %v3933_v20, %v15993_v19 }
  0x85   : > { %13743 = vmatmul.mubr.msk.bf16.gmra.mrb[20].mxu0 %vm1168_vm3, %v15181_v14  ;;  %v3856_v14 = vrot.slane %v3854_v55, 4  ;;  %v3913_v55 = vrot.slane %v3911_v31, 4  ;;  %v3924_v31 = vor.u32 %v3923_v60, %v3919_v8  ;;  %v16038_v63 = vrot.slane %v3955_v41, 4  ;;  %v12347_v60 = vld [vmem:[%s15657_s8 + $0xa8] sm:$0xf] }
  0x86   : > { %13746 = vmatprep.mubr.msk.bf16.mxu0 %vm1168_vm3, %v15182_v15  ;;  %v3859_v15 = vrot.slane %v3857_v56, 5  ;;  %v3832_v56 = vsel %vm15855_vm7, %v3827_v17, %v15936_v5  ;;  %v16032_v61 = vrot.slane %v3934_v39, 4  ;;  %v12344_v41 = vld [vmem:[%s15657_s8 + $0x9c] sm:$0x1] }
  0x87   : > { %v15991_v18 = vcombine.low %v3822_v34, %v3832_v56  ;;  %v3905_v34 = vrot.slane %v3904_v10, 4  ;;  %v16023_v37 = vrot.slane %v3924_v31, 4  ;;  %v3971_v56 = vshll.u32 %v12343_v42, 16  ;;  %v12353_v31 = vld [vmem:[%s15657_s8 + $0xc0] sm:$0xf] }
  0x88   : > { %v3860_v40 = vor.u32 %v3859_v15, %v3856_v14  ;;  %v3914_v14 = vor.u32 %v3913_v55, %v15977_v54  ;;  %v15187_v15 = vld [vmem:[%s15657_s8 + $0xbc] sm:$0xff]   ;;  %v3986_v10 = vshrl.u32 %v12345_v59, 16 }
  0x89   : > { %v3910_v53 = vsel %vm15855_vm7, %v3905_v34, %v15977_v54  ;;  %v16059_v20 = vrot.slane %v3971_v56, 5  ;;  %v15192_v56 = vld [vmem:[%s15657_s8 + $0xf0] sm:$0xff]  }
  0x8a   : > { %v3861_v5 = vrot.slane %v3860_v40, 4  ;;  %v3951_v40 = vshll.u32 %v12341_v24, 16  ;;  %v12351_v24 = vld [vmem:[%s15657_s8 + $0xb8] sm:$0xf] }
  0x8d   : > { %13747 = vmatmul.mubr.msk.bf16.gmra.mrb[24].mxu0 %vm1168_vm3, %v15183_v45  ;;  %v15974_v45 = vrot.slane %v3883_v22, 5  ;;  %v3852_v22 = vsel %vm15855_vm7, %v3847_v62, %v15967_v38  ;;  %v3937_v38 = vshll.u32 %v12339_v23, 16  ;;  %v16036_v62 = vrot.slane %v3951_v40, 5 }
  0x8e   : > { %13750 = vmatprep.mubr.msk.bf16.mxu0 %vm1168_vm3, %v15184_v57  ;;  %v3837_v57 = vrot.slane %v3836_v35, 4  ;;  %v3915_v35 = vrot.slane %v3914_v14, 4  ;;  %v3989_v14 = vshll.u32 %v12345_v59, 16  ;;  %v3999_v23 = vshrl.u32 %v12346_v0, 16 }
  0x8f   : > { %v3890_v6 = vor.u32 %v3889_v49, %v15974_v45  ;;  %v3886_v50 = vsel %vm15855_vm7, %v3881_v13, %v15974_v45  ;;  %v16034_v45 = vrot.slane %v3937_v38, 5  ;;  %v4005_v13 = vshll.u32 %v12347_v60, 16 }
  0x90   : > { %v3842_v17 = vsel %vm15855_vm7, %v3837_v57, %v15939_v9  ;;  %v3876_v9 = vsel %vm15855_vm7, %v3871_v58, %v15970_v46  ;;  %v3920_v55 = vsel %vm15855_vm7, %v3915_v35, %v3919_v8  ;;  %v3975_v57 = vshrl.u32 %v12343_v42, 16 }
  0x91   : > { %v3891_v21 = vrot.slane %v3890_v6, 4  ;;  %v16014_v43 = vcombine.low %v3842_v17, %v3852_v22  ;;  %v3930_v58 = vsel %vm15855_vm7, %v16023_v37, %v15993_v19  ;;  %v3995_v22 = vshll.u32 %v12346_v0, 16  ;;  %v12360_v37 = vld [vmem:[%s15657_s8 + $0xdc] sm:$0xf] }
  0x92   : > { %v16061_v17 = vrot.slane %v3975_v57, 4  ;;  %v3988_v35 = vrot.slane %v3986_v10, 4  ;;  %v3991_v39 = vrot.slane %v3989_v14, 5  ;;  %v4039_v38 = vshll.u32 %v12351_v24, 16  ;;  %v12349_v10 = vld [vmem:[%s15657_s8 + $0xb0] sm:$0x1] }
  0x93   : > { %v3896_v51 = vsel %vm15855_vm7, %v3891_v21, %v3895_v30  ;;  %v4009_v21 = vshrl.u32 %v12347_v60, 16  ;;  %v12352_v30 = vld [vmem:[%s15657_s8 + $0xbc] sm:$0xf]  ;;  %v4043_v40 = vshrl.u32 %v12351_v24, 16  ;;  %v3981_v60 = vshll.u32 %v12344_v41, 16 }
  0x94   : > { %v16042_v54 = vcombine.low %v3886_v50, %v3896_v51  ;;  %v4049_v42 = vshll.u32 %v12352_v30, 16  ;;  %v15191_v50 = vld [vmem:[%s15657_s8 + $0xe4] sm:$0xff]   ;;  %v16076_v51 = vrot.slane %v3995_v22, 5  ;;  %v16086_v14 = vrot.slane %v4039_v38, 5 }
  0x95   : > { %13751 = vmatmul.mubr.msk.bf16.gmra.mrb[28].mxu0 %vm1168_vm3, %v15185_v32  ;;  %v12342_v32 = vld [vmem:[%s15657_s8 + $0x94] sm:$0xf] }
  0x96   : > { %13754 = vmatprep.mubr.msk.bf16.mxu0 %vm1168_vm3, %v15186_v33  ;;  %v3866_v33 = vsel %vm15855_vm7, %v3861_v5, %v15952_v16  ;;  %v3948_v16 = vor.u32 %v3947_v26, %v3944_v25  ;;  %v3961_v44 = vshll.u32 %v12342_v32, 16  ;;  %v3965_v46 = vshrl.u32 %v12342_v32, 16 }
  0x97   : > { %v16016_v49 = vcombine.low %v3866_v33, %v3876_v9  ;;  %v16051_v5 = vcombine.low %v3910_v53, %v3920_v55  ;;  %v3940_v25 = vsel %vm15855_vm7, %v16032_v61, %v16034_v45  ;;  %v3958_v26 = vor.u32 %v16038_v63, %v16036_v62 }
  0x98   : > { %v16044_v3 = vrot.slane %v3948_v16, 4  ;;  %v16046_v6 = vrot.slane %v3961_v44, 5  ;;  %v16048_v8 = vrot.slane %v3965_v46, 4  ;;  %v4053_v16 = vshrl.u32 %v12352_v30, 16 }
  0x99   : > { %v4059_v44 = vshll.u32 %v12353_v31, 16  ;;  %v4063_v46 = vshrl.u32 %v12353_v31, 16  ;;  %v16078_v53 = vrot.slane %v4005_v13, 5  ;;  %v4011_v55 = vrot.slane %v4009_v21, 4  ;;  %v12355_v13 = vld [vmem:[%s15657_s8 + $0xc8] sm:$0xf] }
  0x9a   : > { %v4055_v22 = vrot.slane %v4053_v16, 4  ;;  %v3954_v21 = vsel %vm15855_vm7, %v16044_v3, %v16036_v62  ;;  %v3992_v30 = vor.u32 %v3991_v39, %v3988_v35  ;;  %v4074_v3 = vshrl.u32 %v12355_v13, 16  ;;  %v15193_v16 = vld [vmem:[%s15657_s8 + $0xf8] sm:$0xff]  }
  0x9b   : > { %v4065_v24 = vrot.slane %v4063_v46, 4 }
  0x9d   : > { %13755 = vmatmul.mubr.msk.bf16.gmra.mrb[32].mxu0 %vm1168_vm3, %v15187_v15  ;;  %v12348_v15 = vld [vmem:[%s15657_s8 + $0xac] sm:$0xf] }
  0x9e   : > { %13758 = vmatprep.mubr.msk.bf16.mxu0 %vm1168_vm3, %v15188_v4  ;;  %v12350_v4 = vld [vmem:[%s15657_s8 + $0xb4] sm:$0xf]  ;;  %v4015_v32 = vshll.u32 %v12348_v15, 16  ;;  %v4019_v33 = vshrl.u32 %v12348_v15, 16  ;;  %v4045_v15 = vrot.slane %v4043_v40, 4  ;;  %v3959_v40 = vrot.slane %v3958_v26, 4 }
  0x9f   : > { %v4030_v9 = vshrl.u32 %v12350_v4, 16  ;;  %v4033_v34 = vshll.u32 %v12350_v4, 16  ;;  %v16088_v4 = vrot.slane %v4049_v42, 5 }
  0xa0   : > { %v16081_v57 = vrot.slane %v4015_v32, 5  ;;  %v4021_v59 = vrot.slane %v4019_v33, 4  ;;  %v12354_v32 = vld [vmem:[%s15657_s8 + $0xc4] sm:$0x1]  ;;  %v4012_v33 = vor.u32 %v4011_v55, %v16078_v53  ;;  %v4046_v62 = vor.u32 %v4045_v15, %v16086_v14 }
  0xa1   : > { %v4032_v63 = vrot.slane %v4030_v9, 4  ;;  %v4035_v0 = vrot.slane %v4033_v34, 5  ;;  %v4025_v34 = vshll.u32 %v12349_v10, 16  ;;  %v4056_v39 = vor.u32 %v4055_v22, %v16088_v4 }
  0xa2   : > { %v4022_v9 = vor.u32 %v4021_v59, %v16081_v57  ;;  %v4069_v42 = vshll.u32 %v12354_v32, 16  ;;  %v4047_v10 = vrot.slane %v4046_v62, 4  ;;  %v4076_v15 = vrot.slane %v4074_v3, 4 }
  0xa3   : > { %v4036_v38 = vor.u32 %v4035_v0, %v4032_v63  ;;  %v4027_v59 = vrot.slane %v4025_v34, 5  ;;  %v12356_v0 = vld [vmem:[%s15657_s8 + $0xcc] sm:$0xf] }
  0xa4   : > { %v4023_v26 = vrot.slane %v4022_v9, 4  ;;  %v4083_v32 = vshll.u32 %v12356_v0, 16 }
  0xa5   : > { %13759 = vmatmul.mubr.msk.bf16.gmra.mrb[36].mxu0 %vm1168_vm3, %v15189_v52  ;;  %v4001_v52 = vrot.slane %v3999_v23, 4  ;;  %v16090_v23 = vrot.slane %v4059_v44, 5  ;;  %v15194_v44 = vld [vmem:[%s15657_s8 + $0x104] sm:$0xff]   ;;  %v4037_v63 = vrot.slane %v4036_v38, 4 }
  0xa6   : > { %13762 = vmatprep.mubr.msk.bf16.mxu0 %vm1168_vm3, %v15190_v2  ;;  %v3968_v2 = vor.u32 %v16048_v8, %v16046_v6  ;;  %v3978_v8 = vor.u32 %v16061_v17, %v16059_v20  ;;  %v4077_v17 = vshll.u32 %v12355_v13, 16  ;;  %v4028_v34 = vsel %vm15855_vm7, %v4023_v26, %v4027_v59  ;;  %v12365_v26 = vld [vmem:[%s15657_s8 + $0xf0] sm:$0xf] }
  0xa7   : > { %v4002_v31 = vor.u32 %v4001_v52, %v16076_v51  ;;  %v4066_v41 = vor.u32 %v4065_v24, %v16090_v23  ;;  %v3993_v52 = vrot.slane %v3992_v30, 4  ;;  %v12357_v30 = vld [vmem:[%s15657_s8 + $0xd0] sm:$0xf]  ;;  %v4042_v38 = vsel %vm15855_vm7, %v4037_v63, %v16086_v14 }
  0xa8   : > { %v3969_v35 = vrot.slane %v3968_v2, 4  ;;  %v3979_v46 = vrot.slane %v3978_v8, 4  ;;  %v3964_v2 = vsel %vm15855_vm7, %v3959_v40, %v16046_v6  ;;  %v4079_v22 = vrot.slane %v4077_v17, 5  ;;  %v15195_v17 = vld [vmem:[%s15657_s8 + $0x10c] sm:$0xff]  }
  0xa9   : > { %v4003_v55 = vrot.slane %v4002_v31, 4  ;;  %v4067_v13 = vrot.slane %v4066_v41, 4  ;;  %v4071_v8 = vrot.slane %v4069_v42, 5  ;;  %v3998_v6 = vsel %vm15855_vm7, %v3993_v52, %v16076_v51  ;;  %v16174_v42 = vld [vmem:[%s15657_s8 + $0xd8] sm:$0x1] }
  0xaa   : > { %v3974_v24 = vsel %vm15855_vm7, %v3969_v35, %v16059_v20  ;;  %v4052_v51 = vsel %vm15855_vm7, %v4047_v10, %v16088_v4  ;;  %v4080_v40 = vor.u32 %v4079_v22, %v4076_v15  ;;  %v4093_v62 = vshll.u32 %v12357_v30, 16  ;;  %v12366_v10 = vld [vmem:[%s15657_s8 + $0xf4] sm:$0xf] }
  0xab   : > { %v4008_v20 = vsel %vm15855_vm7, %v4003_v55, %v16078_v53  ;;  %v12358_v53 = vld [vmem:[%s15657_s8 + $0xd4] sm:$0xf]  ;;  %v4097_v3 = vshrl.u32 %v12357_v30, 16  ;;  %v16152_v14 = vcombine.low %v3930_v58, %v3940_v25  ;;  %v16154_v4 = vcombine.low %v3954_v21, %v3964_v2  ;;  %v12361_v58 = vld [vmem:[%s15657_s8 + $0xe0] sm:$0xf] }
  0xac   : > { %v16163_v61 = vcombine.low %v3998_v6, %v4008_v20  ;;  %v16165_v45 = vrot.slane %v4083_v32, 5  ;;  %v16171_v21 = vcombine.low %v4042_v38, %v4052_v51  ;;  %v16180_v52 = vrot.slane %v4080_v40, 4 }
  0xad   : > { %13763 = vmatmul.mubr.msk.bf16.gmra.mrb[40].mxu0 %vm1168_vm3, %v15191_v50  ;;  %v3983_v50 = vrot.slane %v3981_v60, 5  ;;  %v4057_v60 = vrot.slane %v4056_v39, 4  ;;  %v4072_v39 = vsel %vm15855_vm7, %v4067_v13, %v4071_v8  ;;  %v16182_v55 = vrot.slane %v4093_v62, 5  ;;  %v12368_v62 = vld [vmem:[%s15657_s8 + $0xfc] sm:$0xf] }
  0xae   : > { %13766 = vmatprep.mubr.msk.bf16.mxu0 %vm1168_vm3, %v15192_v56  ;;  %v4013_v56 = vrot.slane %v4012_v33, 4  ;;  %v4087_v33 = vshrl.u32 %v12356_v0, 16  ;;  %v4118_v59 = vshrl.u32 %v12360_v37, 16  ;;  %v4121_v63 = vshll.u32 %v12360_v37, 16 }
  0xaf   : > { %v3984_v31 = vsel %vm15855_vm7, %v3979_v46, %v3983_v50  ;;  %v4062_v35 = vsel %vm15855_vm7, %v4057_v60, %v16090_v23  ;;  %v4103_v23 = vshll.u32 %v12358_v53, 16  ;;  %v12363_v46 = vld [vmem:[%s15657_s8 + $0xe8] sm:$0xf]  ;;  %v4127_v0 = vshll.u32 %v12361_v58, 16 }
  0xb0   : > { %v4018_v9 = vsel %vm15855_vm7, %v4013_v56, %v16081_v57  ;;  %v15196_v57 = vld [vmem:[%s15657_s8 + $0x118] sm:$0xff]   ;;  %v16161_v41 = vcombine.low %v3974_v24, %v3984_v31  ;;  %v4089_v19 = vrot.slane %v4087_v33, 4  ;;  %v16178_v50 = vcombine.low %v4062_v35, %v4072_v39 }
  0xb1   : > { %v16169_v25 = vcombine.low %v4018_v9, %v4028_v34  ;;  %v4099_v56 = vrot.slane %v4097_v3, 4  ;;  %v4131_v2 = vshrl.u32 %v12361_v58, 16  ;;  %v4147_v24 = vshll.u32 %v12363_v46, 16  ;;  %v12367_v33 = vld [vmem:[%s15657_s8 + $0xf8] sm:$0xf]  ;;  %v15198_v3 = vld [vmem:[%s15657_s8 + $0x12c] sm:$0xff]  }
  0xb2   : > { %v4151_v60 = vshrl.u32 %v12363_v46, 16  ;;  %v4090_v13 = vor.u32 %v4089_v19, %v16165_v45  ;;  %v16189_v8 = vrot.slane %v4103_v23, 5  ;;  %v4162_v30 = vshrl.u32 %v12365_v26, 16  ;;  %v12364_v19 = vld [vmem:[%s15657_s8 + $0xec] sm:$0x1] }
  0xb3   : > { %v4165_v31 = vshll.u32 %v12365_v26, 16  ;;  %v4113_v32 = vshll.u32 %v16174_v42, 16  ;;  %v4171_v20 = vshll.u32 %v12366_v10, 16  ;;  %v4175_v9 = vshrl.u32 %v12366_v10, 16 }
  0xb4   : > { %v4120_v34 = vrot.slane %v4118_v59, 4  ;;  %v4123_v38 = vrot.slane %v4121_v63, 5  ;;  %v16193_v51 = vrot.slane %v4127_v0, 5  ;;  %v4133_v40 = vrot.slane %v4131_v2, 4 }
  0xb5   : > { %13767 = vmatmul.mubr.msk.bf16.gmra.mrb[44].mxu0 %vm1168_vm3, %v15193_v16  ;;  %v4107_v16 = vshrl.u32 %v12358_v53, 16  ;;  %v15197_v53 = vld [vmem:[%s15657_s8 + $0x120] sm:$0xff]   ;;  %v16200_v35 = vrot.slane %v4147_v24, 5  ;;  %v4153_v39 = vrot.slane %v4151_v60, 4  ;;  %v4164_v37 = vrot.slane %v4162_v30, 4 }
  0xb6   : > { %13770 = vmatprep.mubr.msk.bf16.mxu0 %vm1168_vm3, %v15194_v44  ;;  %v12362_v44 = vld [vmem:[%s15657_s8 + $0xe4] sm:$0xf]  ;;  %v4167_v58 = vrot.slane %v4165_v31, 5  ;;  %v4181_v42 = vshll.u32 %v12367_v33, 16  ;;  %v4185_v23 = vshrl.u32 %v12367_v33, 16  ;;  %v4191_v46 = vshll.u32 %v12368_v62, 16 }
  0xb7   : > { %v4137_v15 = vshll.u32 %v12362_v44, 16  ;;  %v4141_v22 = vshrl.u32 %v12362_v44, 16  ;;  %v4109_v6 = vrot.slane %v4107_v16, 4  ;;  %v16203_v16 = vrot.slane %v4171_v20, 5 }
  0xb8   : > { %v4177_v44 = vrot.slane %v4175_v9, 4  ;;  %v4195_v26 = vshrl.u32 %v12368_v62, 16  ;;  %v4100_v59 = vor.u32 %v4099_v56, %v16182_v55  ;;  %v4124_v0 = vor.u32 %v4123_v38, %v4120_v34  ;;  %v12369_v9 = vld [vmem:[%s15657_s8 + $0x100] sm:$0x1]  ;;  %v12371_v62 = vld [vmem:[%s15657_s8 + $0x108] sm:$0xf] }
  0xb9   : > { %v4110_v63 = vor.u32 %v4109_v6, %v16189_v8  ;;  %v4134_v2 = vor.u32 %v4133_v40, %v16193_v51  ;;  %v4086_v10 = vsel %vm15855_vm7, %v16180_v52, %v16165_v45  ;;  %v4157_v24 = vshll.u32 %v12364_v19, 16  ;;  %v12370_v6 = vld [vmem:[%s15657_s8 + $0x104] sm:$0xf] }
  0xba   : > { %v4154_v56 = vor.u32 %v4153_v39, %v16200_v35  ;;  %v4168_v60 = vor.u32 %v4167_v58, %v4164_v37  ;;  %v4183_v30 = vrot.slane %v4181_v42, 5  ;;  %v4187_v31 = vrot.slane %v4185_v23, 4  ;;  %v15200_v37 = vld [vmem:[%s15657_s8 + $0x140] sm:$0xff]  }
  0xbb   : > { %v4115_v33 = vrot.slane %v4113_v32, 5  ;;  %v4178_v20 = vor.u32 %v4177_v44, %v16203_v16  ;;  %v16219_v45 = vrot.slane %v4191_v46, 5  ;;  %v4197_v52 = vrot.slane %v4195_v26, 4 }
  0xbc   : > { %v4111_v34 = vrot.slane %v4110_v63, 4  ;;  %v4125_v38 = vrot.slane %v4124_v0, 4  ;;  %v4135_v40 = vrot.slane %v4134_v2, 4  ;;  %v4206_v39 = vshrl.u32 %v12370_v6, 16 }
  0xbd   : > { %13771 = vmatmul.mubr.msk.bf16.gmra.mrb[48].mxu0 %vm1168_vm3, %v15195_v17  ;;  %v16198_v17 = vrot.slane %v4137_v15, 5  ;;  %v4091_v15 = vrot.slane %v4090_v13, 4  ;;  %v4101_v13 = vrot.slane %v4100_v59, 4  ;;  %v4209_v19 = vshll.u32 %v12370_v6, 16  ;;  %v12373_v6 = vld [vmem:[%s15657_s8 + $0x110] sm:$0xf] }
  0xbe   : > { %13774 = vmatprep.mubr.msk.bf16.mxu0 %vm1168_vm3, %v15196_v57  ;;  %v4143_v57 = vrot.slane %v4141_v22, 4  ;;  %v4155_v58 = vrot.slane %v4154_v56, 4  ;;  %v4169_v32 = vrot.slane %v4168_v60, 4  ;;  %v4188_v42 = vor.u32 %v4187_v31, %v4183_v30 }
  0xbf   : > { %v4201_v23 = vshll.u32 %v12369_v9, 16  ;;  %v4179_v44 = vrot.slane %v4178_v20, 4  ;;  %v4198_v46 = vor.u32 %v4197_v52, %v16219_v45  ;;  %v4215_v26 = vshll.u32 %v12371_v62, 16  ;;  %v282_v52 = vld [vmem:[%s15657_s8] sm:$0xf] }
  0xc0   : > { %v4144_v22 = vor.u32 %v4143_v57, %v16198_v17  ;;  %v4159_v57 = vrot.slane %v4157_v24, 5  ;;  %v4219_v59 = vshrl.u32 %v12371_v62, 16  ;;  %v4096_v63 = vsel %vm15855_vm7, %v4091_v15, %v16182_v55  ;;  %v12372_v15 = vld [vmem:[%s15657_s8 + $0x10c] sm:$0xf] }
  0xc1   : > { %v4106_v0 = vsel %vm15855_vm7, %v4101_v13, %v16189_v8  ;;  %v4116_v2 = vsel %vm15855_vm7, %v4111_v34, %v4115_v33  ;;  %v4140_v24 = vsel %vm15855_vm7, %v4135_v40, %v16198_v17  ;;  %v4208_v8 = vrot.slane %v4206_v39, 4  ;;  %v15201_v40 = vld [vmem:[%s15657_s8 + $0x148] sm:$0xff]  }
  0xc2   : > { %v4211_v56 = vrot.slane %v4209_v19, 5  ;;  %v4174_v60 = vsel %vm15855_vm7, %v4169_v32, %v16203_v16  ;;  %v16250_v31 = vrot.slane %v4188_v42, 4  ;;  %v16252_v17 = vrot.slane %v4201_v23, 5  ;;  %v15377_v42 = vld [vmem:[%s15657_s8 + $0x4] sm:$0xf] }
  0xc3   : > { %v16257_v33 = vrot.slane %v4198_v46, 4  ;;  %v16259_v20 = vrot.slane %v4215_v26, 5  ;;  %v4221_v9 = vrot.slane %v4219_v59, 4  ;;  %v16262_v13 = vcombine.low %v4086_v10, %v4096_v63  ;;  %v12374_v46 = vld [vmem:[%s15657_s8 + $0x114] sm:$0x1] }
  0xc4   : > { %v16264_v34 = vcombine.low %v4106_v0, %v4116_v2  ;;  %v4225_v16 = vshll.u32 %v12372_v15, 16  ;;  %v4194_v10 = vsel %vm15855_vm7, %v16250_v31, %v16219_v45  ;;  %v4239_v39 = vshrl.u32 %v12373_v6, 16  ;;  %v11971_v2 = vld [vmem:[%s19479_s1 + $0x2] sm:$0x3]  ;;  %v12375_v31 = vld [vmem:[%s15657_s8 + $0x118] sm:$0xf] }
  0xc5   : > { %13775 = vmatmul.mubr.msk.bf16.gmra.mrb[52].mxu0 %vm1168_vm3, %v15197_v53  ;;  %v15199_v53 = vld [vmem:[%s15657_s8 + $0x134] sm:$0xff]   ;;  %v367_v19 = vshrl.u32 %v282_v52, 16  ;;  %v370_v32 = vshll.u32 %v282_v52, 16  ;;  %v376_v23 = vshll.u32 %v15377_v42, 16  ;;  %v380_v63 = vshrl.u32 %v15377_v42, 16  ;;  %15124 = vmatprep.subr.msk.bf16.mxu1 %vm1265_vm0, %v11971_v2 }
  0xc6   : > { %13778 = vmatprep.mubr.msk.bf16.mxu0 %vm1168_vm3, %v15198_v3  ;;  %v4145_v3 = vrot.slane %v4144_v22, 4  ;;  %v4130_v22 = vsel %vm15855_vm7, %v4125_v38, %v16193_v51  ;;  %v4160_v51 = vsel %vm15855_vm7, %v4155_v58, %v4159_v57  ;;  %v4229_v38 = vshrl.u32 %v12372_v15, 16 }
  0xc7   : > { %v16267_v62 = vcombine.low %v4130_v22, %v4140_v24  ;;  %v4222_v58 = vor.u32 %v4221_v9, %v16259_v20  ;;  %v369_v59 = vrot.slane %v367_v19, 4  ;;  %v372_v22 = vrot.slane %v370_v32, 5 }
  0xc8   : > { %v4150_v55 = vsel %vm15855_vm7, %v4145_v3, %v16200_v35  ;;  %v4184_v35 = vsel %vm15855_vm7, %v4179_v44, %v4183_v30  ;;  %v4212_v30 = vor.u32 %v4211_v56, %v4208_v8  ;;  %v4235_v3 = vshll.u32 %v12373_v6, 16  ;;  %v15378_v56 = vld [vmem:[%s15657_s8 + $0x8] sm:$0xf] }
  0xc9   : > { %v16271_v57 = vcombine.low %v4174_v60, %v4184_v35  ;;  %v4227_v44 = vrot.slane %v4225_v16, 5  ;;  %v4231_v26 = vrot.slane %v4229_v38, 4  ;;  %v378_v24 = vrot.slane %v376_v23, 5  ;;  %v15379_v35 = vld [vmem:[%s15657_s8 + $0xc] sm:$0xf] }
  0xca   : > { %v4213_v45 = vrot.slane %v4212_v30, 4  ;;  %v16285_v0 = vrot.slane %v4235_v3, 5  ;;  %v1267_v15 = vsel %vm1265_vm0, %v11971_v2, 0  ;;  %v382_v8 = vrot.slane %v380_v63, 4  ;;  %v15380_v3 = vld [vmem:[%s15657_s8 + $0x10] sm:$0x1] }
  0xcb   : > { %v4245_v60 = vshll.u32 %v12374_v46, 16  ;;  %13523 = vmatpush3.bf16.msra.mxu1 %v1267_v15  ;;  %v390_v6 = vshrl.u32 %v15378_v56, 16  ;;  %v4223_v9 = vrot.slane %v4222_v58, 4  ;;  %v400_v16 = vshrl.u32 %v15379_v35, 16 }
  0xcc   : > { %v383_v52 = vor.u32 %v382_v8, %v378_v24  ;;  %v4232_v19 = vor.u32 %v4231_v26, %v4227_v44  ;;  %v4250_v32 = vshrl.u32 %v12375_v31, 16  ;;  %v4218_v46 = vsel %vm15855_vm7, %v4213_v45, %v16259_v20 }
  0xcd   : > { %13779 = vmatmul.mubr.msk.bf16.gmra.mrb[56].mxu0 %vm1168_vm3, %v15199_v53  ;;  %v16269_v53 = vcombine.low %v4150_v55, %v4160_v51  ;;  %v4241_v55 = vrot.slane %v4239_v39, 4  ;;  %v386_v51 = vshll.u32 %v15378_v56, 16  ;;  %v406_v39 = vshll.u32 %v15380_v3, 16  ;;  %v16313_v56 = vld [vmem:[%s19479_s1 + $0xc] sm:$0x3] }
  0xce   : > { %13782 = vmatprep.mubr.msk.bf16.mxu0 %vm1168_vm3, %v15200_v37  ;;  %v4204_v37 = vsel %vm15855_vm7, %v16257_v33, %v16252_v17  ;;  %v373_v17 = vor.u32 %v372_v22, %v369_v59  ;;  %v396_v33 = vshll.u32 %v15379_v35, 16  ;;  %v384_v42 = vrot.slane %v383_v52, 4  ;;  %v16302_v59 = vld [vmem:[%s15657_s8 + $0x11c] sm:$0xf] }
  0xcf   : > { %v402_v23 = vrot.slane %v400_v16, 4  ;;  %v4253_v58 = vshll.u32 %v12375_v31, 16  ;;  %v4228_v22 = vsel %vm15855_vm7, %v4223_v9, %v4227_v44  ;;  %v408_v8 = vrot.slane %v406_v39, 5  ;;  %v286_v44 = vld [vmem:[%s15657_s8 + $0x14] sm:$0xf] }
  0xd0   : > { %v374_v38 = vrot.slane %v373_v17, 4  ;;  %v398_v30 = vrot.slane %v396_v33, 5  ;;  %v16317_v20 = vcombine.low %v4194_v10, %v4204_v37  ;;  %v4242_v45 = vor.u32 %v4241_v55, %v16285_v0  ;;  %v15381_v33 = vld [vmem:[%s15657_s8 + $0x18] sm:$0xf] }
  0xd1   : > { %v4233_v31 = vrot.slane %v4232_v19, 4  ;;  %v4247_v17 = vrot.slane %v4245_v60, 5  ;;  %v4252_v10 = vrot.slane %v4250_v32, 4  ;;  %v4255_v37 = vrot.slane %v4253_v58, 5  ;;  %v12377_v32 = vld [vmem:[%s15657_s8 + $0x120] sm:$0xf] }
  0xd2   : > { %v379_v63 = vsel %vm15855_vm7, %v374_v38, %v378_v24  ;;  %v403_v15 = vor.u32 %v402_v23, %v398_v30  ;;  %v414_v60 = vshll.u32 %v286_v44, 16  ;;  %v420_v9 = vshll.u32 %v15381_v33, 16  ;;  %v15382_v38 = vld [vmem:[%s15657_s8 + $0x1c] sm:$0xf]  ;;  %v15383_v58 = vld [vmem:[%s15657_s8 + $0x20] sm:$0xf] }
  0xd3   : > { %v4243_v52 = vrot.slane %v4242_v45, 4  ;;  %v424_v16 = vshrl.u32 %v15381_v33, 16  ;;  %v4238_v45 = vsel %vm15855_vm7, %v4233_v31, %v16285_v0 }
  0xd4   : > { %v404_v35 = vrot.slane %v403_v15, 4  ;;  %v416_v39 = vrot.slane %v414_v60, 5  ;;  %v422_v19 = vrot.slane %v420_v9, 5  ;;  %v15384_v15 = vld [vmem:[%s15657_s8 + $0x24] sm:$0x1] }
  0xd5   : > { %13783 = vmatmul.mubr.msk.bf16.gmra.mrb[60].mxu0 %vm1168_vm3, %v15201_v40  ;;  %v392_v40 = vrot.slane %v390_v6, 4  ;;  %v4259_v6 = vshll.u32 %v16302_v59, 16 }
  0xd6   : > { %13788 = vmatprep.mubr.msk.bf16.mxu0 %vm1168_vm3, %v15893_v27  ;;  %v388_v27 = vrot.slane %v386_v51, 5 }
  0xd7   : > { %v16336_v3 = vrot.slane %v4259_v6, 5  ;;  %v4256_v6 = vor.u32 %v4255_v37, %v4252_v10 }
  0xd8   : > { %v393_v2 = vor.u32 %v392_v40, %v388_v27  ;;  %v389_v26 = vsel %vm15855_vm7, %v384_v42, %v388_v27  ;;  %v430_v40 = vshll.u32 %v15382_v38, 16  ;;  %v426_v42 = vrot.slane %v424_v16, 4 }
  0xd9   : > { %v11972_v51 = vcombine.low %v379_v63, %v389_v26  ;;  %v440_v63 = vshll.u32 %v15383_v58, 16  ;;  %v444_v26 = vshrl.u32 %v15383_v58, 16 }
  0xda   : > { %v394_v24 = vrot.slane %v393_v2, 4  ;;  %v432_v23 = vrot.slane %v430_v40, 5  ;;  %v4263_v2 = vshrl.u32 %v16302_v59, 16  ;;  %v4269_v59 = vshll.u32 %v12377_v32, 16 }
  0xdb   : > { %13524 = vmatprep.mubr.msk.bf16.mxu1 %vm1168_vm3, %v11972_v51 }
  0xdc   : > { %v399_v55 = vsel %vm15855_vm7, %v394_v24, %v398_v30  ;;  %v427_v24 = vor.u32 %v426_v42, %v422_v19  ;;  %v16353_v9 = vrot.slane %v4263_v2, 4  ;;  %v15386_v2 = vld [vmem:[%s15657_s8 + $0x30] sm:$0xf] }
  0xdd   : > { %13789 = vmatmul.mubr.msk.bf16.vlgmr.msra.gmra.mrb[0].mxu0 %vm1168_vm3, %v15895_v28  ;;  %v16325_v28 = vcombine.low %v4218_v46, %v4228_v22  ;;  %v434_v46 = vshrl.u32 %v15382_v38, 16 }
  0xde   : > { %13853 = vmatpush3.bf16.msra.mxu0 %v15899_v29  ;;  %13792 = vmatprep.mubr.msk.bf16.mxu0 %vm1168_vm3, %v15910_v36  ;;  %v409_v29 = vsel %vm15855_vm7, %v404_v35, %v408_v8  ;;  %v411_v36 = vshrl.u32 %v286_v44, 16  ;;  %v450_v8 = vshll.u32 %v15384_v15, 16  ;;  %v442_v44 = vrot.slane %v440_v63, 5  ;;  %v12378_v35 = vld [vmem:[%s15657_s8 + $0x124] sm:$0xf] }
  0xdf   : > { %15131 = vmatprep.subr.msk.bf16.mxu0 %vm1265_vm0, %v16313_v56  ;;  %v11973_v27 = vcombine.low %v399_v55, %v409_v29  ;;  %v436_v51 = vrot.slane %v434_v46, 4  ;;  %v446_v29 = vrot.slane %v444_v26, 4  ;;  %v428_v60 = vrot.slane %v427_v24, 4 }
  0xe0   : > { %v413_v30 = vrot.slane %v411_v36, 4  ;;  %v4248_v36 = vsel %vm15855_vm7, %v4243_v52, %v4247_v17  ;;  %v4279_v10 = vshll.u32 %v12378_v35, 16  ;;  %v4283_v37 = vshrl.u32 %v12378_v35, 16 }
  0xe1   : > { %13525 = vmatmul.mubr.msk.bf16.vlgmr.msra.gmra.mrb[0].mxu1 %vm1168_vm3, %v11973_v27  ;;  %v437_v33 = vor.u32 %v436_v51, %v432_v23  ;;  %v447_v31 = vor.u32 %v446_v29, %v442_v44  ;;  %v452_v27 = vrot.slane %v450_v8, 5  ;;  %v433_v16 = vsel %vm15855_vm7, %v428_v60, %v432_v23  ;;  %v15385_v23 = vld [vmem:[%s15657_s8 + $0x2c] sm:$0xf] }
  0xe2   : > { %v417_v22 = vor.u32 %v416_v39, %v413_v30  ;;  %v16360_v17 = vcombine.low %v4238_v45, %v4248_v36  ;;  %v16362_v52 = vrot.slane %v4256_v6, 4  ;;  %v16364_v39 = vrot.slane %v4269_v59, 5  ;;  %v12379_v59 = vld [vmem:[%s15657_s8 + $0x128] sm:$0x1]  ;;  %v12380_v60 = vld [vmem:[%s15657_s8 + $0x12c] sm:$0xf] }
  0xe3   : > { %v438_v38 = vrot.slane %v437_v33, 4  ;;  %v448_v30 = vrot.slane %v447_v31, 4  ;;  %v464_v58 = vshll.u32 %v15385_v23, 16  ;;  %v468_v63 = vshrl.u32 %v15385_v23, 16 }
  0xe4   : > { %v418_v55 = vrot.slane %v417_v22, 4  ;;  %v474_v22 = vshll.u32 %v15386_v2, 16  ;;  %v4266_v24 = vor.u32 %v16353_v9, %v16336_v3  ;;  %v478_v35 = vshrl.u32 %v15386_v2, 16  ;;  %v15388_v9 = vld [vmem:[%s15657_s8 + $0x38] sm:$0x1] }
  0xe5   : > { %13793 = vmatmul.mubr.msk.bf16.gmra.mrb[4].mxu0 %vm1168_vm3, %v15918_v48  ;;  %v4273_v48 = vshrl.u32 %v12377_v32, 16  ;;  %v453_v46 = vsel %vm15855_vm7, %v448_v30, %v452_v27  ;;  %v466_v51 = vrot.slane %v464_v58, 5  ;;  %v4294_v58 = vshrl.u32 %v12380_v60, 16 }
  0xe6   : > { %13796 = vmatprep.mubr.msk.bf16.mxu0 %vm1168_vm3, %v15943_v11  ;;  %v423_v0 = vsel %vm15855_vm7, %v418_v55, %v422_v19  ;;  %v290_v11 = vld [vmem:[%s15657_s8 + $0x28] sm:$0xf]  ;;  %v443_v19 = vsel %vm15855_vm7, %v438_v38, %v442_v44  ;;  %v470_v44 = vrot.slane %v468_v63, 4  ;;  %v476_v6 = vrot.slane %v474_v22, 5  ;;  %v15387_v55 = vld [vmem:[%s15657_s8 + $0x34] sm:$0xf] }
  0xe7   : > { %v11974_v40 = vcombine.low %v423_v0, %v433_v16  ;;  %v455_v32 = vshrl.u32 %v290_v11, 16  ;;  %v458_v42 = vshll.u32 %v290_v11, 16  ;;  %v4275_v26 = vrot.slane %v4273_v48, 4  ;;  %v294_v38 = vld [vmem:[%s15657_s8 + $0x3c] sm:$0xf] }
  0xe8   : > { %v11975_v15 = vcombine.low %v443_v19, %v453_v46  ;;  %v484_v29 = vshll.u32 %v15387_v55, 16  ;;  %v488_v36 = vshrl.u32 %v15387_v55, 16  ;;  %v16382_v48 = vrot.slane %v4279_v10, 5 }
  0xe9   : > { %13528 = vmatprep.mubr.msk.bf16.mxu1 %vm1168_vm3, %v11974_v40  ;;  %v457_v8 = vrot.slane %v455_v32, 4  ;;  %v460_v45 = vrot.slane %v458_v42, 5  ;;  %v471_v33 = vor.u32 %v470_v44, %v466_v51  ;;  %v494_v0 = vshll.u32 %v15388_v9, 16 }
  0xea   : > { %13529 = vmatmul.mubr.msk.bf16.gmra.mrb[4].mxu1 %vm1168_vm3, %v11975_v15  ;;  %v480_v27 = vrot.slane %v478_v35, 4  ;;  %v486_v11 = vrot.slane %v484_v29, 5  ;;  %v490_v16 = vrot.slane %v488_v36, 4  ;;  %v4262_v40 = vsel %vm15855_vm7, %v16362_v52, %v16336_v3 }
  0xeb   : > { %v4276_v30 = vor.u32 %v4275_v26, %v16364_v39  ;;  %v4289_v10 = vshll.u32 %v12379_v59, 16  ;;  %v472_v19 = vrot.slane %v471_v33, 4  ;;  %v496_v23 = vrot.slane %v494_v0, 5  ;;  %v15390_v0 = vld [vmem:[%s15657_s8 + $0x44] sm:$0xf] }
  0xec   : > { %v481_v42 = vor.u32 %v480_v27, %v476_v6  ;;  %v491_v46 = vor.u32 %v490_v16, %v486_v11  ;;  %v4297_v63 = vshll.u32 %v12380_v60, 16  ;;  %v499_v22 = vshrl.u32 %v294_v38, 16  ;;  %v16422_v27 = vld [vmem:[%s15657_s8 + $0x134] sm:$0xf] }
  0xed   : > { %13797 = vmatmul.mubr.msk.bf16.gmra.mrb[8].mxu0 %vm1168_vm3, %v15989_v12  ;;  %v461_v12 = vor.u32 %v460_v45, %v457_v8  ;;  %v477_v2 = vsel %vm15855_vm7, %v472_v19, %v476_v6  ;;  %v4267_v26 = vrot.slane %v4266_v24, 4  ;;  %v16407_v44 = vrot.slane %v4289_v10, 5 }
  0xee   : > { %13800 = vmatprep.mubr.msk.bf16.mxu0 %vm1168_vm3, %v15991_v18  ;;  %v16384_v18 = vrot.slane %v4283_v37, 4  ;;  %v16395_v37 = vld [vmem:[%s15657_s8 + $0x130] sm:$0xf]  ;;  %v482_v8 = vrot.slane %v481_v42, 4  ;;  %v492_v45 = vrot.slane %v491_v46, 4  ;;  %v501_v59 = vrot.slane %v499_v22, 4 }
  0xef   : > { %v462_v31 = vrot.slane %v461_v12, 4  ;;  %v4303_v6 = vshll.u32 %v16395_v37, 16  ;;  %v502_v12 = vshll.u32 %v294_v38, 16  ;;  %v4277_v55 = vrot.slane %v4276_v30, 4  ;;  %v15391_v38 = vld [vmem:[%s15657_s8 + $0x48] sm:$0xf] }
  0xf0   : > { %v497_v24 = vsel %vm15855_vm7, %v492_v45, %v496_v23  ;;  %v16416_v29 = vrot.slane %v4294_v58, 4  ;;  %v16418_v60 = vrot.slane %v4297_v63, 5  ;;  %v522_v16 = vshrl.u32 %v15390_v0, 16  ;;  %v15392_v46 = vld [vmem:[%s15657_s8 + $0x4c] sm:$0x1] }
  0xf1   : > { %v467_v32 = vsel %vm15855_vm7, %v462_v31, %v466_v51  ;;  %v4286_v51 = vor.u32 %v16384_v18, %v16382_v48  ;;  %v504_v33 = vrot.slane %v502_v12, 5  ;;  %v518_v31 = vshll.u32 %v15390_v0, 16  ;;  %v298_v12 = vld [vmem:[%s15657_s8 + $0x50] sm:$0xf] }
  0xf2   : > { %v11976_v15 = vcombine.low %v467_v32, %v477_v2  ;;  %v528_v10 = vshll.u32 %v15391_v38, 16  ;;  %v532_v30 = vshrl.u32 %v15391_v38, 16  ;;  %v4272_v19 = vsel %vm15855_vm7, %v4267_v26, %v16364_v39 }
  0xf3   : > { %v505_v32 = vor.u32 %v504_v33, %v501_v59  ;;  %v520_v42 = vrot.slane %v518_v31, 5  ;;  %v538_v23 = vshll.u32 %v15392_v46, 16  ;;  %v524_v63 = vrot.slane %v522_v16, 4  ;;  %v15393_v31 = vld [vmem:[%s15657_s8 + $0x54] sm:$0xf] }
  0xf4   : > { %13532 = vmatprep.mubr.msk.bf16.mxu1 %vm1168_vm3, %v11976_v15  ;;  %v530_v2 = vrot.slane %v528_v10, 5  ;;  %v534_v22 = vrot.slane %v532_v30, 4  ;;  %v4287_v15 = vrot.slane %v4286_v51, 4  ;;  %v4313_v45 = vshll.u32 %v16422_v27, 16  ;;  %v15394_v10 = vld [vmem:[%s15657_s8 + $0x58] sm:$0xf] }
  0xf5   : > { %13801 = vmatmul.mubr.msk.bf16.gmra.mrb[12].mxu0 %vm1168_vm3, %v16014_v43  ;;  %v487_v43 = vsel %vm15855_vm7, %v482_v8, %v486_v11  ;;  %v4307_v8 = vshrl.u32 %v16395_v37, 16  ;;  %v525_v26 = vor.u32 %v524_v63, %v520_v42  ;;  %v4282_v37 = vsel %vm15855_vm7, %v4277_v55, %v16382_v48  ;;  %v15395_v46 = vld [vmem:[%s15657_s8 + $0x5c] sm:$0xf] }
  0xf6   : > { %13804 = vmatprep.mubr.msk.bf16.mxu0 %vm1168_vm3, %v16016_v49  ;;  %v15389_v49 = vld [vmem:[%s15657_s8 + $0x40] sm:$0xf]  ;;  %v11977_v36 = vcombine.low %v487_v43, %v497_v24  ;;  %v506_v43 = vrot.slane %v505_v32, 4  ;;  %v535_v59 = vor.u32 %v534_v22, %v530_v2  ;;  %v540_v24 = vrot.slane %v538_v23, 5 }
  0xf7   : > { %v508_v35 = vshll.u32 %v15389_v49, 16  ;;  %v512_v18 = vshrl.u32 %v15389_v49, 16  ;;  %v16446_v51 = vrot.slane %v4303_v6, 5  ;;  %v4300_v49 = vor.u32 %v16418_v60, %v16416_v29  ;;  %v15396_v22 = vld [vmem:[%s15657_s8 + $0x60] sm:$0x1] }
  0xf8   : > { %13533 = vmatmul.mubr.msk.bf16.gmra.mrb[8].mxu1 %vm1168_vm3, %v11977_v36  ;;  %v526_v52 = vrot.slane %v525_v26, 4  ;;  %v4292_v48 = vsel %vm15855_vm7, %v4287_v15, %v16407_v44  ;;  %v4309_v6 = vrot.slane %v4307_v8, 4  ;;  %v16459_v55 = vrot.slane %v4313_v45, 5  ;;  %v16481_v45 = vld [vmem:[%s15657_s8 + $0x140] sm:$0xf] }
  0xf9   : > { %v510_v9 = vrot.slane %v508_v35, 5  ;;  %v514_v11 = vrot.slane %v512_v18, 4  ;;  %v12383_v35 = vld [vmem:[%s15657_s8 + $0x138] sm:$0xf]  ;;  %v4317_v18 = vshrl.u32 %v16422_v27, 16  ;;  %v543_v33 = vshrl.u32 %v298_v12, 16 }
  0xfa   : > { %v531_v29 = vsel %vm15855_vm7, %v526_v52, %v530_v2  ;;  %v546_v44 = vshll.u32 %v298_v12, 16  ;;  %v16468_v16 = vcombine.low %v4282_v37, %v4292_v48  ;;  %v556_v27 = vshrl.u32 %v15393_v31, 16 }
  0xfb   : > { %v515_v58 = vor.u32 %v514_v11, %v510_v9  ;;  %v552_v11 = vshll.u32 %v15393_v31, 16  ;;  %v545_v38 = vrot.slane %v543_v33, 4  ;;  %v562_v30 = vshll.u32 %v15394_v10, 16 }
  0xfc   : > { %v572_v23 = vshll.u32 %v15395_v46, 16  ;;  %v576_v2 = vshrl.u32 %v15395_v46, 16  ;;  %v582_v15 = vshll.u32 %v15396_v22, 16  ;;  %v16478_v8 = vrot.slane %v4300_v49, 4  ;;  %v15397_v46 = vld [vmem:[%s15657_s8 + $0x68] sm:$0xf] }
  0xfd   : > { %13805 = vmatmul.mubr.msk.bf16.gmra.mrb[16].mxu0 %vm1168_vm3, %v16042_v54  ;;  %v516_v39 = vrot.slane %v515_v58, 4  ;;  %v16441_v54 = vcombine.low %v4262_v40, %v4272_v19  ;;  %v536_v40 = vrot.slane %v535_v59, 4  ;;  %v548_v19 = vrot.slane %v546_v44, 5  ;;  %v16485_v59 = vld [vmem:[%s15657_s8 + $0x13c] sm:$0x1] }
  0xfe   : > { %13808 = vmatprep.mubr.msk.bf16.mxu0 %vm1168_vm3, %v16051_v5  ;;  %v511_v5 = vsel %vm15855_vm7, %v506_v43, %v510_v9  ;;  %v4323_v9 = vshll.u32 %v12383_v35, 16  ;;  %v554_v32 = vrot.slane %v552_v11, 5  ;;  %v558_v58 = vrot.slane %v556_v27, 4 }
  0xff   : > { %v521_v3 = vsel %vm15855_vm7, %v516_v39, %v520_v42  ;;  %v541_v60 = vsel %vm15855_vm7, %v536_v40, %v540_v24  ;;  %v566_v42 = vshrl.u32 %v15394_v10, 16  ;;  %v564_v63 = vrot.slane %v562_v30, 5 }
 0x100   : > { %v11978_v36 = vcombine.low %v511_v5, %v521_v3  ;;  %v11979_v0 = vcombine.low %v531_v29, %v541_v60  ;;  %v574_v39 = vrot.slane %v572_v23, 5  ;;  %v4310_v26 = vor.u32 %v4309_v6, %v16446_v51  ;;  %v302_v60 = vld [vmem:[%s15657_s8 + $0x64] sm:$0xf] }
 0x101   : > { %v568_v43 = vrot.slane %v566_v42, 4  ;;  %v4327_v24 = vshrl.u32 %v12383_v35, 16  ;;  %v559_v37 = vor.u32 %v558_v58, %v554_v32  ;;  %v16487_v5 = vrot.slane %v4317_v18, 4 }
 0x102   : > { %13536 = vmatprep.mubr.msk.bf16.mxu1 %vm1168_vm3, %v11978_v36  ;;  %v16489_v12 = vrot.slane %v4323_v9, 5  ;;  %v4338_v52 = vshrl.u32 %v16481_v45, 16  ;;  %v584_v36 = vrot.slane %v582_v15, 5  ;;  %v4306_v6 = vsel %vm15855_vm7, %v16478_v8, %v16446_v51 }
 0x103   : > { %13537 = vmatmul.mubr.msk.bf16.gmra.mrb[12].mxu1 %vm1168_vm3, %v11979_v0  ;;  %v569_v3 = vor.u32 %v568_v43, %v564_v63  ;;  %v560_v40 = vrot.slane %v559_v37, 4  ;;  %v4333_v35 = vshll.u32 %v16485_v59, 16  ;;  %v4311_v33 = vrot.slane %v4310_v26, 4  ;;  %v16501_v0 = vld [vmem:[%s15657_s8 + $0x144] sm:$0xf] }
 0x104   : > { %v4329_v9 = vrot.slane %v4327_v24, 4  ;;  %v4320_v51 = vor.u32 %v16487_v5, %v16459_v55  ;;  %v4341_v11 = vshll.u32 %v16481_v45, 16  ;;  %v16514_v10 = vrot.slane %v4338_v52, 4  ;;  %v15400_v37 = vld [vmem:[%s15657_s8 + $0x74] sm:$0x1] }
 0x105   : > { %13809 = vmatmul.mubr.msk.bf16.gmra.mrb[20].mxu0 %vm1168_vm3, %v16152_v14  ;;  %v549_v14 = vor.u32 %v548_v19, %v545_v38  ;;  %v570_v29 = vrot.slane %v569_v3, 4  ;;  %v565_v44 = vsel %vm15855_vm7, %v560_v40, %v564_v63  ;;  %v587_v19 = vshrl.u32 %v302_v60, 16 }
 0x106   : > { %13812 = vmatprep.mubr.msk.bf16.mxu0 %vm1168_vm3, %v16154_v4  ;;  %v578_v4 = vrot.slane %v576_v2, 4  ;;  %v596_v23 = vshll.u32 %v15397_v46, 16  ;;  %v600_v58 = vshrl.u32 %v15397_v46, 16  ;;  %v4316_v5 = vsel %vm15855_vm7, %v4311_v33, %v16459_v55 }
 0x107   : > { %v550_v49 = vrot.slane %v549_v14, 4  ;;  %v575_v27 = vsel %vm15855_vm7, %v570_v29, %v574_v39  ;;  %v589_v63 = vrot.slane %v587_v19, 4  ;;  %v15399_v14 = vld [vmem:[%s15657_s8 + $0x70] sm:$0xf]  ;;  %v4330_v40 = vor.u32 %v4329_v9, %v16489_v12  ;;  %v16532_v29 = vld [vmem:[%s15657_s8 + $0x148] sm:$0xf] }
 0x108   : > { %v579_v48 = vor.u32 %v578_v4, %v574_v39  ;;  %v598_v8 = vrot.slane %v596_v23, 5  ;;  %v602_v45 = vrot.slane %v600_v58, 4  ;;  %v616_v43 = vshll.u32 %v15399_v14, 16 }
 0x109   : > { %v555_v18 = vsel %vm15855_vm7, %v550_v49, %v554_v32  ;;  %v4347_v32 = vshll.u32 %v16501_v0, 16  ;;  %v620_v39 = vshrl.u32 %v15399_v14, 16  ;;  %v626_v4 = vshll.u32 %v15400_v37, 16 }
 0x10a   : > { %v580_v31 = vrot.slane %v579_v48, 4  ;;  %v11980_v38 = vcombine.low %v555_v18, %v565_v44  ;;  %v603_v49 = vor.u32 %v602_v45, %v598_v8  ;;  %v618_v3 = vrot.slane %v616_v43, 5  ;;  %v15402_v45 = vld [vmem:[%s15657_s8 + $0x80] sm:$0xf] }
 0x10b   : > { %v622_v52 = vrot.slane %v620_v39, 4  ;;  %v4343_v48 = vrot.slane %v4341_v11, 5  ;;  %v16537_v55 = vcombine.low %v4306_v6, %v4316_v5  ;;  %v4335_v33 = vrot.slane %v4333_v35, 5 }
 0x10c   : > { %v585_v30 = vsel %vm15855_vm7, %v580_v31, %v584_v36  ;;  %13540 = vmatprep.mubr.msk.bf16.mxu1 %vm1168_vm3, %v11980_v38  ;;  %v604_v44 = vrot.slane %v603_v49, 4  ;;  %v628_v38 = vrot.slane %v626_v4, 5  ;;  %v4361_v23 = vshrl.u32 %v16532_v29, 16 }
 0x10d   : > { %13813 = vmatmul.mubr.msk.bf16.gmra.mrb[24].mxu0 %vm1168_vm3, %v16161_v41  ;;  %v590_v41 = vshll.u32 %v302_v60, 16  ;;  %v11981_v42 = vcombine.low %v575_v27, %v585_v30  ;;  %v4351_v60 = vshrl.u32 %v16501_v0, 16  ;;  %v623_v31 = vor.u32 %v622_v52, %v618_v3  ;;  %v306_v27 = vld [vmem:[%s15657_s8 + $0x78] sm:$0xf] }
 0x10e   : > { %13816 = vmatprep.mubr.msk.bf16.mxu0 %vm1168_vm3, %v16163_v61  ;;  %v15398_v61 = vld [vmem:[%s15657_s8 + $0x6c] sm:$0xf]  ;;  %v4321_v30 = vrot.slane %v4320_v51, 4  ;;  %v650_v14 = vshll.u32 %v15402_v45, 16 }
 0x10f   : > { %v592_v2 = vrot.slane %v590_v41, 5  ;;  %v606_v22 = vshll.u32 %v15398_v61, 16  ;;  %v610_v15 = vshrl.u32 %v15398_v61, 16  ;;  %13541 = vmatmul.mubr.msk.bf16.gmra.mrb[16].mxu1 %vm1168_vm3, %v11981_v42  ;;  %v624_v19 = vrot.slane %v623_v31, 4 }
 0x110   : > { %v4331_v41 = vrot.slane %v4330_v40, 4  ;;  %v4344_v42 = vor.u32 %v4343_v48, %v16514_v10  ;;  %v4353_v46 = vrot.slane %v4351_v60, 4  ;;  %v12388_v10 = vld [vmem:[%s15657_s8 + $0x14c] sm:$0xf]  ;;  %v652_v4 = vrot.slane %v650_v14, 5 }
 0x111   : > { %v593_v26 = vor.u32 %v592_v2, %v589_v63  ;;  %v608_v59 = vrot.slane %v606_v22, 5  ;;  %v612_v24 = vrot.slane %v610_v15, 4  ;;  %v629_v51 = vsel %vm15855_vm7, %v624_v19, %v628_v38  ;;  %v15401_v2 = vld [vmem:[%s15657_s8 + $0x7c] sm:$0xf] }
 0x112   : > { %v634_v63 = vshll.u32 %v306_v27, 16  ;;  %v640_v61 = vshll.u32 %v15401_v2, 16  ;;  %v4326_v22 = vsel %vm15855_vm7, %v4321_v30, %v16489_v12  ;;  %v15404_v12 = vld [vmem:[%s15657_s8 + $0x88] sm:$0x1]  ;;  %v16569_v60 = vrot.slane %v4344_v42, 4 }
 0x113   : > { %v594_v36 = vrot.slane %v593_v26, 4  ;;  %v613_v18 = vor.u32 %v612_v24, %v608_v59  ;;  %v609_v0 = vsel %vm15855_vm7, %v604_v44, %v608_v59  ;;  %v654_v26 = vshrl.u32 %v15402_v45, 16  ;;  %v15403_v59 = vld [vmem:[%s15657_s8 + $0x84] sm:$0xf] }
 0x114   : > { %v636_v43 = vrot.slane %v634_v63, 5  ;;  %v642_v39 = vrot.slane %v640_v61, 5  ;;  %v660_v24 = vshll.u32 %v15403_v59, 16  ;;  %v664_v5 = vshrl.u32 %v15403_v59, 16 }
 0x115   : > { %13817 = vmatmul.mubr.msk.bf16.gmra.mrb[28].mxu0 %vm1168_vm3, %v16169_v25  ;;  %v599_v9 = vsel %vm15855_vm7, %v594_v36, %v598_v8  ;;  %v614_v11 = vrot.slane %v613_v18, 4  ;;  %v16542_v25 = vrot.slane %v4347_v32, 5  ;;  %v631_v32 = vshrl.u32 %v306_v27, 16 }
 0x116   : > { %13820 = vmatprep.mubr.msk.bf16.mxu0 %vm1168_vm3, %v16171_v21  ;;  %v4357_v21 = vshll.u32 %v16532_v29, 16  ;;  %v11982_v6 = vcombine.low %v599_v9, %v609_v0  ;;  %v644_v8 = vshrl.u32 %v15401_v2, 16  ;;  %v670_v49 = vshll.u32 %v15404_v12, 16 }
 0x117   : > { %v619_v35 = vsel %vm15855_vm7, %v614_v11, %v618_v3  ;;  %v633_v15 = vrot.slane %v631_v32, 4  ;;  %v4367_v3 = vshll.u32 %v12388_v10, 16  ;;  %v656_v40 = vrot.slane %v654_v26, 4 }
 0x118   : > { %13544 = vmatprep.mubr.msk.bf16.mxu1 %vm1168_vm3, %v11982_v6  ;;  %v11983_v58 = vcombine.low %v619_v35, %v629_v51  ;;  %v646_v37 = vrot.slane %v644_v8, 4  ;;  %v662_v48 = vrot.slane %v660_v24, 5  ;;  %v4336_v36 = vsel %vm15855_vm7, %v4331_v41, %v4335_v33  ;;  %v310_v6 = vld [vmem:[%s15657_s8 + $0x8c] sm:$0xf]  ;;  %v15405_v8 = vld [vmem:[%s15657_s8 + $0x90] sm:$0xf] }
 0x119   : > { %v637_v52 = vor.u32 %v636_v43, %v633_v15  ;;  %v4371_v18 = vshrl.u32 %v12388_v10, 16  ;;  %v16571_v44 = vrot.slane %v4357_v21, 5  ;;  %v657_v38 = vor.u32 %v656_v40, %v652_v4 }
 0x11a   : > { %13545 = vmatmul.mubr.msk.bf16.gmra.mrb[20].mxu1 %vm1168_vm3, %v11983_v58  ;;  %v647_v29 = vor.u32 %v646_v37, %v642_v39  ;;  %v4354_v9 = vor.u32 %v4353_v46, %v16542_v25  ;;  %v672_v30 = vrot.slane %v670_v49, 5  ;;  %v16577_v0 = vcombine.low %v4326_v22, %v4336_v36 }
 0x11b   : > { %v638_v31 = vrot.slane %v637_v52, 4  ;;  %v4363_v33 = vrot.slane %v4361_v23, 4  ;;  %v658_v41 = vrot.slane %v657_v38, 4  ;;  %v16582_v35 = vrot.slane %v4367_v3, 5  ;;  %v15408_v52 = vld [vmem:[%s15657_s8 + $0x9c] sm:$0x1] }
 0x11c   : > { %v648_v11 = vrot.slane %v647_v29, 4  ;;  %v4373_v21 = vrot.slane %v4371_v18, 4  ;;  %v4350_v51 = vsel %vm15855_vm7, %v16569_v60, %v16542_v25  ;;  %v16595_v63 = vrot.slane %v4354_v9, 4 }
 0x11d   : > { %13821 = vmatmul.mubr.msk.bf16.gmra.mrb[32].mxu0 %vm1168_vm3, %v16178_v50  ;;  %v666_v50 = vrot.slane %v664_v5, 4  ;;  %v643_v19 = vsel %vm15855_vm7, %v638_v31, %v642_v39  ;;  %v663_v58 = vsel %vm15855_vm7, %v658_v41, %v662_v48  ;;  %v675_v61 = vshrl.u32 %v310_v6, 16  ;;  %v15406_v39 = vld [vmem:[%s15657_s8 + $0x94] sm:$0xf]  ;;  %v15409_v31 = vld [vmem:[%s15657_s8 + $0x18] sm:$0xf] }
 0x11e   : > { %13824 = vmatprep.mubr.msk.bf16.mxu0 %vm1168_vm3, %v16262_v13  ;;  %v16575_v13 = vld [vmem:[%s15657_s8 + $0x150] sm:$0x1]  ;;  %v653_v42 = vsel %vm15855_vm7, %v648_v11, %v652_v4  ;;  %v678_v22 = vshll.u32 %v310_v6, 16  ;;  %v4364_v10 = vor.u32 %v4363_v33, %v16571_v44  ;;  %v684_v45 = vshll.u32 %v15405_v8, 16  ;;  %v12455_v11 = vld [vmem:[%s15657_s8 + $0x14] sm:$0xe] }
 0x11f   : > { %v667_v27 = vor.u32 %v666_v50, %v662_v48  ;;  %v4377_v32 = vshll.u32 %v16575_v13, 16  ;;  %v11984_v23 = vcombine.low %v643_v19, %v653_v42  ;;  %v677_v14 = vrot.slane %v675_v61, 4 }
 0x120   : > { %v680_v43 = vrot.slane %v678_v22, 5  ;;  %v694_v26 = vshll.u32 %v15406_v39, 16  ;;  %v698_v59 = vshrl.u32 %v15406_v39, 16  ;;  %v686_v24 = vrot.slane %v684_v45, 5  ;;  %v15412_v39 = vld [vmem:[%s15657_s8 + $0x24] sm:$0x1] }
 0x121   : > { %v668_v46 = vrot.slane %v667_v27, 4  ;;  %13548 = vmatprep.mubr.msk.bf16.mxu1 %vm1168_vm3, %v11984_v23  ;;  %v714_v40 = vshll.u32 %v15408_v52, 16  ;;  %v4374_v48 = vor.u32 %v4373_v21, %v16582_v35  ;;  %v16609_v50 = vrot.slane %v4364_v10, 4  ;;  %v15410_v27 = vld [vmem:[%s15657_s8 + $0x1c] sm:$0xf] }
 0x122   : > { %v681_v12 = vor.u32 %v680_v43, %v677_v14  ;;  %v696_v49 = vrot.slane %v694_v26, 5  ;;  %v700_v3 = vrot.slane %v698_v59, 4  ;;  %v5029_v38 = vrot.slane %v15409_v31, 5  ;;  %v314_v23 = vld [vmem:[%s15657_s8 + $0xa0] sm:$0xf] }
 0x123   : > { %v673_v2 = vsel %vm15855_vm7, %v668_v46, %v672_v30  ;;  %v5032_v30 = vrot.slane %v15410_v27, 5  ;;  %v716_v41 = vrot.slane %v714_v40, 5  ;;  %v4360_v6 = vsel %vm15855_vm7, %v16595_v63, %v16571_v44  ;;  %v315_v63 = vld [vmem:[%s15657_s8 + $0xa4] sm:$0xf]  ;;  %v317_v43 = vld [vmem:[%s15657_s8 + $0xac] sm:$0xf] }
 0x124   : > { %v11985_v15 = vcombine.low %v663_v58, %v673_v2  ;;  %v682_v9 = vrot.slane %v681_v12, 4  ;;  %v701_v13 = vor.u32 %v700_v3, %v696_v49  ;;  %v16620_v21 = vrot.slane %v4377_v32, 5  ;;  %v12456_v31 = vld [vmem:[%s15657_s8 + $0x28] sm:$0xe] }
 0x125   : > { %13825 = vmatmul.mubr.msk.bf16.gmra.mrb[36].mxu0 %vm1168_vm3, %v16264_v34  ;;  %v688_v34 = vshrl.u32 %v15405_v8, 16  ;;  %v4375_v58 = vrot.slane %v4374_v48, 4  ;;  %v4370_v32 = vsel %vm15855_vm7, %v16609_v50, %v16582_v35  ;;  %v12471_v22 = vrot.slane %v12455_v11, 9 }
 0x126   : > { %13828 = vmatprep.mubr.msk.bf16.mxu0 %vm1168_vm3, %v16267_v62  ;;  %13549 = vmatmul.mubr.msk.bf16.gmra.mrb[24].mxu1 %vm1168_vm3, %v11985_v15  ;;  %v15407_v62 = vld [vmem:[%s15657_s8 + $0x98] sm:$0xf]  ;;  %v687_v42 = vsel %vm15855_vm7, %v682_v9, %v686_v24  ;;  %v702_v46 = vrot.slane %v701_v13, 4  ;;  %v316_v15 = vld [vmem:[%s15657_s8 + $0xa8] sm:$0xf]  ;;  %v5031_v8 = vrot.slane %v5029_v38, 4 }
 0x127   : > { %v690_v37 = vrot.slane %v688_v34, 4  ;;  %v704_v4 = vshll.u32 %v15407_v62, 16  ;;  %v708_v5 = vshrl.u32 %v15407_v62, 16  ;;  %v5034_v45 = vrot.slane %v5032_v30, 4 }
 0x128   : > { %v719_v14 = vshrl.u32 %v314_v23, 16  ;;  %v5038_v26 = vrot.slane %v15412_v39, 5  ;;  %v722_v35 = vshll.u32 %v314_v23, 16  ;;  %v738_v12 = vshll.u32 %v316_v15, 16  ;;  %v321_v39 = vld [vmem:[%s15657_s8 + $0xc0] sm:$0xf] }
 0x129   : > { %v691_v36 = vor.u32 %v690_v37, %v686_v24  ;;  %v706_v18 = vrot.slane %v704_v4, 5  ;;  %v710_v29 = vrot.slane %v708_v5, 4  ;;  %v728_v24 = vshll.u32 %v315_v63, 16  ;;  %v355_v37 = vld [vmem:[%s15657_s8 + $0xb0] sm:$0x1] }
 0x12a   : > { %v721_v4 = vrot.slane %v719_v14, 4  ;;  %v732_v5 = vshrl.u32 %v315_v63, 16  ;;  %v742_v52 = vshrl.u32 %v316_v15, 16  ;;  %v748_v40 = vshll.u32 %v317_v43, 16  ;;  %v318_v63 = vld [vmem:[%s15657_s8 + $0xb4] sm:$0xf] }
 0x12b   : > { %v692_v33 = vrot.slane %v691_v36, 4  ;;  %v711_v19 = vor.u32 %v710_v29, %v706_v18  ;;  %v730_v3 = vrot.slane %v728_v24, 5  ;;  %v740_v36 = vrot.slane %v738_v12, 5 }
 0x12c   : > { %v734_v48 = vrot.slane %v732_v5, 4  ;;  %v758_v29 = vshll.u32 %v355_v37, 16  ;;  %v4380_v50 = vsel %vm15855_vm7, %v4375_v58, %v16620_v21  ;;  %v744_v13 = vrot.slane %v742_v52, 4  ;;  %v356_v37 = vld [vmem:[%s15657_s8 + $0xc4] sm:$0x1] }
 0x12d   : > { %13829 = vmatmul.mubr.msk.bf16.gmra.mrb[40].mxu0 %vm1168_vm3, %v16269_v53  ;;  %v15411_v53 = vld [vmem:[%s15657_s8 + $0x20] sm:$0xf]  ;;  %v697_v61 = vsel %vm15855_vm7, %v692_v33, %v696_v49  ;;  %v712_v44 = vrot.slane %v711_v19, 4  ;;  %v724_v49 = vrot.slane %v722_v35, 5  ;;  %v750_v11 = vrot.slane %v748_v40, 5 }
 0x12e   : > { %13832 = vmatprep.mubr.msk.bf16.mxu0 %vm1168_vm3, %v16271_v57  ;;  %v5035_v2 = vrot.slane %v15411_v53, 5  ;;  %v11986_v10 = vcombine.low %v687_v42, %v697_v61  ;;  %v707_v57 = vsel %vm15855_vm7, %v702_v46, %v706_v18  ;;  %v752_v18 = vshrl.u32 %v317_v43, 16  ;;  %v15413_v53 = vld [vmem:[%s15657_s8 + $0x2c] sm:$0xf] }
 0x12f   : > { %v717_v34 = vsel %vm15855_vm7, %v712_v44, %v716_v41  ;;  %v725_v9 = vor.u32 %v724_v49, %v721_v4  ;;  %v16655_v27 = vsel %vm15663_vm4, %v12471_v22, %v5029_v38  ;;  %v16659_v33 = vsel %vm15663_vm4, %v5031_v8, %v5032_v30  ;;  %v320_v8 = vld [vmem:[%s15657_s8 + $0xbc] sm:$0xf] }
 0x130   : > { %13552 = vmatprep.mubr.msk.bf16.mxu1 %vm1168_vm3, %v11986_v10  ;;  %v11987_v59 = vcombine.low %v707_v57, %v717_v34  ;;  %v5037_v62 = vrot.slane %v5035_v2, 4  ;;  %v754_v19 = vrot.slane %v752_v18, 4  ;;  %v16663_v41 = vsel %vm15663_vm4, %v5034_v45, %v5035_v2  ;;  %v15414_v45 = vld [vmem:[%s15657_s8 + $0x30] sm:$0xf] }
 0x131   : > { %v745_v42 = vor.u32 %v744_v13, %v740_v36  ;;  %v12472_v38 = vrot.slane %v12456_v31, 9  ;;  %v760_v58 = vrot.slane %v758_v29, 5  ;;  %v16674_v30 = vcombine.low %v4350_v51, %v4360_v6  ;;  %v319_v51 = vld [vmem:[%s15657_s8 + $0xb8] sm:$0xf] }
 0x132   : > { %13553 = vmatmul.mubr.msk.bf16.gmra.mrb[28].mxu1 %vm1168_vm3, %v11987_v59  ;;  %v16667_v21 = vsel %vm15663_vm4, %v5037_v62, %v5038_v26  ;;  %v755_v23 = vor.u32 %v754_v19, %v750_v11  ;;  %v5042_v2 = vrot.slane %v15413_v53, 5  ;;  %v16680_v22 = vcombine.low %v4370_v32, %v4380_v50  ;;  %v15415_v62 = vld [vmem:[%s15657_s8 + $0x34] sm:$0xf] }
 0x133   : > { %v746_v44 = vrot.slane %v745_v42, 4  ;;  %v16684_v10 = vsel %vm1265_vm0, %v16313_v56, 0  ;;  %v12488_v6 = vcombine.low %v16655_v27, %v16659_v33  ;;  %v12489_v57 = vcombine.low %v16663_v41, %v16667_v21 }
 0x134   : > { %v756_v60 = vrot.slane %v755_v23, 4  ;;  %v16698_v56 = vsel %vm15663_vm4, %v12472_v38, %v5042_v2  ;;  %v5045_v34 = vrot.slane %v15414_v45, 5  ;;  %v763_v43 = vshrl.u32 %v318_v63, 16  ;;  %v12457_v38 = vld [vmem:[%s15657_s8 + $0x3c] sm:$0xe] }
 0x135   : > { %13833 = vmatmul.mubr.msk.bf16.gmra.mrb[44].mxu0 %vm1168_vm3, %v16317_v20  ;;  %v735_v20 = vor.u32 %v734_v48, %v730_v3  ;;  %v751_v32 = vsel %vm15855_vm7, %v746_v44, %v750_v11  ;;  %v5044_v26 = vrot.slane %v5042_v2, 4  ;;  %v766_v35 = vshll.u32 %v318_v63, 16  ;;  %v15416_v11 = vld [vmem:[%s15657_s8 + $0x38] sm:$0x1]  ;;  %v15418_v2 = vld [vmem:[%s15657_s8 + $0x44] sm:$0xf] }
 0x136   : > { %13836 = vmatprep.mubr.msk.bf16.mxu0 %vm1168_vm3, %v16325_v28  ;;  %v726_v28 = vrot.slane %v725_v9, 4  ;;  %v761_v14 = vsel %vm15855_vm7, %v756_v60, %v760_v58  ;;  %v772_v24 = vshll.u32 %v319_v51, 16  ;;  %v5048_v4 = vrot.slane %v15415_v62, 5  ;;  %v322_v45 = vld [vmem:[%s15657_s8 + $0xc8] sm:$0xf] }
 0x137   : > { %v736_v46 = vrot.slane %v735_v20, 4  ;;  %v11989_v59 = vcombine.low %v751_v32, %v761_v14  ;;  %v765_v5 = vrot.slane %v763_v43, 4  ;;  %v776_v12 = vshrl.u32 %v319_v51, 16  ;;  %v15419_v51 = vld [vmem:[%s15657_s8 + $0x48] sm:$0xf] }
 0x138   : > { %v731_v61 = vsel %vm15855_vm7, %v726_v28, %v730_v3  ;;  %v782_v49 = vshll.u32 %v320_v8, 16  ;;  %v768_v3 = vrot.slane %v766_v35, 5  ;;  %v786_v52 = vshrl.u32 %v320_v8, 16 }
 0x139   : > { %v741_v25 = vsel %vm15855_vm7, %v736_v46, %v740_v36  ;;  %v792_v40 = vshll.u32 %v321_v39, 16  ;;  %v778_v48 = vrot.slane %v776_v12, 4  ;;  %v796_v18 = vshrl.u32 %v321_v39, 16  ;;  %v15417_v46 = vld [vmem:[%s15657_s8 + $0x40] sm:$0xf] }
 0x13a   : > { %v11988_v15 = vcombine.low %v731_v61, %v741_v25  ;;  %v784_v36 = vrot.slane %v782_v49, 5  ;;  %v802_v29 = vshll.u32 %v356_v37, 16  ;;  %v769_v50 = vor.u32 %v768_v3, %v765_v5  ;;  %v323_v39 = vld [vmem:[%s15657_s8 + $0xcc] sm:$0xf]  ;;  %v325_v49 = vld [vmem:[%s15657_s8 + $0xd4] sm:$0xf] }
 0x13b   : > { %v788_v31 = vrot.slane %v786_v52, 4  ;;  %v794_v9 = vrot.slane %v792_v40, 5  ;;  %v5050_v13 = vrot.slane %v5048_v4, 4  ;;  %v5051_v20 = vrot.slane %v15416_v11, 5 }
 0x13c   : > { %13556 = vmatprep.mubr.msk.bf16.mxu1 %vm1168_vm3, %v11988_v15  ;;  %v798_v28 = vrot.slane %v796_v18, 4  ;;  %v16715_v42 = vsel %vm15663_vm4, %v5044_v26, %v5045_v34  ;;  %v5055_v23 = vrot.slane %v15417_v46, 5  ;;  %v770_v58 = vrot.slane %v769_v50, 4  ;;  %v12458_v46 = vld [vmem:[%s15657_s8 + $0x50] sm:$0xe] }
 0x13d   : > { %13837 = vmatmul.mubr.msk.bf16.gmra.mrb[48].mxu0 %vm1168_vm3, %v16360_v17  ;;  %13557 = vmatmul.mubr.msk.bf16.gmra.mrb[32].mxu1 %vm1168_vm3, %v11989_v59  ;;  %v774_v17 = vrot.slane %v772_v24, 5  ;;  %v789_v53 = vor.u32 %v788_v31, %v784_v36  ;;  %v5058_v61 = vrot.slane %v15418_v2, 5  ;;  %v804_v25 = vrot.slane %v802_v29, 5  ;;  %v15420_v59 = vld [vmem:[%s15657_s8 + $0x4c] sm:$0x1] }
 0x13e   : > { %13840 = vmatprep.mubr.msk.bf16.mxu0 %vm1168_vm3, %v16441_v54  ;;  %v5047_v54 = vrot.slane %v5045_v34, 4  ;;  %v799_v63 = vor.u32 %v798_v28, %v794_v9  ;;  %v5061_v15 = vrot.slane %v15419_v51, 5  ;;  %v16734_v34 = vsel %vm15663_vm4, %v5050_v13, %v5051_v20 }
 0x13f   : > { %v779_v19 = vor.u32 %v778_v48, %v774_v17  ;;  %v775_v32 = vsel %vm15855_vm7, %v770_v58, %v774_v17  ;;  %v790_v8 = vrot.slane %v789_v53, 4  ;;  %v5057_v26 = vrot.slane %v5055_v23, 4  ;;  %v357_v48 = vld [vmem:[%s15657_s8 + $0xd8] sm:$0x1] }
 0x140   : > { %v16724_v60 = vsel %vm15663_vm4, %v5047_v54, %v5048_v4  ;;  %v800_v43 = vrot.slane %v799_v63, 4  ;;  %v5064_v35 = vrot.slane %v15420_v59, 5  ;;  %v5060_v62 = vrot.slane %v5058_v61, 4 }
 0x141   : > { %v780_v44 = vrot.slane %v779_v19, 4  ;;  %v795_v37 = vsel %vm15855_vm7, %v790_v8, %v794_v9  ;;  %v807_v5 = vshrl.u32 %v322_v45, 16  ;;  %v810_v12 = vshll.u32 %v322_v45, 16 }
 0x142   : > { %v805_v4 = vsel %vm15855_vm7, %v800_v43, %v804_v25  ;;  %v5063_v3 = vrot.slane %v5061_v15, 4  ;;  %v816_v52 = vshll.u32 %v323_v39, 16  ;;  %v820_v40 = vshrl.u32 %v323_v39, 16  ;;  %v15421_v43 = vld [vmem:[%s15657_s8 + $0x54] sm:$0xf] }
 0x143   : > { %v785_v14 = vsel %vm15855_vm7, %v780_v44, %v784_v36  ;;  %v11991_v17 = vcombine.low %v795_v37, %v805_v4  ;;  %v809_v36 = vrot.slane %v807_v5, 4  ;;  %v812_v18 = vrot.slane %v810_v12, 5  ;;  %v16792_v4 = vld [vmem:[%s15657_s8 + $0xe4] sm:$0xf]  ;;  %v15422_v5 = vld [vmem:[%s15657_s8 + $0x58] sm:$0xf] }
 0x144   : > { %v11990_v24 = vcombine.low %v775_v32, %v785_v14  ;;  %v818_v50 = vrot.slane %v816_v52, 5  ;;  %v822_v31 = vrot.slane %v820_v40, 4  ;;  %v836_v9 = vshll.u32 %v325_v49, 16  ;;  %v16800_v40 = vld [vmem:[%s15657_s8 + $0xe8] sm:$0xf] }
 0x145   : > { %13841 = vmatmul.mubr.msk.bf16.gmra.mrb[52].mxu0 %vm1168_vm3, %v16468_v16  ;;  %v12473_v16 = vrot.slane %v12457_v38, 9  ;;  %v840_v13 = vshrl.u32 %v325_v49, 16  ;;  %v813_v11 = vor.u32 %v812_v18, %v809_v36  ;;  %v846_v28 = vshll.u32 %v357_v48, 16  ;;  %v15423_v49 = vld [vmem:[%s15657_s8 + $0x5c] sm:$0xf] }
 0x146   : > { %13844 = vmatprep.mubr.msk.bf16.mxu0 %vm1168_vm3, %v16537_v55  ;;  %v324_v55 = vld [vmem:[%s15657_s8 + $0xd0] sm:$0xf]  ;;  %13560 = vmatprep.mubr.msk.bf16.mxu1 %vm1168_vm3, %v11990_v24  ;;  %v823_v58 = vor.u32 %v822_v31, %v818_v50  ;;  %v838_v53 = vrot.slane %v836_v9, 5  ;;  %v16760_v44 = vsel %vm15663_vm4, %v5057_v26, %v5058_v61  ;;  %v16768_v25 = vsel %vm15663_vm4, %v5063_v3, %v5064_v35  ;;  %v16783_v35 = vld [vmem:[%s15657_s8 + $0xe0] sm:$0xf] }
 0x147   : > { %v826_v29 = vshll.u32 %v324_v55, 16  ;;  %v830_v54 = vshrl.u32 %v324_v55, 16  ;;  %13561 = vmatmul.mubr.msk.bf16.gmra.mrb[36].mxu1 %vm1168_vm3, %v11991_v17  ;;  %v16753_v38 = vsel %vm15663_vm4, %v12473_v16, %v5055_v23  ;;  %v842_v2 = vrot.slane %v840_v13, 4  ;;  %v16775_v16 = vld [vmem:[%s15657_s8 + $0xdc] sm:$0xf] }
 0x148   : > { %v814_v63 = vrot.slane %v813_v11, 4  ;;  %v824_v51 = vrot.slane %v823_v58, 4  ;;  %v848_v8 = vrot.slane %v846_v28, 5  ;;  %v12474_v61 = vrot.slane %v12458_v46, 9  ;;  %v16817_v11 = vld [vmem:[%s19479_s1] sm:$0x3] }
 0x149   : > { %v828_v20 = vrot.slane %v826_v29, 5  ;;  %v832_v19 = vrot.slane %v830_v54, 4  ;;  %v843_v32 = vor.u32 %v842_v2, %v838_v53  ;;  %v12491_v14 = vcombine.low %v16724_v60, %v16734_v34  ;;  %v358_v54 = vld [vmem:[%s15657_s8 + $0xec] sm:$0x1]  ;;  %15125 = vmatprep.subr.msk.bf16.mxu1 %vm1265_vm0, %v16817_v11 }
 0x14a   : > { %v5068_v39 = vrot.slane %v15421_v43, 5  ;;  %v12492_v24 = vcombine.low %v16753_v38, %v16760_v44  ;;  %v5071_v12 = vrot.slane %v15422_v5, 5  ;;  %v5074_v3 = vrot.slane %v15423_v49, 5  ;;  %v16841_v43 = vld [vmem:[%s15657_s8 + $0x6c] sm:$0xf] }
 0x14b   : > { %v833_v23 = vor.u32 %v832_v19, %v828_v20  ;;  %v829_v26 = vsel %vm15855_vm7, %v824_v51, %v828_v20  ;;  %v844_v59 = vrot.slane %v843_v32, 4  ;;  %v851_v52 = vshrl.u32 %v16775_v16, 16  ;;  %v16832_v51 = vld [vmem:[%s15657_s8 + $0x68] sm:$0xf] }
 0x14c   : > { %v16804_v48 = vsel %vm15663_vm4, %v12474_v61, %v5068_v39  ;;  %v854_v18 = vshll.u32 %v16775_v16, 16  ;;  %v860_v29 = vshll.u32 %v16783_v35, 16  ;;  %v864_v9 = vshrl.u32 %v16783_v35, 16 }
 0x14d   : > { %13845 = vmatmul.mubr.msk.bf16.gmra.mrb[56].mxu0 %vm1168_vm3, %v16577_v0  ;;  %v16764_v0 = vsel %vm15663_vm4, %v5060_v62, %v5061_v15  ;;  %v819_v15 = vsel %vm15855_vm7, %v814_v63, %v818_v50  ;;  %v834_v45 = vrot.slane %v833_v23, 4  ;;  %v849_v17 = vsel %vm15855_vm7, %v844_v59, %v848_v8 }
 0x14e   : > { %13848 = vmatprep.mubr.msk.bf16.mxu0 %vm1168_vm3, %v16674_v30  ;;  %v12490_v30 = vcombine.low %v16698_v56, %v16715_v42  ;;  %v12493_v37 = vcombine.low %v16764_v0, %v16768_v25  ;;  %v11992_v55 = vcombine.low %v819_v15, %v829_v26  ;;  %v5070_v50 = vrot.slane %v5068_v39, 4  ;;  %v16889_v42 = vld [vmem:[%s15657_s8 + $0xfc] sm:$0xf] }
 0x14f   : > { %v839_v62 = vsel %vm15855_vm7, %v834_v45, %v838_v53  ;;  %v853_v31 = vrot.slane %v851_v52, 4  ;;  %v870_v13 = vshll.u32 %v16792_v4, 16  ;;  %v862_v20 = vrot.slane %v860_v29, 5  ;;  %v12459_v45 = vld [vmem:[%s15657_s8 + $0x64] sm:$0xe] }
 0x150   : > { %13564 = vmatprep.mubr.msk.bf16.mxu1 %vm1168_vm3, %v11992_v55  ;;  %v11993_v36 = vcombine.low %v839_v62, %v849_v17  ;;  %v874_v19 = vshrl.u32 %v16792_v4, 16  ;;  %v880_v28 = vshll.u32 %v16800_v40, 16  ;;  %v866_v46 = vrot.slane %v864_v9, 4  ;;  %v16845_v55 = vld [vmem:[%s15657_s8 + $0x70] sm:$0xf] }
 0x151   : > { %v872_v58 = vrot.slane %v870_v13, 5  ;;  %v884_v53 = vshrl.u32 %v16800_v40, 16  ;;  %v890_v2 = vshll.u32 %v358_v54, 16  ;;  %v5073_v27 = vrot.slane %v5071_v12, 4  ;;  %v16849_v52 = vld [vmem:[%s15657_s8 + $0xf0] sm:$0xf] }
 0x152   : > { %13565 = vmatmul.mubr.msk.bf16.gmra.mrb[40].mxu1 %vm1168_vm3, %v11993_v36  ;;  %v882_v63 = vrot.slane %v880_v28, 5  ;;  %v16829_v23 = vrot.slane %v5074_v3, 4  ;;  %v5081_v32 = vrot.slane %v16832_v51, 5  ;;  %v867_v8 = vor.u32 %v866_v46, %v862_v20  ;;  %v15427_v36 = vld [vmem:[%s15657_s8 + $0x60] sm:$0x1] }
 0x153   : > { %v886_v61 = vrot.slane %v884_v53, 4  ;;  %v16837_v15 = vsel %vm15663_vm4, %v5070_v50, %v5071_v12  ;;  %v5084_v39 = vrot.slane %v16841_v43, 5  ;;  %v5087_v62 = vrot.slane %v16845_v55, 5  ;;  %v16861_v50 = vld [vmem:[%s19479_s1 + $0xe] sm:$0x3] }
 0x154   : > { %v868_v5 = vrot.slane %v867_v8, 4  ;;  %v892_v17 = vrot.slane %v890_v2, 5  ;;  %v16853_v12 = vsel %vm15663_vm4, %v5073_v27, %v5074_v3  ;;  %v5083_v3 = vrot.slane %v5081_v32, 4 }
 0x155   : > { %13849 = vmatmul.mubr.msk.bf16.gmra.mrb[60].mxu0 %vm1168_vm3, %v16680_v22  ;;  %v856_v22 = vrot.slane %v854_v18, 5  ;;  %v887_v49 = vor.u32 %v886_v61, %v882_v63  ;;  %v5077_v18 = vrot.slane %v15427_v36, 5  ;;  %v5086_v41 = vrot.slane %v5084_v39, 4 }
 0x156   : > { %13854 = vmatprep.mubr.msk.bf16.mxu0 %vm1168_vm3, %v12488_v6  ;;  %v876_v6 = vrot.slane %v874_v19, 4  ;;  %v873_v9 = vsel %vm15855_vm7, %v868_v5, %v872_v58  ;;  %v895_v19 = vshrl.u32 %v16849_v52, 16  ;;  %v12494_v28 = vcombine.low %v16804_v48, %v16837_v15 }
 0x157   : > { %v857_v33 = vor.u32 %v856_v22, %v853_v31  ;;  %v12475_v31 = vrot.slane %v12459_v45, 9  ;;  %v888_v13 = vrot.slane %v887_v49, 4  ;;  %v16870_v22 = vld [vmem:[%s15657_s8 + $0xf4] sm:$0xf]  ;;  %v5089_v46 = vrot.slane %v5087_v62, 4 }
 0x158   : > { %v877_v59 = vor.u32 %v876_v6, %v872_v58  ;;  %v898_v56 = vshll.u32 %v16849_v52, 16  ;;  %v15428_v58 = vld [vmem:[%s15657_s8 + $0x74] sm:$0x1]  ;;  %v897_v27 = vrot.slane %v895_v19, 4  ;;  %v924_v45 = vshll.u32 %v16889_v42, 16 }
 0x159   : > { %v858_v26 = vrot.slane %v857_v33, 4  ;;  %v5090_v53 = vrot.slane %v15428_v58, 5  ;;  %v904_v33 = vshll.u32 %v16870_v22, 16  ;;  %v928_v43 = vshrl.u32 %v16889_v42, 16 }
 0x15a   : > { %v878_v54 = vrot.slane %v877_v59, 4  ;;  %v900_v6 = vrot.slane %v898_v56, 5  ;;  %v16910_v36 = vsel %vm15663_vm4, %v12475_v31, %v5081_v32  ;;  %v16927_v32 = vsel %vm15663_vm4, %v5086_v41, %v5087_v62  ;;  %v15429_v41 = vld [vmem:[%s15657_s8 + $0x7c] sm:$0xf]  ;;  %v16948_v56 = vld [vmem:[%s15657_s8 + $0x108] sm:$0xf] }
 0x15b   : > { %v863_v29 = vsel %vm15855_vm7, %v858_v26, %v862_v20  ;;  %v16880_v20 = vld [vmem:[%s15657_s8 + $0xf8] sm:$0xf]  ;;  %v906_v61 = vrot.slane %v904_v33, 5  ;;  %v16931_v60 = vsel %vm15663_vm4, %v5089_v46, %v5090_v53 }
 0x15c   : > { %v11994_v21 = vcombine.low %v863_v29, %v873_v9  ;;  %v914_v51 = vshll.u32 %v16880_v20, 16  ;;  %v918_v8 = vshrl.u32 %v16880_v20, 16  ;;  %v901_v59 = vor.u32 %v900_v6, %v897_v27  ;;  %v12460_v29 = vld [vmem:[%s15657_s8 + $0x78] sm:$0xe] }
 0x15d   : > { %13855 = vmatmul.mubr.msk.bf16.vlgmr.msra.gmra.mrb[0].mxu0 %vm1168_vm3, %v12489_v57  ;;  %v883_v57 = vsel %vm15855_vm7, %v878_v54, %v882_v63  ;;  %v908_v63 = vshrl.u32 %v16870_v22, 16  ;;  %v926_v54 = vrot.slane %v924_v45, 5  ;;  %v930_v9 = vrot.slane %v928_v43, 4 }
 0x15e   : > { %13919 = vmatpush3.bf16.msra.mxu0 %v16684_v10  ;;  %13858 = vmatprep.mubr.msk.bf16.mxu0 %vm1168_vm3, %v12490_v30  ;;  %v893_v10 = vsel %vm15855_vm7, %v888_v13, %v892_v17  ;;  %v359_v30 = vld [vmem:[%s15657_s8 + $0x100] sm:$0x1]  ;;  %v916_v5 = vrot.slane %v914_v51, 5  ;;  %v920_v49 = vrot.slane %v918_v8, 4  ;;  %v16906_v17 = vsel %vm15663_vm4, %v16829_v23, %v5077_v18  ;;  %v16961_v51 = vld [vmem:[%s15657_s8 + $0x110] sm:$0xf] }
 0x15f   : > { %15132 = vmatprep.subr.msk.bf16.mxu0 %vm1265_vm0, %v16861_v50  ;;  %13568 = vmatprep.mubr.msk.bf16.mxu1 %vm1168_vm3, %v11994_v21  ;;  %v11995_v2 = vcombine.low %v883_v57, %v893_v10  ;;  %v934_v26 = vshll.u32 %v359_v30, 16  ;;  %v910_v55 = vrot.slane %v908_v63, 4  ;;  %v16919_v13 = vsel %vm15663_vm4, %v5083_v3, %v5084_v39  ;;  %v16934_v39 = vld [vmem:[%s15657_s8 + $0x104] sm:$0xf]  ;;  %v16958_v63 = vld [vmem:[%s15657_s8 + $0x10c] sm:$0xf] }
 0x160   : > { %v902_v21 = vrot.slane %v901_v59, 4  ;;  %v921_v18 = vor.u32 %v920_v49, %v916_v5  ;;  %v931_v34 = vor.u32 %v930_v9, %v926_v54  ;;  %v12476_v31 = vrot.slane %v12460_v29, 9  ;;  %v360_v59 = vld [vmem:[%s15657_s8 + $0x114] sm:$0x1] }
 0x161   : > { %13569 = vmatmul.mubr.msk.bf16.gmra.mrb[44].mxu1 %vm1168_vm3, %v11995_v2  ;;  %v911_v23 = vor.u32 %v910_v55, %v906_v61  ;;  %v12495_v62 = vcombine.low %v16853_v12, %v16906_v17  ;;  %v12496_v3 = vcombine.low %v16910_v36, %v16919_v13  ;;  %v5094_v57 = vrot.slane %v15429_v41, 5  ;;  %v15430_v2 = vld [vmem:[%s15657_s8 + $0x80] sm:$0xf] }
 0x162   : > { %v907_v38 = vsel %vm15855_vm7, %v902_v21, %v906_v61  ;;  %v932_v19 = vrot.slane %v931_v34, 4  ;;  %v939_v30 = vshrl.u32 %v16934_v39, 16  ;;  %v942_v58 = vshll.u32 %v16934_v39, 16  ;;  %v15431_v61 = vld [vmem:[%s15657_s8 + $0x84] sm:$0xf] }
 0x163   : > { %v912_v44 = vrot.slane %v911_v23, 4  ;;  %v12497_v53 = vcombine.low %v16927_v32, %v16931_v60  ;;  %v5097_v27 = vrot.slane %v15430_v2, 5  ;;  %v16965_v8 = vsel %vm15663_vm4, %v12476_v31, %v5094_v57 }
 0x164   : > { %v5100_v45 = vrot.slane %v15431_v61, 5  ;;  %v5096_v55 = vrot.slane %v5094_v57, 4  ;;  %v948_v49 = vshll.u32 %v16948_v56, 16  ;;  %v952_v29 = vshrl.u32 %v16948_v56, 16 }
 0x165   : > { %13859 = vmatmul.mubr.msk.bf16.gmra.mrb[4].mxu0 %vm1168_vm3, %v12491_v14  ;;  %v936_v14 = vrot.slane %v934_v26, 5  ;;  %v917_v46 = vsel %vm15855_vm7, %v912_v44, %v916_v5  ;;  %v941_v26 = vrot.slane %v939_v30, 4  ;;  %v944_v5 = vrot.slane %v942_v58, 5  ;;  %v12461_v30 = vld [vmem:[%s15657_s8 + $0x8c] sm:$0xe] }
 0x166   : > { %13862 = vmatprep.mubr.msk.bf16.mxu0 %vm1168_vm3, %v12492_v24  ;;  %v922_v24 = vrot.slane %v921_v18, 4  ;;  %v11996_v33 = vcombine.low %v907_v38, %v917_v46  ;;  %v962_v9 = vshrl.u32 %v16958_v63, 16  ;;  %v968_v21 = vshll.u32 %v16961_v51, 16  ;;  %v15433_v58 = vld [vmem:[%s15657_s8 + $0x94] sm:$0xf] }
 0x167   : > { %v937_v6 = vsel %vm15855_vm7, %v932_v19, %v936_v14  ;;  %v972_v23 = vshrl.u32 %v16961_v51, 16  ;;  %v945_v18 = vor.u32 %v944_v5, %v941_v26  ;;  %v950_v0 = vrot.slane %v948_v49, 5  ;;  %v15435_v26 = vld [vmem:[%s15657_s8 + $0x88] sm:$0x1] }
 0x168   : > { %v927_v10 = vsel %vm15855_vm7, %v922_v24, %v926_v54  ;;  %13572 = vmatprep.mubr.msk.bf16.mxu1 %vm1168_vm3, %v11996_v33  ;;  %v958_v54 = vshll.u32 %v16958_v63, 16  ;;  %v954_v25 = vrot.slane %v952_v29, 4  ;;  %v964_v14 = vrot.slane %v962_v9, 4  ;;  %v15434_v33 = vld [vmem:[%s15657_s8 + $0x98] sm:$0xf] }
 0x169   : > { %v11997_v43 = vcombine.low %v927_v10, %v937_v6  ;;  %v970_v31 = vrot.slane %v968_v21, 5  ;;  %v974_v38 = vrot.slane %v972_v23, 4  ;;  %v16987_v44 = vsel %vm15663_vm4, %v5096_v55, %v5097_v27  ;;  %v16991_v10 = vld [vmem:[%s15657_s8 + $0x118] sm:$0xf]  ;;  %v17008_v9 = vld [vmem:[%s15657_s8 + $0x11c] sm:$0xf] }
 0x16a   : > { %v960_v34 = vrot.slane %v958_v54, 5  ;;  %v5099_v24 = vrot.slane %v5097_v27, 4  ;;  %v946_v48 = vrot.slane %v945_v18, 4  ;;  %v955_v15 = vor.u32 %v954_v25, %v950_v0  ;;  %v17023_v25 = vld [vmem:[%s15657_s8 + $0x124] sm:$0xf] }
 0x16b   : > { %13573 = vmatmul.mubr.msk.bf16.gmra.mrb[48].mxu1 %vm1168_vm3, %v11997_v43  ;;  %v975_v19 = vor.u32 %v974_v38, %v970_v31  ;;  %v5110_v2 = vrot.slane %v15433_v58, 5  ;;  %v5113_v6 = vrot.slane %v15434_v33, 5  ;;  %v5102_v43 = vrot.slane %v5100_v45, 4 }
 0x16c   : > { %v965_v57 = vor.u32 %v964_v14, %v960_v34  ;;  %v951_v61 = vsel %vm15855_vm7, %v946_v48, %v950_v0  ;;  %v956_v27 = vrot.slane %v955_v15, 4  ;;  %v12498_v49 = vcombine.low %v16965_v8, %v16987_v44  ;;  %v17020_v0 = vld [vmem:[%s15657_s8 + $0x120] sm:$0xf]  ;;  %v15436_v14 = vld [vmem:[%s15657_s8 + $0x9c] sm:$0x1] }
 0x16d   : > { %13863 = vmatmul.mubr.msk.bf16.gmra.mrb[8].mxu0 %vm1168_vm3, %v12493_v37  ;;  %v978_v37 = vshll.u32 %v360_v59, 16  ;;  %v5103_v59 = vrot.slane %v15435_v26, 5  ;;  %v976_v5 = vrot.slane %v975_v19, 4  ;;  %v17003_v29 = vsel %vm15663_vm4, %v5099_v24, %v5100_v45 }
 0x16e   : > { %13866 = vmatprep.mubr.msk.bf16.mxu0 %vm1168_vm3, %v12494_v28  ;;  %v15432_v28 = vld [vmem:[%s15657_s8 + $0x90] sm:$0xf]  ;;  %v966_v55 = vrot.slane %v965_v57, 4  ;;  %v961_v54 = vsel %vm15855_vm7, %v956_v27, %v960_v34  ;;  %v983_v21 = vshrl.u32 %v16991_v10, 16  ;;  %v12477_v23 = vrot.slane %v12461_v30, 9 }
 0x16f   : > { %v5107_v41 = vrot.slane %v15432_v28, 5  ;;  %v980_v46 = vrot.slane %v978_v37, 5  ;;  %v11998_v8 = vcombine.low %v951_v61, %v961_v54  ;;  %v5112_v17 = vrot.slane %v5110_v2, 4  ;;  %v17030_v34 = vld [vmem:[%s15657_s8 + $0x128] sm:$0x1] }
 0x170   : > { %v971_v45 = vsel %vm15855_vm7, %v966_v55, %v970_v31  ;;  %v5116_v31 = vrot.slane %v15436_v14, 5  ;;  %v985_v38 = vrot.slane %v983_v21, 4  ;;  %v986_v44 = vshll.u32 %v16991_v10, 16  ;;  %v17077_v14 = vld [vmem:[%s15657_s8 + $0x130] sm:$0xf] }
 0x171   : > { %v981_v18 = vsel %vm15855_vm7, %v976_v5, %v980_v46  ;;  %v5109_v12 = vrot.slane %v5107_v41, 4  ;;  %13576 = vmatprep.mubr.msk.bf16.mxu1 %vm1168_vm3, %v11998_v8  ;;  %v992_v24 = vshll.u32 %v17008_v9, 16  ;;  %v996_v36 = vshrl.u32 %v17008_v9, 16 }
 0x172   : > { %v11999_v37 = vcombine.low %v971_v45, %v981_v18  ;;  %v1002_v13 = vshll.u32 %v17020_v0, 16  ;;  %v1012_v48 = vshll.u32 %v17023_v25, 16  ;;  %v988_v15 = vrot.slane %v986_v44, 5  ;;  %v12462_v45 = vld [vmem:[%s15657_s8 + $0xa0] sm:$0xe] }
 0x173   : > { %v994_v28 = vrot.slane %v992_v24, 5  ;;  %v1016_v57 = vshrl.u32 %v17023_v25, 16  ;;  %v1022_v19 = vshll.u32 %v17030_v34, 16  ;;  %v998_v46 = vrot.slane %v996_v36, 4  ;;  %v15437_v18 = vld [vmem:[%s15657_s8 + $0xa4] sm:$0xf] }
 0x174   : > { %13577 = vmatmul.mubr.msk.bf16.gmra.mrb[52].mxu1 %vm1168_vm3, %v11999_v37  ;;  %v1004_v30 = vrot.slane %v1002_v13, 5  ;;  %v1014_v33 = vrot.slane %v1012_v48, 5  ;;  %v5104_v61 = vsel %vm15663_vm4, %v5102_v43, %v5103_v59  ;;  %v5108_v27 = vsel %vm15663_vm4, %v12477_v23, %v5107_v41  ;;  %v17062_v23 = vld [vmem:[%s15657_s8 + $0x12c] sm:$0xf]  ;;  %v15438_v24 = vld [vmem:[%s15657_s8 + $0xa8] sm:$0xf] }
 0x175   : > { %13867 = vmatmul.mubr.msk.bf16.gmra.mrb[12].mxu0 %vm1168_vm3, %v12495_v62  ;;  %v5115_v62 = vrot.slane %v5113_v6, 4  ;;  %v989_v26 = vor.u32 %v988_v15, %v985_v38  ;;  %v1018_v55 = vrot.slane %v1016_v57, 4  ;;  %v5111_v5 = vsel %vm15663_vm4, %v5109_v12, %v5110_v2  ;;  %v17087_v48 = vld [vmem:[%s15657_s8 + $0x138] sm:$0xf]  ;;  %v15439_v15 = vld [vmem:[%s15657_s8 + $0xac] sm:$0xf] }
 0x176   : > { %13870 = vmatprep.mubr.msk.bf16.mxu0 %vm1168_vm3, %v12496_v3  ;;  %v1006_v3 = vshrl.u32 %v17020_v0, 16  ;;  %v17051_v54 = vsel %vm15663_vm4, %v5112_v17, %v5113_v6  ;;  %v999_v21 = vor.u32 %v998_v46, %v994_v28  ;;  %v1024_v2 = vrot.slane %v1022_v19, 5 }
 0x177   : > { %v17059_v41 = vsel %vm15663_vm4, %v5115_v62, %v5116_v31  ;;  %v990_v43 = vrot.slane %v989_v26, 4  ;;  %v1019_v59 = vor.u32 %v1018_v55, %v1014_v33  ;;  %v12499_v6 = vcombine.low %v17003_v29, %v5104_v61  ;;  %v17080_v31 = vld [vmem:[%s15657_s8 + $0x134] sm:$0xf] }
 0x178   : > { %v1008_v58 = vrot.slane %v1006_v3, 4  ;;  %v1000_v32 = vrot.slane %v999_v21, 4  ;;  %v5120_v12 = vrot.slane %v15437_v18, 5  ;;  %v12501_v37 = vcombine.low %v17051_v54, %v17059_v41  ;;  %v15444_v54 = vld [vmem:[%s15657_s8 + $0x4] sm:$0xf] }
 0x179   : > { %v995_v17 = vsel %vm15855_vm7, %v990_v43, %v994_v28  ;;  %v1020_v62 = vrot.slane %v1019_v59, 4  ;;  %v1027_v38 = vshrl.u32 %v17062_v23, 16  ;;  %v12478_v44 = vrot.slane %v12462_v45, 9  ;;  %v15445_v41 = vld [vmem:[%s15657_s8] sm:$0xf] }
 0x17a   : > { %v1009_v8 = vor.u32 %v1008_v58, %v1004_v30  ;;  %v5123_v36 = vrot.slane %v15438_v24, 5  ;;  %v5126_v28 = vrot.slane %v15439_v15, 5  ;;  %v1030_v46 = vshll.u32 %v17062_v23, 16 }
 0x17b   : > { %v1025_v3 = vsel %vm15855_vm7, %v1020_v62, %v1024_v2  ;;  %v1029_v19 = vrot.slane %v1027_v38, 4  ;;  %v5122_v58 = vrot.slane %v5120_v12, 4  ;;  %v1040_v61 = vshrl.u32 %v17077_v14, 16  ;;  %v12463_v38 = vld [vmem:[%s15657_s8 + $0xb4] sm:$0xe] }
 0x17c   : > { %v1010_v60 = vrot.slane %v1009_v8, 4  ;;  %v1032_v26 = vrot.slane %v1030_v46, 5  ;;  %v1050_v55 = vshrl.u32 %v17080_v31, 16  ;;  %v1060_v21 = vshrl.u32 %v17087_v48, 16 }
 0x17d   : > { %13871 = vmatmul.mubr.msk.bf16.gmra.mrb[16].mxu0 %vm1168_vm3, %v12497_v53  ;;  %v12500_v53 = vcombine.low %v5108_v27, %v5111_v5  ;;  %v1046_v27 = vshll.u32 %v17080_v31, 16  ;;  %v1056_v5 = vshll.u32 %v17087_v48, 16  ;;  %v1042_v43 = vrot.slane %v1040_v61, 4 }
 0x17e   : > { %13874 = vmatprep.mubr.msk.bf16.mxu0 %vm1168_vm3, %v12498_v49  ;;  %v1005_v49 = vsel %vm15855_vm7, %v1000_v32, %v1004_v30  ;;  %v1015_v29 = vsel %vm15855_vm7, %v1010_v60, %v1014_v33  ;;  %v17092_v30 = vld [vmem:[%s15657_s8 + $0x13c] sm:$0x1]  ;;  %v1036_v33 = vshll.u32 %v17077_v14, 16  ;;  %v1033_v45 = vor.u32 %v1032_v26, %v1029_v19  ;;  %v15441_v19 = vld [vmem:[%s15657_s8 + $0xb0] sm:$0x1] }
 0x17f   : > { %v12000_v13 = vcombine.low %v995_v17, %v1005_v49  ;;  %v12001_v57 = vcombine.low %v1015_v29, %v1025_v3  ;;  %v1048_v59 = vrot.slane %v1046_v27, 5  ;;  %v1066_v2 = vshll.u32 %v17092_v30, 16  ;;  %v15440_v49 = vld [vmem:[%s15657_s8 + $0xb8] sm:$0xf] }
 0x180   : > { %v1038_v8 = vrot.slane %v1036_v33, 5  ;;  %v1052_v32 = vrot.slane %v1050_v55, 4  ;;  %v1058_v60 = vrot.slane %v1056_v5, 5  ;;  %v1062_v18 = vrot.slane %v1060_v21, 4  ;;  %v15442_v55 = vld [vmem:[%s15657_s8 + $0xbc] sm:$0xf] }
 0x181   : > { %13580 = vmatprep.mubr.msk.bf16.mxu1 %vm1168_vm3, %v12000_v13  ;;  %v5121_v17 = vsel %vm15663_vm4, %v12478_v44, %v5120_v12  ;;  %v5124_v62 = vsel %vm15663_vm4, %v5122_v58, %v5123_v36  ;;  %v1034_v24 = vrot.slane %v1033_v45, 4  ;;  %v5125_v15 = vrot.slane %v5123_v36, 4 }
 0x182   : > { %13581 = vmatmul.mubr.msk.bf16.gmra.mrb[56].mxu1 %vm1168_vm3, %v12001_v57  ;;  %v1043_v29 = vor.u32 %v1042_v43, %v1038_v8  ;;  %v1053_v13 = vor.u32 %v1052_v32, %v1048_v59  ;;  %v1063_v3 = vor.u32 %v1062_v18, %v1058_v60  ;;  %v5128_v57 = vrot.slane %v5126_v28, 4 }
 0x183   : > { %v5129_v46 = vrot.slane %v15441_v19, 5  ;;  %v12502_v61 = vcombine.low %v5121_v17, %v5124_v62  ;;  %v1039_v12 = vsel %vm15855_vm7, %v1034_v24, %v1038_v8  ;;  %v12479_v27 = vrot.slane %v12463_v38, 9 }
 0x184   : > { %v1044_v33 = vrot.slane %v1043_v29, 4  ;;  %v1054_v44 = vrot.slane %v1053_v13, 4  ;;  %v1064_v58 = vrot.slane %v1063_v3, 4  ;;  %v5136_v5 = vrot.slane %v15442_v55, 5  ;;  %v15448_v3 = vld [vmem:[%s15657_s8 + $0xc4] sm:$0x1] }
 0x185   : > { %13875 = vmatmul.mubr.msk.bf16.gmra.mrb[20].mxu0 %vm1168_vm3, %v12499_v6  ;;  %v5133_v6 = vrot.slane %v15440_v49, 5  ;;  %v1815_v45 = vsel %vm1265_vm0, %v16817_v11, 0  ;;  %v5130_v32 = vsel %vm15663_vm4, %v5128_v57, %v5129_v46  ;;  %v12464_v49 = vld [vmem:[%s15657_s8 + $0xc8] sm:$0xe]  ;;  %v15450_v57 = vld [vmem:[%s15657_s8 + $0xc] sm:$0xf] }
 0x186   : > { %13878 = vmatprep.mubr.msk.bf16.mxu0 %vm1168_vm3, %v12500_v53  ;;  %v1068_v53 = vrot.slane %v1066_v2, 5  ;;  %v1049_v36 = vsel %vm15855_vm7, %v1044_v33, %v1048_v59  ;;  %v1059_v43 = vsel %vm15855_vm7, %v1054_v44, %v1058_v60  ;;  %v5127_v59 = vsel %vm15663_vm4, %v5125_v15, %v5126_v28  ;;  %v15443_v60 = vld [vmem:[%s15657_s8 + $0xc0] sm:$0xf]  ;;  %v15446_v28 = vld [vmem:[%s15657_s8 + $0xcc] sm:$0xf]  ;;  %13589 = vmatpush3.bf16.msra.mxu1 %v1815_v45 }
 0x187   : > { %v5135_v26 = vrot.slane %v5133_v6, 4  ;;  %v12002_v21 = vcombine.low %v1039_v12, %v1049_v36  ;;  %v5139_v18 = vrot.slane %v15443_v60, 5  ;;  %v5134_v17 = vsel %vm15663_vm4, %v12479_v27, %v5133_v6  ;;  %v15447_v6 = vld [vmem:[%s19479_s1 + $0x4] sm:$0x3]  ;;  %v15449_v15 = vld [vmem:[%s15657_s8 + $0x8] sm:$0xf] }
 0x188   : > { %v1069_v8 = vsel %vm15855_vm7, %v1064_v58, %v1068_v53  ;;  %v5146_v62 = vrot.slane %v15446_v28, 5  ;;  %v12503_v29 = vcombine.low %v5127_v59, %v5130_v32  ;;  %15127 = vmatprep.subr.msk.bf16.mxu1 %vm1265_vm0, %v15447_v6  ;;  %v5138_v24 = vrot.slane %v5136_v5, 4  ;;  %v15452_v44 = vld [vmem:[%s15657_s8 + $0x18] sm:$0xf]  ;;  %v15453_v58 = vld [vmem:[%s15657_s8 + $0x14] sm:$0xf] }
 0x189   : > { %v12003_v2 = vcombine.low %v1059_v43, %v1069_v8  ;;  %13584 = vmatprep.mubr.msk.bf16.mxu1 %vm1168_vm3, %v12002_v21  ;;  %v5137_v11 = vsel %vm15663_vm4, %v5135_v26, %v5136_v5  ;;  %v5141_v13 = vrot.slane %v5139_v18, 4  ;;  %v5142_v53 = vrot.slane %v15448_v3, 5  ;;  %v15454_v5 = vld [vmem:[%s15657_s8 + $0xd4] sm:$0xf]  ;;  %v15455_v8 = vld [vmem:[%s15657_s8 + $0xe0] sm:$0xf] }
 0x18a   : > { %v12504_v38 = vcombine.low %v5134_v17, %v5137_v11  ;;  %v12037_v19 = vcombine.low %v15449_v15, %v15450_v57  ;;  %v12480_v46 = vrot.slane %v12464_v49, 9  ;;  %v5148_v33 = vrot.slane %v5146_v62, 4  ;;  %v12465_v45 = vld [vmem:[%s15657_s8 + $0xdc] sm:$0xe]  ;;  %v15457_v11 = vld [vmem:[%s15657_s8 + $0xe4] sm:$0xf] }
 0x18b   : > { %13585 = vmatmul.mubr.msk.bf16.gmra.mrb[60].mxu1 %vm1168_vm3, %v12003_v2  ;;  %v12038_v27 = vcombine.low %v15453_v58, %v15452_v44  ;;  %v5140_v26 = vsel %vm15663_vm4, %v5138_v24, %v5139_v18  ;;  %v5143_v55 = vsel %vm15663_vm4, %v5141_v13, %v5142_v53  ;;  %v5152_v36 = vrot.slane %v15454_v5, 5  ;;  %v15459_v49 = vld [vmem:[%s15657_s8 + $0x20] sm:$0xf]  ;;  %v15460_v6 = vld [vmem:[%s15657_s8 + $0x2c] sm:$0xf] }
 0x18c   : > { %v5147_v21 = vsel %vm15663_vm4, %v12480_v46, %v5146_v62  ;;  %v5159_v2 = vrot.slane %v15455_v8, 5  ;;  %v12505_v59 = vcombine.low %v5140_v26, %v5143_v55  ;;  %v5162_v28 = vrot.slane %v15457_v11, 5  ;;  %v15458_v62 = vld [vmem:[%s15657_s8 + $0x1c] sm:$0xf]  ;;  %v15462_v3 = vld [vmem:[%s15657_s8 + $0xe8] sm:$0xf] }
 0x18d   : > { %13879 = vmatmul.mubr.msk.bf16.gmra.mrb[24].mxu0 %vm1168_vm3, %v12501_v37  ;;  %v12036_v37 = vcombine.low %v15445_v41, %v15444_v54  ;;  %v5154_v18 = vrot.slane %v5152_v36, 4  ;;  %v15456_v54 = vld [vmem:[%s15657_s8 + $0xd8] sm:$0x1]  ;;  %v5165_v53 = vrot.slane %v15462_v3, 5  ;;  %v15467_v8 = vld [vmem:[%s15657_s8 + $0x34] sm:$0xf] }
 0x18e   : > { %13882 = vmatprep.mubr.msk.bf16.mxu0 %vm1168_vm3, %v12502_v61  ;;  %v15451_v61 = vld [vmem:[%s15657_s8 + $0xd0] sm:$0xf]  ;;  %v5155_v41 = vrot.slane %v15456_v54, 5  ;;  %v5161_v17 = vrot.slane %v5159_v2, 4  ;;  %v5164_v44 = vrot.slane %v5162_v28, 4 }
 0x18f   : > { %13590 = vmatprep.mubr.msk.bf16.mxu1 %vm1168_vm3, %v12036_v37  ;;  %v5149_v12 = vrot.slane %v15451_v61, 5  ;;  %v12481_v37 = vrot.slane %v12465_v45, 9  ;;  %v5167_v58 = vrot.slane %v5165_v53, 4  ;;  %v15468_v45 = vld [vmem:[%s15657_s8 + $0x40] sm:$0xf] }
 0x190   : > { %v5156_v13 = vsel %vm15663_vm4, %v5154_v18, %v5155_v41  ;;  %v5163_v57 = vsel %vm15663_vm4, %v5161_v17, %v5162_v28  ;;  %v15470_v54 = vld [vmem:[%s15657_s8 + $0xfc] sm:$0xf]  ;;  %v15471_v11 = vld [vmem:[%s15657_s8 + $0x108] sm:$0xf] }
 0x191   : > { %v5150_v43 = vsel %vm15663_vm4, %v5148_v33, %v5149_v12  ;;  %v5151_v60 = vrot.slane %v5149_v12, 4  ;;  %v5160_v15 = vsel %vm15663_vm4, %v12481_v37, %v5159_v2  ;;  %v12466_v33 = vld [vmem:[%s15657_s8 + $0xf0] sm:$0xe]  ;;  %v5178_v41 = vrot.slane %v15470_v54, 5 }
 0x192   : > { %v12506_v32 = vcombine.low %v5147_v21, %v5150_v43  ;;  %v12508_v12 = vcombine.low %v5160_v15, %v5163_v57  ;;  %v12482_v55 = vrot.slane %v12466_v33, 9  ;;  %v15466_v43 = vld [vmem:[%s15657_s8 + $0x30] sm:$0xf]  ;;  %v5185_v28 = vrot.slane %v15471_v11, 5  ;;  %v15474_v57 = vld [vmem:[%s15657_s8 + $0x44] sm:$0xf] }
 0x193   : > { %13591 = vmatmul.mubr.msk.bf16.vlgmr.msra.gmra.mrb[0].mxu1 %vm1168_vm3, %v12037_v19  ;;  %v15463_v19 = vld [vmem:[%s15657_s8 + $0xf4] sm:$0xf]  ;;  %v12041_v2 = vcombine.low %v15466_v43, %v15467_v8  ;;  %v12468_v43 = vld [vmem:[%s15657_s8 + $0x118] sm:$0xe]  ;;  %v15483_v11 = vld [vmem:[%s15657_s8 + $0x5c] sm:$0xf] }
 0x194   : > { %13594 = vmatprep.mubr.msk.bf16.mxu1 %vm1168_vm3, %v12038_v27  ;;  %14387 = vmatpush3.bf16.msra.mxu1 %v15644_v1  ;;  %v5153_v1 = vsel %vm15663_vm4, %v5151_v60, %v5152_v36  ;;  %v5172_v46 = vrot.slane %v15463_v19, 5  ;;  %v15464_v27 = vld [vmem:[%s15657_s8 + $0xec] sm:$0x1]  ;;  %v15465_v36 = vld [vmem:[%s15657_s8 + $0xf8] sm:$0xf]  ;;  %v5166_v60 = vsel %vm15663_vm4, %v5164_v44, %v5165_v53  ;;  %v5187_v3 = vrot.slane %v5185_v28, 4 }
 0x195   : > { %13883 = vmatmul.mubr.msk.bf16.gmra.mrb[28].mxu0 %vm1168_vm3, %v12503_v29  ;;  %v12039_v29 = vcombine.low %v15458_v62, %v15459_v49  ;;  %v12507_v61 = vcombine.low %v5153_v1, %v5156_v13  ;;  %v5168_v26 = vrot.slane %v15464_v27, 5  ;;  %v5175_v21 = vrot.slane %v15465_v36, 5  ;;  %v12467_v62 = vld [vmem:[%s15657_s8 + $0x104] sm:$0xe]  ;;  %v15473_v53 = vld [vmem:[%s15657_s8 + $0x10c] sm:$0xf] }
 0x196   : > { %13886 = vmatprep.mubr.msk.bf16.mxu0 %vm1168_vm3, %v12504_v38  ;;  %v15461_v38 = vld [vmem:[%s15657_s8 + $0x28] sm:$0xf]  ;;  %v5174_v5 = vrot.slane %v5172_v46, 4  ;;  %v5173_v37 = vsel %vm15663_vm4, %v12482_v55, %v5172_v46  ;;  %v12483_v13 = vrot.slane %v12467_v62, 9  ;;  %v5188_v15 = vrot.slane %v15473_v53, 5 }
 0x197   : > { %v12040_v24 = vcombine.low %v15461_v38, %v15460_v6  ;;  %v5169_v18 = vsel %vm15663_vm4, %v5167_v58, %v5168_v26  ;;  %v5177_v6 = vrot.slane %v5175_v21, 4  ;;  %v5180_v38 = vrot.slane %v5178_v41, 4  ;;  %v15475_v19 = vld [vmem:[%s15657_s8 + $0x48] sm:$0xf]  ;;  %v15476_v33 = vld [vmem:[%s15657_s8 + $0x54] sm:$0xf] }
 0x198   : > { %v5176_v17 = vsel %vm15663_vm4, %v5174_v5, %v5175_v21  ;;  %v12509_v49 = vcombine.low %v5166_v60, %v5169_v18  ;;  %v12043_v46 = vcombine.low %v15474_v57, %v15475_v19  ;;  %v15478_v27 = vld [vmem:[%s15657_s8 + $0x110] sm:$0xf]  ;;  %v5186_v55 = vsel %vm15663_vm4, %v12483_v13, %v5185_v28  ;;  %v15479_v36 = vld [vmem:[%s15657_s8 + $0x11c] sm:$0xf]  ;;  %v15484_v62 = vld [vmem:[%s15657_s8 + $0x68] sm:$0xf] }
 0x199   : > { %v5179_v44 = vsel %vm15663_vm4, %v5177_v6, %v5178_v41  ;;  %v5191_v26 = vrot.slane %v15478_v27, 5  ;;  %v5189_v5 = vsel %vm15663_vm4, %v5187_v3, %v5188_v15  ;;  %v5198_v21 = vrot.slane %v15479_v36, 5  ;;  %v15481_v41 = vld [vmem:[%s15657_s8 + $0x120] sm:$0xf]  ;;  %v15487_v53 = vld [vmem:[%s15657_s8 + $0x130] sm:$0xf] }
 0x19a   : > { %v12484_v18 = vrot.slane %v12468_v43, 9  ;;  %v12469_v57 = vld [vmem:[%s15657_s8 + $0x12c] sm:$0xe]  ;;  %v15491_v36 = vld [vmem:[%s15657_s8 + $0x70] sm:$0xf] }
 0x19b   : > { %13595 = vmatmul.mubr.msk.bf16.gmra.mrb[4].mxu1 %vm1168_vm3, %v12039_v29  ;;  %v12510_v29 = vcombine.low %v5173_v37, %v5176_v17  ;;  %v5200_v54 = vrot.slane %v5198_v21, 4  ;;  %v5201_v37 = vrot.slane %v15481_v41, 5  ;;  %v15482_v17 = vld [vmem:[%s15657_s8 + $0x58] sm:$0xf]  ;;  %v15492_v43 = vld [vmem:[%s15657_s8 + $0x7c] sm:$0xf] }
 0x19c   : > { %13598 = vmatprep.mubr.msk.bf16.mxu1 %vm1168_vm3, %v12040_v24  ;;  %v15472_v24 = vld [vmem:[%s15657_s8 + $0x100] sm:$0x1]  ;;  %v12045_v28 = vcombine.low %v15482_v17, %v15483_v11  ;;  %v5199_v13 = vsel %vm15663_vm4, %v12484_v18, %v5198_v21  ;;  %v15495_v41 = vld [vmem:[%s15657_s8 + $0x144] sm:$0xf]  ;;  %v12470_v17 = vld [vmem:[%s15657_s8 + $0x140] sm:$0xe] }
 0x19d   : > { %13887 = vmatmul.mubr.msk.bf16.gmra.mrb[32].mxu0 %vm1168_vm3, %v12505_v59  ;;  %v15469_v59 = vld [vmem:[%s15657_s8 + $0x3c] sm:$0xf]  ;;  %v5181_v1 = vrot.slane %v15472_v24, 5  ;;  %v15486_v24 = vld [vmem:[%s15657_s8 + $0x124] sm:$0xf]  ;;  %v5202_v3 = vsel %vm15663_vm4, %v5200_v54, %v5201_v37 }
 0x19e   : > { %13890 = vmatprep.mubr.msk.bf16.mxu0 %vm1168_vm3, %v12506_v32  ;;  %v12042_v32 = vcombine.low %v15469_v59, %v15468_v45  ;;  %v5190_v45 = vrot.slane %v5188_v15, 4  ;;  %v5193_v59 = vrot.slane %v5191_v26, 4  ;;  %v5211_v15 = vrot.slane %v15487_v53, 5  ;;  %v15499_v53 = vld [vmem:[%s15657_s8 + $0x84] sm:$0xf] }
 0x19f   : > { %v5182_v58 = vsel %vm15663_vm4, %v5180_v38, %v5181_v1  ;;  %v5204_v1 = vrot.slane %v15486_v24, 5 }
 0x1a0   : > { %v12511_v8 = vcombine.low %v5179_v44, %v5182_v58  ;;  %v5192_v6 = vsel %vm15663_vm4, %v5190_v45, %v5191_v26  ;;  %v12485_v58 = vrot.slane %v12469_v57, 9  ;;  %v5213_v27 = vrot.slane %v5211_v15, 4  ;;  %v15489_v26 = vld [vmem:[%s15657_s8 + $0x134] sm:$0xf]  ;;  %v15500_v57 = vld [vmem:[%s15657_s8 + $0x90] sm:$0xf] }
 0x1a2   : > { %v5212_v18 = vsel %vm15663_vm4, %v12485_v58, %v5211_v15 }
 0x1a3   : > { %13599 = vmatmul.mubr.msk.bf16.gmra.mrb[8].mxu1 %vm1168_vm3, %v12041_v2  ;;  %v12512_v2 = vcombine.low %v5186_v55, %v5189_v5  ;;  %v5214_v55 = vrot.slane %v15489_v26, 5  ;;  %v15490_v5 = vld [vmem:[%s15657_s8 + $0x6c] sm:$0xf] }
 0x1a4   : > { %13602 = vmatprep.mubr.msk.bf16.mxu1 %vm1168_vm3, %v12042_v32  ;;  %v15480_v32 = vld [vmem:[%s15657_s8 + $0x114] sm:$0x1]  ;;  %v12047_v21 = vcombine.low %v15490_v5, %v15491_v36 }
 0x1a5   : > { %13891 = vmatmul.mubr.msk.bf16.gmra.mrb[36].mxu0 %vm1168_vm3, %v12507_v61  ;;  %v15477_v61 = vld [vmem:[%s15657_s8 + $0x50] sm:$0xf]  ;;  %v5194_v60 = vrot.slane %v15480_v32, 5  ;;  %v15494_v32 = vld [vmem:[%s15657_s8 + $0x138] sm:$0xf]  ;;  %v5215_v54 = vsel %vm15663_vm4, %v5213_v27, %v5214_v55 }
 0x1a6   : > { %13894 = vmatprep.mubr.msk.bf16.mxu0 %vm1168_vm3, %v12508_v12  ;;  %v12044_v12 = vcombine.low %v15477_v61, %v15476_v33  ;;  %v5203_v33 = vrot.slane %v5201_v37, 4  ;;  %v5206_v61 = vrot.slane %v5204_v1, 4  ;;  %v5224_v37 = vrot.slane %v15495_v41, 5 }
 0x1a7   : > { %v5195_v38 = vsel %vm15663_vm4, %v5193_v59, %v5194_v60  ;;  %v5217_v60 = vrot.slane %v15494_v32, 5  ;;  %v17299_v32 = vld [vmem:[%s15657_s8 + $0xa4] sm:$0xf] }
 0x1a8   : > { %v12513_v19 = vcombine.low %v5192_v6, %v5195_v38  ;;  %v5205_v45 = vsel %vm15663_vm4, %v5203_v33, %v5204_v1  ;;  %v12486_v38 = vrot.slane %v12470_v17, 9  ;;  %v5226_v24 = vrot.slane %v5224_v37, 4  ;;  %v15497_v1 = vld [vmem:[%s15657_s8 + $0x148] sm:$0xf] }
 0x1a9   : > { %v17312_v17 = vld [vmem:[%s15657_s8 + $0xa8] sm:$0xf] }
 0x1aa   : > { %v5225_v58 = vsel %vm15663_vm4, %v12486_v38, %v5224_v37  ;;  %v15203_v37 = vld [vmem:[%s15657_s8 + $0x28] sm:$0xff]   ;;  %v15207_v38 = vld [vmem:[%s15657_s8 + $0x3c] sm:$0xff]  }
 0x1ab   : > { %13603 = vmatmul.mubr.msk.bf16.gmra.mrb[12].mxu1 %vm1168_vm3, %v12043_v46  ;;  %v12514_v46 = vcombine.low %v5199_v13, %v5202_v3  ;;  %v5227_v13 = vrot.slane %v15497_v1, 5  ;;  %v15498_v3 = vld [vmem:[%s15657_s8 + $0x80] sm:$0xf]  ;;  %v17333_v1 = vld [vmem:[%s15657_s8 + $0xbc] sm:$0xf] }
 0x1ac   : > { %13606 = vmatprep.mubr.msk.bf16.mxu1 %vm1168_vm3, %v12044_v12  ;;  %v15488_v12 = vld [vmem:[%s15657_s8 + $0x128] sm:$0x1]  ;;  %v12049_v15 = vcombine.low %v15498_v3, %v15499_v53 }
 0x1ad   : > { %13895 = vmatmul.mubr.msk.bf16.gmra.mrb[40].mxu0 %vm1168_vm3, %v12509_v49  ;;  %v15485_v49 = vld [vmem:[%s15657_s8 + $0x64] sm:$0xf]  ;;  %v5207_v44 = vrot.slane %v15488_v12, 5  ;;  %v15502_v12 = vld [vmem:[%s15657_s8 + $0x14c] sm:$0xf]  ;;  %v5228_v27 = vsel %vm15663_vm4, %v5226_v24, %v5227_v13  ;;  %v5229_v5 = vrot.slane %v5227_v13, 4 }
 0x1ae   : > { %13898 = vmatprep.mubr.msk.bf16.mxu0 %vm1168_vm3, %v12510_v29  ;;  %v12046_v29 = vcombine.low %v15485_v49, %v15484_v62  ;;  %v5216_v62 = vrot.slane %v5214_v55, 4  ;;  %v5219_v49 = vrot.slane %v5217_v60, 4  ;;  %v12518_v55 = vcombine.low %v5225_v58, %v5228_v27  ;;  %v17336_v13 = vld [vmem:[%s15657_s8 + $0xc0] sm:$0xf]  ;;  %v15514_v53 = vld [vmem:[%s15657_s8 + $0xc8] sm:$0xf] }
 0x1af   : > { %v5208_v59 = vsel %vm15663_vm4, %v5206_v61, %v5207_v44  ;;  %v5230_v44 = vrot.slane %v15502_v12, 5  ;;  %v7446_v24 = vsel %vm1265_vm0, %v16861_v50, 0  ;;  %v12055_v3 = vcombine.low %v17333_v1, %v17336_v13  ;;  %v15208_v50 = vld [vmem:[%s15657_s8 + $0x44] sm:$0xff]   ;;  %v15212_v58 = vld [vmem:[%s15657_s8 + $0x58] sm:$0xff]  }
 0x1b0   : > { %v12515_v11 = vcombine.low %v5205_v45, %v5208_v59  ;;  %v5218_v33 = vsel %vm15663_vm4, %v5216_v62, %v5217_v60  ;;  %v15506_v59 = vld [vmem:[%s15657_s8 + $0xa0] sm:$0xf]  ;;  %v15510_v62 = vld [vmem:[%s15657_s8 + $0xb4] sm:$0xf]  ;;  %v15215_v27 = vld [vmem:[%s15657_s8 + $0x64] sm:$0xff]  }
 0x1b1   : > { %v5232_v36 = vrot.slane %v5230_v44, 4  ;;  %v12052_v60 = vcombine.low %v15506_v59, %v17299_v32 }
 0x1b3   : > { %13607 = vmatmul.mubr.msk.bf16.gmra.mrb[16].mxu1 %vm1168_vm3, %v12045_v28  ;;  %v12516_v28 = vcombine.low %v5212_v18, %v5215_v54  ;;  %v5231_v18 = vsel %vm15663_vm4, %v5229_v5, %v5230_v44  ;;  %v12058_v44 = vcombine.low %v16775_v16, %v16783_v35  ;;  %v15216_v16 = vld [vmem:[%s15657_s8 + $0x6c] sm:$0xff]   ;;  %v15219_v35 = vld [vmem:[%s15657_s8 + $0x78] sm:$0xff]   ;;  %v12061_v5 = vcombine.low %v16880_v20, %v16889_v42 }
 0x1b4   : > { %13610 = vmatprep.mubr.msk.bf16.mxu1 %vm1168_vm3, %v12046_v29  ;;  %v15496_v29 = vld [vmem:[%s15657_s8 + $0x13c] sm:$0x1]  ;;  %v12064_v20 = vcombine.low %v16991_v10, %v17008_v9  ;;  %v15224_v42 = vld [vmem:[%s15657_s8 + $0x94] sm:$0xff]   ;;  %v12066_v10 = vcombine.low %v17062_v23, %v17077_v14 }
 0x1b5   : > { %13899 = vmatmul.mubr.msk.bf16.gmra.mrb[44].mxu0 %vm1168_vm3, %v12511_v8  ;;  %v15493_v8 = vld [vmem:[%s15657_s8 + $0x78] sm:$0xf]  ;;  %v5220_v6 = vrot.slane %v15496_v29, 5 }
 0x1b6   : > { %13902 = vmatprep.mubr.msk.bf16.mxu0 %vm1168_vm3, %v12512_v2  ;;  %v12048_v2 = vcombine.low %v15493_v8, %v15492_v43  ;;  %v15504_v8 = vld [vmem:[%s15657_s8 + $0x94] sm:$0xf] }
 0x1b7   : > { %v5221_v61 = vsel %vm15663_vm4, %v5219_v49, %v5220_v6  ;;  %v17321_v49 = vld [vmem:[%s15657_s8 + $0xb8] sm:$0xf]  ;;  %v15204_v6 = vld [vmem:[%s15657_s8 + $0x30] sm:$0xff]  }
 0x1b8   : > { %v12517_v26 = vcombine.low %v5218_v33, %v5221_v61  ;;  %v12054_v29 = vcombine.low %v15510_v62, %v17321_v49  ;;  %v17359_v33 = vld [vmem:[%s15657_s8 + $0xd0] sm:$0xf]  ;;  %v17362_v61 = vld [vmem:[%s15657_s8 + $0xd4] sm:$0xf] }
 0x1b9   : > { %v12057_v12 = vcombine.low %v17359_v33, %v17362_v61 }
 0x1bb   : > { %13611 = vmatmul.mubr.msk.bf16.gmra.mrb[20].mxu1 %vm1168_vm3, %v12047_v21  ;;  %v15503_v21 = vld [vmem:[%s15657_s8 + $0x150] sm:$0x1] }
 0x1bc   : > { %13614 = vmatprep.mubr.msk.bf16.mxu1 %vm1168_vm3, %v12048_v2  ;;  %v5233_v43 = vrot.slane %v15503_v21, 5  ;;  %v15505_v2 = vld [vmem:[%s15657_s8 + $0x98] sm:$0xf]  ;;  %v2114_v21 = vld [vmem:[%s15657_s8 + $0xa0] sm:$0xe] }
 0x1bd   : > { %13903 = vmatmul.mubr.msk.bf16.gmra.mrb[48].mxu0 %vm1168_vm3, %v12513_v19  ;;  %v15501_v19 = vld [vmem:[%s15657_s8 + $0x8c] sm:$0xf]  ;;  %v12051_v45 = vcombine.low %v15504_v8, %v15505_v2  ;;  %v12108_v8 = vrot.slane %v2114_v21, 9  ;;  %v2117_v21 = vld [vmem:[%s15657_s8 + $0xdc] sm:$0xe] }
 0x1be   : > { %13906 = vmatprep.mubr.msk.bf16.mxu0 %vm1168_vm3, %v12514_v46  ;;  %v12050_v46 = vcombine.low %v15501_v19, %v15500_v57  ;;  %v5234_v54 = vsel %vm15663_vm4, %v5232_v36, %v5233_v43  ;;  %v17348_v19 = vld [vmem:[%s19479_s1 + $0x10] sm:$0x3]  ;;  %v15227_v36 = vld [vmem:[%s15657_s8 + $0xa0] sm:$0xff]   ;;  %v12065_v43 = vcombine.low %v17020_v0, %v17023_v25 }
 0x1bf   : > { %v12519_v41 = vcombine.low %v5231_v18, %v5234_v54  ;;  %v2276_v18 = vrot.slane %v17321_v49, 5  ;;  %v15231_v54 = vld [vmem:[%s15657_s8 + $0xb4] sm:$0xff]  }
 0x1c3   : > { %13615 = vmatmul.mubr.msk.bf16.gmra.mrb[24].mxu1 %vm1168_vm3, %v12049_v15  ;;  %v17342_v15 = vld [vmem:[%s15657_s8 + $0xcc] sm:$0xf] }
 0x1c4   : > { %13618 = vmatprep.mubr.msk.bf16.mxu1 %vm1168_vm3, %v12050_v46  ;;  %v12056_v57 = vcombine.low %v15514_v53, %v17342_v15  ;;  %v15211_v46 = vld [vmem:[%s15657_s8 + $0x50] sm:$0xff]   ;;  %v2282_v53 = vrot.slane %v17336_v13, 5 }
 0x1c5   : > { %13907 = vmatmul.mubr.msk.bf16.gmra.mrb[52].mxu0 %vm1168_vm3, %v12515_v11  ;;  %v17315_v11 = vld [vmem:[%s15657_s8 + $0xac] sm:$0xf] }
 0x1c6   : > { %13910 = vmatprep.mubr.msk.bf16.mxu0 %vm1168_vm3, %v12516_v28  ;;  %v12053_v28 = vcombine.low %v17312_v17, %v17315_v11  ;;  %v2269_v59 = vrot.slane %v17315_v11, 5 }
 0x1cb   : > { %13619 = vmatmul.mubr.msk.bf16.gmra.mrb[28].mxu1 %vm1168_vm3, %v12051_v45  ;;  %v2266_v45 = vrot.slane %v17312_v17, 5  ;;  %v15518_v17 = vld [vmem:[%s15657_s8 + $0xb0] sm:$0x1] }
 0x1cc   : > { %13622 = vmatprep.mubr.msk.bf16.mxu1 %vm1168_vm3, %v12052_v60 }
 0x1cd   : > { %13911 = vmatmul.mubr.msk.bf16.gmra.mrb[56].mxu0 %vm1168_vm3, %v12517_v26  ;;  %v12059_v26 = vcombine.low %v16792_v4, %v16800_v40  ;;  %v12062_v4 = vcombine.low %v16934_v39, %v16948_v56  ;;  %v15220_v40 = vld [vmem:[%s15657_s8 + $0x80] sm:$0xff]   ;;  %v2263_v39 = vrot.slane %v17299_v32, 5  ;;  %v15228_v32 = vld [vmem:[%s15657_s8 + $0xa8] sm:$0xff]   ;;  %v2268_v11 = vrot.slane %v2266_v45, 4 }
 0x1ce   : > { %13914 = vmatprep.mubr.msk.bf16.mxu0 %vm1168_vm3, %v12518_v55  ;;  %v12060_v55 = vcombine.low %v16849_v52, %v16870_v22  ;;  %v15223_v52 = vld [vmem:[%s15657_s8 + $0x8c] sm:$0xff]   ;;  %v12063_v22 = vcombine.low %v16958_v63, %v16961_v51 }
 0x1cf   : > { %v2265_v2 = vrot.slane %v2263_v39, 4  ;;  %v2264_v60 = vsel %vm15663_vm4, %v12108_v8, %v2263_v39  ;;  %v2270_v49 = vsel %vm15663_vm4, %v2268_v11, %v2269_v59 }
 0x1d1   : > { %v2267_v23 = vsel %vm15663_vm4, %v2265_v2, %v2266_v45  ;;  %v15521_v45 = vld [vmem:[%s15657_s8 + $0xd8] sm:$0x1] }
 0x1d2   : > { %v12133_v62 = vcombine.low %v2264_v60, %v2267_v23  ;;  %v15522_v60 = vld [vmem:[%s15657_s8 + $0xe4] sm:$0xf] }
 0x1d3   : > { %13623 = vmatmul.mubr.msk.bf16.gmra.mrb[32].mxu1 %vm1168_vm3, %v12053_v28  ;;  %v2272_v28 = vrot.slane %v15518_v17, 5  ;;  %v2305_v23 = vrot.slane %v15522_v60, 5  ;;  %v15240_v17 = vld [vmem:[%s15657_s8 + $0xe4] sm:$0xff]  }
 0x1d4   : > { %13626 = vmatprep.mubr.msk.bf16.mxu1 %vm1168_vm3, %v12054_v29  ;;  %v2271_v29 = vrot.slane %v2269_v59, 4  ;;  %v12111_v59 = vrot.slane %v2117_v21, 9  ;;  %v2331_v21 = vrot.slane %v16958_v63, 5 }
 0x1d5   : > { %13915 = vmatmul.mubr.msk.bf16.gmra.mrb[60].mxu0 %vm1168_vm3, %v12519_v41  ;;  %v2115_v41 = vld [vmem:[%s15657_s8 + $0xb4] sm:$0xe] }
 0x1d6   : > { %13920 = vmatprep.mubr.msk.bf16.mxu0 %vm1168_vm3, %v15203_v37  ;;  %v12067_v37 = vcombine.low %v17080_v31, %v17087_v48 }
 0x1db   : > { %13627 = vmatmul.mubr.msk.bf16.gmra.mrb[36].mxu1 %vm1168_vm3, %v12055_v3  ;;  %v2273_v3 = vsel %vm15663_vm4, %v2271_v29, %v2272_v28 }
 0x1dc   : > { %13630 = vmatprep.mubr.msk.bf16.mxu1 %vm1168_vm3, %v12056_v57  ;;  %v15232_v57 = vld [vmem:[%s15657_s8 + $0xbc] sm:$0xff]  }
 0x1dd   : > { %13921 = vmatmul.mubr.msk.bf16.vlgmr.msra.gmra.mrb[0].mxu0 %vm1168_vm3, %v15204_v6  ;;  %v12109_v6 = vrot.slane %v2115_v41, 9  ;;  %v15523_v41 = vld [vmem:[%s15657_s8 + $0xe8] sm:$0xf] }
 0x1de   : > { %13985 = vmatpush3.bf16.msra.mxu0 %v7446_v24  ;;  %13924 = vmatprep.mubr.msk.bf16.mxu0 %vm1168_vm3, %v15207_v38  ;;  %v2278_v38 = vrot.slane %v2276_v18, 4  ;;  %v2279_v24 = vrot.slane %v17333_v1, 5 }
 0x1df   : > { %15133 = vmatprep.subr.msk.bf16.mxu0 %vm1265_vm0, %v17348_v19 }
 0x1e0   : > { %v2280_v1 = vsel %vm15663_vm4, %v2278_v38, %v2279_v24  ;;  %v2118_v38 = vld [vmem:[%s15657_s8 + $0xf0] sm:$0xe] }
 0x1e3   : > { %13631 = vmatmul.mubr.msk.bf16.gmra.mrb[40].mxu1 %vm1168_vm3, %v12057_v12  ;;  %v15235_v12 = vld [vmem:[%s15657_s8 + $0xc8] sm:$0xff]  }
 0x1e4   : > { %13634 = vmatprep.mubr.msk.bf16.mxu1 %vm1168_vm3, %v12058_v44  ;;  %v2116_v44 = vld [vmem:[%s15657_s8 + $0xc8] sm:$0xe] }
 0x1e5   : > { %13925 = vmatmul.mubr.msk.bf16.gmra.mrb[4].mxu0 %vm1168_vm3, %v15208_v50  ;;  %v2277_v50 = vsel %vm15663_vm4, %v12109_v6, %v2276_v18  ;;  %v12110_v13 = vrot.slane %v2116_v44, 9  ;;  %v15243_v6 = vld [vmem:[%s15657_s8 + $0xf0] sm:$0xff]  }
 0x1e6   : > { %13928 = vmatprep.mubr.msk.bf16.mxu0 %vm1168_vm3, %v15211_v46  ;;  %v2289_v46 = vrot.slane %v17342_v15, 5 }
 0x1eb   : > { %13635 = vmatmul.mubr.msk.bf16.gmra.mrb[44].mxu1 %vm1168_vm3, %v12059_v26  ;;  %v2281_v26 = vrot.slane %v2279_v24, 4 }
 0x1ec   : > { %13638 = vmatprep.mubr.msk.bf16.mxu1 %vm1168_vm3, %v12060_v55  ;;  %v2284_v55 = vrot.slane %v2282_v53, 4 }
 0x1ed   : > { %13929 = vmatmul.mubr.msk.bf16.gmra.mrb[8].mxu0 %vm1168_vm3, %v15212_v58  ;;  %v12134_v58 = vcombine.low %v2270_v49, %v2273_v3  ;;  %v2283_v15 = vsel %vm15663_vm4, %v2281_v26, %v2282_v53  ;;  %v2307_v3 = vrot.slane %v2305_v23, 4  ;;  %v15527_v26 = vld [vmem:[%s15657_s8 + $0xfc] sm:$0xf] }
 0x1ee   : > { %13932 = vmatprep.mubr.msk.bf16.mxu0 %vm1168_vm3, %v15215_v27  ;;  %v12135_v27 = vcombine.low %v2277_v50, %v2280_v1  ;;  %v12112_v1 = vrot.slane %v2118_v38, 9 }
 0x1f3   : > { %13639 = vmatmul.mubr.msk.bf16.gmra.mrb[48].mxu1 %vm1168_vm3, %v12061_v5  ;;  %v2291_v5 = vrot.slane %v2289_v46, 4 }
 0x1f4   : > { %13642 = vmatprep.mubr.msk.bf16.mxu1 %vm1168_vm3, %v12062_v4  ;;  %v2292_v4 = vrot.slane %v17359_v33, 5  ;;  %v2290_v33 = vsel %vm15663_vm4, %v12110_v13, %v2289_v46 }
 0x1f5   : > { %13933 = vmatmul.mubr.msk.bf16.gmra.mrb[12].mxu0 %vm1168_vm3, %v15216_v16  ;;  %v15519_v16 = vld [vmem:[%s15657_s8 + $0xc4] sm:$0x1] }
 0x1f6   : > { %13936 = vmatprep.mubr.msk.bf16.mxu0 %vm1168_vm3, %v15219_v35  ;;  %v2285_v35 = vrot.slane %v15519_v16, 5  ;;  %v2294_v8 = vrot.slane %v2292_v4, 4  ;;  %v15244_v16 = vld [vmem:[%s15657_s8 + $0xf8] sm:$0xff]  }
 0x1fb   : > { %13643 = vmatmul.mubr.msk.bf16.gmra.mrb[52].mxu1 %vm1168_vm3, %v12063_v22  ;;  %v15236_v22 = vld [vmem:[%s15657_s8 + $0xd0] sm:$0xff]  }
 0x1fc   : > { %13646 = vmatprep.mubr.msk.bf16.mxu1 %vm1168_vm3, %v12064_v20  ;;  %v2293_v20 = vsel %vm15663_vm4, %v2291_v5, %v2292_v4  ;;  %v2328_v5 = vrot.slane %v16948_v56, 5  ;;  %v15247_v4 = vld [vmem:[%s15657_s8 + $0x104] sm:$0xff]  }
 0x1fd   : > { %13937 = vmatmul.mubr.msk.bf16.gmra.mrb[16].mxu0 %vm1168_vm3, %v15220_v40  ;;  %v2286_v40 = vsel %vm15663_vm4, %v2284_v55, %v2285_v35  ;;  %v2321_v55 = vrot.slane %v15527_v26, 5  ;;  %v12681_v56 = vld [vmem:[%s15657_s8 + $0x28] sm:$0xf] }
 0x1fe   : > { %13940 = vmatprep.mubr.msk.bf16.mxu0 %vm1168_vm3, %v15223_v52  ;;  %v2295_v52 = vrot.slane %v17362_v61, 5  ;;  %v2298_v61 = vrot.slane %v15521_v45, 5  ;;  %v6548_v60 = vshrl.u32 %v12681_v56, 16 }
 0x200   : > { %v2297_v2 = vrot.slane %v2295_v52, 4  ;;  %v2296_v18 = vsel %vm15663_vm4, %v2294_v8, %v2295_v52  ;;  %v2334_v8 = vrot.slane %v16961_v51, 5 }
 0x203   : > { %13647 = vmatmul.mubr.msk.bf16.gmra.mrb[56].mxu1 %vm1168_vm3, %v12065_v43  ;;  %v12136_v43 = vcombine.low %v2283_v15, %v2286_v40  ;;  %v2119_v15 = vld [vmem:[%s15657_s8 + $0x104] sm:$0xe] }
 0x204   : > { %13650 = vmatprep.mubr.msk.bf16.mxu1 %vm1168_vm3, %v12066_v10  ;;  %v12137_v10 = vcombine.low %v2290_v33, %v2293_v20  ;;  %v2323_v33 = vrot.slane %v2321_v55, 4  ;;  %v15528_v20 = vld [vmem:[%s15657_s8 + $0x100] sm:$0x1] }
 0x205   : > { %13941 = vmatmul.mubr.msk.bf16.gmra.mrb[20].mxu0 %vm1168_vm3, %v15224_v42  ;;  %v15520_v42 = vld [vmem:[%s15657_s8 + $0xe0] sm:$0xf] }
 0x206   : > { %13944 = vmatprep.mubr.msk.bf16.mxu0 %vm1168_vm3, %v15227_v36  ;;  %v2302_v39 = vrot.slane %v15520_v42, 5  ;;  %v15239_v36 = vld [vmem:[%s15657_s8 + $0xdc] sm:$0xff]   ;;  %v2324_v42 = vrot.slane %v15528_v20, 5 }
 0x208   : > { %v2303_v28 = vsel %vm15663_vm4, %v12111_v59, %v2302_v39  ;;  %v15251_v59 = vld [vmem:[%s15657_s8 + $0x118] sm:$0xff]  }
 0x20b   : > { %13651 = vmatmul.mubr.msk.bf16.gmra.mrb[60].mxu1 %vm1168_vm3, %v12067_v37  ;;  %v2308_v37 = vrot.slane %v15523_v41, 5  ;;  %v2333_v41 = vrot.slane %v2331_v21, 4 }
 0x20c   : > { %13688 = vmatprep.mubr.msk.bf16.mxu1 %vm1168_vm3, %v12133_v62  ;;  %v15524_v62 = vld [vmem:[%s15657_s8 + $0xf4] sm:$0xf] }
 0x20d   : > { %13945 = vmatmul.mubr.msk.bf16.gmra.mrb[24].mxu0 %vm1168_vm3, %v15228_v32  ;;  %v2304_v32 = vrot.slane %v2302_v39, 4  ;;  %v2315_v29 = vrot.slane %v15524_v62, 5  ;;  %v2310_v53 = vrot.slane %v2308_v37, 4  ;;  %v12113_v39 = vrot.slane %v2119_v15, 9  ;;  %v12684_v15 = vld [vmem:[%s15657_s8 + $0x34] sm:$0xf] }
 0x20e   : > { %13948 = vmatprep.mubr.msk.bf16.mxu0 %vm1168_vm3, %v15231_v54  ;;  %v2299_v54 = vsel %vm15663_vm4, %v2297_v2, %v2298_v61  ;;  %v15248_v2 = vld [vmem:[%s15657_s8 + $0x10c] sm:$0xff]   ;;  %v2341_v61 = vrot.slane %v17008_v9, 5 }
 0x20f   : > { %v2306_v11 = vsel %vm15663_vm4, %v2304_v32, %v2305_v23  ;;  %v12138_v24 = vcombine.low %v2296_v18, %v2299_v54  ;;  %v2317_v46 = vrot.slane %v2315_v29, 4  ;;  %v2316_v35 = vsel %vm15663_vm4, %v12112_v1, %v2315_v29  ;;  %v2120_v32 = vld [vmem:[%s15657_s8 + $0x118] sm:$0xe]  ;;  %v12682_v18 = vld [vmem:[%s15657_s8 + $0x2c] sm:$0xf] }
 0x210   : > { %v12139_v49 = vcombine.low %v2303_v28, %v2306_v11  ;;  %v2329_v63 = vsel %vm15663_vm4, %v12113_v39, %v2328_v5  ;;  %v6551_v28 = vshll.u32 %v12681_v56, 16  ;;  %v12114_v11 = vrot.slane %v2120_v32, 9  ;;  %v12683_v9 = vld [vmem:[%s15657_s8 + $0x30] sm:$0xf]  ;;  %v12687_v39 = vld [vmem:[%s15657_s8 + $0x40] sm:$0xf] }
 0x211   : > { %v2343_v62 = vrot.slane %v2341_v61, 4  ;;  %v2344_v29 = vrot.slane %v17020_v0, 5  ;;  %v6561_v38 = vshrl.u32 %v12682_v18, 16  ;;  %v2347_v0 = vrot.slane %v17023_v25, 5  ;;  %v15256_v56 = vld [vmem:[%s15657_s8 + $0x134] sm:$0xff]  }
 0x212   : > { %v12688_v32 = vld [vmem:[%s15657_s8 + $0x44] sm:$0xf] }
 0x213   : > { %13689 = vmatmul.mubr.msk.bf16.vlgmr.msra.gmra.mrb[32].mxu1 %vm1168_vm3, %v12134_v58  ;;  %v2309_v58 = vsel %vm15663_vm4, %v2307_v3, %v2308_v37  ;;  %v2336_v37 = vrot.slane %v2334_v8, 4  ;;  %v2345_v1 = vsel %vm15663_vm4, %v2343_v62, %v2344_v29  ;;  %v6563_v26 = vrot.slane %v6561_v38, 4 }
 0x214   : > { %13692 = vmatprep.mubr.msk.bf16.mxu1 %vm1168_vm3, %v12135_v27  ;;  %v6611_v38 = vshll.u32 %v12688_v32, 16 }
 0x215   : > { %13949 = vmatmul.mubr.msk.bf16.gmra.mrb[28].mxu0 %vm1168_vm3, %v15232_v57  ;;  %v15525_v57 = vld [vmem:[%s15657_s8 + $0xec] sm:$0x1] }
 0x216   : > { %13952 = vmatprep.mubr.msk.bf16.mxu0 %vm1168_vm3, %v15235_v12  ;;  %v2311_v50 = vrot.slane %v15525_v57, 5  ;;  %v15526_v12 = vld [vmem:[%s15657_s8 + $0xf8] sm:$0xf]  ;;  %v6553_v57 = vrot.slane %v6551_v28, 5 }
 0x217   : > { %v2318_v44 = vrot.slane %v15526_v12, 5  ;;  %v15255_v12 = vld [vmem:[%s15657_s8 + $0x12c] sm:$0xff]  }
 0x218   : > { %v2312_v27 = vsel %vm15663_vm4, %v2310_v53, %v2311_v50  ;;  %v15252_v53 = vld [vmem:[%s15657_s8 + $0x120] sm:$0xff]   ;;  %v2342_v50 = vsel %vm15663_vm4, %v12114_v11, %v2341_v61  ;;  %v12685_v11 = vld [vmem:[%s15657_s8 + $0x38] sm:$0x1] }
 0x219   : > { %v2319_v13 = vsel %vm15663_vm4, %v2317_v46, %v2318_v44  ;;  %v12140_v40 = vcombine.low %v2309_v58, %v2312_v27  ;;  %v2354_v46 = vrot.slane %v17077_v14, 5  ;;  %v2121_v58 = vld [vmem:[%s15657_s8 + $0x12c] sm:$0xe] }
 0x21a   : > { %v12141_v52 = vcombine.low %v2316_v35, %v2319_v13  ;;  %v2346_v35 = vrot.slane %v2344_v29, 4  ;;  %v2349_v13 = vrot.slane %v2347_v0, 4  ;;  %v12115_v14 = vrot.slane %v2121_v58, 9 }
 0x21b   : > { %13693 = vmatmul.mubr.msk.bf16.gmra.mrb[36].mxu1 %vm1168_vm3, %v12136_v43 }
 0x21c   : > { %13696 = vmatprep.mubr.msk.bf16.mxu1 %vm1168_vm3, %v12137_v10  ;;  %v2325_v10 = vsel %vm15663_vm4, %v2323_v33, %v2324_v42  ;;  %v12686_v42 = vld [vmem:[%s15657_s8 + $0x3c] sm:$0xf] }
 0x21d   : > { %13953 = vmatmul.mubr.msk.bf16.gmra.mrb[32].mxu0 %vm1168_vm3, %v15236_v22  ;;  %v2320_v22 = vrot.slane %v2318_v44, 4  ;;  %v6567_v44 = vshll.u32 %v12683_v9, 16  ;;  %v6595_v61 = vshll.u32 %v12686_v42, 16 }
 0x21e   : > { %13956 = vmatprep.mubr.msk.bf16.mxu0 %vm1168_vm3, %v15239_v36  ;;  %v2330_v36 = vrot.slane %v2328_v5, 4  ;;  %v2350_v5 = vrot.slane %v17030_v34, 5  ;;  %v6577_v34 = vshll.u32 %v12684_v15, 16 }
 0x21f   : > { %v2322_v43 = vsel %vm15663_vm4, %v2320_v22, %v2321_v55  ;;  %v6571_v55 = vshrl.u32 %v12683_v9, 16  ;;  %v17551_v33 = vrot.slane %v6567_v44, 5  ;;  %v12691_v9 = vld [vmem:[%s15657_s8 + $0x50] sm:$0xf]  ;;  %v15260_v44 = vld [vmem:[%s15657_s8 + $0x148] sm:$0xff]  }
 0x220   : > { %v2332_v45 = vsel %vm15663_vm4, %v2330_v36, %v2331_v21  ;;  %v12142_v23 = vcombine.low %v2322_v43, %v2325_v10  ;;  %v2351_v36 = vsel %vm15663_vm4, %v2349_v13, %v2350_v5  ;;  %v2360_v21 = vrot.slane %v17087_v48, 5 }
 0x221   : > { %v12143_v54 = vcombine.low %v2329_v63, %v2332_v45  ;;  %v17553_v20 = vrot.slane %v6571_v55, 4  ;;  %v6581_v10 = vshrl.u32 %v12684_v15, 16  ;;  %v15259_v63 = vld [vmem:[%s15657_s8 + $0x140] sm:$0xff]   ;;  %v6592_v45 = vshrl.u32 %v12686_v42, 16 }
 0x222   : > { %v17583_v62 = vrot.slane %v6577_v34, 5  ;;  %v17603_v5 = vrot.slane %v6611_v38, 5 }
 0x223   : > { %13697 = vmatmul.mubr.msk.bf16.gmra.mrb[40].mxu1 %vm1168_vm3, %v12138_v24  ;;  %v6550_v24 = vrot.slane %v6548_v60, 4  ;;  %v6601_v60 = vshll.u32 %v12687_v39, 16  ;;  %v6574_v28 = vor.u32 %v17553_v20, %v17551_v33  ;;  %v6583_v29 = vrot.slane %v6581_v10, 4 }
 0x224   : > { %13700 = vmatprep.mubr.msk.bf16.mxu1 %vm1168_vm3, %v12139_v49  ;;  %v2335_v49 = vsel %vm15663_vm4, %v2333_v41, %v2334_v8  ;;  %v2355_v8 = vsel %vm15663_vm4, %v12115_v14, %v2354_v46 }
 0x225   : > { %13957 = vmatmul.mubr.msk.bf16.gmra.mrb[36].mxu0 %vm1168_vm3, %v15240_v17  ;;  %v15529_v17 = vld [vmem:[%s15657_s8 + $0x114] sm:$0x1]  ;;  %v6575_v34 = vrot.slane %v6574_v28, 4 }
 0x226   : > { %13960 = vmatprep.mubr.msk.bf16.mxu0 %vm1168_vm3, %v15243_v6  ;;  %v2337_v51 = vrot.slane %v15529_v17, 5  ;;  %v6557_v6 = vshll.u32 %v12682_v18, 16  ;;  %v12689_v18 = vld [vmem:[%s15657_s8 + $0x48] sm:$0xf]  ;;  %v2363_v17 = vrot.slane %v17092_v30, 5  ;;  %v6597_v30 = vrot.slane %v6595_v61, 5 }
 0x227   : > { %v6580_v28 = vsel %vm15855_vm7, %v6575_v34, %v17583_v62 }
 0x228   : > { %v2338_v3 = vsel %vm15663_vm4, %v2336_v37, %v2337_v51  ;;  %v17543_v27 = vrot.slane %v6557_v6, 5  ;;  %v2362_v37 = vrot.slane %v2360_v21, 4  ;;  %v6594_v6 = vrot.slane %v6592_v45, 4 }
 0x229   : > { %v12144_v25 = vcombine.low %v2335_v49, %v2338_v3  ;;  %v12692_v49 = vld [vmem:[%s15657_s8 + $0x54] sm:$0xf]  ;;  %v17588_v3 = vrot.slane %v6601_v60, 5 }
 0x22a   : > { %v6564_v22 = vor.u32 %v6563_v26, %v17543_v27  ;;  %v12693_v26 = vld [vmem:[%s15657_s8 + $0x58] sm:$0xf]  ;;  %v6645_v55 = vshll.u32 %v12692_v49, 16  ;;  %v6598_v13 = vor.u32 %v6597_v30, %v6594_v6 }
 0x22b   : > { %13701 = vmatmul.mubr.msk.bf16.gmra.mrb[44].mxu1 %vm1168_vm3, %v12140_v40  ;;  %v2356_v40 = vrot.slane %v2354_v46, 4  ;;  %v6655_v42 = vshll.u32 %v12693_v26, 16 }
 0x22c   : > { %13704 = vmatprep.mubr.msk.bf16.mxu1 %vm1168_vm3, %v12141_v52  ;;  %v2357_v52 = vrot.slane %v17080_v31, 5  ;;  %v2348_v31 = vsel %vm15663_vm4, %v2346_v35, %v2347_v0  ;;  %v6584_v35 = vor.u32 %v6583_v29, %v17583_v62 }
 0x22d   : > { %13961 = vmatmul.mubr.msk.bf16.gmra.mrb[40].mxu0 %vm1168_vm3, %v15244_v16  ;;  %v12145_v16 = vcombine.low %v2342_v50, %v2345_v1  ;;  %v12146_v48 = vcombine.low %v2348_v31, %v2351_v36  ;;  %v6636_v50 = vshrl.u32 %v12691_v9, 16  ;;  %v6639_v1 = vshll.u32 %v12691_v9, 16  ;;  %v12694_v36 = vld [vmem:[%s15657_s8 + $0x5c] sm:$0xf] }
 0x22e   : > { %13964 = vmatprep.mubr.msk.bf16.mxu0 %vm1168_vm3, %v15247_v4  ;;  %v6554_v4 = vor.u32 %v6553_v57, %v6550_v24  ;;  %v2359_v41 = vrot.slane %v2357_v52, 4  ;;  %v6615_v24 = vshrl.u32 %v12688_v32, 16  ;;  %v6625_v57 = vshrl.u32 %v12689_v18, 16  ;;  %v12697_v32 = vld [vmem:[%s15657_s8 + $0x68] sm:$0xf] }
 0x22f   : > { %v6641_v20 = vrot.slane %v6639_v1, 5  ;;  %v6689_v29 = vshll.u32 %v12697_v32, 16  ;;  %v6693_v9 = vshrl.u32 %v12697_v32, 16  ;;  %v12695_v1 = vld [vmem:[%s15657_s8 + $0x60] sm:$0x1] }
 0x230   : > { %v17565_v43 = vrot.slane %v6554_v4, 4  ;;  %v2361_v46 = vsel %vm15663_vm4, %v2359_v41, %v2360_v21  ;;  %v6617_v4 = vrot.slane %v6615_v24, 4  ;;  %v6659_v21 = vshrl.u32 %v12693_v26, 16  ;;  %v12699_v26 = vld [vmem:[%s15657_s8 + $0x70] sm:$0xf] }
 0x232   : > { %v6560_v51 = vsel %vm15855_vm7, %v17565_v43, %v17543_v27  ;;  %v6587_v27 = vshll.u32 %v12685_v11, 16  ;;  %v6585_v43 = vrot.slane %v6584_v35, 4  ;;  %v6618_v45 = vor.u32 %v6617_v4, %v17603_v5 }
 0x233   : > { %13705 = vmatmul.mubr.msk.bf16.gmra.mrb[48].mxu1 %vm1168_vm3, %v12142_v23  ;;  %v6605_v23 = vshrl.u32 %v12687_v39, 16  ;;  %v17610_v39 = vrot.slane %v6645_v55, 5 }
 0x234   : > { %13708 = vmatprep.mubr.msk.bf16.mxu1 %vm1168_vm3, %v12143_v54  ;;  %v6589_v10 = vrot.slane %v6587_v27, 5  ;;  %v6619_v38 = vrot.slane %v6618_v45, 4  ;;  %v12703_v45 = vld [vmem:[%s15657_s8 + $0x80] sm:$0xf] }
 0x235   : > { %13965 = vmatmul.mubr.msk.bf16.gmra.mrb[44].mxu0 %vm1168_vm3, %v15248_v2  ;;  %v2358_v2 = vsel %vm15663_vm4, %v2356_v40, %v2357_v52  ;;  %v6607_v0 = vrot.slane %v6605_v23, 4  ;;  %v6627_v40 = vrot.slane %v6625_v57, 4  ;;  %v6657_v23 = vrot.slane %v6655_v42, 5 }
 0x236   : > { %13968 = vmatprep.mubr.msk.bf16.mxu0 %vm1168_vm3, %v15251_v59  ;;  %v6565_v59 = vrot.slane %v6564_v22, 4  ;;  %v12147_v54 = vcombine.low %v2355_v8, %v2358_v2  ;;  %v12690_v22 = vld [vmem:[%s15657_s8 + $0x4c] sm:$0x1]  ;;  %v6599_v8 = vrot.slane %v6598_v13, 4  ;;  %v12696_v2 = vld [vmem:[%s15657_s8 + $0x64] sm:$0xf]  ;;  %v6590_v11 = vsel %vm15855_vm7, %v6585_v43, %v6589_v10 }
 0x237   : > { %v6608_v15 = vor.u32 %v6607_v0, %v17588_v3 }
 0x238   : > { %v6570_v58 = vsel %vm15855_vm7, %v6565_v59, %v17551_v33  ;;  %v6638_v33 = vrot.slane %v6636_v50, 4  ;;  %v6631_v59 = vshll.u32 %v12690_v22, 16  ;;  %v6604_v6 = vsel %vm15855_vm7, %v6599_v8, %v17588_v3 }
 0x23a   : > { %v6642_v60 = vor.u32 %v6641_v20, %v6638_v33  ;;  %v6633_v24 = vrot.slane %v6631_v59, 5  ;;  %v6709_v20 = vshll.u32 %v12699_v26, 16 }
 0x23b   : > { %13709 = vmatmul.mubr.msk.bf16.gmra.mrb[52].mxu1 %vm1168_vm3, %v12144_v25  ;;  %v6649_v25 = vshrl.u32 %v12692_v49, 16  ;;  %v12698_v49 = vld [vmem:[%s15657_s8 + $0x6c] sm:$0xf] }
 0x23c   : > { %13712 = vmatprep.mubr.msk.bf16.mxu1 %vm1168_vm3, %v12145_v16  ;;  %v15263_v16 = vld [vmem:[%s15657_s8 + $0x154] sm:$0xff]   ;;  %v6699_v27 = vshll.u32 %v12698_v49, 16  ;;  %v6703_v55 = vshrl.u32 %v12698_v49, 16 }
 0x23d   : > { %13969 = vmatmul.mubr.msk.bf16.gmra.mrb[48].mxu0 %vm1168_vm3, %v15252_v53  ;;  %v6621_v53 = vshll.u32 %v12689_v18, 16  ;;  %v6651_v31 = vrot.slane %v6649_v25, 4  ;;  %v6669_v18 = vshrl.u32 %v12694_v36, 16  ;;  %v12763_v25 = vcombine.low %v6580_v28, %v6590_v11 }
 0x23e   : > { %13972 = vmatprep.mubr.msk.bf16.mxu0 %vm1168_vm3, %v15255_v12  ;;  %v2364_v12 = vsel %vm15663_vm4, %v2362_v37, %v2363_v17  ;;  %v6661_v37 = vrot.slane %v6659_v21, 4  ;;  %v6680_v17 = vshrl.u32 %v12696_v2, 16  ;;  %v8300_v21 = vsel %vm1265_vm0, %v17348_v19, 0 }
 0x23f   : > { %v17606_v14 = vrot.slane %v6621_v53, 5  ;;  %v12148_v52 = vcombine.low %v2361_v46, %v2364_v12  ;;  %v6652_v41 = vor.u32 %v6651_v31, %v17610_v39  ;;  %v6643_v53 = vrot.slane %v6642_v60, 4 }
 0x240   : > { %v6671_v57 = vrot.slane %v6669_v18, 4  ;;  %v6662_v46 = vor.u32 %v6661_v37, %v6657_v23  ;;  %v6682_v3 = vrot.slane %v6680_v17, 4  ;;  %v17657_v31 = vrot.slane %v6699_v27, 5  ;;  %v12706_v37 = vld [vmem:[%s15657_s8 + $0x8c] sm:$0xf] }
 0x241   : > { %v6628_v61 = vor.u32 %v6627_v40, %v17606_v14  ;;  %v6653_v50 = vrot.slane %v6652_v41, 4  ;;  %v6624_v35 = vsel %vm15855_vm7, %v6619_v38, %v17606_v14  ;;  %v12701_v40 = vld [vmem:[%s15657_s8 + $0x78] sm:$0xf]  ;;  %v6713_v14 = vshrl.u32 %v12699_v26, 16  ;;  %v12705_v26 = vld [vmem:[%s15657_s8 + $0x88] sm:$0x1] }
 0x242   : > { %v17654_v33 = vrot.slane %v6662_v46, 4  ;;  %v6727_v43 = vshll.u32 %v12701_v40, 16  ;;  %v17668_v60 = vrot.slane %v6709_v20, 5  ;;  %v6743_v11 = vshll.u32 %v12703_v45, 16 }
 0x243   : > { %13713 = vmatmul.mubr.msk.bf16.gmra.mrb[56].mxu1 %vm1168_vm3, %v12146_v48  ;;  %v6665_v48 = vshll.u32 %v12694_v36, 16  ;;  %v6629_v0 = vrot.slane %v6628_v61, 4  ;;  %v6658_v22 = vsel %vm15855_vm7, %v6653_v50, %v6657_v23  ;;  %v12700_v36 = vld [vmem:[%s15657_s8 + $0x74] sm:$0x1]  ;;  %v12704_v23 = vld [vmem:[%s15657_s8 + $0x84] sm:$0xf] }
 0x244   : > { %13716 = vmatprep.mubr.msk.bf16.mxu1 %vm1168_vm3, %v12147_v54  ;;  %v15264_v54 = vld [vmem:[%s15657_s8 + $0x15c] sm:$0xff]   ;;  %v6719_v19 = vshll.u32 %v12700_v36, 16  ;;  %v6715_v41 = vrot.slane %v6713_v14, 4  ;;  %v6757_v38 = vshrl.u32 %v12704_v23, 16  ;;  %v12708_v50 = vld [vmem:[%s15657_s8 + $0x94] sm:$0xf] }
 0x245   : > { %13973 = vmatmul.mubr.msk.bf16.gmra.mrb[52].mxu0 %vm1168_vm3, %v15256_v56  ;;  %v12762_v56 = vcombine.low %v6560_v51, %v6570_v58  ;;  %v6683_v51 = vshll.u32 %v12696_v2, 16  ;;  %v17633_v62 = vrot.slane %v6665_v48, 5  ;;  %v6695_v58 = vrot.slane %v6693_v9, 4 }
 0x246   : > { %13976 = vmatprep.mubr.msk.bf16.mxu0 %vm1168_vm3, %v15259_v63  ;;  %v6609_v63 = vrot.slane %v6608_v15, 4  ;;  %v6634_v13 = vsel %vm15855_vm7, %v6629_v0, %v6633_v24  ;;  %v6675_v15 = vshll.u32 %v12695_v1, 16  ;;  %v17679_v49 = vrot.slane %v6719_v19, 5 }
 0x247   : > { %v6685_v12 = vrot.slane %v6683_v51, 5  ;;  %v6672_v4 = vor.u32 %v6671_v57, %v17633_v62  ;;  %v12765_v8 = vcombine.low %v6624_v35, %v6634_v13  ;;  %v6668_v59 = vsel %vm15855_vm7, %v17654_v33, %v17633_v62 }
 0x248   : > { %v6614_v30 = vsel %vm15855_vm7, %v6609_v63, %v17603_v5  ;;  %v6648_v5 = vsel %vm15855_vm7, %v6643_v53, %v17610_v39  ;;  %v6705_v39 = vrot.slane %v6703_v55, 4  ;;  %v6677_v63 = vrot.slane %v6675_v15, 5 }
 0x249   : > { %v6686_v42 = vor.u32 %v6685_v12, %v6682_v3  ;;  %v12766_v2 = vcombine.low %v6648_v5, %v6658_v22  ;;  %v6673_v32 = vrot.slane %v6672_v4, 4  ;;  %v6729_v51 = vrot.slane %v6727_v43, 5  ;;  %v12709_v4 = vld [vmem:[%s15657_s8 + $0x98] sm:$0xf] }
 0x24a   : > { %v6768_v0 = vshrl.u32 %v12706_v37, 16  ;;  %v6771_v53 = vshll.u32 %v12706_v37, 16  ;;  %v6716_v57 = vor.u32 %v6715_v41, %v17668_v60  ;;  %v6745_v27 = vrot.slane %v6743_v11, 5 }
 0x24b   : > { %13717 = vmatmul.mubr.msk.bf16.gmra.mrb[60].mxu1 %vm1168_vm3, %v12148_v52  ;;  %v12702_v52 = vld [vmem:[%s15657_s8 + $0x7c] sm:$0xf]  ;;  %v6687_v48 = vrot.slane %v6686_v42, 4  ;;  %v6678_v24 = vsel %vm15855_vm7, %v6673_v32, %v6677_v63  ;;  %v6787_v5 = vshll.u32 %v12708_v50, 16  ;;  %v6791_v15 = vshrl.u32 %v12708_v50, 16 }
 0x24c   : > { %v6733_v10 = vshll.u32 %v12702_v52, 16  ;;  %v6737_v61 = vshrl.u32 %v12702_v52, 16  ;;  %v6770_v35 = vrot.slane %v6768_v0, 4  ;;  %v6773_v13 = vrot.slane %v6771_v53, 5 }
 0x24d   : > { %13977 = vmatmul.mubr.msk.bf16.gmra.mrb[56].mxu0 %vm1168_vm3, %v15260_v44  ;;  %v17638_v44 = vrot.slane %v6689_v29, 5  ;;  %v12707_v29 = vld [vmem:[%s15657_s8 + $0x90] sm:$0xf]  ;;  %v6763_v52 = vshll.u32 %v12705_v26, 16  ;;  %v12767_v20 = vcombine.low %v6668_v59, %v6678_v24  ;;  %v6801_v63 = vshrl.u32 %v12709_v4, 16 }
 0x24e   : > { %13980 = vmatprep.mubr.msk.bf16.mxu0 %vm1168_vm3, %v15263_v16  ;;  %v12764_v16 = vcombine.low %v6604_v6, %v6614_v30  ;;  %v17674_v28 = vrot.slane %v6733_v10, 5  ;;  %v6739_v9 = vrot.slane %v6737_v61, 4  ;;  %v6747_v6 = vshrl.u32 %v12703_v45, 16 }
 0x24f   : > { %v6696_v34 = vor.u32 %v6695_v58, %v17638_v44  ;;  %v6753_v30 = vshll.u32 %v12704_v23, 16  ;;  %v6692_v62 = vsel %vm15855_vm7, %v6687_v48, %v17638_v44  ;;  %v6777_v1 = vshll.u32 %v12707_v29, 16 }
 0x250   : > { %v6781_v46 = vshrl.u32 %v12707_v29, 16  ;;  %v6740_v55 = vor.u32 %v6739_v9, %v17674_v28  ;;  %v6759_v44 = vrot.slane %v6757_v38, 4  ;;  %v6774_v43 = vor.u32 %v6773_v13, %v6770_v35  ;;  %v12714_v38 = vld [vmem:[%s15657_s8 + $0xac] sm:$0xf] }
 0x251   : > { %v6697_v18 = vrot.slane %v6696_v34, 4  ;;  %v17698_v22 = vrot.slane %v6777_v1, 5  ;;  %v6789_v10 = vrot.slane %v6787_v5, 5  ;;  %v6765_v61 = vrot.slane %v6763_v52, 5 }
 0x252   : > { %v6783_v33 = vrot.slane %v6781_v46, 4  ;;  %v6741_v34 = vrot.slane %v6740_v55, 4  ;;  %v6803_v9 = vrot.slane %v6801_v63, 4  ;;  %v6841_v13 = vshll.u32 %v12714_v38, 16 }
 0x253   : > { %v6702_v3 = vsel %vm15855_vm7, %v6697_v18, %v17657_v31 }
 0x254   : > { %v12768_v14 = vcombine.low %v6692_v62, %v6702_v3  ;;  %v6784_v59 = vor.u32 %v6783_v33, %v17698_v22  ;;  %v12718_v33 = vld [vmem:[%s15657_s8 + $0xbc] sm:$0xf]  ;;  %v17762_v63 = vrot.slane %v6841_v13, 5 }
 0x255   : > { %13981 = vmatmul.mubr.msk.bf16.gmra.mrb[60].mxu0 %vm1168_vm3, %v15264_v54  ;;  %v6706_v54 = vor.u32 %v6705_v39, %v17657_v31  ;;  %v6797_v39 = vshll.u32 %v12709_v4, 16 }
 0x256   : > { %13986 = vmatprep.mubr.msk.bf16.mxu0 %vm1168_vm3, %v12762_v56  ;;  %v6724_v56 = vshrl.u32 %v12701_v40, 16  ;;  %v6717_v40 = vrot.slane %v6716_v57, 4 }
 0x257   : > { %v17689_v12 = vrot.slane %v6706_v54, 4  ;;  %v17720_v29 = vrot.slane %v6797_v39, 5 }
 0x258   : > { %v6726_v17 = vrot.slane %v6724_v56, 4  ;;  %v12712_v56 = vld [vmem:[%s15657_s8 + $0xa4] sm:$0xf]  ;;  %v6722_v45 = vsel %vm15855_vm7, %v6717_v40, %v17679_v49  ;;  %v6845_v40 = vshrl.u32 %v12714_v38, 16 }
 0x259   : > { %v6821_v48 = vshll.u32 %v12712_v56, 16  ;;  %v6825_v18 = vshrl.u32 %v12712_v56, 16  ;;  %v6804_v26 = vor.u32 %v6803_v9, %v17720_v29 }
 0x25a   : > { %v6730_v58 = vor.u32 %v6729_v51, %v6726_v17  ;;  %v6775_v17 = vrot.slane %v6774_v43, 4  ;;  %v12710_v51 = vld [vmem:[%s15657_s8 + $0x9c] sm:$0x1] }
 0x25b   : > { %v17729_v53 = vrot.slane %v6821_v48, 5  ;;  %v6827_v62 = vrot.slane %v6825_v18, 4  ;;  %v6807_v55 = vshll.u32 %v12710_v51, 16  ;;  %v17770_v18 = vld [vmem:[%s15657_s8 + $0xb0] sm:$0x1] }
 0x25c   : > { %v6731_v42 = vrot.slane %v6730_v58, 4  ;;  %v6780_v58 = vsel %vm15855_vm7, %v6775_v17, %v17698_v22 }
 0x25d   : > { %13987 = vmatmul.mubr.msk.bf16.vlgmr.msra.gmra.mrb[0].mxu0 %vm1168_vm3, %v12763_v25  ;;  %v6749_v25 = vrot.slane %v6747_v6, 4 }
 0x25e   : > { %14051 = vmatpush3.bf16.msra.mxu0 %v8300_v21  ;;  %13990 = vmatprep.mubr.msk.bf16.mxu0 %vm1168_vm3, %v12764_v16  ;;  %v17693_v16 = vrot.slane %v6753_v30, 5  ;;  %v12711_v21 = vld [vmem:[%s15657_s8 + $0xa0] sm:$0xf]  ;;  %v6736_v54 = vsel %vm15855_vm7, %v6731_v42, %v17674_v28  ;;  %v6785_v30 = vrot.slane %v6784_v59, 4  ;;  %v12713_v28 = vld [vmem:[%s15657_s8 + $0xa8] sm:$0xf] }
 0x25f   : > { %v6750_v31 = vor.u32 %v6749_v25, %v6745_v27  ;;  %v6812_v19 = vshrl.u32 %v12711_v21, 16  ;;  %v6815_v23 = vshll.u32 %v12711_v21, 16  ;;  %v12717_v25 = vld [vmem:[%s15657_s8 + $0xb8] sm:$0xf]  ;;  %v6835_v35 = vshrl.u32 %v12713_v28, 16 }
 0x260   : > { %v6760_v36 = vor.u32 %v6759_v44, %v17693_v16  ;;  %v6790_v44 = vsel %vm15855_vm7, %v6785_v30, %v6789_v10  ;;  %v12719_v42 = vld [vmem:[%s15657_s8 + $0xc0] sm:$0xf]  ;;  %v6869_v39 = vshrl.u32 %v12717_v25, 16  ;;  %v12721_v21 = vld [vmem:[%s15657_s8 + $0xc8] sm:$0xf] }
 0x261   : > { %v6751_v41 = vrot.slane %v6750_v31, 4  ;;  %v6814_v49 = vrot.slane %v6812_v19, 4  ;;  %v6817_v0 = vrot.slane %v6815_v23, 5  ;;  %v6805_v31 = vrot.slane %v6804_v26, 4 }
 0x262   : > { %v6761_v37 = vrot.slane %v6760_v36, 4  ;;  %v6809_v36 = vrot.slane %v6807_v55, 5  ;;  %v6847_v19 = vrot.slane %v6845_v40, 4  ;;  %v6871_v17 = vrot.slane %v6869_v39, 4  ;;  %v17791_v55 = vld [vmem:[%s15657_s8 + $0xc4] sm:$0x1] }
 0x263   : > { %v6756_v46 = vsel %vm15855_vm7, %v6751_v41, %v17693_v16  ;;  %v6831_v16 = vshll.u32 %v12713_v28, 16  ;;  %v6818_v4 = vor.u32 %v6817_v0, %v6814_v49  ;;  %v6875_v41 = vshll.u32 %v12718_v33, 16  ;;  %v12726_v39 = vld [vmem:[%s15657_s8 + $0xdc] sm:$0xf] }
 0x264   : > { %v6766_v3 = vsel %vm15855_vm7, %v6761_v37, %v6765_v61  ;;  %v6879_v37 = vshrl.u32 %v12718_v33, 16  ;;  %v6885_v51 = vshll.u32 %v12719_v42, 16  ;;  %v6810_v9 = vsel %vm15855_vm7, %v6805_v31, %v6809_v36  ;;  %v17803_v33 = vld [vmem:[%s15657_s8 + $0xd4] sm:$0xf] }
 0x265   : > { %13991 = vmatmul.mubr.msk.bf16.gmra.mrb[4].mxu0 %vm1168_vm3, %v12765_v8  ;;  %v6793_v8 = vrot.slane %v6791_v15, 4  ;;  %v6828_v15 = vor.u32 %v6827_v62, %v17729_v53  ;;  %v12771_v22 = vcombine.low %v6756_v46, %v6766_v3  ;;  %v6819_v61 = vrot.slane %v6818_v4, 4  ;;  %v12723_v46 = vld [vmem:[%s15657_s8 + $0xd0] sm:$0xf] }
 0x266   : > { %13994 = vmatprep.mubr.msk.bf16.mxu0 %vm1168_vm3, %v12766_v2  ;;  %v6712_v2 = vsel %vm15855_vm7, %v17689_v12, %v17668_v60  ;;  %v17711_v32 = vpop.f32.mrb[0].mxu1  ;;  %v6746_v60 = vsel %vm15855_vm7, %v6741_v34, %v6745_v27  ;;  %v12716_v12 = vld [vmem:[%s15657_s8 + $0xb4] sm:$0xf]  ;;  %v12772_v34 = vcombine.low %v6780_v58, %v6790_v44  ;;  %v6903_v30 = vshll.u32 %v12721_v21, 16 }
 0x267   : > { %19491 = vst [vmem:[#allocation3_spill] sm:$0xff] %v17711_v32  ;;  %v6794_v11 = vor.u32 %v6793_v8, %v6789_v10  ;;  %v17722_v6 = vpop.f32.mrb[1].mxu1  ;;  %v12769_v50 = vcombine.low %v6712_v2, %v6722_v45  ;;  %v12770_v1 = vcombine.low %v6736_v54, %v6746_v60  ;;  %v6856_v52 = vshrl.u32 %v12716_v12, 16  ;;  %v12722_v2 = vld [vmem:[%s15657_s8 + $0xcc] sm:$0xf] }
 0x268   : > { %19492 = vst [vmem:[#allocation4_spill] sm:$0xff] %v17722_v6  ;;  %v17727_v24 = vpop.f32.mrb[2].mxu1  ;;  %v6833_v10 = vrot.slane %v6831_v16, 5  ;;  %v6837_v8 = vrot.slane %v6835_v35, 4  ;;  %v6829_v59 = vrot.slane %v6828_v15, 4  ;;  %v6909_v28 = vshll.u32 %v12722_v2, 16 }
 0x269   : > { %19493 = vst [vmem:[#allocation5_spill] sm:$0xff] %v17727_v24  ;;  %v17731_v57 = vpop.f32.mrb[3].mxu1  ;;  %v17742_v27 = vrot.slane %v6794_v11, 4  ;;  %v6858_v23 = vrot.slane %v6856_v52, 4  ;;  %v6889_v11 = vshrl.u32 %v12719_v42, 16  ;;  %v6913_v38 = vshrl.u32 %v12722_v2, 16 }
 0x26a   : > { %19494 = vst [vmem:[#allocation6_spill] sm:$0xff] %v17731_v57  ;;  %v6824_v0 = vsel %vm15855_vm7, %v6819_v61, %v17729_v53  ;;  %v6838_v62 = vor.u32 %v6837_v8, %v6833_v10  ;;  %v6834_v3 = vsel %vm15855_vm7, %v6829_v59, %v6833_v10  ;;  %v17786_v58 = vrot.slane %v6875_v41, 5  ;;  %v18113_v57 = vld [vmem:[%s15657_s8 + $0x150] sm:$0x1]  ;;  %v18119_v32 = vld [vmem:[%s15657_s8 + $0x160] sm:$0xf] }
 0x26b   : > { %v6800_v43 = vsel %vm15855_vm7, %v17742_v27, %v17720_v29  ;;  %v6900_v29 = vshrl.u32 %v12721_v21, 16  ;;  %v6881_v27 = vrot.slane %v6879_v37, 4  ;;  %v17793_v53 = vrot.slane %v6885_v51, 5 }
 0x26c   : > { %v6905_v35 = vrot.slane %v6903_v30, 5  ;;  %v17798_v13 = vrot.slane %v6909_v28, 5  ;;  %v6915_v4 = vrot.slane %v6913_v38, 4  ;;  %v6919_v15 = vshll.u32 %v12723_v46, 16 }
 0x26d   : > { %13995 = vmatmul.mubr.msk.bf16.gmra.mrb[8].mxu0 %vm1168_vm3, %v12767_v20  ;;  %v6859_v20 = vshll.u32 %v12716_v12, 16  ;;  %v6902_v44 = vrot.slane %v6900_v29, 4  ;;  %v12773_v52 = vcombine.low %v6800_v43, %v6810_v9  ;;  %v12774_v42 = vcombine.low %v6824_v0, %v6834_v3  ;;  %v17812_v43 = vld [vmem:[%s15657_s8 + $0xe0] sm:$0xf]  ;;  %v17827_v9 = vld [vmem:[%s15657_s8 + $0xe4] sm:$0xf] }
 0x26e   : > { %13998 = vmatprep.mubr.msk.bf16.mxu0 %vm1168_vm3, %v12768_v14  ;;  %v17748_v5 = vpop.f32.mrb[4].mxu1  ;;  %v6865_v14 = vshll.u32 %v12717_v25, 16  ;;  %v6891_v25 = vrot.slane %v6889_v11, 4  ;;  %v6839_v31 = vrot.slane %v6838_v62, 4  ;;  %v6882_v8 = vor.u32 %v6881_v27, %v17786_v58 }
 0x26f   : > { %19495 = vst [vmem:[#allocation7_spill] sm:$0xff] %v17748_v5  ;;  %v17755_v56 = vpop.f32.mrb[5].mxu1  ;;  %v6861_v54 = vrot.slane %v6859_v20, 5  ;;  %v6923_v20 = vshrl.u32 %v12723_v46, 16  ;;  %v6906_v61 = vor.u32 %v6905_v35, %v6902_v44  ;;  %v6916_v59 = vor.u32 %v6915_v4, %v17798_v13 }
 0x270   : > { %19496 = vst [vmem:[#allocation8_spill] sm:$0xff] %v17755_v56  ;;  %v17765_v45 = vpop.f32.mrb[6].mxu1  ;;  %v17772_v60 = vrot.slane %v6865_v14, 5  ;;  %v6892_v2 = vor.u32 %v6891_v25, %v17793_v53  ;;  %v6933_v37 = vshrl.u32 %v17803_v33, 16  ;;  %v6947_v51 = vshll.u32 %v12726_v39, 16 }
 0x271   : > { %19497 = vst [vmem:[#allocation9_spill] sm:$0xff] %v17765_v45  ;;  %v17767_v48 = vpop.f32.mrb[7].mxu1  ;;  %v6862_v12 = vor.u32 %v6861_v54, %v6858_v23  ;;  %v6929_v23 = vshll.u32 %v17803_v33, 16  ;;  %v6925_v41 = vrot.slane %v6923_v20, 4  ;;  %v6844_v11 = vsel %vm15855_vm7, %v6839_v31, %v17762_v63  ;;  %v18078_v45 = vld [vmem:[%s15657_s8 + $0x13c] sm:$0x1] }
 0x272   : > { %19498 = vst [vmem:[#allocation10_spill] sm:$0xff] %v17767_v48  ;;  %v6872_v26 = vor.u32 %v6871_v17, %v17772_v60  ;;  %v6944_v17 = vshrl.u32 %v12726_v39, 16  ;;  %v6953_v30 = vshll.u32 %v17812_v43, 16  ;;  %v6957_v28 = vshrl.u32 %v17812_v43, 16 }
 0x273   : > { %v6863_v21 = vrot.slane %v6862_v12, 4  ;;  %v6883_v0 = vrot.slane %v6882_v8, 4  ;;  %v6893_v46 = vrot.slane %v6892_v2, 4  ;;  %v6907_v3 = vrot.slane %v6906_v61, 4  ;;  %v12731_v8 = vld [vmem:[%s15657_s8 + $0xf0] sm:$0xf] }
 0x274   : > { %v6873_v10 = vrot.slane %v6872_v26, 4  ;;  %v6917_v12 = vrot.slane %v6916_v59, 4  ;;  %v17844_v27 = vrot.slane %v6929_v23, 5  ;;  %v6946_v44 = vrot.slane %v6944_v17, 4 }
 0x275   : > { %13999 = vmatmul.mubr.msk.bf16.gmra.mrb[12].mxu0 %vm1168_vm3, %v12769_v50  ;;  %v6848_v50 = vor.u32 %v6847_v19, %v17762_v63  ;;  %v17815_v19 = vrot.slane %v6919_v15, 5  ;;  %v6868_v38 = vsel %vm15855_vm7, %v6863_v21, %v17772_v60  ;;  %v17849_v60 = vld [vmem:[%s15657_s8 + $0xd8] sm:$0x1]  ;;  %v6949_v35 = vrot.slane %v6947_v51, 5 }
 0x276   : > { %14002 = vmatprep.mubr.msk.bf16.mxu0 %vm1168_vm3, %v12770_v1  ;;  %v17776_v49 = vpop.f32.mrb[8].mxu1  ;;  %v6851_v1 = vshll.u32 %v17770_v18, 16  ;;  %v6878_v63 = vsel %vm15855_vm7, %v6873_v10, %v17786_v58  ;;  %v6935_v58 = vrot.slane %v6933_v37, 4  ;;  %v17854_v15 = vrot.slane %v6953_v30, 5 }
 0x277   : > { %19499 = vst [vmem:[#allocation11_spill] sm:$0xff] %v17776_v49  ;;  %v17795_v16 = vpop.f32.mrb[9].mxu1  ;;  %v6849_v36 = vrot.slane %v6848_v50, 4  ;;  %v17839_v50 = vld [vmem:[%s15657_s8 + $0xe8] sm:$0xf]  ;;  %v6926_v25 = vor.u32 %v6925_v41, %v17815_v19  ;;  %v6967_v20 = vshrl.u32 %v17827_v9, 16  ;;  %v6888_v39 = vsel %vm15855_vm7, %v6883_v0, %v17793_v53 }
 0x278   : > { %19500 = vst [vmem:[#allocation12_spill] sm:$0xff] %v17795_v16  ;;  %v17800_v40 = vpop.f32.mrb[10].mxu1  ;;  %v6973_v31 = vshll.u32 %v17839_v50, 16  ;;  %v6939_v10 = vshll.u32 %v17849_v60, 16  ;;  %v6912_v61 = vsel %vm15855_vm7, %v6907_v3, %v17798_v13  ;;  %v6922_v59 = vsel %vm15855_vm7, %v6917_v12, %v17815_v19  ;;  %v17879_v41 = vld [vmem:[%s15657_s8 + $0xf4] sm:$0xf] }
 0x279   : > { %19501 = vst [vmem:[#allocation13_spill] sm:$0xff] %v17800_v40  ;;  %v17805_v14 = vpop.f32.mrb[11].mxu1  ;;  %v17875_v23 = vrot.slane %v6926_v25, 4  ;;  %v6936_v53 = vor.u32 %v6935_v58, %v17844_v27  ;;  %v6950_v37 = vor.u32 %v6949_v35, %v6946_v44  ;;  %v6988_v30 = vshrl.u32 %v12731_v8, 16  ;;  %v17901_v44 = vld [vmem:[%s15657_s8 + $0xfc] sm:$0xf] }
 0x27a   : > { %19502 = vst [vmem:[#allocation14_spill] sm:$0xff] %v17805_v14  ;;  %v17888_v13 = vrot.slane %v6973_v31, 5  ;;  %v6997_v0 = vshll.u32 %v17879_v41, 16  ;;  %v12778_v12 = vcombine.low %v6912_v61, %v6922_v59  ;;  %v6941_v58 = vrot.slane %v6939_v10, 5  ;;  %v12736_v31 = vld [vmem:[%s15657_s8 + $0x104] sm:$0xf] }
 0x27b   : > { %v6937_v25 = vrot.slane %v6936_v53, 4  ;;  %v17914_v10 = vld [vmem:[%s15657_s8 + $0x108] sm:$0xf]  ;;  %v7017_v53 = vshll.u32 %v17901_v44, 16 }
 0x27d   : > { %14003 = vmatmul.mubr.msk.bf16.gmra.mrb[16].mxu0 %vm1168_vm3, %v12771_v22  ;;  %v6853_v22 = vrot.slane %v6851_v1, 5 }
 0x27e   : > { %14006 = vmatprep.mubr.msk.bf16.mxu0 %vm1168_vm3, %v12772_v34  ;;  %v6895_v34 = vshll.u32 %v17791_v55, 16  ;;  %v17818_v54 = vpop.f32.mrb[12].mxu1 }
 0x27f   : > { %19503 = vst [vmem:[#allocation15_spill] sm:$0xff] %v17818_v54  ;;  %v6854_v29 = vsel %vm15855_vm7, %v6849_v36, %v6853_v22  ;;  %v17841_v1 = vpop.f32.mrb[13].mxu1  ;;  %v6963_v22 = vshll.u32 %v17827_v9, 16  ;;  %v6977_v36 = vshrl.u32 %v17839_v50, 16 }
 0x280   : > { %v6897_v62 = vrot.slane %v6895_v34, 5  ;;  %19504 = vst [vmem:[#allocation16_spill] sm:$0xff] %v17841_v1  ;;  %v17846_v26 = vpop.f32.mrb[14].mxu1  ;;  %v12776_v34 = vcombine.low %v6868_v38, %v6878_v63  ;;  %v17894_v63 = vld [vmem:[%s15657_s8 + $0xf8] sm:$0xf] }
 0x281   : > { %19505 = vst [vmem:[#allocation17_spill] sm:$0xff] %v17846_v26  ;;  %v17852_v4 = vpop.f32.mrb[15].mxu1  ;;  %v17882_v51 = vrot.slane %v6963_v22, 5  ;;  %v6979_v19 = vrot.slane %v6977_v36, 4  ;;  %v6951_v22 = vrot.slane %v6950_v37, 4  ;;  %v7007_v59 = vshll.u32 %v17894_v63, 16 }
 0x282   : > { %19506 = vst [vmem:[#allocation18_spill] sm:$0xff] %v17852_v4  ;;  %v6898_v21 = vsel %vm15855_vm7, %v6893_v46, %v6897_v62  ;;  %v7001_v62 = vshrl.u32 %v17879_v41, 16  ;;  %v7021_v37 = vshrl.u32 %v17901_v44, 16  ;;  %v17971_v26 = vld [vmem:[%s15657_s8 + $0x11c] sm:$0xf] }
 0x283   : > { %v12777_v3 = vcombine.low %v6888_v39, %v6898_v21  ;;  %v6990_v39 = vrot.slane %v6988_v30, 4  ;;  %v6956_v30 = vsel %vm15855_vm7, %v6951_v22, %v17854_v15 }
 0x284   : > { %v7003_v61 = vrot.slane %v7001_v62, 4 }
 0x285   : > { %14007 = vmatmul.mubr.msk.bf16.gmra.mrb[20].mxu0 %vm1168_vm3, %v12773_v52  ;;  %v6959_v52 = vrot.slane %v6957_v28, 4  ;;  %v6991_v28 = vshll.u32 %v12731_v8, 16  ;;  %v17916_v8 = vrot.slane %v6997_v0, 5  ;;  %v7045_v0 = vshrl.u32 %v17914_v10, 16 }
 0x286   : > { %14010 = vmatprep.mubr.msk.bf16.mxu0 %vm1168_vm3, %v12774_v42  ;;  %v12775_v42 = vcombine.low %v6844_v11, %v6854_v29  ;;  %v17867_v2 = vpop.f32.mrb[16].mxu1  ;;  %v17885_v11 = vld [vmem:[%s15657_s8 + $0xec] sm:$0x1]  ;;  %v6969_v29 = vrot.slane %v6967_v20, 4 }
 0x287   : > { %19507 = vst [vmem:[#allocation19_spill] sm:$0xff] %v17867_v2  ;;  %v6960_v17 = vor.u32 %v6959_v52, %v17854_v15  ;;  %v17890_v38 = vpop.f32.mrb[17].mxu1  ;;  %v6932_v52 = vsel %vm15855_vm7, %v17875_v23, %v17844_v27  ;;  %v6993_v21 = vrot.slane %v6991_v28, 5  ;;  %v7011_v27 = vshrl.u32 %v17894_v63, 16 }
 0x288   : > { %19508 = vst [vmem:[#allocation20_spill] sm:$0xff] %v17890_v38  ;;  %v17898_v46 = vpop.f32.mrb[18].mxu1  ;;  %v6970_v36 = vor.u32 %v6969_v29, %v17882_v51  ;;  %v7035_v29 = vshll.u32 %v12736_v31, 16  ;;  %v7041_v28 = vshll.u32 %v17914_v10, 16  ;;  %v7004_v22 = vor.u32 %v7003_v61, %v17916_v8 }
 0x289   : > { %19509 = vst [vmem:[#allocation21_spill] sm:$0xff] %v17898_v46  ;;  %v17903_v35 = vpop.f32.mrb[19].mxu1  ;;  %v6961_v20 = vrot.slane %v6960_v17, 4  ;;  %v7032_v17 = vshrl.u32 %v12736_v31, 16  ;;  %v6994_v15 = vor.u32 %v6993_v21, %v6990_v39  ;;  %v7009_v46 = vrot.slane %v7007_v59, 5 }
 0x28a   : > { %19510 = vst [vmem:[#allocation22_spill] sm:$0xff] %v17903_v35  ;;  %v7013_v38 = vrot.slane %v7011_v27, 4  ;;  %v7047_v39 = vrot.slane %v7045_v0, 4  ;;  %v7005_v4 = vrot.slane %v7004_v22, 4 }
 0x28b   : > { %v6966_v62 = vsel %vm15855_vm7, %v6961_v20, %v17882_v51  ;;  %v17947_v51 = vrot.slane %v7017_v53, 5  ;;  %v7023_v20 = vrot.slane %v7021_v37, 4 }
 0x28c   : > { %v12780_v37 = vcombine.low %v6956_v30, %v6966_v62 }
 0x28d   : > { %14011 = vmatmul.mubr.msk.bf16.gmra.mrb[24].mxu0 %vm1168_vm3, %v12775_v42  ;;  %v6983_v42 = vshll.u32 %v17885_v11, 16 }
 0x28e   : > { %14014 = vmatprep.mubr.msk.bf16.mxu0 %vm1168_vm3, %v12776_v34  ;;  %v6980_v34 = vor.u32 %v6979_v19, %v17888_v13  ;;  %v17920_v23 = vpop.f32.mrb[20].mxu1  ;;  %v6942_v19 = vsel %vm15855_vm7, %v6937_v25, %v6941_v58  ;;  %v17936_v25 = vld [vmem:[%s15657_s8 + $0x10c] sm:$0xf] }
 0x28f   : > { %19511 = vst [vmem:[#allocation23_spill] sm:$0xff] %v17920_v23  ;;  %v6971_v23 = vrot.slane %v6970_v36, 4  ;;  %v6985_v35 = vrot.slane %v6983_v42, 5  ;;  %v17938_v58 = vpop.f32.mrb[21].mxu1  ;;  %v7034_v42 = vrot.slane %v7032_v17, 4  ;;  %v7037_v36 = vrot.slane %v7035_v29, 5 }
 0x290   : > { %v6981_v31 = vrot.slane %v6980_v34, 4  ;;  %19512 = vst [vmem:[#allocation24_spill] sm:$0xff] %v17938_v58  ;;  %v17945_v2 = vpop.f32.mrb[22].mxu1  ;;  %v17952_v58 = vld [vmem:[%s15657_s8 + $0x100] sm:$0x1]  ;;  %v7051_v21 = vshll.u32 %v17936_v25, 16  ;;  %v12779_v59 = vcombine.low %v6932_v52, %v6942_v19  ;;  %v7024_v52 = vor.u32 %v7023_v20, %v17947_v51 }
 0x291   : > { %19513 = vst [vmem:[#allocation25_spill] sm:$0xff] %v17945_v2  ;;  %v17949_v34 = vpop.f32.mrb[23].mxu1  ;;  %v7055_v61 = vshrl.u32 %v17936_v25, 16  ;;  %v6976_v17 = vsel %vm15855_vm7, %v6971_v23, %v17888_v13  ;;  %v6995_v29 = vrot.slane %v6994_v15, 4  ;;  %v7027_v19 = vshll.u32 %v17952_v58, 16 }
 0x292   : > { %19514 = vst [vmem:[#allocation26_spill] sm:$0xff] %v17949_v34  ;;  %v12741_v34 = vld [vmem:[%s15657_s8 + $0x118] sm:$0xf]  ;;  %v6986_v2 = vsel %vm15855_vm7, %v6981_v31, %v6985_v35  ;;  %v7038_v30 = vor.u32 %v7037_v36, %v7034_v42  ;;  %v17974_v13 = vrot.slane %v7051_v21, 5  ;;  %v17989_v21 = vld [vmem:[%s15657_s8 + $0x120] sm:$0xf] }
 0x293   : > { %v7057_v23 = vrot.slane %v7055_v61, 4  ;;  %v7076_v31 = vshrl.u32 %v12741_v34, 16  ;;  %v7079_v22 = vshll.u32 %v12741_v34, 16  ;;  %v12781_v42 = vcombine.low %v6976_v17, %v6986_v2 }
 0x294   : > { %v7000_v36 = vsel %vm15855_vm7, %v6995_v29, %v17916_v8  ;;  %v7085_v61 = vshll.u32 %v17971_v26, 16  ;;  %v7010_v34 = vsel %vm15855_vm7, %v7005_v4, %v7009_v46  ;;  %v7039_v17 = vrot.slane %v7038_v30, 4 }
 0x295   : > { %14015 = vmatmul.mubr.msk.bf16.gmra.mrb[28].mxu0 %vm1168_vm3, %v12777_v3  ;;  %v17943_v3 = vld [vmem:[%s15657_s8 + $0x110] sm:$0xf]  ;;  %v7058_v8 = vor.u32 %v7057_v23, %v17974_v13  ;;  %v7081_v4 = vrot.slane %v7079_v22, 5  ;;  %v7099_v1 = vshrl.u32 %v17989_v21, 16 }
 0x296   : > { %14018 = vmatprep.mubr.msk.bf16.mxu0 %vm1168_vm3, %v12778_v12  ;;  %v17954_v12 = vrot.slane %v7041_v28, 5  ;;  %v7061_v27 = vshll.u32 %v17943_v3, 16  ;;  %v7065_v53 = vshrl.u32 %v17943_v3, 16  ;;  %v7014_v28 = vor.u32 %v7013_v38, %v7009_v46  ;;  %v17964_v0 = vpop.f32.mrb[24].mxu1  ;;  %v17977_v38 = vld [vmem:[%s15657_s8 + $0x114] sm:$0x1] }
 0x297   : > { %19515 = vst [vmem:[#allocation27_spill] sm:$0xff] %v17964_v0  ;;  %v17982_v20 = vpop.f32.mrb[25].mxu1  ;;  %v7071_v29 = vshll.u32 %v17977_v38, 16  ;;  %v7078_v0 = vrot.slane %v7076_v31, 4  ;;  %v7095_v46 = vshll.u32 %v17989_v21, 16  ;;  %v18009_v30 = vrot.slane %v7085_v61, 5 }
 0x298   : > { %v7048_v62 = vor.u32 %v7047_v39, %v17954_v12  ;;  %v17980_v15 = vrot.slane %v7061_v27, 5  ;;  %v7067_v35 = vrot.slane %v7065_v53, 4  ;;  %19516 = vst [vmem:[#allocation28_spill] sm:$0xff] %v17982_v20  ;;  %v7015_v39 = vrot.slane %v7014_v28, 4  ;;  %v18002_v28 = vld [vmem:[%s15657_s8 + $0x124] sm:$0xf] }
 0x299   : > { %v7025_v27 = vrot.slane %v7024_v52, 4  ;;  %v7029_v53 = vrot.slane %v7027_v19, 5  ;;  %v12782_v52 = vcombine.low %v7000_v36, %v7010_v34  ;;  %v7105_v54 = vshll.u32 %v18002_v28, 16  ;;  %v18018_v31 = vld [vmem:[%s15657_s8 + $0x130] sm:$0xf] }
 0x29a   : > { %v7049_v20 = vrot.slane %v7048_v62, 4  ;;  %v7020_v19 = vsel %vm15855_vm7, %v7015_v39, %v17947_v51  ;;  %v12746_v62 = vld [vmem:[%s15657_s8 + $0x12c] sm:$0xf]  ;;  %v7044_v51 = vsel %vm15855_vm7, %v7039_v17, %v17954_v12  ;;  %v7059_v36 = vrot.slane %v7058_v8, 4 }
 0x29b   : > { %v7030_v22 = vsel %vm15855_vm7, %v7025_v27, %v7029_v53  ;;  %v7073_v39 = vrot.slane %v7071_v29, 5  ;;  %v7120_v27 = vshrl.u32 %v12746_v62, 16  ;;  %v7123_v53 = vshll.u32 %v12746_v62, 16 }
 0x29c   : > { %v7054_v61 = vsel %vm15855_vm7, %v7049_v20, %v17974_v13  ;;  %v7129_v12 = vshll.u32 %v18018_v31, 16  ;;  %v7101_v20 = vrot.slane %v7099_v1, 4  ;;  %v12783_v29 = vcombine.low %v7020_v19, %v7030_v22  ;;  %v18059_v22 = vld [vmem:[%s15657_s8 + $0x144] sm:$0xf] }
 0x29d   : > { %14019 = vmatmul.mubr.msk.bf16.gmra.mrb[32].mxu0 %vm1168_vm3, %v12779_v59  ;;  %v17992_v59 = vpop.f32.mrb[26].mxu1  ;;  %v7064_v62 = vsel %vm15855_vm7, %v7059_v36, %v17980_v15 }
 0x29e   : > { %14022 = vmatprep.mubr.msk.bf16.mxu0 %vm1168_vm3, %v12780_v37  ;;  %19517 = vst [vmem:[#allocation29_spill] sm:$0xff] %v17992_v59  ;;  %v7089_v37 = vshrl.u32 %v17971_v26, 16  ;;  %v17997_v2 = vpop.f32.mrb[27].mxu1  ;;  %v7068_v59 = vor.u32 %v7067_v35, %v17980_v15  ;;  %v7109_v35 = vshrl.u32 %v18002_v28, 16 }
 0x29f   : > { %19518 = vst [vmem:[#allocation30_spill] sm:$0xff] %v17997_v2  ;;  %v18012_v23 = vpop.f32.mrb[28].mxu1 }
 0x2a0   : > { %19519 = vst [vmem:[#allocation31_spill] sm:$0xff] %v18012_v23  ;;  %v7091_v2 = vrot.slane %v7089_v37, 4  ;;  %v7069_v34 = vrot.slane %v7068_v59, 4  ;;  %v7082_v37 = vor.u32 %v7081_v4, %v7078_v0  ;;  %v7097_v23 = vrot.slane %v7095_v46, 5  ;;  %v18029_v14 = vpop.f32.mrb[29].mxu1 }
 0x2a1   : > { %19520 = vst [vmem:[#allocation32_spill] sm:$0xff] %v18029_v14  ;;  %v18034_v17 = vpop.f32.mrb[30].mxu1  ;;  %v18037_v0 = vrot.slane %v7105_v54, 5  ;;  %v7111_v59 = vrot.slane %v7109_v35, 4  ;;  %v18042_v4 = vld [vmem:[%s15657_s8 + $0x128] sm:$0x1] }
 0x2a2   : > { %19521 = vst [vmem:[#allocation33_spill] sm:$0xff] %v18034_v17  ;;  %v7092_v13 = vor.u32 %v7091_v2, %v18009_v30  ;;  %v18039_v8 = vpop.f32.mrb[31].mxu1  ;;  %v18045_v46 = vld [vmem:[%s15657_s8 + $0x134] sm:$0xf]  ;;  %v7074_v2 = vsel %vm15855_vm7, %v7069_v34, %v7073_v39  ;;  %v7083_v1 = vrot.slane %v7082_v37, 4  ;;  %v7122_v35 = vrot.slane %v7120_v27, 4 }
 0x2a3   : > { %19522 = vst [vmem:[#allocation34_spill] sm:$0xff] %v18039_v8  ;;  %v18053_v54 = vld [vmem:[%s15657_s8 + $0x138] sm:$0xf]  ;;  %v12751_v17 = vld [vmem:[%s15657_s8 + $0x140] sm:$0xf]  ;;  %v7125_v14 = vrot.slane %v7123_v53, 5 }
 0x2a4   : > { %v18056_v8 = vrot.slane %v7129_v12, 5  ;;  %v7093_v40 = vrot.slane %v7092_v13, 4  ;;  %v7115_v15 = vshll.u32 %v18042_v4, 16  ;;  %v7139_v36 = vshll.u32 %v18045_v46, 16 }
 0x2a5   : > { %14023 = vmatmul.mubr.msk.bf16.gmra.mrb[36].mxu0 %vm1168_vm3, %v12781_v42  ;;  %v7133_v42 = vshrl.u32 %v18018_v31, 16  ;;  %v7143_v39 = vshrl.u32 %v18045_v46, 16  ;;  %v7149_v34 = vshll.u32 %v18053_v54, 16  ;;  %v7153_v37 = vshrl.u32 %v18053_v54, 16 }
 0x2a6   : > { %14026 = vmatprep.mubr.msk.bf16.mxu0 %vm1168_vm3, %v12782_v52  ;;  %v12784_v52 = vcombine.low %v7044_v51, %v7054_v61  ;;  %v7102_v51 = vor.u32 %v7101_v20, %v7097_v23  ;;  %v7112_v61 = vor.u32 %v7111_v59, %v18037_v0  ;;  %v7164_v27 = vshrl.u32 %v12751_v17, 16 }
 0x2a7   : > { %v7135_v19 = vrot.slane %v7133_v42, 4  ;;  %v7167_v53 = vshll.u32 %v12751_v17, 16  ;;  %v7173_v12 = vshll.u32 %v18059_v22, 16  ;;  %v7177_v42 = vshrl.u32 %v18059_v22, 16 }
 0x2a8   : > { %v12785_v13 = vcombine.low %v7064_v62, %v7074_v2  ;;  %v7088_v20 = vsel %vm15855_vm7, %v7083_v1, %v18009_v30  ;;  %v7126_v59 = vor.u32 %v7125_v14, %v7122_v35  ;;  %v7103_v49 = vrot.slane %v7102_v51, 4  ;;  %v18083_v2 = vld [vmem:[%s15657_s8 + $0x148] sm:$0xf] }
 0x2a9   : > { %v7136_v16 = vor.u32 %v7135_v19, %v18056_v8  ;;  %v7113_v17 = vrot.slane %v7112_v61, 4  ;;  %v7117_v48 = vrot.slane %v7115_v15, 5  ;;  %v7141_v56 = vrot.slane %v7139_v36, 5  ;;  %v18087_v61 = vld [vmem:[%s15657_s8 + $0x14c] sm:$0xf] }
 0x2aa   : > { %v7145_v5 = vrot.slane %v7143_v39, 4  ;;  %v7155_v62 = vrot.slane %v7153_v37, 4  ;;  %v7166_v14 = vrot.slane %v7164_v27, 4  ;;  %v7169_v30 = vrot.slane %v7167_v53, 5  ;;  %v12756_v53 = vld [vmem:[%s15657_s8 + $0x154] sm:$0xf] }
 0x2ab   : > { %v7175_v1 = vrot.slane %v7173_v12, 5  ;;  %v7179_v35 = vrot.slane %v7177_v42, 4  ;;  %v7137_v19 = vrot.slane %v7136_v16, 4  ;;  %v7159_v51 = vshll.u32 %v18078_v45, 16  ;;  %v18099_v16 = vld [vmem:[%s15657_s8 + $0x158] sm:$0xf] }
 0x2ac   : > { %v7108_v15 = vsel %vm15855_vm7, %v7103_v49, %v18037_v0  ;;  %v7118_v36 = vsel %vm15855_vm7, %v7113_v17, %v7117_v48  ;;  %v7146_v39 = vor.u32 %v7145_v5, %v7141_v56  ;;  %v7183_v37 = vshll.u32 %v18083_v2, 16 }
 0x2ad   : > { %14027 = vmatmul.mubr.msk.bf16.gmra.mrb[40].mxu0 %vm1168_vm3, %v12783_v29  ;;  %v7098_v29 = vsel %vm15855_vm7, %v7093_v40, %v7097_v23  ;;  %v7127_v23 = vrot.slane %v7126_v59, 4  ;;  %v7187_v27 = vshrl.u32 %v18083_v2, 16  ;;  %v7170_v12 = vor.u32 %v7169_v30, %v7166_v14 }
 0x2ae   : > { %14030 = vmatprep.mubr.msk.bf16.mxu0 %vm1168_vm3, %v12784_v52  ;;  %v18080_v52 = vrot.slane %v7149_v34, 5  ;;  %v12786_v40 = vcombine.low %v7088_v20, %v7098_v29  ;;  %v7180_v42 = vor.u32 %v7179_v35, %v7175_v1  ;;  %v7193_v20 = vshll.u32 %v18087_v61, 16 }
 0x2af   : > { %v7197_v49 = vshrl.u32 %v18087_v61, 16  ;;  %v12787_v5 = vcombine.low %v7108_v15, %v7118_v36  ;;  %v7132_v48 = vsel %vm15855_vm7, %v7127_v23, %v18056_v8  ;;  %v7142_v0 = vsel %vm15855_vm7, %v7137_v19, %v7141_v56  ;;  %v18116_v19 = vld [vmem:[%s15657_s8 + $0x15c] sm:$0xf] }
 0x2b0   : > { %v7156_v34 = vor.u32 %v7155_v62, %v18080_v52  ;;  %v7161_v59 = vrot.slane %v7159_v51, 5  ;;  %v7211_v29 = vshll.u32 %v12756_v53, 16  ;;  %v7217_v17 = vshll.u32 %v18099_v16, 16 }
 0x2b1   : > { %v7221_v62 = vshrl.u32 %v18099_v16, 16  ;;  %v7147_v14 = vrot.slane %v7146_v39, 4  ;;  %v7185_v35 = vrot.slane %v7183_v37, 5  ;;  %v7171_v15 = vrot.slane %v7170_v12, 4 }
 0x2b2   : > { %v7157_v30 = vrot.slane %v7156_v34, 4  ;;  %v7181_v36 = vrot.slane %v7180_v42, 4  ;;  %v7195_v8 = vrot.slane %v7193_v20, 5  ;;  %v7199_v23 = vrot.slane %v7197_v49, 4 }
 0x2b3   : > { %v12788_v56 = vcombine.low %v7132_v48, %v7142_v0  ;;  %v7219_v24 = vrot.slane %v7217_v17, 5  ;;  %v7223_v6 = vrot.slane %v7221_v62, 4  ;;  %v7152_v39 = vsel %vm15855_vm7, %v7147_v14, %v18080_v52 }
 0x2b4   : > { %v7162_v34 = vsel %vm15855_vm7, %v7157_v30, %v7161_v59  ;;  %v7203_v37 = vshll.u32 %v18113_v57, 16  ;;  %v7186_v12 = vsel %vm15855_vm7, %v7181_v36, %v7185_v35  ;;  %v7200_v20 = vor.u32 %v7199_v23, %v7195_v8  ;;  %v18138_v23 = vld [vmem:[%s15657_s8 + $0x164] sm:$0x1] }
 0x2b5   : > { %14031 = vmatmul.mubr.msk.bf16.gmra.mrb[44].mxu0 %vm1168_vm3, %v12785_v13  ;;  %v7208_v13 = vshrl.u32 %v12756_v53, 16  ;;  %v7213_v53 = vrot.slane %v7211_v29, 5  ;;  %v7227_v49 = vshll.u32 %v18116_v19, 16  ;;  %v7231_v52 = vshrl.u32 %v18116_v19, 16 }
 0x2b6   : > { %14034 = vmatprep.mubr.msk.bf16.mxu0 %vm1168_vm3, %v12786_v40  ;;  %v7189_v40 = vrot.slane %v7187_v27, 4  ;;  %v7176_v27 = vsel %vm15855_vm7, %v7171_v15, %v7175_v1  ;;  %v7237_v48 = vshll.u32 %v18119_v32, 16  ;;  %v7241_v0 = vshrl.u32 %v18119_v32, 16 }
 0x2b7   : > { %v7210_v51 = vrot.slane %v7208_v13, 4  ;;  %v7224_v59 = vor.u32 %v7223_v6, %v7219_v24  ;;  %v12789_v13 = vcombine.low %v7152_v39, %v7162_v34  ;;  %v12790_v1 = vcombine.low %v7176_v27, %v7186_v12  ;;  %v15530_v27 = vld [vmem:[%s15657_s8 + $0x2c] sm:$0xf] }
 0x2b8   : > { %v7190_v42 = vor.u32 %v7189_v40, %v7185_v35  ;;  %v7201_v17 = vrot.slane %v7200_v20, 4  ;;  %v7205_v62 = vrot.slane %v7203_v37, 5  ;;  %v7229_v14 = vrot.slane %v7227_v49, 5 }
 0x2b9   : > { %v7233_v30 = vrot.slane %v7231_v52, 4  ;;  %v7239_v35 = vrot.slane %v7237_v48, 5  ;;  %v7243_v40 = vrot.slane %v7241_v0, 4  ;;  %v7225_v36 = vrot.slane %v7224_v59, 4  ;;  %v15531_v59 = vld [vmem:[%s15657_s8 + $0x30] sm:$0xf] }
 0x2ba   : > { %v7191_v29 = vrot.slane %v7190_v42, 4  ;;  %v7247_v39 = vshll.u32 %v18138_v23, 16  ;;  %v7899_v12 = vrot.slane %v15530_v27, 5 }
 0x2bb   : > { %v7230_v37 = vsel %vm15855_vm7, %v7225_v36, %v7229_v14 }
 0x2bc   : > { %v7196_v6 = vsel %vm15855_vm7, %v7191_v29, %v7195_v8  ;;  %v12826_v8 = vld [vmem:[%s15657_s8 + $0x28] sm:$0xe]  ;;  %v7249_v48 = vrot.slane %v7247_v39, 5  ;;  %v15532_v29 = vld [vmem:[%s15657_s8 + $0x34] sm:$0xf] }
 0x2bd   : > { %14035 = vmatmul.mubr.msk.bf16.gmra.mrb[48].mxu0 %vm1168_vm3, %v12787_v5  ;;  %v7214_v5 = vor.u32 %v7213_v53, %v7210_v51  ;;  %v7234_v51 = vor.u32 %v7233_v30, %v7229_v14  ;;  %v7244_v53 = vor.u32 %v7243_v40, %v7239_v35  ;;  %v12842_v0 = vrot.slane %v12826_v8, 9  ;;  %v15533_v30 = vld [vmem:[%s15657_s8 + $0x40] sm:$0xf]  ;;  %v15536_v8 = vld [vmem:[%s15657_s8 + $0x48] sm:$0xf] }
 0x2be   : > { %14038 = vmatprep.mubr.msk.bf16.mxu0 %vm1168_vm3, %v12788_v56  ;;  %v7206_v56 = vsel %vm15855_vm7, %v7201_v17, %v7205_v62  ;;  %v7905_v17 = vrot.slane %v15532_v29, 5  ;;  %v7912_v40 = vrot.slane %v15533_v30, 5 }
 0x2bf   : > { %v7215_v15 = vrot.slane %v7214_v5, 4  ;;  %v12791_v42 = vcombine.low %v7196_v6, %v7206_v56  ;;  %v7235_v49 = vrot.slane %v7234_v51, 4  ;;  %v7245_v52 = vrot.slane %v7244_v53, 4 }
 0x2c0   : > { %v7901_v5 = vrot.slane %v7899_v12, 4  ;;  %v7900_v62 = vsel %vm15663_vm4, %v12842_v0, %v7899_v12  ;;  %v7908_v51 = vrot.slane %v15534_v47, 5  ;;  %v7914_v39 = vrot.slane %v7912_v40, 4  ;;  %v12828_v0 = vld [vmem:[%s15657_s8 + $0x50] sm:$0xe] }
 0x2c1   : > { %v7220_v34 = vsel %vm15855_vm7, %v7215_v15, %v7219_v24  ;;  %v7240_v24 = vsel %vm15855_vm7, %v7235_v49, %v7239_v35  ;;  %v12827_v15 = vld [vmem:[%s15657_s8 + $0x3c] sm:$0xe]  ;;  %v7907_v35 = vrot.slane %v7905_v17, 4  ;;  %v15541_v47 = vld [vmem:[%s15657_s8 + $0x68] sm:$0xf] }
 0x2c2   : > { %v12792_v20 = vcombine.low %v7220_v34, %v7230_v37  ;;  %v12843_v53 = vrot.slane %v12827_v15, 9  ;;  %v15535_v34 = vld [vmem:[%s15657_s8 + $0x44] sm:$0xf] }
 0x2c3   : > { %v7915_v37 = vrot.slane %v15535_v34, 5  ;;  %v7909_v12 = vsel %vm15663_vm4, %v7907_v35, %v7908_v51  ;;  %v7938_v51 = vrot.slane %v15541_v47, 5  ;;  %v15547_v47 = vld [vmem:[%s15657_s8 + $0x80] sm:$0xf] }
 0x2c5   : > { %14039 = vmatmul.mubr.msk.bf16.gmra.mrb[52].mxu0 %vm1168_vm3, %v12789_v13  ;;  %v7902_v13 = vrot.slane %v15531_v59, 5  ;;  %v7916_v49 = vsel %vm15663_vm4, %v7914_v39, %v7915_v37 }
 0x2c6   : > { %14042 = vmatprep.mubr.msk.bf16.mxu0 %vm1168_vm3, %v12790_v1  ;;  %v7250_v1 = vsel %vm15855_vm7, %v7245_v52, %v7249_v48  ;;  %v15537_v52 = vld [vmem:[%s15657_s8 + $0x54] sm:$0xf] }
 0x2c7   : > { %v7903_v14 = vsel %vm15663_vm4, %v7901_v5, %v7902_v13  ;;  %v12793_v36 = vcombine.low %v7240_v24, %v7250_v1  ;;  %v7904_v6 = vrot.slane %v7902_v13, 4  ;;  %v7925_v48 = vrot.slane %v15537_v52, 5  ;;  %v15538_v1 = vld [vmem:[%s15657_s8 + $0x4c] sm:$0x1] }
 0x2c8   : > { %v12859_v56 = vcombine.low %v7900_v62, %v7903_v14  ;;  %v7917_v13 = vrot.slane %v7915_v37, 4  ;;  %v7921_v29 = vrot.slane %v15538_v1, 5  ;;  %v15539_v14 = vld [vmem:[%s15657_s8 + $0x58] sm:$0xf]  ;;  %v15545_v1 = vld [vmem:[%s15657_s8 + $0x7c] sm:$0xf] }
 0x2c9   : > { %v7906_v27 = vsel %vm15663_vm4, %v7904_v6, %v7905_v17  ;;  %v12844_v17 = vrot.slane %v12828_v0, 9  ;;  %v7927_v62 = vrot.slane %v7925_v48, 4  ;;  %v7928_v30 = vrot.slane %v15539_v14, 5 }
 0x2ca   : > { %v12860_v5 = vcombine.low %v7906_v27, %v7909_v12  ;;  %v15542_v12 = vld [vmem:[%s15657_s8 + $0x60] sm:$0x1] }
 0x2cb   : > { %v7929_v35 = vsel %vm15663_vm4, %v7927_v62, %v7928_v30  ;;  %v7930_v37 = vrot.slane %v7928_v30, 4 }
 0x2cd   : > { %14043 = vmatmul.mubr.msk.bf16.gmra.mrb[56].mxu0 %vm1168_vm3, %v12791_v42  ;;  %v7918_v42 = vrot.slane %v15536_v8, 5  ;;  %v7934_v8 = vrot.slane %v15542_v12, 5  ;;  %v15548_v12 = vld [vmem:[%s15657_s8 + $0x84] sm:$0xf] }
 0x2ce   : > { %14046 = vmatprep.mubr.msk.bf16.mxu0 %vm1168_vm3, %v12792_v20  ;;  %v7913_v20 = vsel %vm15663_vm4, %v12843_v53, %v7912_v40  ;;  %v12829_v53 = vld [vmem:[%s15657_s8 + $0x64] sm:$0xe] }
 0x2cf   : > { %v12861_v59 = vcombine.low %v7913_v20, %v7916_v49  ;;  %v7920_v24 = vrot.slane %v7918_v42, 4  ;;  %v7919_v40 = vsel %vm15663_vm4, %v7917_v13, %v7918_v42  ;;  %v12845_v42 = vrot.slane %v12829_v53, 9  ;;  %v15543_v49 = vld [vmem:[%s15657_s8 + $0x6c] sm:$0xf] }
 0x2d0   : > { %v7940_v20 = vrot.slane %v7938_v51, 4  ;;  %v7941_v52 = vrot.slane %v15543_v49, 5  ;;  %v15549_v49 = vld [vmem:[%s15657_s8 + $0x90] sm:$0xf] }
 0x2d1   : > { %v7922_v15 = vsel %vm15663_vm4, %v7920_v24, %v7921_v29  ;;  %v7939_v13 = vsel %vm15663_vm4, %v12845_v42, %v7938_v51  ;;  %v7951_v29 = vrot.slane %v15545_v1, 5  ;;  %v7954_v51 = vrot.slane %v15547_v47, 5  ;;  %v15552_v47 = vld [vmem:[%s15657_s8 + $0x98] sm:$0xf] }
 0x2d2   : > { %v12862_v39 = vcombine.low %v7919_v40, %v7922_v15  ;;  %v7942_v24 = vsel %vm15663_vm4, %v7940_v20, %v7941_v52  ;;  %v7943_v30 = vrot.slane %v7941_v52, 4  ;;  %v15546_v15 = vld [vmem:[%s15657_s8 + $0x74] sm:$0x1]  ;;  %v7964_v52 = vrot.slane %v15549_v49, 5 }
 0x2d3   : > { %v12865_v14 = vcombine.low %v7939_v13, %v7942_v24  ;;  %v7956_v13 = vrot.slane %v7954_v51, 4  ;;  %v15550_v24 = vld [vmem:[%s15657_s8 + $0x88] sm:$0x1] }
 0x2d4   : > { %v7960_v1 = vrot.slane %v15550_v24, 5 }
 0x2d5   : > { %14047 = vmatmul.mubr.msk.bf16.gmra.mrb[60].mxu0 %vm1168_vm3, %v12793_v36  ;;  %v15540_v36 = vld [vmem:[%s15657_s8 + $0x5c] sm:$0xf] }
 0x2d6   : > { %14052 = vmatprep.mubr.msk.bf16.mxu0 %vm1168_vm3, %v12859_v56  ;;  %v7931_v6 = vrot.slane %v15540_v36, 5  ;;  %v7926_v56 = vsel %vm15663_vm4, %v12844_v17, %v7925_v48  ;;  %v12830_v17 = vld [vmem:[%s15657_s8 + $0x78] sm:$0xe]  ;;  %v7947_v36 = vrot.slane %v15546_v15, 5 }
 0x2d7   : > { %v12863_v34 = vcombine.low %v7926_v56, %v7929_v35  ;;  %v12846_v56 = vrot.slane %v12830_v17, 9  ;;  %v7953_v35 = vrot.slane %v7951_v29, 4 }
 0x2d8   : > { %v7933_v27 = vrot.slane %v7931_v6, 4  ;;  %v7932_v48 = vsel %vm15663_vm4, %v7930_v37, %v7931_v6 }
 0x2d9   : > { %v7952_v42 = vsel %vm15663_vm4, %v12846_v56, %v7951_v29  ;;  %v7955_v20 = vsel %vm15663_vm4, %v7953_v35, %v7954_v51  ;;  %v15551_v29 = vld [vmem:[%s15657_s8 + $0x94] sm:$0xf]  ;;  %v7970_v51 = vrot.slane %v15552_v47, 5  ;;  %v15556_v47 = vld [vmem:[%s15657_s8 + $0xac] sm:$0xf] }
 0x2da   : > { %v7935_v0 = vsel %vm15663_vm4, %v7933_v27, %v7934_v8  ;;  %v7957_v8 = vrot.slane %v15548_v12, 5  ;;  %v15553_v12 = vld [vmem:[%s15657_s8 + $0xa4] sm:$0xf] }
 0x2db   : > { %v12864_v62 = vcombine.low %v7932_v48, %v7935_v0  ;;  %v12831_v48 = vld [vmem:[%s15657_s8 + $0x8c] sm:$0xe] }
 0x2dc   : > { %v7958_v56 = vsel %vm15663_vm4, %v7956_v13, %v7957_v8 }
 0x2dd   : > { %14053 = vmatmul.mubr.msk.bf16.vlgmr.msra.gmra.mrb[0].mxu0 %vm1168_vm3, %v12860_v5  ;;  %v15544_v5 = vld [vmem:[%s15657_s8 + $0x70] sm:$0xf] }
 0x2de   : > { %14056 = vmatprep.mubr.msk.bf16.mxu0 %vm1168_vm3, %v12861_v59  ;;  %v7944_v59 = vrot.slane %v15544_v5, 5  ;;  %v12867_v5 = vcombine.low %v7952_v42, %v7955_v20  ;;  %v7977_v42 = vrot.slane %v15553_v12, 5  ;;  %v12832_v20 = vld [vmem:[%s15657_s8 + $0xa0] sm:$0xe] }
 0x2df   : > { %v12848_v24 = vrot.slane %v12832_v20, 9  ;;  %v15557_v20 = vld [vmem:[%s15657_s8 + $0xb8] sm:$0xf] }
 0x2e0   : > { %v7946_v40 = vrot.slane %v7944_v59, 4  ;;  %v7945_v37 = vsel %vm15663_vm4, %v7943_v30, %v7944_v59  ;;  %v7959_v59 = vrot.slane %v7957_v8, 4  ;;  %v7967_v30 = vrot.slane %v15551_v29, 5 }
 0x2e1   : > { %v7972_v8 = vrot.slane %v7970_v51, 4 }
 0x2e2   : > { %v7948_v27 = vsel %vm15663_vm4, %v7946_v40, %v7947_v36  ;;  %v7961_v35 = vsel %vm15663_vm4, %v7959_v59, %v7960_v1  ;;  %v7979_v1 = vrot.slane %v7977_v42, 4 }
 0x2e3   : > { %v12866_v0 = vcombine.low %v7945_v37, %v7948_v27  ;;  %v12868_v49 = vcombine.low %v7958_v56, %v7961_v35 }
 0x2e5   : > { %14057 = vmatmul.mubr.msk.bf16.gmra.mrb[4].mxu0 %vm1168_vm3, %v12862_v39 }
 0x2e6   : > { %14060 = vmatprep.mubr.msk.bf16.mxu0 %vm1168_vm3, %v12863_v34  ;;  %v18213_v6 = vpop.f32.mrb[32].mxu1 }
 0x2e7   : > { %v18216_v53 = vpop.f32.mrb[33].mxu1 }
 0x2e8   : > { %v18218_v39 = vpop.f32.mrb[34].mxu1 }
 0x2e9   : > { %v18221_v34 = vpop.f32.mrb[35].mxu1 }
 0x2ed   : > { %14061 = vmatmul.mubr.msk.bf16.gmra.mrb[8].mxu0 %vm1168_vm3, %v12864_v62  ;;  %v12847_v62 = vrot.slane %v12831_v48, 9 }
 0x2ee   : > { %14064 = vmatprep.mubr.msk.bf16.mxu0 %vm1168_vm3, %v12865_v14  ;;  %v18236_v17 = vpop.f32.mrb[36].mxu1  ;;  %v7966_v14 = vrot.slane %v7964_v52, 4 }
 0x2ef   : > { %v18239_v40 = vpop.f32.mrb[37].mxu1  ;;  %v7965_v37 = vsel %vm15663_vm4, %v12847_v62, %v7964_v52  ;;  %v15555_v52 = vld [vmem:[%s15657_s8 + $0xa8] sm:$0xf] }
 0x2f0   : > { %v18241_v15 = vpop.f32.mrb[38].mxu1  ;;  %v7968_v27 = vsel %vm15663_vm4, %v7966_v14, %v7967_v30  ;;  %v7980_v62 = vrot.slane %v15555_v52, 5 }
 0x2f1   : > { %v18244_v36 = vpop.f32.mrb[39].mxu1  ;;  %v12869_v48 = vcombine.low %v7965_v37, %v7968_v27  ;;  %v7983_v37 = vrot.slane %v15556_v47, 5  ;;  %v7978_v27 = vsel %vm15663_vm4, %v12848_v24, %v7977_v42  ;;  %v15558_v42 = vld [vmem:[%s15657_s8 + $0xbc] sm:$0xf] }
 0x2f2   : > { %v7981_v12 = vsel %vm15663_vm4, %v7979_v1, %v7980_v62  ;;  %v7993_v24 = vrot.slane %v15558_v42, 5  ;;  %v12834_v42 = vld [vmem:[%s15657_s8 + $0xc8] sm:$0xe] }
 0x2f5   : > { %14065 = vmatmul.mubr.msk.bf16.gmra.mrb[12].mxu0 %vm1168_vm3, %v12866_v0  ;;  %v7969_v0 = vrot.slane %v7967_v30, 4 }
 0x2f6   : > { %14068 = vmatprep.mubr.msk.bf16.mxu0 %vm1168_vm3, %v12867_v5  ;;  %v15554_v5 = vld [vmem:[%s15657_s8 + $0x9c] sm:$0x1]  ;;  %v18259_v59 = vpop.f32.mrb[40].mxu1 }
 0x2f7   : > { %v7973_v13 = vrot.slane %v15554_v5, 5  ;;  %v18262_v29 = vpop.f32.mrb[41].mxu1  ;;  %v7971_v30 = vsel %vm15663_vm4, %v7969_v0, %v7970_v51  ;;  %v12833_v5 = vld [vmem:[%s15657_s8 + $0xb4] sm:$0xe]  ;;  %v7985_v51 = vrot.slane %v7983_v37, 4  ;;  %v7986_v0 = vrot.slane %v17770_v18, 5 }
 0x2f8   : > { %v18264_v14 = vpop.f32.mrb[42].mxu1 }
 0x2f9   : > { %19523 = vst [vmem:[#allocation35_spill] sm:$0xff] %v18264_v14  ;;  %v18267_v56 = vpop.f32.mrb[43].mxu1  ;;  %v7974_v35 = vsel %vm15663_vm4, %v7972_v8, %v7973_v13  ;;  %v12849_v13 = vrot.slane %v12833_v5, 9  ;;  %v15560_v5 = vld [vmem:[%s15657_s8 + $0xcc] sm:$0xf] }
 0x2fa   : > { %19524 = vst [vmem:[#allocation36_spill] sm:$0xff] %v18267_v56  ;;  %v12870_v52 = vcombine.low %v7971_v30, %v7974_v35  ;;  %v7982_v56 = vrot.slane %v7980_v62, 4  ;;  %v7987_v62 = vsel %vm15663_vm4, %v7985_v51, %v7986_v0  ;;  %v15559_v35 = vld [vmem:[%s15657_s8 + $0xc0] sm:$0xf]  ;;  %v12850_v51 = vrot.slane %v12834_v42, 9 }
 0x2fc   : > { %v7984_v18 = vsel %vm15663_vm4, %v7982_v56, %v7983_v37  ;;  %v7999_v56 = vrot.slane %v17791_v55, 5 }
 0x2fd   : > { %14069 = vmatmul.mubr.msk.bf16.gmra.mrb[16].mxu0 %vm1168_vm3, %v12868_v49  ;;  %v7990_v49 = vrot.slane %v15557_v20, 5 }
 0x2fe   : > { %14072 = vmatprep.mubr.msk.bf16.mxu0 %vm1168_vm3, %v12869_v48  ;;  %v12871_v48 = vcombine.low %v7978_v27, %v7981_v12  ;;  %v18282_v8 = vpop.f32.mrb[44].mxu1  ;;  %v7996_v27 = vrot.slane %v15559_v35, 5  ;;  %v15561_v35 = vld [vmem:[%s15657_s8 + $0xd0] sm:$0xf] }
 0x2ff   : > { %19525 = vst [vmem:[#allocation37_spill] sm:$0xff] %v18282_v8  ;;  %v7992_v47 = vrot.slane %v7990_v49, 4  ;;  %v18285_v14 = vpop.f32.mrb[45].mxu1  ;;  %v7991_v12 = vsel %vm15663_vm4, %v12849_v13, %v7990_v49  ;;  %v8006_v8 = vrot.slane %v15561_v35, 5 }
 0x300   : > { %19526 = vst [vmem:[#allocation38_spill] sm:$0xff] %v18285_v14  ;;  %v18287_v1 = vpop.f32.mrb[46].mxu1  ;;  %v7998_v14 = vrot.slane %v7996_v27, 4 }
 0x301   : > { %19527 = vst [vmem:[#allocation39_spill] sm:$0xff] %v18287_v1  ;;  %v18290_v30 = vpop.f32.mrb[47].mxu1  ;;  %v7994_v20 = vsel %vm15663_vm4, %v7992_v47, %v7993_v24  ;;  %v7995_v1 = vrot.slane %v7993_v24, 4 }
 0x302   : > { %19528 = vst [vmem:[#allocation40_spill] sm:$0xff] %v18290_v30  ;;  %v12872_v30 = vcombine.low %v7984_v18, %v7987_v62  ;;  %v8000_v24 = vsel %vm15663_vm4, %v7998_v14, %v7999_v56  ;;  %v8009_v18 = vrot.slane %v17803_v33, 5  ;;  %v8019_v56 = vrot.slane %v17827_v9, 5 }
 0x303   : > { %v7997_v55 = vsel %vm15663_vm4, %v7995_v1, %v7996_v27  ;;  %v8012_v1 = vrot.slane %v17849_v60, 5 }
 0x304   : > { %v8011_v35 = vrot.slane %v8009_v18, 4 }
 0x305   : > { %14073 = vmatmul.mubr.msk.bf16.gmra.mrb[20].mxu0 %vm1168_vm3, %v12870_v52  ;;  %v8003_v52 = vrot.slane %v15560_v5, 5  ;;  %v12874_v5 = vcombine.low %v7997_v55, %v8000_v24  ;;  %v8029_v24 = vrot.slane %v17879_v41, 5 }
 0x306   : > { %14076 = vmatprep.mubr.msk.bf16.mxu0 %vm1168_vm3, %v12871_v48  ;;  %v12873_v48 = vcombine.low %v7991_v12, %v7994_v20  ;;  %v18305_v37 = vpop.f32.mrb[48].mxu1  ;;  %v12835_v20 = vld [vmem:[%s15657_s8 + $0xdc] sm:$0xe] }
 0x307   : > { %v8005_v0 = vrot.slane %v8003_v52, 4  ;;  %v18308_v49 = vpop.f32.mrb[49].mxu1  ;;  %v8004_v62 = vsel %vm15663_vm4, %v12850_v51, %v8003_v52  ;;  %v12851_v14 = vrot.slane %v12835_v20, 9 }
 0x308   : > { %v18310_v13 = vpop.f32.mrb[50].mxu1 }
 0x309   : > { %v18313_v47 = vpop.f32.mrb[51].mxu1  ;;  %v8007_v12 = vsel %vm15663_vm4, %v8005_v0, %v8006_v8  ;;  %v8022_v0 = vrot.slane %v17839_v50, 5  ;;  %v8031_v50 = vrot.slane %v8029_v24, 4 }
 0x30a   : > { %v12875_v42 = vcombine.low %v8004_v62, %v8007_v12  ;;  %v12836_v62 = vld [vmem:[%s15657_s8 + $0xf0] sm:$0xe] }
 0x30d   : > { %14077 = vmatmul.mubr.msk.bf16.gmra.mrb[24].mxu0 %vm1168_vm3, %v12872_v30  ;;  %v8016_v30 = vrot.slane %v17812_v43, 5 }
 0x30e   : > { %14080 = vmatprep.mubr.msk.bf16.mxu0 %vm1168_vm3, %v12873_v48  ;;  %v8008_v48 = vrot.slane %v8006_v8, 4  ;;  %v18328_v27 = vpop.f32.mrb[52].mxu1  ;;  %v8013_v8 = vsel %vm15663_vm4, %v8011_v35, %v8012_v1  ;;  %v12852_v35 = vrot.slane %v12836_v62, 9  ;;  %v8032_v1 = vrot.slane %v17894_v63, 5 }
 0x30f   : > { %v8018_v33 = vrot.slane %v8016_v30, 4  ;;  %v18331_v52 = vpop.f32.mrb[53].mxu1  ;;  %v8017_v9 = vsel %vm15663_vm4, %v12851_v14, %v8016_v30 }
 0x310   : > { %v18333_v51 = vpop.f32.mrb[54].mxu1  ;;  %v8010_v60 = vsel %vm15663_vm4, %v8008_v48, %v8009_v18  ;;  %v8025_v18 = vrot.slane %v17885_v11, 5  ;;  %v8030_v63 = vsel %vm15663_vm4, %v12852_v35, %v8029_v24 }
 0x311   : > { %v18336_v43 = vpop.f32.mrb[55].mxu1  ;;  %v8020_v55 = vsel %vm15663_vm4, %v8018_v33, %v8019_v56  ;;  %v12876_v12 = vcombine.low %v8010_v60, %v8013_v8  ;;  %v8033_v60 = vsel %vm15663_vm4, %v8031_v50, %v8032_v1  ;;  %v8042_v8 = vrot.slane %v17914_v10, 5 }
 0x312   : > { %v12877_v20 = vcombine.low %v8017_v9, %v8020_v55  ;;  %v12837_v9 = vld [vmem:[%s15657_s8 + $0x104] sm:$0xe]  ;;  %v12879_v62 = vcombine.low %v8030_v63, %v8033_v60  ;;  %v12838_v63 = vld [vmem:[%s15657_s8 + $0x118] sm:$0xe] }
 0x315   : > { %14081 = vmatmul.mubr.msk.bf16.gmra.mrb[28].mxu0 %vm1168_vm3, %v12874_v5  ;;  %v8021_v5 = vrot.slane %v8019_v56, 4  ;;  %v8035_v56 = vrot.slane %v17901_v44, 5  ;;  %v8044_v44 = vrot.slane %v8042_v8, 4 }
 0x316   : > { %14084 = vmatprep.mubr.msk.bf16.mxu0 %vm1168_vm3, %v12875_v42  ;;  %v8024_v42 = vrot.slane %v8022_v0, 4  ;;  %v18351_v48 = vpop.f32.mrb[56].mxu1 }
 0x317   : > { %v18354_v30 = vpop.f32.mrb[57].mxu1  ;;  %v8023_v11 = vsel %vm15663_vm4, %v8021_v5, %v8022_v0  ;;  %v8038_v0 = vrot.slane %v17952_v58, 5 }
 0x318   : > { %v18356_v14 = vpop.f32.mrb[58].mxu1  ;;  %v8026_v33 = vsel %vm15663_vm4, %v8024_v42, %v8025_v18  ;;  %v12853_v42 = vrot.slane %v12837_v9, 9  ;;  %v8045_v18 = vrot.slane %v17936_v25, 5 }
 0x319   : > { %v18359_v41 = vpop.f32.mrb[59].mxu1  ;;  %v12878_v55 = vcombine.low %v8023_v11, %v8026_v33  ;;  %v8055_v33 = vrot.slane %v17971_v26, 5 }
 0x31a   : > { %v8043_v25 = vsel %vm15663_vm4, %v12853_v42, %v8042_v8  ;;  %v8046_v11 = vsel %vm15663_vm4, %v8044_v44, %v8045_v18  ;;  %v12839_v44 = vld [vmem:[%s15657_s8 + $0x12c] sm:$0xe] }
 0x31b   : > { %v12881_v9 = vcombine.low %v8043_v25, %v8046_v11  ;;  %v12855_v11 = vrot.slane %v12839_v44, 9 }
 0x31d   : > { %14085 = vmatmul.mubr.msk.bf16.gmra.mrb[32].mxu0 %vm1168_vm3, %v12876_v12  ;;  %v8034_v12 = vrot.slane %v8032_v1, 4  ;;  %v8048_v1 = vrot.slane %v17943_v3, 5  ;;  %v8058_v3 = vrot.slane %v17989_v21, 5  ;;  %v8068_v21 = vrot.slane %v18018_v31, 5 }
 0x31e   : > { %14088 = vmatprep.mubr.msk.bf16.mxu0 %vm1168_vm3, %v12877_v20  ;;  %v8037_v20 = vrot.slane %v8035_v56, 4  ;;  %v18374_v5 = vpop.f32.mrb[60].mxu1 }
 0x31f   : > { %v18377_v24 = vpop.f32.mrb[61].mxu1  ;;  %v8036_v58 = vsel %vm15663_vm4, %v8034_v12, %v8035_v56  ;;  %v8051_v56 = vrot.slane %v17977_v38, 5  ;;  %v12854_v12 = vrot.slane %v12838_v63, 9  ;;  %v8070_v63 = vrot.slane %v8068_v21, 4 }
 0x320   : > { %v18379_v35 = vpop.f32.mrb[62].mxu1  ;;  %v8039_v50 = vsel %vm15663_vm4, %v8037_v20, %v8038_v0  ;;  %v8057_v20 = vrot.slane %v8055_v33, 4  ;;  %v8061_v0 = vrot.slane %v18002_v28, 5  ;;  %v8071_v28 = vrot.slane %v18045_v46, 5 }
 0x321   : > { %v18382_v10 = vpop.f32.mrb[63].mxu1  ;;  %v12880_v60 = vcombine.low %v8036_v58, %v8039_v50  ;;  %v8056_v42 = vsel %vm15663_vm4, %v12854_v12, %v8055_v33  ;;  %v8060_v50 = vrot.slane %v8058_v3, 4  ;;  %v8081_v46 = vrot.slane %v18059_v22, 5 }
 0x322   : > { %v8059_v38 = vsel %vm15663_vm4, %v8057_v20, %v8058_v3  ;;  %v8063_v25 = vrot.slane %v8061_v0, 4  ;;  %v8073_v12 = vrot.slane %v8071_v28, 4  ;;  %v8077_v3 = vrot.slane %v18078_v45, 5 }
 0x323   : > { %v12883_v58 = vcombine.low %v8056_v42, %v8059_v38  ;;  %v8062_v33 = vsel %vm15663_vm4, %v8060_v50, %v8061_v0  ;;  %v8087_v42 = vrot.slane %v18087_v61, 5  ;;  %v12924_v61 = vld [vmem:[%s19481_s3 + $0x2] sm:$0x3] }
 0x324   : > { %15134 = vmatprep.subr.msk.bf16.mxu1 %vm1265_vm0, %v12924_v61 }
 0x325   : > { %14089 = vmatmul.mubr.msk.bf16.gmra.mrb[36].mxu0 %vm1168_vm3, %v12878_v55  ;;  %v8047_v55 = vrot.slane %v8045_v18, 4  ;;  %v8089_v50 = vrot.slane %v8087_v42, 4 }
 0x326   : > { %14092 = vmatprep.mubr.msk.bf16.mxu0 %vm1168_vm3, %v12879_v62  ;;  %v8050_v62 = vrot.slane %v8048_v1, 4 }
 0x327   : > { %v8049_v8 = vsel %vm15663_vm4, %v8047_v55, %v8048_v1  ;;  %v8064_v1 = vrot.slane %v18042_v4, 5  ;;  %v8072_v4 = vsel %vm15663_vm4, %v8070_v63, %v8071_v28  ;;  %v12840_v55 = vld [vmem:[%s15657_s8 + $0x140] sm:$0xe]  ;;  %v8097_v63 = vrot.slane %v18116_v19, 5 }
 0x328   : > { %v8052_v26 = vsel %vm15663_vm4, %v8050_v62, %v8051_v56  ;;  %v9033_v28 = vsel %vm1265_vm0, %v12924_v61, 0  ;;  %v8100_v19 = vrot.slane %v18119_v32, 5 }
 0x329   : > { %v12882_v18 = vcombine.low %v8049_v8, %v8052_v26  ;;  %v8065_v31 = vsel %vm15663_vm4, %v8063_v25, %v8064_v1  ;;  %v12856_v8 = vrot.slane %v12840_v55, 9  ;;  %v8083_v26 = vrot.slane %v8081_v46, 4  ;;  %14117 = vmatpush3.bf16.msra.mxu1 %v9033_v28  ;;  %v19534_v28 = vld [vmem:[#allocation8_spill] sm:$0xff] }
 0x32a   : > { %v12884_v62 = vcombine.low %v8062_v33, %v8065_v31  ;;  %v8090_v25 = vrot.slane %v18113_v57, 5  ;;  %v8103_v55 = vrot.slane %v18138_v23, 5 }
 0x32b   : > { %v8082_v38 = vsel %vm15663_vm4, %v12856_v8, %v8081_v46  ;;  %v8102_v46 = vrot.slane %v8100_v19, 4 }
 0x32d   : > { %14093 = vmatmul.mubr.msk.bf16.gmra.mrb[40].mxu0 %vm1168_vm3, %v12880_v60  ;;  %v8074_v60 = vrot.slane %v18053_v54, 5  ;;  %v8084_v54 = vrot.slane %v18083_v2, 5  ;;  %v8094_v2 = vrot.slane %v18099_v16, 5  ;;  %v8091_v16 = vsel %vm15663_vm4, %v8089_v50, %v8090_v25 }
 0x32e   : > { %14096 = vmatprep.mubr.msk.bf16.mxu0 %vm1168_vm3, %v12881_v9  ;;  %v8069_v9 = vsel %vm15663_vm4, %v12855_v11, %v8068_v21  ;;  %v12841_v21 = vld [vmem:[%s15657_s8 + $0x154] sm:$0xe]  ;;  %v8104_v32 = vsel %vm15663_vm4, %v8102_v46, %v8103_v55 }
 0x32f   : > { %v12885_v56 = vcombine.low %v8069_v9, %v8072_v4  ;;  %v8076_v20 = vrot.slane %v8074_v60, 4  ;;  %v8075_v0 = vsel %vm15663_vm4, %v8073_v12, %v8074_v60  ;;  %v8085_v45 = vsel %vm15663_vm4, %v8083_v26, %v8084_v54  ;;  %v18470_v12 = vld [vmem:[%s19481_s3] sm:$0x3]  ;;  %v19530_v26 = vld [vmem:[#allocation4_spill] sm:$0xff] }
 0x330   : > { %v12857_v1 = vrot.slane %v12841_v21, 9  ;;  %v8096_v11 = vrot.slane %v8094_v2, 4  ;;  %v8099_v4 = vrot.slane %v8097_v63, 4  ;;  %15135 = vmatprep.subr.msk.bf16.mxu1 %vm1265_vm0, %v18470_v12 }
 0x331   : > { %v8078_v22 = vsel %vm15663_vm4, %v8076_v20, %v8077_v3  ;;  %v19529_v20 = vld [vmem:[#allocation3_spill] sm:$0xff] }
 0x332   : > { %v12886_v44 = vcombine.low %v8075_v0, %v8078_v22  ;;  %v8095_v33 = vsel %vm15663_vm4, %v12857_v1, %v8094_v2  ;;  %v8098_v31 = vsel %vm15663_vm4, %v8096_v11, %v8097_v63  ;;  %v19531_v22 = vld [vmem:[#allocation5_spill] sm:$0xff]  ;;  %v19533_v11 = vld [vmem:[#allocation7_spill] sm:$0xff] }
 0x333   : > { %v12889_v9 = vcombine.low %v8095_v33, %v8098_v31 }
 0x335   : > { %14097 = vmatmul.mubr.msk.bf16.gmra.mrb[44].mxu0 %vm1168_vm3, %v12882_v18  ;;  %v12887_v18 = vcombine.low %v8082_v38, %v8085_v45  ;;  %v19532_v45 = vld [vmem:[#allocation6_spill] sm:$0xff] }
 0x336   : > { %14100 = vmatprep.mubr.msk.bf16.mxu0 %vm1168_vm3, %v12883_v58  ;;  %v8086_v58 = vrot.slane %v8084_v54, 4 }
 0x338   : > { %v8088_v57 = vsel %vm15663_vm4, %v8086_v58, %v8087_v42 }
 0x339   : > { %v12888_v60 = vcombine.low %v8088_v57, %v8091_v16 }
 0x33d   : > { %14101 = vmatmul.mubr.msk.bf16.gmra.mrb[48].mxu0 %vm1168_vm3, %v12884_v62  ;;  %v8101_v62 = vsel %vm15663_vm4, %v8099_v4, %v8100_v19  ;;  %v19535_v19 = vld [vmem:[#allocation9_spill] sm:$0xff] }
 0x33e   : > { %14104 = vmatprep.mubr.msk.bf16.mxu0 %vm1168_vm3, %v12885_v56  ;;  %v12890_v56 = vcombine.low %v8101_v62, %v8104_v32 }
 0x345   : > { %14105 = vmatmul.mubr.msk.bf16.gmra.mrb[52].mxu0 %vm1168_vm3, %v12886_v44 }
 0x346   : > { %14108 = vmatprep.mubr.msk.bf16.mxu0 %vm1168_vm3, %v12887_v18 }
 0x34d   : > { %14109 = vmatmul.mubr.msk.bf16.gmra.mrb[56].mxu0 %vm1168_vm3, %v12888_v60  ;;  %v19536_v60 = vld [vmem:[#allocation10_spill] sm:$0xff] }
 0x34e   : > { %14112 = vmatprep.mubr.msk.bf16.mxu0 %vm1168_vm3, %v12889_v9 }
 0x355   : > { %14113 = vmatmul.mubr.msk.bf16.gmra.mrb[60].mxu0 %vm1168_vm3, %v12890_v56 }
 0x3b0   : > { %v14054_v23 = vpop.f32.mrb[0].mxu0 }
 0x3b1   : > { %v14388_v3 = vadd.f32 %v14054_v23, %v19529_v20  ;;  %v8336_v8 = vpop.f32.mrb[1].mxu0 }
 0x3b2   : > { %v14389_v54 = vadd.f32 %v8336_v8, %v19530_v26  ;;  %v14055_v0 = vpop.f32.mrb[2].mxu0 }
 0x3b3   : > { %v14390_v42 = vadd.f32 %v14055_v0, %v19531_v22  ;;  %v8339_v38 = vpop.f32.mrb[3].mxu0  ;;  %v8664_v21 = vadd.f32 %v14388_v3, %v18478_v7  ;;  %v19537_v3 = vld [vmem:[#allocation11_spill] sm:$0xff]  ;;  %v19538_v0 = vld [vmem:[#allocation12_spill] sm:$0xff] }
 0x3b4   : > { %v14391_v2 = vadd.f32 %v8339_v38, %v19532_v45  ;;  %v8662_v18 = vadd.f32 %v14389_v54, %v18478_v7 }
 0x3b5   : > { %v8665_v44 = vadd.f32 %v14390_v42, %v18478_v7 }
 0x3b6   : > { %v8663_v58 = vadd.f32 %v14391_v2, %v18478_v7  ;;  %v19539_v2 = vld [vmem:[#allocation13_spill] sm:$0xff] }
 0x3b7   : > { %v8727_v50 = vpack.c.bf16 %v8665_v44, %v8664_v21 }
 0x3b8   : > { %v8726_v25 = vpack.c.bf16 %v8663_v58, %v8662_v18  ;;  %v14058_v1 = vpop.f32.mrb[4].mxu0  ;;  %v19540_v18 = vld [vmem:[#allocation14_spill] sm:$0xff] }
 0x3b9   : > { %8759 = vst.msk [vmem:[#allocation2 + $0x8] sm:$0xff] %vm1168_vm3, %v8727_v50  ;;  %v14392_v63 = vadd.f32 %v14058_v1, %v19533_v11  ;;  %v8352_v61 = vpop.f32.mrb[5].mxu0 }
 0x3ba   : > { %8758 = vst.msk [vmem:[#allocation2] sm:$0xff] %vm1168_vm3, %v8726_v25  ;;  %v14393_v57 = vadd.f32 %v8352_v61, %v19534_v28  ;;  %v14059_v16 = vpop.f32.mrb[6].mxu0 }
 0x3bb   : > { %v14394_v33 = vadd.f32 %v14059_v16, %v19535_v19  ;;  %v8355_v31 = vpop.f32.mrb[7].mxu0  ;;  %v8668_v4 = vadd.f32 %v14392_v63, %v18478_v7 }
 0x3bc   : > { %v14395_v9 = vadd.f32 %v8355_v31, %v19536_v60  ;;  %v8666_v55 = vadd.f32 %v14393_v57, %v18478_v7 }
 0x3bd   : > { %v8669_v46 = vadd.f32 %v14394_v33, %v18478_v7 }
 0x3be   : > { %v8667_v62 = vadd.f32 %v14395_v9, %v18478_v7  ;;  %v19541_v9 = vld [vmem:[#allocation15_spill] sm:$0xff] }
 0x3bf   : > { %v8729_v32 = vpack.c.bf16 %v8669_v46, %v8668_v4 }
 0x3c0   : > { %v8728_v56 = vpack.c.bf16 %v8667_v62, %v8666_v55  ;;  %v14062_v23 = vpop.f32.mrb[8].mxu0  ;;  %v18497_v20 = vld [vmem:[#allocation2 + $0x8] sm:$0x1] }
 0x3c1   : > { %8761 = vst.msk [vmem:[#allocation2 + $0x18] sm:$0xff] %vm1168_vm3, %v8729_v32  ;;  %v14396_v8 = vadd.f32 %v14062_v23, %v19537_v3  ;;  %v8368_v26 = vpop.f32.mrb[9].mxu0  ;;  %v18501_v54 = vld [vmem:[#allocation2] sm:$0xff]  ;;  %v8828_v45 = vshll.u32 %v18497_v20, 16  ;;  %v19542_v62 = vld [vmem:[#allocation16_spill] sm:$0xff] }
 0x3c2   : > { %8760 = vst.msk [vmem:[#allocation2 + $0x10] sm:$0xff] %vm1168_vm3, %v8728_v56  ;;  %v14397_v22 = vadd.f32 %v8368_v26, %v19538_v0  ;;  %v14063_v42 = vpop.f32.mrb[10].mxu0  ;;  %v8823_v38 = vshll.u32 %v18501_v54, 16  ;;  %v8821_v50 = vshrl.u32 %v18501_v54, 16 }
 0x3c3   : > { %v14398_v21 = vadd.f32 %v14063_v42, %v19539_v2  ;;  %v8371_v44 = vpop.f32.mrb[11].mxu0  ;;  %v8672_v1 = vadd.f32 %v14396_v8, %v18478_v7  ;;  %v8830_v57 = vrot.slane %v8828_v45, 1  ;;  %v19543_v8 = vld [vmem:[#allocation17_spill] sm:$0xff] }
 0x3c4   : > { %v14399_v58 = vadd.f32 %v8371_v44, %v19540_v18  ;;  %v8825_v25 = vrot.slane %v8823_v38, 1  ;;  %v8670_v63 = vadd.f32 %v14397_v22, %v18478_v7  ;;  %v19544_v22 = vld [vmem:[#allocation18_spill] sm:$0xff] }
 0x3c5   : > { %v8673_v11 = vadd.f32 %v14398_v21, %v18478_v7 }
 0x3c6   : > { %v8671_v61 = vadd.f32 %v14399_v58, %v18478_v7  ;;  %v8826_v28 = vor.u32 %v8825_v25, %v8821_v50 }
 0x3c7   : > { %v8731_v16 = vpack.c.bf16 %v8673_v11, %v8672_v1  ;;  %v9209_v1 = vsel %vm1265_vm0, %v18470_v12, 0 }
 0x3c8   : > { %v8730_v19 = vpack.c.bf16 %v8671_v61, %v8670_v63  ;;  %v14066_v33 = vpop.f32.mrb[12].mxu0  ;;  %v8831_v31 = vsel %vm8819_vm8, %v8826_v28, %v8830_v57  ;;  %v18515_v60 = vld [vmem:[#allocation2 + $0x18] sm:$0x1]  ;;  %v18544_v57 = vld [vmem:[%s19481_s3 + $0x4] sm:$0x3] }
 0x3c9   : > { %8763 = vst.msk [vmem:[#allocation2 + $0x28] sm:$0xff] %vm1168_vm3, %v8731_v16  ;;  %v14400_v4 = vadd.f32 %v14066_v33, %v19541_v9  ;;  %v8384_v46 = vpop.f32.mrb[13].mxu0  ;;  %14118 = vmatprep.mubr.msk.bf16.mxu1 %vm1168_vm3, %v8831_v31  ;;  %v18520_v55 = vld [vmem:[#allocation2 + $0x10] sm:$0xff]  ;;  %v8840_v3 = vshll.u32 %v18515_v60, 16  ;;  %v19545_v16 = vld [vmem:[#allocation19_spill] sm:$0xff]  ;;  %v19546_v31 = vld [vmem:[#allocation20_spill] sm:$0xff] }
 0x3ca   : > { %8762 = vst.msk [vmem:[#allocation2 + $0x20] sm:$0xff] %vm1168_vm3, %v8730_v19  ;;  %v14401_v32 = vadd.f32 %v8384_v46, %v19542_v62  ;;  %v14067_v56 = vpop.f32.mrb[14].mxu0  ;;  %v8835_v23 = vshll.u32 %v18520_v55, 16  ;;  %v8833_v38 = vshrl.u32 %v18520_v55, 16 }
 0x3cb   : > { %v14402_v26 = vadd.f32 %v14067_v56, %v19543_v8  ;;  %v8387_v0 = vpop.f32.mrb[15].mxu0  ;;  %v8676_v2 = vadd.f32 %v14400_v4, %v18478_v7  ;;  %v8842_v50 = vrot.slane %v8840_v3, 1  ;;  %v19548_v3 = vld [vmem:[#allocation22_spill] sm:$0xff] }
 0x3cc   : > { %v14403_v42 = vadd.f32 %v8387_v0, %v19544_v22  ;;  %v8837_v45 = vrot.slane %v8835_v23, 1  ;;  %v8674_v44 = vadd.f32 %v14401_v32, %v18478_v7  ;;  %v19547_v32 = vld [vmem:[#allocation21_spill] sm:$0xff] }
 0x3cd   : > { %v8677_v21 = vadd.f32 %v14402_v26, %v18478_v7 }
 0x3ce   : > { %v8675_v18 = vadd.f32 %v14403_v42, %v18478_v7  ;;  %v18533_v58 = vor.u32 %v8837_v45, %v8833_v38 }
 0x3cf   : > { %v8733_v25 = vpack.c.bf16 %v8677_v21, %v8676_v2 }
 0x3d0   : > { %v8732_v11 = vpack.c.bf16 %v8675_v18, %v8674_v44  ;;  %v14070_v63 = vpop.f32.mrb[16].mxu0  ;;  %v8843_v61 = vsel %vm8819_vm8, %v18533_v58, %v8842_v50  ;;  %v18539_v28 = vld [vmem:[#allocation2 + $0x28] sm:$0x1] }
 0x3d1   : > { %8765 = vst.msk [vmem:[#allocation2 + $0x38] sm:$0xff] %vm1168_vm3, %v8733_v25  ;;  %v14404_v19 = vadd.f32 %v14070_v63, %v19545_v16  ;;  %v8400_v33 = vpop.f32.mrb[17].mxu0  ;;  %14119 = vmatmul.mubr.msk.bf16.vlgmr.msra.gmra.mrb[64].mxu1 %vm1168_vm3, %v8843_v61  ;;  %v18549_v12 = vld [vmem:[#allocation2 + $0x20] sm:$0xff]  ;;  %v8852_v62 = vshll.u32 %v18539_v28, 16 }
 0x3d2   : > { %8764 = vst.msk [vmem:[#allocation2 + $0x30] sm:$0xff] %vm1168_vm3, %v8732_v11  ;;  %v14405_v9 = vadd.f32 %v8400_v33, %v19546_v31  ;;  %v14071_v4 = vpop.f32.mrb[18].mxu0  ;;  %v8847_v46 = vshll.u32 %v18549_v12, 16  ;;  %14147 = vmatpush3.bf16.msra.mxu1 %v9209_v1  ;;  %v8845_v26 = vshrl.u32 %v18549_v12, 16  ;;  %v19549_v11 = vld [vmem:[#allocation23_spill] sm:$0xff] }
 0x3d3   : > { %v14406_v56 = vadd.f32 %v14071_v4, %v19547_v32  ;;  %v8403_v23 = vpop.f32.mrb[19].mxu0  ;;  %15136 = vmatprep.subr.msk.bf16.mxu1 %vm1265_vm0, %v18544_v57  ;;  %v8680_v22 = vadd.f32 %v14404_v19, %v18478_v7  ;;  %v8854_v21 = vrot.slane %v8852_v62, 1  ;;  %v19550_v19 = vld [vmem:[#allocation24_spill] sm:$0xff] }
 0x3d4   : > { %v14407_v8 = vadd.f32 %v8403_v23, %v19548_v3  ;;  %v8849_v0 = vrot.slane %v8847_v46, 1  ;;  %v8678_v38 = vadd.f32 %v14405_v9, %v18478_v7  ;;  %v19551_v46 = vld [vmem:[#allocation25_spill] sm:$0xff] }
 0x3d5   : > { %v8681_v42 = vadd.f32 %v14406_v56, %v18478_v7  ;;  %v19552_v56 = vld [vmem:[#allocation26_spill] sm:$0xff] }
 0x3d6   : > { %v8679_v45 = vadd.f32 %v14407_v8, %v18478_v7  ;;  %v18564_v2 = vor.u32 %v8849_v0, %v8845_v26 }
 0x3d7   : > { %v8735_v44 = vpack.c.bf16 %v8681_v42, %v8680_v22 }
 0x3d8   : > { %v8734_v18 = vpack.c.bf16 %v8679_v45, %v8678_v38  ;;  %v14074_v50 = vpop.f32.mrb[20].mxu0  ;;  %v8855_v25 = vsel %vm8819_vm8, %v18564_v2, %v8854_v21  ;;  %v18568_v1 = vld [vmem:[#allocation2 + $0x38] sm:$0x1] }
 0x3d9   : > { %8767 = vst.msk [vmem:[#allocation2 + $0x48] sm:$0xff] %vm1168_vm3, %v8735_v44  ;;  %v14408_v63 = vadd.f32 %v14074_v50, %v19549_v11  ;;  %v8416_v61 = vpop.f32.mrb[21].mxu0  ;;  %14122 = vmatprep.mubr.msk.bf16.mxu1 %vm1168_vm3, %v8855_v25  ;;  %v18573_v16 = vld [vmem:[#allocation2 + $0x30] sm:$0xff]  ;;  %v8864_v4 = vshll.u32 %v18568_v1, 16  ;;  %v19553_v11 = vld [vmem:[#allocation27_spill] sm:$0xff] }
 0x3da   : > { %8766 = vst.msk [vmem:[#allocation2 + $0x40] sm:$0xff] %vm1168_vm3, %v8734_v18  ;;  %v14409_v33 = vadd.f32 %v8416_v61, %v19550_v19  ;;  %v14075_v31 = vpop.f32.mrb[22].mxu0  ;;  %v8859_v9 = vshll.u32 %v18573_v16, 16  ;;  %v8857_v3 = vshrl.u32 %v18573_v16, 16 }
 0x3db   : > { %v14410_v62 = vadd.f32 %v14075_v31, %v19551_v46  ;;  %v8419_v32 = vpop.f32.mrb[23].mxu0  ;;  %v8684_v26 = vadd.f32 %v14408_v63, %v18478_v7  ;;  %v8866_v45 = vrot.slane %v8864_v4, 1 }
 0x3dc   : > { %v14411_v23 = vadd.f32 %v8419_v32, %v19552_v56  ;;  %v8861_v8 = vrot.slane %v8859_v9, 1  ;;  %v8682_v22 = vadd.f32 %v14409_v33, %v18478_v7  ;;  %v19554_v33 = vld [vmem:[#allocation28_spill] sm:$0xff] }
 0x3dd   : > { %v8685_v0 = vadd.f32 %v14410_v62, %v18478_v7  ;;  %v19555_v62 = vld [vmem:[#allocation29_spill] sm:$0xff] }
 0x3de   : > { %v8683_v42 = vadd.f32 %v14411_v23, %v18478_v7  ;;  %v18586_v38 = vor.u32 %v8861_v8, %v8857_v3  ;;  %v19556_v23 = vld [vmem:[#allocation30_spill] sm:$0xff] }
 0x3df   : > { %v8737_v21 = vpack.c.bf16 %v8685_v0, %v8684_v26 }
 0x3e0   : > { %v8736_v44 = vpack.c.bf16 %v8683_v42, %v8682_v22  ;;  %v14078_v18 = vpop.f32.mrb[24].mxu0  ;;  %v8867_v50 = vsel %vm8819_vm8, %v18586_v38, %v8866_v45  ;;  %v18590_v25 = vld [vmem:[#allocation2 + $0x48] sm:$0x1] }
 0x3e1   : > { %8769 = vst.msk [vmem:[#allocation2 + $0x58] sm:$0xff] %vm1168_vm3, %v8737_v21  ;;  %v14412_v63 = vadd.f32 %v14078_v18, %v19553_v11  ;;  %v8432_v61 = vpop.f32.mrb[25].mxu0  ;;  %14123 = vmatmul.mubr.msk.bf16.gmra.mrb[68].mxu1 %vm1168_vm3, %v8867_v50  ;;  %v18595_v19 = vld [vmem:[#allocation2 + $0x40] sm:$0xff]  ;;  %v8876_v46 = vshll.u32 %v18590_v25, 16 }
 0x3e2   : > { %8768 = vst.msk [vmem:[#allocation2 + $0x50] sm:$0xff] %vm1168_vm3, %v8736_v44  ;;  %v14413_v31 = vadd.f32 %v8432_v61, %v19554_v33  ;;  %v14079_v9 = vpop.f32.mrb[26].mxu0  ;;  %v8871_v4 = vshll.u32 %v18595_v19, 16  ;;  %v8869_v8 = vshrl.u32 %v18595_v19, 16 }
 0x3e3   : > { %v14414_v32 = vadd.f32 %v14079_v9, %v19555_v62  ;;  %v8435_v56 = vpop.f32.mrb[27].mxu0  ;;  %v8688_v0 = vadd.f32 %v14412_v63, %v18478_v7  ;;  %v8878_v44 = vrot.slane %v8876_v46, 1  ;;  %v19557_v63 = vld [vmem:[#allocation31_spill] sm:$0xff]  ;;  %v19558_v46 = vld [vmem:[#allocation32_spill] sm:$0xff] }
 0x3e4   : > { %v14415_v3 = vadd.f32 %v8435_v56, %v19556_v23  ;;  %v8873_v26 = vrot.slane %v8871_v4, 1  ;;  %v8686_v42 = vadd.f32 %v14413_v31, %v18478_v7 }
 0x3e5   : > { %v8689_v22 = vadd.f32 %v14414_v32, %v18478_v7 }
 0x3e6   : > { %v8687_v45 = vadd.f32 %v14415_v3, %v18478_v7  ;;  %v18608_v21 = vor.u32 %v8873_v26, %v8869_v8  ;;  %v19559_v3 = vld [vmem:[#allocation33_spill] sm:$0xff] }
 0x3e7   : > { %v8739_v18 = vpack.c.bf16 %v8689_v22, %v8688_v0  ;;  %v19560_v0 = vld [vmem:[#allocation34_spill] sm:$0xff] }
 0x3e8   : > { %v8738_v50 = vpack.c.bf16 %v8687_v45, %v8686_v42  ;;  %v14082_v11 = vpop.f32.mrb[28].mxu0  ;;  %v8879_v61 = vsel %vm8819_vm8, %v18608_v21, %v8878_v44  ;;  %v18612_v33 = vld [vmem:[#allocation2 + $0x58] sm:$0x1] }
 0x3e9   : > { %8771 = vst.msk [vmem:[#allocation2 + $0x68] sm:$0xff] %vm1168_vm3, %v8739_v18  ;;  %v14416_v9 = vadd.f32 %v14082_v11, %v19557_v63  ;;  %v8448_v4 = vpop.f32.mrb[29].mxu0  ;;  %14126 = vmatprep.mubr.msk.bf16.mxu1 %vm1168_vm3, %v8879_v61  ;;  %v18617_v31 = vld [vmem:[#allocation2 + $0x50] sm:$0xff]  ;;  %v8888_v23 = vshll.u32 %v18612_v33, 16 }
 0x3ea   : > { %8770 = vst.msk [vmem:[#allocation2 + $0x60] sm:$0xff] %vm1168_vm3, %v8738_v50  ;;  %v14417_v62 = vadd.f32 %v8448_v4, %v19558_v46  ;;  %v14083_v32 = vpop.f32.mrb[30].mxu0  ;;  %v8883_v56 = vshll.u32 %v18617_v31, 16  ;;  %v8881_v42 = vshrl.u32 %v18617_v31, 16 }
 0x3eb   : > { %v14418_v8 = vadd.f32 %v14083_v32, %v19559_v3  ;;  %v8451_v26 = vpop.f32.mrb[31].mxu0  ;;  %v8692_v44 = vadd.f32 %v14416_v9, %v18478_v7  ;;  %v8890_v63 = vrot.slane %v8888_v23, 1 }
 0x3ec   : > { %v14419_v22 = vadd.f32 %v8451_v26, %v19560_v0  ;;  %v8885_v45 = vrot.slane %v8883_v56, 1  ;;  %v8690_v50 = vadd.f32 %v14417_v62, %v18478_v7 }
 0x3ed   : > { %v8693_v18 = vadd.f32 %v14418_v8, %v18478_v7 }
 0x3ee   : > { %v8691_v11 = vadd.f32 %v14419_v22, %v18478_v7  ;;  %v18630_v61 = vor.u32 %v8885_v45, %v8881_v42 }
 0x3ef   : > { %v8741_v4 = vpack.c.bf16 %v8693_v18, %v8692_v44 }
 0x3f0   : > { %v8740_v46 = vpack.c.bf16 %v8691_v11, %v8690_v50  ;;  %v14086_v32 = vpop.f32.mrb[32].mxu0  ;;  %v8891_v3 = vsel %vm8819_vm8, %v18630_v61, %v8890_v63  ;;  %v18634_v26 = vld [vmem:[#allocation2 + $0x68] sm:$0x1] }
 0x3f1   : > { %8773 = vst.msk [vmem:[#allocation2 + $0x78] sm:$0xff] %vm1168_vm3, %v8741_v4  ;;  %v14420_v9 = vadd.f32 %v14086_v32, %v18213_v6  ;;  %v8464_v56 = vpop.f32.mrb[33].mxu0  ;;  %14127 = vmatmul.mubr.msk.bf16.gmra.mrb[72].mxu1 %vm1168_vm3, %v8891_v3  ;;  %v18639_v62 = vld [vmem:[#allocation2 + $0x60] sm:$0xff]  ;;  %v8900_v22 = vshll.u32 %v18634_v26, 16 }
 0x3f2   : > { %8772 = vst.msk [vmem:[#allocation2 + $0x70] sm:$0xff] %vm1168_vm3, %v8740_v46  ;;  %v14421_v23 = vadd.f32 %v8464_v56, %v18216_v53  ;;  %v14087_v8 = vpop.f32.mrb[34].mxu0  ;;  %v8895_v0 = vshll.u32 %v18639_v62, 16  ;;  %v8893_v6 = vshrl.u32 %v18639_v62, 16 }
 0x3f3   : > { %v14422_v42 = vadd.f32 %v14087_v8, %v18218_v39  ;;  %v8467_v45 = vpop.f32.mrb[35].mxu0  ;;  %v8696_v50 = vadd.f32 %v14420_v9, %v18478_v7  ;;  %v8902_v46 = vrot.slane %v8900_v22, 1 }
 0x3f4   : > { %v14423_v44 = vadd.f32 %v8467_v45, %v18221_v34  ;;  %v8897_v18 = vrot.slane %v8895_v0, 1  ;;  %v8694_v63 = vadd.f32 %v14421_v23, %v18478_v7 }
 0x3f5   : > { %v8697_v11 = vadd.f32 %v14422_v42, %v18478_v7 }
 0x3f6   : > { %v8695_v53 = vadd.f32 %v14423_v44, %v18478_v7  ;;  %v18652_v4 = vor.u32 %v8897_v18, %v8893_v6 }
 0x3f7   : > { %v8743_v32 = vpack.c.bf16 %v8697_v11, %v8696_v50 }
 0x3f8   : > { %v8742_v3 = vpack.c.bf16 %v8695_v53, %v8694_v63  ;;  %v14090_v39 = vpop.f32.mrb[36].mxu0  ;;  %v8903_v34 = vsel %vm8819_vm8, %v18652_v4, %v8902_v46  ;;  %v18656_v56 = vld [vmem:[#allocation2 + $0x78] sm:$0x1] }
 0x3f9   : > { %8775 = vst.msk [vmem:[#allocation2 + $0x88] sm:$0xff] %vm1168_vm3, %v8743_v32  ;;  %v14424_v9 = vadd.f32 %v14090_v39, %v18236_v17  ;;  %v8480_v8 = vpop.f32.mrb[37].mxu0  ;;  %14130 = vmatprep.mubr.msk.bf16.mxu1 %vm1168_vm3, %v8903_v34  ;;  %v18661_v23 = vld [vmem:[#allocation2 + $0x70] sm:$0xff]  ;;  %v8912_v45 = vshll.u32 %v18656_v56, 16 }
 0x3fa   : > { %8774 = vst.msk [vmem:[#allocation2 + $0x80] sm:$0xff] %vm1168_vm3, %v8742_v3  ;;  %v14425_v0 = vadd.f32 %v8480_v8, %v18239_v40  ;;  %v14091_v22 = vpop.f32.mrb[38].mxu0  ;;  %v8907_v42 = vshll.u32 %v18661_v23, 16  ;;  %v8905_v17 = vshrl.u32 %v18661_v23, 16 }
 0x3fb   : > { %v14426_v44 = vadd.f32 %v14091_v22, %v18241_v15  ;;  %v8483_v6 = vpop.f32.mrb[39].mxu0  ;;  %v8700_v11 = vadd.f32 %v14424_v9, %v18478_v7  ;;  %v8914_v32 = vrot.slane %v8912_v45, 1 }
 0x3fc   : > { %v14427_v18 = vadd.f32 %v8483_v6, %v18244_v36  ;;  %v8909_v50 = vrot.slane %v8907_v42, 1  ;;  %v8698_v53 = vadd.f32 %v14425_v0, %v18478_v7  ;;  %v19562_v6 = vld [vmem:[#allocation35_spill] sm:$0xff] }
 0x3fd   : > { %v8701_v63 = vadd.f32 %v14426_v44, %v18478_v7 }
 0x3fe   : > { %v8699_v40 = vadd.f32 %v14427_v18, %v18478_v7  ;;  %v18674_v46 = vor.u32 %v8909_v50, %v8905_v17  ;;  %v19563_v50 = vld [vmem:[#allocation36_spill] sm:$0xff] }
 0x3ff   : > { %v8745_v3 = vpack.c.bf16 %v8701_v63, %v8700_v11 }
 0x400   : > { %19561 = vst [vmem:[#allocation3_spill] sm:$0xff] %v18674_v46  ;;  %v8744_v39 = vpack.c.bf16 %v8699_v40, %v8698_v53  ;;  %v14094_v15 = vpop.f32.mrb[40].mxu0  ;;  %v8915_v36 = vsel %vm8819_vm8, %v18674_v46, %v8914_v32  ;;  %v18678_v34 = vld [vmem:[#allocation2 + $0x88] sm:$0x1] }
 0x401   : > { %8777 = vst.msk [vmem:[#allocation2 + $0x98] sm:$0xff] %vm1168_vm3, %v8745_v3  ;;  %v14428_v9 = vadd.f32 %v14094_v15, %v18259_v59  ;;  %v8496_v8 = vpop.f32.mrb[41].mxu0  ;;  %14131 = vmatmul.mubr.msk.bf16.gmra.mrb[76].mxu1 %vm1168_vm3, %v8915_v36  ;;  %v18683_v0 = vld [vmem:[#allocation2 + $0x80] sm:$0xff]  ;;  %v8924_v44 = vshll.u32 %v18678_v34, 16 }
 0x402   : > { %8776 = vst.msk [vmem:[#allocation2 + $0x90] sm:$0xff] %vm1168_vm3, %v8744_v39  ;;  %v14429_v22 = vadd.f32 %v8496_v8, %v18262_v29  ;;  %v14095_v42 = vpop.f32.mrb[42].mxu0  ;;  %v8919_v45 = vshll.u32 %v18683_v0, 16  ;;  %v8917_v59 = vshrl.u32 %v18683_v0, 16 }
 0x403   : > { %v14430_v18 = vadd.f32 %v14095_v42, %v19562_v6  ;;  %v8499_v17 = vpop.f32.mrb[43].mxu0  ;;  %v8704_v53 = vadd.f32 %v14428_v9, %v18478_v7  ;;  %v8926_v39 = vrot.slane %v8924_v44, 1  ;;  %v19565_v9 = vld [vmem:[#allocation37_spill] sm:$0xff]  ;;  %v19566_v44 = vld [vmem:[#allocation38_spill] sm:$0xff] }
 0x404   : > { %v14431_v11 = vadd.f32 %v8499_v17, %v19563_v50  ;;  %v8921_v63 = vrot.slane %v8919_v45, 1  ;;  %v8702_v32 = vadd.f32 %v14429_v22, %v18478_v7 }
 0x405   : > { %v8705_v40 = vadd.f32 %v14430_v18, %v18478_v7 }
 0x406   : > { %v8703_v29 = vadd.f32 %v14431_v11, %v18478_v7  ;;  %v18696_v3 = vor.u32 %v8921_v63, %v8917_v59  ;;  %v19567_v63 = vld [vmem:[#allocation39_spill] sm:$0xff] }
 0x407   : > { %v8747_v15 = vpack.c.bf16 %v8705_v40, %v8704_v53 }
 0x408   : > { %19564 = vst [vmem:[#allocation4_spill] sm:$0xff] %v18696_v3  ;;  %v8746_v36 = vpack.c.bf16 %v8703_v29, %v8702_v32  ;;  %v14098_v8 = vpop.f32.mrb[44].mxu0  ;;  %v8927_v42 = vsel %vm8819_vm8, %v18696_v3, %v8926_v39  ;;  %v18700_v6 = vld [vmem:[#allocation2 + $0x98] sm:$0x1]  ;;  %v19568_v32 = vld [vmem:[#allocation40_spill] sm:$0xff] }
 0x409   : > { %8779 = vst.msk [vmem:[#allocation2 + $0xa8] sm:$0xff] %vm1168_vm3, %v8747_v15  ;;  %v14432_v45 = vadd.f32 %v14098_v8, %v19565_v9  ;;  %v8512_v18 = vpop.f32.mrb[45].mxu0  ;;  %14134 = vmatprep.mubr.msk.bf16.mxu1 %vm1168_vm3, %v8927_v42  ;;  %v18705_v22 = vld [vmem:[#allocation2 + $0x90] sm:$0xff]  ;;  %v8936_v59 = vshll.u32 %v18700_v6, 16 }
 0x40a   : > { %8778 = vst.msk [vmem:[#allocation2 + $0xa0] sm:$0xff] %vm1168_vm3, %v8746_v36  ;;  %v14433_v17 = vadd.f32 %v8512_v18, %v19566_v44  ;;  %v14099_v50 = vpop.f32.mrb[46].mxu0  ;;  %v8931_v11 = vshll.u32 %v18705_v22, 16  ;;  %v8929_v39 = vshrl.u32 %v18705_v22, 16 }
 0x40b   : > { %v14434_v53 = vadd.f32 %v14099_v50, %v19567_v63  ;;  %v8515_v40 = vpop.f32.mrb[47].mxu0  ;;  %v8708_v8 = vadd.f32 %v14432_v45, %v18478_v7  ;;  %v8938_v44 = vrot.slane %v8936_v59, 1 }
 0x40c   : > { %v14435_v29 = vadd.f32 %v8515_v40, %v19568_v32  ;;  %v8933_v15 = vrot.slane %v8931_v11, 1  ;;  %v8706_v36 = vadd.f32 %v14433_v17, %v18478_v7 }
 0x40d   : > { %v8709_v42 = vadd.f32 %v14434_v53, %v18478_v7 }
 0x40e   : > { %v8707_v9 = vadd.f32 %v14435_v29, %v18478_v7  ;;  %v18718_v18 = vor.u32 %v8933_v15, %v8929_v39 }
 0x40f   : > { %v8749_v3 = vpack.c.bf16 %v8709_v42, %v8708_v8 }
 0x410   : > { %v8748_v46 = vpack.c.bf16 %v8707_v9, %v8706_v36  ;;  %v14102_v50 = vpop.f32.mrb[48].mxu0  ;;  %v8939_v63 = vsel %vm8819_vm8, %v18718_v18, %v8938_v44  ;;  %v18722_v40 = vld [vmem:[#allocation2 + $0xa8] sm:$0x1] }
 0x411   : > { %8781 = vst.msk [vmem:[#allocation2 + $0xb8] sm:$0xff] %vm1168_vm3, %v8749_v3  ;;  %v14436_v45 = vadd.f32 %v14102_v50, %v18305_v37  ;;  %v8528_v11 = vpop.f32.mrb[49].mxu0  ;;  %14135 = vmatmul.mubr.msk.bf16.gmra.mrb[80].mxu1 %vm1168_vm3, %v8939_v63  ;;  %v18727_v17 = vld [vmem:[#allocation2 + $0xa0] sm:$0xff]  ;;  %v8948_v29 = vshll.u32 %v18722_v40, 16 }
 0x412   : > { %8780 = vst.msk [vmem:[#allocation2 + $0xb0] sm:$0xff] %vm1168_vm3, %v8748_v46  ;;  %v14437_v59 = vadd.f32 %v8528_v11, %v18308_v49  ;;  %v14103_v53 = vpop.f32.mrb[50].mxu0  ;;  %v8943_v32 = vshll.u32 %v18727_v17, 16  ;;  %v8941_v37 = vshrl.u32 %v18727_v17, 16 }
 0x413   : > { %v14438_v39 = vadd.f32 %v14103_v53, %v18310_v13  ;;  %v8531_v15 = vpop.f32.mrb[51].mxu0  ;;  %v8712_v42 = vadd.f32 %v14436_v45, %v18478_v7  ;;  %v8950_v44 = vrot.slane %v8948_v29, 1 }
 0x414   : > { %v14439_v3 = vadd.f32 %v8531_v15, %v18313_v47  ;;  %v8945_v8 = vrot.slane %v8943_v32, 1  ;;  %v8710_v46 = vadd.f32 %v14437_v59, %v18478_v7 }
 0x415   : > { %v8713_v36 = vadd.f32 %v14438_v39, %v18478_v7 }
 0x416   : > { %v8711_v49 = vadd.f32 %v14439_v3, %v18478_v7  ;;  %v18740_v9 = vor.u32 %v8945_v8, %v8941_v37 }
 0x417   : > { %v8751_v50 = vpack.c.bf16 %v8713_v36, %v8712_v42 }
 0x418   : > { %v8750_v63 = vpack.c.bf16 %v8711_v49, %v8710_v46  ;;  %v14106_v13 = vpop.f32.mrb[52].mxu0  ;;  %v8951_v47 = vsel %vm8819_vm8, %v18740_v9, %v8950_v44  ;;  %v18744_v11 = vld [vmem:[#allocation2 + $0xb8] sm:$0x1] }
 0x419   : > { %8783 = vst.msk [vmem:[#allocation2 + $0xc8] sm:$0xff] %vm1168_vm3, %v8751_v50  ;;  %v14440_v45 = vadd.f32 %v14106_v13, %v18328_v27  ;;  %v8544_v53 = vpop.f32.mrb[53].mxu0  ;;  %14138 = vmatprep.mubr.msk.bf16.mxu1 %vm1168_vm3, %v8951_v47  ;;  %v18749_v59 = vld [vmem:[#allocation2 + $0xb0] sm:$0xff]  ;;  %v8960_v15 = vshll.u32 %v18744_v11, 16 }
 0x41a   : > { %8782 = vst.msk [vmem:[#allocation2 + $0xc0] sm:$0xff] %vm1168_vm3, %v8750_v63  ;;  %v14441_v32 = vadd.f32 %v8544_v53, %v18331_v52  ;;  %v14107_v29 = vpop.f32.mrb[54].mxu0  ;;  %v8955_v39 = vshll.u32 %v18749_v59, 16  ;;  %v8953_v27 = vshrl.u32 %v18749_v59, 16 }
 0x41b   : > { %v14442_v3 = vadd.f32 %v14107_v29, %v18333_v51  ;;  %v8547_v37 = vpop.f32.mrb[55].mxu0  ;;  %v8716_v36 = vadd.f32 %v14440_v45, %v18478_v7  ;;  %v8962_v50 = vrot.slane %v8960_v15, 1 }
 0x41c   : > { %v14443_v8 = vadd.f32 %v8547_v37, %v18336_v43  ;;  %v8957_v42 = vrot.slane %v8955_v39, 1  ;;  %v8714_v49 = vadd.f32 %v14441_v32, %v18478_v7 }
 0x41d   : > { %v8717_v46 = vadd.f32 %v14442_v3, %v18478_v7 }
 0x41e   : > { %v8715_v52 = vadd.f32 %v14443_v8, %v18478_v7  ;;  %v18762_v44 = vor.u32 %v8957_v42, %v8953_v27 }
 0x41f   : > { %v8753_v63 = vpack.c.bf16 %v8717_v46, %v8716_v36 }
 0x420   : > { %v8752_v13 = vpack.c.bf16 %v8715_v52, %v8714_v49  ;;  %v14110_v51 = vpop.f32.mrb[56].mxu0  ;;  %v8963_v43 = vsel %vm8819_vm8, %v18762_v44, %v8962_v50  ;;  %v18766_v47 = vld [vmem:[#allocation2 + $0xc8] sm:$0x1] }
 0x421   : > { %8785 = vst.msk [vmem:[#allocation2 + $0xd8] sm:$0xff] %vm1168_vm3, %v8753_v63  ;;  %v14444_v45 = vadd.f32 %v14110_v51, %v18351_v48  ;;  %v8560_v53 = vpop.f32.mrb[57].mxu0  ;;  %14139 = vmatmul.mubr.msk.bf16.gmra.mrb[84].mxu1 %vm1168_vm3, %v8963_v43  ;;  %v18771_v32 = vld [vmem:[#allocation2 + $0xc0] sm:$0xff]  ;;  %v8972_v3 = vshll.u32 %v18766_v47, 16 }
 0x422   : > { %8784 = vst.msk [vmem:[#allocation2 + $0xd0] sm:$0xff] %vm1168_vm3, %v8752_v13  ;;  %v14445_v29 = vadd.f32 %v8560_v53, %v18354_v30  ;;  %v14111_v39 = vpop.f32.mrb[58].mxu0  ;;  %v8967_v15 = vshll.u32 %v18771_v32, 16  ;;  %v8965_v48 = vshrl.u32 %v18771_v32, 16 }
 0x423   : > { %v14446_v37 = vadd.f32 %v14111_v39, %v18356_v14  ;;  %v8563_v8 = vpop.f32.mrb[59].mxu0  ;;  %v8720_v36 = vadd.f32 %v14444_v45, %v18478_v7  ;;  %v8974_v50 = vrot.slane %v8972_v3, 1 }
 0x424   : > { %v14447_v27 = vadd.f32 %v8563_v8, %v18359_v41  ;;  %v8969_v42 = vrot.slane %v8967_v15, 1  ;;  %v8718_v49 = vadd.f32 %v14445_v29, %v18478_v7 }
 0x425   : > { %v8721_v46 = vadd.f32 %v14446_v37, %v18478_v7 }
 0x426   : > { %v8719_v30 = vadd.f32 %v14447_v27, %v18478_v7  ;;  %v18784_v52 = vor.u32 %v8969_v42, %v8965_v48 }
 0x427   : > { %v8755_v63 = vpack.c.bf16 %v8721_v46, %v8720_v36 }
 0x428   : > { %v8754_v13 = vpack.c.bf16 %v8719_v30, %v8718_v49  ;;  %v14114_v14 = vpop.f32.mrb[60].mxu0  ;;  %v8975_v41 = vsel %vm8819_vm8, %v18784_v52, %v8974_v50  ;;  %v18788_v51 = vld [vmem:[#allocation2 + $0xd8] sm:$0x1] }
 0x429   : > { %8787 = vst.msk [vmem:[#allocation2 + $0xe8] sm:$0xff] %vm1168_vm3, %v8755_v63  ;;  %v14448_v43 = vadd.f32 %v14114_v14, %v18374_v5  ;;  %v8576_v45 = vpop.f32.mrb[61].mxu0  ;;  %14142 = vmatprep.mubr.msk.bf16.mxu1 %vm1168_vm3, %v8975_v41  ;;  %v18793_v53 = vld [vmem:[#allocation2 + $0xd0] sm:$0xff]  ;;  %v8984_v3 = vshll.u32 %v18788_v51, 16 }
 0x42a   : > { %8786 = vst.msk [vmem:[#allocation2 + $0xe0] sm:$0xff] %vm1168_vm3, %v8754_v13  ;;  %v14449_v29 = vadd.f32 %v8576_v45, %v18377_v24  ;;  %v14115_v39 = vpop.f32.mrb[62].mxu0  ;;  %v8979_v15 = vshll.u32 %v18793_v53, 16  ;;  %v8977_v5 = vshrl.u32 %v18793_v53, 16  ;;  %v9400_v13 = vrot.slane %v18497_v20, 1 }
 0x42b   : > { %v14450_v37 = vadd.f32 %v14115_v39, %v18379_v35  ;;  %v8579_v8 = vpop.f32.mrb[63].mxu0  ;;  %v8724_v42 = vadd.f32 %v14448_v43, %v18478_v7  ;;  %v8986_v30 = vrot.slane %v8984_v3, 1  ;;  %v9357_v41 = vld [vmem:[#allocation2 + $0x10] sm:$0xfe]  ;;  %v9358_v43 = vld [vmem:[#allocation2 + $0x20] sm:$0xfe] }
 0x42c   : > { %v14451_v27 = vadd.f32 %v8579_v8, %v18382_v10  ;;  %v8981_v48 = vrot.slane %v8979_v15, 1  ;;  %v8722_v46 = vadd.f32 %v14449_v29, %v18478_v7  ;;  %v9486_v10 = vsel %vm1265_vm0, %v18544_v57, 0 }
 0x42d   : > { %v8725_v36 = vadd.f32 %v14450_v37, %v18478_v7  ;;  %v9402_v45 = vrot.slane %v9357_v41, 1  ;;  %v9403_v29 = vrot.slane %v18515_v60, 1  ;;  %v9405_v39 = vrot.slane %v9358_v43, 1  ;;  %v12983_v37 = vld [vmem:[%s19481_s3 + $0x8] sm:$0x3] }
 0x42e   : > { %v8723_v24 = vadd.f32 %v14451_v27, %v18478_v7  ;;  %v18806_v49 = vor.u32 %v8981_v48, %v8977_v5  ;;  %v12968_v7 = vld [vmem:[%s19481_s3 + $0x6] sm:$0x3]  ;;  %v9406_v15 = vrot.slane %v18539_v28, 1  ;;  %v9359_v27 = vld [vmem:[#allocation2 + $0x30] sm:$0xfe]  ;;  %v9409_v5 = vrot.slane %v18568_v1, 1 }
 0x42f   : > { %v8757_v50 = vpack.c.bf16 %v8725_v36, %v8724_v42  ;;  %v9721_v3 = vsel %vm1265_vm0, %v12968_v7, 0  ;;  %v9404_v20 = vsel %vm9398_vm9, %v9402_v45, %v9403_v29  ;;  %v9360_v60 = vld [vmem:[#allocation2 + $0x40] sm:$0xfe]  ;;  %v9408_v28 = vrot.slane %v9359_v27, 1  ;;  %v9365_v43 = vld [vmem:[#allocation2 + $0x90] sm:$0xfe] }
 0x430   : > { %v8756_v63 = vpack.c.bf16 %v8723_v24, %v8722_v46  ;;  %v8987_v35 = vsel %vm8819_vm8, %v18806_v49, %v8986_v30  ;;  %v9407_v8 = vsel %vm9398_vm9, %v9405_v39, %v9406_v15  ;;  %v9411_v48 = vrot.slane %v9360_v60, 1  ;;  %v9361_v24 = vld [vmem:[#allocation2 + $0x50] sm:$0xfe]  ;;  %v9362_v30 = vld [vmem:[#allocation2 + $0x60] sm:$0xfe] }
 0x431   : > { %8789 = vst.msk [vmem:[#allocation2 + $0xf8] sm:$0xff] %vm1168_vm3, %v8757_v50  ;;  %14143 = vmatmul.mubr.msk.bf16.gmra.mrb[88].mxu1 %vm1168_vm3, %v8987_v35  ;;  %v9412_v42 = vrot.slane %v18590_v25, 1  ;;  %v9410_v36 = vsel %vm9398_vm9, %v9408_v28, %v9409_v5  ;;  %v9414_v50 = vrot.slane %v9361_v24, 1  ;;  %v9417_v35 = vrot.slane %v9362_v30, 1  ;;  %v9366_v45 = vld [vmem:[#allocation2 + $0xa0] sm:$0xfe] }
 0x432   : > { %8788 = vst.msk [vmem:[#allocation2 + $0xf0] sm:$0xff] %vm1168_vm3, %v8756_v63  ;;  %14148 = vmatprep.mubr.msk.bf16.mxu1 %vm1168_vm3, %v18501_v54  ;;  %v9356_v54 = vld [vmem:[#allocation2] sm:$0xfe]  ;;  %v9415_v63 = vrot.slane %v18612_v33, 1  ;;  %v9424_v41 = vrot.slane %v18678_v34, 1  ;;  %v9426_v29 = vrot.slane %v9365_v43, 1 }
 0x433   : > { %v9399_v57 = vrot.slane %v9356_v54, 1  ;;  %v9413_v46 = vsel %vm9398_vm9, %v9411_v48, %v9412_v42  ;;  %v9364_v54 = vld [vmem:[#allocation2 + $0x80] sm:$0xfe]  ;;  %v9427_v39 = vrot.slane %v18700_v6, 1  ;;  %v9429_v15 = vrot.slane %v9366_v45, 1 }
 0x434   : > { %v9416_v1 = vsel %vm9398_vm9, %v9414_v50, %v9415_v63  ;;  %v9433_v60 = vrot.slane %v18744_v11, 1  ;;  %v9436_v5 = vrot.slane %v18766_v47, 1  ;;  %v9369_v48 = vld [vmem:[#allocation2 + $0xd0] sm:$0xfe]  ;;  %v10137_v11 = vsel %vm1265_vm0, %v12983_v37, 0 }
 0x435   : > { %v9401_v14 = vsel %vm9398_vm9, %v9399_v57, %v9400_v13  ;;  %v9421_v13 = vrot.slane %v18656_v56, 1  ;;  %v9428_v56 = vsel %vm9398_vm9, %v9426_v29, %v9427_v39  ;;  %v9438_v42 = vrot.slane %v9369_v48, 1  ;;  %v12998_v47 = vld [vmem:[%s19481_s3 + $0xa] sm:$0x3]  ;;  %v18942_v63 = vld [vmem:[#allocation2 + $0x48] sm:$0x1] }
 0x436   : > { %v10441_v30 = vsel %vm1265_vm0, %v12998_v47, 0  ;;  %v18973_v45 = vld [vmem:[#allocation2 + $0x88] sm:$0x1]  ;;  %v18977_v29 = vld [vmem:[#allocation2 + $0x98] sm:$0x1]  ;;  %v19569_v39 = vld [vmem:[#allocation3_spill] sm:$0xff] }
 0x437   : > { %v18997_v48 = vld [vmem:[#allocation2 + $0xc8] sm:$0x1] }
 0x439   : > { %14149 = vmatmul.mubr.msk.bf16.vlgmr.msra.gmra.mrb[64].mxu1 %vm1168_vm3, %v18520_v55 }
 0x43a   : > { %14177 = vmatpush3.bf16.msra.mxu1 %v9486_v10  ;;  %14152 = vmatprep.mubr.msk.bf16.mxu1 %vm1168_vm3, %v18549_v12  ;;  %v9418_v10 = vrot.slane %v18634_v26, 1 }
 0x43b   : > { %15137 = vmatprep.subr.msk.bf16.mxu1 %vm1265_vm0, %v12968_v7  ;;  %v9363_v7 = vld [vmem:[#allocation2 + $0x70] sm:$0xfe] }
 0x43c   : > { %v9419_v25 = vsel %vm9398_vm9, %v9417_v35, %v9418_v10  ;;  %v9420_v57 = vrot.slane %v9363_v7, 1  ;;  %v18946_v10 = vld [vmem:[#allocation2 + $0x58] sm:$0x1] }
 0x43d   : > { %v9980_v7 = vshll.u32 %v18946_v10, 16 }
 0x43e   : > { %v9422_v33 = vsel %vm9398_vm9, %v9420_v57, %v9421_v13  ;;  %v18961_v57 = vld [vmem:[#allocation2 + $0x68] sm:$0x1] }
 0x441   : > { %14153 = vmatmul.mubr.msk.bf16.gmra.mrb[68].mxu1 %vm1168_vm3, %v18573_v16 }
 0x442   : > { %14156 = vmatprep.mubr.msk.bf16.mxu1 %vm1168_vm3, %v18595_v19 }
 0x449   : > { %14157 = vmatmul.mubr.msk.bf16.gmra.mrb[72].mxu1 %vm1168_vm3, %v18617_v31 }
 0x44a   : > { %14160 = vmatprep.mubr.msk.bf16.mxu1 %vm1168_vm3, %v18639_v62 }
 0x451   : > { %14161 = vmatmul.mubr.msk.bf16.gmra.mrb[76].mxu1 %vm1168_vm3, %v18661_v23 }
 0x452   : > { %14164 = vmatprep.mubr.msk.bf16.mxu1 %vm1168_vm3, %v18683_v0 }
 0x459   : > { %14165 = vmatmul.mubr.msk.bf16.gmra.mrb[80].mxu1 %vm1168_vm3, %v18705_v22 }
 0x45a   : > { %14168 = vmatprep.mubr.msk.bf16.mxu1 %vm1168_vm3, %v18727_v17 }
 0x461   : > { %14169 = vmatmul.mubr.msk.bf16.gmra.mrb[84].mxu1 %vm1168_vm3, %v18749_v59 }
 0x462   : > { %14172 = vmatprep.mubr.msk.bf16.mxu1 %vm1168_vm3, %v18771_v32 }
 0x469   : > { %14173 = vmatmul.mubr.msk.bf16.gmra.mrb[88].mxu1 %vm1168_vm3, %v18793_v53 }
 0x46a   : > { %14178 = vmatprep.mubr.msk.bf16.mxu1 %vm1168_vm3, %v9401_v14  ;;  %v9423_v14 = vrot.slane %v9364_v54, 1  ;;  %v9982_v54 = vrot.slane %v9980_v7, 1 }
 0x46c   : > { %v9425_v26 = vsel %vm9398_vm9, %v9423_v14, %v9424_v41  ;;  %v18965_v14 = vld [vmem:[#allocation2 + $0x78] sm:$0x1]  ;;  %v9992_v41 = vshll.u32 %v18961_v57, 16 }
 0x471   : > { %14179 = vmatmul.mubr.msk.bf16.vlgmr.msra.gmra.mrb[64].mxu1 %vm1168_vm3, %v9404_v20  ;;  %v9367_v20 = vld [vmem:[#allocation2 + $0xb0] sm:$0xfe] }
 0x472   : > { %14207 = vmatpush3.bf16.msra.mxu1 %v9721_v3  ;;  %14182 = vmatprep.mubr.msk.bf16.mxu1 %vm1168_vm3, %v9407_v8  ;;  %v9430_v3 = vrot.slane %v18722_v40, 1  ;;  %v9368_v8 = vld [vmem:[#allocation2 + $0xc0] sm:$0xfe]  ;;  %v9432_v27 = vrot.slane %v9367_v20, 1  ;;  %v18985_v20 = vld [vmem:[#allocation2 + $0xa8] sm:$0x1] }
 0x473   : > { %15138 = vmatprep.subr.msk.bf16.mxu1 %vm1265_vm0, %v12983_v37  ;;  %v9435_v28 = vrot.slane %v9368_v8, 1  ;;  %v19570_v8 = vld [vmem:[#allocation4_spill] sm:$0xff] }
 0x474   : > { %v9431_v34 = vsel %vm9398_vm9, %v9429_v15, %v9430_v3  ;;  %v9434_v6 = vsel %vm9398_vm9, %v9432_v27, %v9433_v60  ;;  %v10016_v15 = vshll.u32 %v18973_v45, 16  ;;  %v10028_v3 = vshll.u32 %v18977_v29, 16  ;;  %v18989_v27 = vld [vmem:[#allocation2 + $0xb8] sm:$0x1] }
 0x475   : > { %v9437_v40 = vsel %vm9398_vm9, %v9435_v28, %v9436_v5  ;;  %v10040_v28 = vshll.u32 %v18985_v20, 16  ;;  %v10052_v5 = vshll.u32 %v18989_v27, 16 }
 0x479   : > { %14183 = vmatmul.mubr.msk.bf16.gmra.mrb[68].mxu1 %vm1168_vm3, %v9410_v36  ;;  %v9439_v36 = vrot.slane %v18788_v51, 1 }
 0x47a   : > { %14186 = vmatprep.mubr.msk.bf16.mxu1 %vm1168_vm3, %v9413_v46 }
 0x47b   : > { %v9440_v46 = vsel %vm9398_vm9, %v9438_v42, %v9439_v36  ;;  %v19001_v36 = vld [vmem:[#allocation2 + $0xd8] sm:$0x1] }
 0x481   : > { %14187 = vmatmul.mubr.msk.bf16.gmra.mrb[72].mxu1 %vm1168_vm3, %v9416_v1 }
 0x482   : > { %14190 = vmatprep.mubr.msk.bf16.mxu1 %vm1168_vm3, %v9419_v25  ;;  %v9968_v25 = vshll.u32 %v18942_v63, 16 }
 0x489   : > { %14191 = vmatmul.mubr.msk.bf16.gmra.mrb[76].mxu1 %vm1168_vm3, %v9422_v33  ;;  %v10004_v33 = vshll.u32 %v18965_v14, 16 }
 0x48a   : > { %14194 = vmatprep.mubr.msk.bf16.mxu1 %vm1168_vm3, %v9425_v26  ;;  %v9994_v26 = vrot.slane %v9992_v41, 1 }
 0x48b   : > { %v10006_v43 = vrot.slane %v10004_v33, 1 }
 0x491   : > { %14195 = vmatmul.mubr.msk.bf16.gmra.mrb[80].mxu1 %vm1168_vm3, %v9428_v56  ;;  %v10018_v56 = vrot.slane %v10016_v15, 1 }
 0x492   : > { %14198 = vmatprep.mubr.msk.bf16.mxu1 %vm1168_vm3, %v9431_v34  ;;  %v10030_v34 = vrot.slane %v10028_v3, 1  ;;  %v10367_v3 = vrot.slane %v18946_v10, 1 }
 0x494   : > { %v10031_v60 = vsel %vm8819_vm8, %v18718_v18, %v10030_v34 }
 0x499   : > { %14199 = vmatmul.mubr.msk.bf16.gmra.mrb[84].mxu1 %vm1168_vm3, %v9434_v6  ;;  %v10042_v6 = vrot.slane %v10040_v28, 1  ;;  %v10370_v28 = vrot.slane %v18961_v57, 1 }
 0x49a   : > { %14202 = vmatprep.mubr.msk.bf16.mxu1 %vm1168_vm3, %v9437_v40  ;;  %v10054_v40 = vrot.slane %v10052_v5, 1 }
 0x49b   : > { %v10043_v42 = vsel %vm8819_vm8, %v18740_v9, %v10042_v6  ;;  %v10373_v6 = vrot.slane %v18965_v14, 1 }
 0x49c   : > { %v10055_v18 = vsel %vm8819_vm8, %v18762_v44, %v10054_v40  ;;  %v10319_v40 = vld [vmem:[#allocation2 + $0x80] sm:$0xfe] }
 0x4a1   : > { %14203 = vmatmul.mubr.msk.bf16.gmra.mrb[88].mxu1 %vm1168_vm3, %v9440_v46  ;;  %v10064_v46 = vshll.u32 %v18997_v48, 16 }
 0x4a2   : > { %14208 = vmatprep.mubr.msk.bf16.mxu1 %vm1168_vm3, %v18520_v55  ;;  %v18921_v55 = vld [vmem:[#allocation2 + $0x18] sm:$0x1] }
 0x4a9   : > { %14209 = vmatmul.mubr.msk.bf16.vlgmr.msra.gmra.mrb[64].mxu1 %vm1168_vm3, %v18549_v12  ;;  %v9932_v12 = vshll.u32 %v18921_v55, 16 }
 0x4aa   : > { %14237 = vmatpush3.bf16.msra.mxu1 %v10137_v11  ;;  %14212 = vmatprep.mubr.msk.bf16.mxu1 %vm1168_vm3, %v18573_v16  ;;  %v10076_v11 = vshll.u32 %v19001_v36, 16 }
 0x4ab   : > { %15139 = vmatprep.subr.msk.bf16.mxu1 %vm1265_vm0, %v12998_v47  ;;  %v9934_v16 = vrot.slane %v9932_v12, 1  ;;  %v10066_v12 = vrot.slane %v10064_v46, 1  ;;  %v10376_v46 = vrot.slane %v18973_v45, 1 }
 0x4ad   : > { %v10067_v9 = vsel %vm8819_vm8, %v18784_v52, %v10066_v12  ;;  %v10321_v12 = vld [vmem:[#allocation2 + $0xa0] sm:$0xfe] }
 0x4b1   : > { %14213 = vmatmul.mubr.msk.bf16.gmra.mrb[68].mxu1 %vm1168_vm3, %v18595_v19  ;;  %v18928_v19 = vld [vmem:[#allocation2 + $0x28] sm:$0x1] }
 0x4b2   : > { %14216 = vmatprep.mubr.msk.bf16.mxu1 %vm1168_vm3, %v18617_v31  ;;  %v18930_v31 = vld [vmem:[#allocation2 + $0xe0] sm:$0xff]  ;;  %v9944_v51 = vshll.u32 %v18928_v19, 16  ;;  %v10358_v41 = vrot.slane %v18928_v19, 1  ;;  %v10316_v19 = vld [vmem:[#allocation2 + $0x50] sm:$0xfe] }
 0x4b3   : > { %v10083_v47 = vshll.u32 %v18930_v31, 16  ;;  %v10366_v15 = vrot.slane %v10316_v19, 1 }
 0x4b4   : > { %v9946_v24 = vrot.slane %v9944_v51, 1 }
 0x4b5   : > { %v10085_v51 = vrot.slane %v10083_v47, 1  ;;  %v10368_v34 = vsel %vm9398_vm9, %v10366_v15, %v10367_v3  ;;  %v10379_v47 = vrot.slane %v18977_v29, 1  ;;  %v19112_v3 = vld [vmem:[#allocation2 + $0x48] sm:$0x1] }
 0x4b6   : > { %v9947_v35 = vsel %vm8819_vm8, %v18564_v2, %v9946_v24  ;;  %v9970_v2 = vrot.slane %v9968_v25, 1 }
 0x4b8   : > { %v9971_v13 = vsel %vm8819_vm8, %v18608_v21, %v9970_v2  ;;  %v9995_v21 = vsel %vm8819_vm8, %v18652_v4, %v9994_v26  ;;  %v10019_v4 = vsel %vm8819_vm8, %v19570_v8, %v10018_v56  ;;  %v10317_v8 = vld [vmem:[#allocation2 + $0x60] sm:$0xfe] }
 0x4b9   : > { %14217 = vmatmul.mubr.msk.bf16.gmra.mrb[72].mxu1 %vm1168_vm3, %v18639_v62  ;;  %v18932_v62 = vld [vmem:[#allocation2 + $0x38] sm:$0x1] }
 0x4ba   : > { %14220 = vmatprep.mubr.msk.bf16.mxu1 %vm1168_vm3, %v18661_v23  ;;  %v9935_v23 = vsel %vm8819_vm8, %v18533_v58, %v9934_v16  ;;  %v9956_v37 = vshll.u32 %v18932_v62, 16  ;;  %v18951_v58 = vld [vmem:[%s19481_s3 + $0xc] sm:$0x3]  ;;  %v10078_v16 = vrot.slane %v10076_v11, 1  ;;  %v10361_v26 = vrot.slane %v18932_v62, 1 }
 0x4bc   : > { %v9958_v50 = vrot.slane %v9956_v37, 1  ;;  %v10079_v44 = vsel %vm8819_vm8, %v18806_v49, %v10078_v16  ;;  %v10081_v37 = vshrl.u32 %v18930_v31, 16  ;;  %v10322_v16 = vld [vmem:[#allocation2 + $0xb0] sm:$0xfe] }
 0x4be   : > { %v9959_v1 = vsel %vm8819_vm8, %v18586_v38, %v9958_v50  ;;  %v9983_v38 = vsel %vm8819_vm8, %v18630_v61, %v9982_v54  ;;  %v10007_v61 = vsel %vm8819_vm8, %v19569_v39, %v10006_v43  ;;  %v19020_v50 = vor.u32 %v10085_v51, %v10081_v37  ;;  %v10313_v54 = vld [vmem:[#allocation2 + $0x20] sm:$0xfe] }
 0x4bf   : > { %v10382_v51 = vrot.slane %v18985_v20, 1  ;;  %v10385_v37 = vrot.slane %v18989_v27, 1 }
 0x4c1   : > { %14221 = vmatmul.mubr.msk.bf16.gmra.mrb[76].mxu1 %vm1168_vm3, %v18683_v0 }
 0x4c2   : > { %14224 = vmatprep.mubr.msk.bf16.mxu1 %vm1168_vm3, %v18705_v22 }
 0x4c9   : > { %14225 = vmatmul.mubr.msk.bf16.gmra.mrb[80].mxu1 %vm1168_vm3, %v18727_v17 }
 0x4ca   : > { %14228 = vmatprep.mubr.msk.bf16.mxu1 %vm1168_vm3, %v18749_v59 }
 0x4d1   : > { %14229 = vmatmul.mubr.msk.bf16.gmra.mrb[84].mxu1 %vm1168_vm3, %v18771_v32 }
 0x4d2   : > { %14232 = vmatprep.mubr.msk.bf16.mxu1 %vm1168_vm3, %v18793_v53 }
 0x4d9   : > { %14233 = vmatmul.mubr.msk.bf16.gmra.mrb[88].mxu1 %vm1168_vm3, %v18930_v31 }
 0x4da   : > { %14238 = vmatprep.mubr.msk.bf16.mxu1 %vm1168_vm3, %v9935_v23  ;;  %v19010_v23 = vld [vmem:[#allocation2 + $0xe8] sm:$0x1] }
 0x4db   : > { %v10088_v24 = vshll.u32 %v19010_v23, 16 }
 0x4dd   : > { %v10090_v25 = vrot.slane %v10088_v24, 1  ;;  %v10323_v24 = vld [vmem:[#allocation2 + $0xc0] sm:$0xfe] }
 0x4df   : > { %v10091_v7 = vsel %vm8819_vm8, %v19020_v50, %v10090_v25 }
 0x4e1   : > { %14239 = vmatmul.mubr.msk.bf16.vlgmr.msra.gmra.mrb[64].mxu1 %vm1168_vm3, %v9947_v35 }
 0x4e2   : > { %14267 = vmatpush3.bf16.msra.mxu1 %v10441_v30  ;;  %14242 = vmatprep.mubr.msk.bf16.mxu1 %vm1168_vm3, %v9959_v1  ;;  %v10312_v30 = vld [vmem:[#allocation2 + $0x10] sm:$0xfe]  ;;  %v10355_v1 = vrot.slane %v18921_v55, 1  ;;  %v10676_v55 = vsel %vm1265_vm0, %v18951_v58, 0 }
 0x4e3   : > { %15140 = vmatprep.subr.msk.bf16.mxu1 %vm1265_vm0, %v18951_v58  ;;  %v10354_v35 = vrot.slane %v10312_v30, 1  ;;  %v10364_v58 = vrot.slane %v18942_v63, 1  ;;  %v10324_v30 = vld [vmem:[#allocation2 + $0xd0] sm:$0xfe] }
 0x4e4   : > { %v10390_v25 = vrot.slane %v10324_v30, 1 }
 0x4e5   : > { %v10356_v2 = vsel %vm9398_vm9, %v10354_v35, %v10355_v1  ;;  %v10387_v35 = vrot.slane %v10323_v24, 1  ;;  %v10388_v1 = vrot.slane %v18997_v48, 1  ;;  %v10617_v48 = vld [vmem:[#allocation2 + $0x20] sm:$0xff] }
 0x4e7   : > { %v10389_v20 = vsel %vm9398_vm9, %v10387_v35, %v10388_v1  ;;  %v19132_v35 = vld [vmem:[#allocation2 + $0x78] sm:$0x1] }
 0x4e9   : > { %14243 = vmatmul.mubr.msk.bf16.gmra.mrb[68].mxu1 %vm1168_vm3, %v9971_v13  ;;  %v10314_v13 = vld [vmem:[#allocation2 + $0x30] sm:$0xfe] }
 0x4ea   : > { %14246 = vmatprep.mubr.msk.bf16.mxu1 %vm1168_vm3, %v9983_v38  ;;  %v10357_v38 = vrot.slane %v10313_v54, 1  ;;  %v10360_v33 = vrot.slane %v10314_v13, 1  ;;  %v10394_v13 = vrot.slane %v19010_v23, 1  ;;  %v10620_v23 = vld [vmem:[#allocation2 + $0x50] sm:$0xff] }
 0x4ec   : > { %v10359_v43 = vsel %vm9398_vm9, %v10357_v38, %v10358_v41  ;;  %v10362_v39 = vsel %vm9398_vm9, %v10360_v33, %v10361_v26  ;;  %v10618_v41 = vld [vmem:[#allocation2 + $0x30] sm:$0xff]  ;;  %v10619_v26 = vld [vmem:[#allocation2 + $0x40] sm:$0xff] }
 0x4ed   : > { %v13043_v33 = vld [vmem:[%s19481_s3 + $0x10] sm:$0x3] }
 0x4f1   : > { %14247 = vmatmul.mubr.msk.bf16.gmra.mrb[72].mxu1 %vm1168_vm3, %v9995_v21  ;;  %v19036_v21 = vld [vmem:[%s19481_s3 + $0xe] sm:$0x3] }
 0x4f2   : > { %14250 = vmatprep.mubr.msk.bf16.mxu1 %vm1168_vm3, %v10007_v61  ;;  %v10315_v61 = vld [vmem:[#allocation2 + $0x40] sm:$0xfe] }
 0x4f3   : > { %v10363_v62 = vrot.slane %v10315_v61, 1 }
 0x4f5   : > { %v10365_v56 = vsel %vm9398_vm9, %v10363_v62, %v10364_v58  ;;  %v10906_v62 = vshll.u32 %v10619_v26, 16  ;;  %v19108_v58 = vld [vmem:[#allocation2 + $0x38] sm:$0x1] }
 0x4f9   : > { %14251 = vmatmul.mubr.msk.bf16.gmra.mrb[76].mxu1 %vm1168_vm3, %v10019_v4  ;;  %v10318_v4 = vld [vmem:[#allocation2 + $0x70] sm:$0xfe] }
 0x4fa   : > { %14254 = vmatprep.mubr.msk.bf16.mxu1 %vm1168_vm3, %v10031_v60  ;;  %v10369_v60 = vrot.slane %v10317_v8, 1  ;;  %v10372_v5 = vrot.slane %v10318_v4, 1  ;;  %v10904_v8 = vshrl.u32 %v10619_v26, 16  ;;  %v10911_v4 = vshll.u32 %v19112_v3, 16 }
 0x4fc   : > { %v10371_v63 = vsel %vm9398_vm9, %v10369_v60, %v10370_v28  ;;  %v10374_v10 = vsel %vm9398_vm9, %v10372_v5, %v10373_v6  ;;  %v10918_v28 = vshll.u32 %v10620_v23, 16 }
 0x501   : > { %14255 = vmatmul.mubr.msk.bf16.gmra.mrb[80].mxu1 %vm1168_vm3, %v10043_v42  ;;  %v10320_v42 = vld [vmem:[#allocation2 + $0x90] sm:$0xfe] }
 0x502   : > { %14258 = vmatprep.mubr.msk.bf16.mxu1 %vm1168_vm3, %v10055_v18  ;;  %v10375_v18 = vrot.slane %v10319_v40, 1  ;;  %v10378_v11 = vrot.slane %v10320_v42, 1  ;;  %v10913_v40 = vrot.slane %v10911_v4, 1  ;;  %v19121_v42 = vld [vmem:[#allocation2 + $0x58] sm:$0x1] }
 0x504   : > { %v10377_v57 = vsel %vm9398_vm9, %v10375_v18, %v10376_v46  ;;  %v10380_v14 = vsel %vm9398_vm9, %v10378_v11, %v10379_v47  ;;  %v10920_v46 = vrot.slane %v10918_v28, 1  ;;  %v19124_v11 = vld [vmem:[#allocation2 + $0x68] sm:$0x1]  ;;  %v19153_v28 = vld [vmem:[#allocation2 + $0xb8] sm:$0x1] }
 0x509   : > { %14259 = vmatmul.mubr.msk.bf16.gmra.mrb[84].mxu1 %vm1168_vm3, %v10067_v9  ;;  %v10381_v9 = vrot.slane %v10321_v12, 1  ;;  %v10923_v12 = vshll.u32 %v19121_v42, 16 }
 0x50a   : > { %14262 = vmatprep.mubr.msk.bf16.mxu1 %vm1168_vm3, %v10079_v44  ;;  %v10384_v44 = vrot.slane %v10322_v16, 1  ;;  %v10863_v16 = vld [vmem:[#allocation2 + $0x80] sm:$0xff] }
 0x50b   : > { %v10383_v45 = vsel %vm9398_vm9, %v10381_v9, %v10382_v51  ;;  %v10935_v51 = vshll.u32 %v19124_v11, 16  ;;  %v10925_v24 = vrot.slane %v10923_v12, 1  ;;  %v19163_v12 = vld [vmem:[#allocation2 + $0xd8] sm:$0x1] }
 0x50c   : > { %v10386_v29 = vsel %vm9398_vm9, %v10384_v44, %v10385_v37 }
 0x50d   : > { %v10937_v30 = vrot.slane %v10935_v51, 1 }
 0x511   : > { %14263 = vmatmul.mubr.msk.bf16.gmra.mrb[88].mxu1 %vm1168_vm3, %v10091_v7  ;;  %v10391_v7 = vrot.slane %v19001_v36, 1  ;;  %v11092_v36 = vsel %vm1265_vm0, %v19036_v21, 0 }
 0x512   : > { %14268 = vmatprep.mubr.msk.bf16.mxu1 %vm1168_vm3, %v10356_v2  ;;  %v10325_v2 = vld [vmem:[#allocation2 + $0xe0] sm:$0xfe] }
 0x513   : > { %v10392_v27 = vsel %vm9398_vm9, %v10390_v25, %v10391_v7  ;;  %v10393_v54 = vrot.slane %v10325_v2, 1  ;;  %v19135_v7 = vld [vmem:[#allocation2 + $0x88] sm:$0x1]  ;;  %v10865_v2 = vld [vmem:[#allocation2 + $0x90] sm:$0xff] }
 0x515   : > { %v10395_v38 = vsel %vm9398_vm9, %v10393_v54, %v10394_v13  ;;  %v10947_v13 = vshll.u32 %v19132_v35, 16 }
 0x519   : > { %14269 = vmatmul.mubr.msk.bf16.vlgmr.msra.gmra.mrb[64].mxu1 %vm1168_vm3, %v10359_v43  ;;  %v19087_v43 = vld [vmem:[#allocation2 + $0x70] sm:$0xff] }
 0x51a   : > { %14297 = vmatpush3.bf16.msra.mxu1 %v10676_v55  ;;  %14272 = vmatprep.mubr.msk.bf16.mxu1 %vm1168_vm3, %v10362_v39  ;;  %v10621_v55 = vld [vmem:[#allocation2 + $0x60] sm:$0xff]  ;;  %v19101_v39 = vld [vmem:[#allocation2 + $0x28] sm:$0x1]  ;;  %v10942_v37 = vshll.u32 %v19087_v43, 16  ;;  %v10940_v54 = vshrl.u32 %v19087_v43, 16 }
 0x51b   : > { %15141 = vmatprep.subr.msk.bf16.mxu1 %vm1265_vm0, %v19036_v21  ;;  %v10882_v21 = vshll.u32 %v10617_v48, 16  ;;  %v10930_v6 = vshll.u32 %v10621_v55, 16  ;;  %v10928_v9 = vshrl.u32 %v10621_v55, 16 }
 0x51c   : > { %v10944_v25 = vrot.slane %v10942_v37, 1 }
 0x51d   : > { %v10884_v61 = vrot.slane %v10882_v21, 1 }
 0x521   : > { %14273 = vmatmul.mubr.msk.bf16.gmra.mrb[68].mxu1 %vm1168_vm3, %v10365_v56  ;;  %v10892_v56 = vshrl.u32 %v10618_v41, 16 }
 0x522   : > { %14276 = vmatprep.mubr.msk.bf16.mxu1 %vm1168_vm3, %v10368_v34  ;;  %v10899_v34 = vshll.u32 %v19108_v58, 16 }
 0x529   : > { %14277 = vmatmul.mubr.msk.bf16.gmra.mrb[72].mxu1 %vm1168_vm3, %v10371_v63  ;;  %v10901_v63 = vrot.slane %v10899_v34, 1 }
 0x52a   : > { %14280 = vmatprep.mubr.msk.bf16.mxu1 %vm1168_vm3, %v10374_v10  ;;  %v11396_v10 = vsel %vm1265_vm0, %v13043_v33, 0 }
 0x531   : > { %14281 = vmatmul.mubr.msk.bf16.gmra.mrb[76].mxu1 %vm1168_vm3, %v10377_v57  ;;  %v10932_v57 = vrot.slane %v10930_v6, 1 }
 0x532   : > { %14284 = vmatprep.mubr.msk.bf16.mxu1 %vm1168_vm3, %v10380_v14  ;;  %v10916_v14 = vshrl.u32 %v10620_v23, 16 }
 0x534   : > { %v10921_v44 = vor.u32 %v10920_v46, %v10916_v14 }
 0x536   : > { %v10926_v1 = vsel %vm8819_vm8, %v10921_v44, %v10925_v24  ;;  %v11019_v44 = vshll.u32 %v19163_v12, 16 }
 0x539   : > { %14285 = vmatmul.mubr.msk.bf16.gmra.mrb[80].mxu1 %vm1168_vm3, %v10383_v45  ;;  %v10933_v45 = vor.u32 %v10932_v57, %v10928_v9  ;;  %v19166_v9 = vld [vmem:[#allocation2 + $0xe8] sm:$0x1] }
 0x53a   : > { %14288 = vmatprep.mubr.msk.bf16.mxu1 %vm1168_vm3, %v10386_v29  ;;  %v10954_v29 = vshll.u32 %v10863_v16, 16  ;;  %v11031_v37 = vshll.u32 %v19166_v9, 16 }
 0x53c   : > { %v11033_v24 = vrot.slane %v11031_v37, 1  ;;  %v11343_v37 = vrot.slane %v19163_v12, 1  ;;  %v19232_v12 = vld [vmem:[%s19482_s4] ss:$0 sm:$0xff] }
 0x541   : > { %14289 = vmatmul.mubr.msk.bf16.gmra.mrb[84].mxu1 %vm1168_vm3, %v10389_v20  ;;  %v10938_v20 = vsel %vm8819_vm8, %v10933_v45, %v10937_v30  ;;  %v19175_v30 = vld [vmem:[#allocation2 + $0xf8] sm:$0x1] }
 0x542   : > { %14292 = vmatprep.mubr.msk.bf16.mxu1 %vm1168_vm3, %v10392_v27  ;;  %v10956_v27 = vrot.slane %v10954_v29, 1  ;;  %v11021_v29 = vrot.slane %v11019_v44, 1 }
 0x549   : > { %14293 = vmatmul.mubr.msk.bf16.gmra.mrb[88].mxu1 %vm1168_vm3, %v10395_v38  ;;  %v10867_v38 = vld [vmem:[#allocation2 + $0xa0] sm:$0xff] }
 0x54a   : > { %14298 = vmatprep.mubr.msk.bf16.mxu1 %vm1168_vm3, %v10617_v48 }
 0x551   : > { %14299 = vmatmul.mubr.msk.bf16.vlgmr.msra.gmra.mrb[64].mxu1 %vm1168_vm3, %v10618_v41 }
 0x552   : > { %14327 = vmatpush3.bf16.msra.mxu1 %v11092_v36  ;;  %14302 = vmatprep.mubr.msk.bf16.mxu1 %vm1168_vm3, %v10619_v26  ;;  %v10959_v36 = vshll.u32 %v19135_v7, 16 }
 0x553   : > { %15142 = vmatprep.subr.msk.bf16.mxu1 %vm1265_vm0, %v13043_v33  ;;  %v10966_v33 = vshll.u32 %v10865_v2, 16 }
 0x554   : > { %v10961_v21 = vrot.slane %v10959_v36, 1 }
 0x559   : > { %14303 = vmatmul.mubr.msk.bf16.gmra.mrb[68].mxu1 %vm1168_vm3, %v10620_v23  ;;  %v10978_v23 = vshll.u32 %v10867_v38, 16 }
 0x55a   : > { %14306 = vmatprep.mubr.msk.bf16.mxu1 %vm1168_vm3, %v10621_v55  ;;  %v10949_v55 = vrot.slane %v10947_v13, 1 }
 0x561   : > { %14307 = vmatmul.mubr.msk.bf16.gmra.mrb[72].mxu1 %vm1168_vm3, %v19087_v43 }
 0x562   : > { %14310 = vmatprep.mubr.msk.bf16.mxu1 %vm1168_vm3, %v18683_v0  ;;  %v10880_v0 = vshrl.u32 %v10617_v48, 16  ;;  %v10952_v48 = vshrl.u32 %v10863_v16, 16 }
 0x564   : > { %v10885_v19 = vor.u32 %v10884_v61, %v10880_v0  ;;  %v10957_v26 = vor.u32 %v10956_v27, %v10952_v48  ;;  %v19143_v61 = vld [vmem:[#allocation2 + $0x98] sm:$0x1]  ;;  %v11043_v27 = vshll.u32 %v19175_v30, 16 }
 0x566   : > { %v10962_v43 = vsel %vm8819_vm8, %v10957_v26, %v10961_v21  ;;  %v11045_v48 = vrot.slane %v11043_v27, 1  ;;  %v11270_v21 = vld [vmem:[#allocation2 + $0x50] sm:$0xfe] }
 0x569   : > { %14311 = vmatmul.mubr.msk.bf16.gmra.mrb[76].mxu1 %vm1168_vm3, %v18705_v22  ;;  %v10887_v22 = vshll.u32 %v19101_v39, 16 }
 0x56a   : > { %14314 = vmatprep.mubr.msk.bf16.mxu1 %vm1168_vm3, %v18727_v17  ;;  %v10894_v17 = vshll.u32 %v10618_v41, 16  ;;  %v10945_v41 = vor.u32 %v10944_v25, %v10940_v54 }
 0x56c   : > { %v10896_v15 = vrot.slane %v10894_v17, 1  ;;  %v10950_v0 = vsel %vm8819_vm8, %v10945_v41, %v10949_v55  ;;  %v19146_v17 = vld [vmem:[#allocation2 + $0xa8] sm:$0x1]  ;;  %v11268_v41 = vld [vmem:[#allocation2 + $0x30] sm:$0xfe] }
 0x56e   : > { %v10897_v60 = vor.u32 %v10896_v15, %v10892_v56  ;;  %v10971_v15 = vshll.u32 %v19143_v61, 16 }
 0x570   : > { %v10902_v18 = vsel %vm8819_vm8, %v10897_v60, %v10901_v63  ;;  %v10973_v4 = vrot.slane %v10971_v15, 1  ;;  %v19156_v63 = vld [vmem:[#allocation2 + $0xc8] sm:$0x1]  ;;  %v11273_v15 = vld [vmem:[#allocation2 + $0x80] sm:$0xfe] }
 0x571   : > { %14315 = vmatmul.mubr.msk.bf16.gmra.mrb[80].mxu1 %vm1168_vm3, %v18749_v59  ;;  %v10889_v59 = vrot.slane %v10887_v22, 1  ;;  %v10968_v22 = vrot.slane %v10966_v33, 1  ;;  %v11007_v46 = vshll.u32 %v19156_v63, 16  ;;  %v11312_v33 = vrot.slane %v11268_v41, 1 }
 0x572   : > { %14318 = vmatprep.mubr.msk.bf16.mxu1 %vm1168_vm3, %v18771_v32  ;;  %v19110_v32 = vld [vmem:[#allocation2 + $0xf0] sm:$0xff] }
 0x573   : > { %v11009_v14 = vrot.slane %v11007_v46, 1  ;;  %v11038_v45 = vshll.u32 %v19110_v32, 16 }
 0x575   : > { %v11010_v51 = vsel %vm8819_vm8, %v18784_v52, %v11009_v14  ;;  %v11040_v25 = vrot.slane %v11038_v45, 1  ;;  %v11034_v52 = vsel %vm8819_vm8, %v19020_v50, %v11033_v24  ;;  %v11269_v50 = vld [vmem:[#allocation2 + $0x40] sm:$0xfe]  ;;  %v11340_v14 = vrot.slane %v19156_v63, 1  ;;  %v11280_v24 = vld [vmem:[#allocation2 + $0xf0] sm:$0xfe] }
 0x576   : > { %v11315_v26 = vrot.slane %v11269_v50, 1 }
 0x579   : > { %14319 = vmatmul.mubr.msk.bf16.gmra.mrb[84].mxu1 %vm1168_vm3, %v18793_v53  ;;  %v10890_v53 = vsel %vm8819_vm8, %v10885_v19, %v10889_v59  ;;  %v10980_v19 = vrot.slane %v10978_v23, 1  ;;  %v10964_v59 = vshrl.u32 %v10865_v2, 16  ;;  %v11267_v2 = vld [vmem:[#allocation2 + $0x20] sm:$0xfe]  ;;  %v11316_v23 = vrot.slane %v19112_v3, 1 }
 0x57a   : > { %14322 = vmatprep.mubr.msk.bf16.mxu1 %vm1168_vm3, %v18930_v31  ;;  %v10908_v31 = vrot.slane %v10906_v62, 1  ;;  %v10869_v62 = vld [vmem:[#allocation2 + $0xb0] sm:$0xff]  ;;  %v11309_v13 = vrot.slane %v11267_v2, 1 }
 0x57b   : > { %v10969_v56 = vor.u32 %v10968_v22, %v10964_v59  ;;  %v10990_v34 = vshll.u32 %v10869_v62, 16  ;;  %v11318_v22 = vrot.slane %v11270_v21, 1  ;;  %v11272_v59 = vld [vmem:[#allocation2 + $0x70] sm:$0xfe] }
 0x57c   : > { %v10909_v5 = vor.u32 %v10908_v31, %v10904_v8  ;;  %v10983_v31 = vshll.u32 %v19146_v17, 16 }
 0x57d   : > { %v10992_v6 = vrot.slane %v10990_v34, 1  ;;  %v11328_v34 = vrot.slane %v19135_v7, 1 }
 0x57e   : > { %v10914_v47 = vsel %vm8819_vm8, %v10909_v5, %v10913_v40  ;;  %v10985_v60 = vrot.slane %v10983_v31, 1  ;;  %v10974_v5 = vsel %vm8819_vm8, %v10969_v56, %v10973_v4  ;;  %v10988_v40 = vshrl.u32 %v10869_v62, 16  ;;  %v11275_v4 = vld [vmem:[#allocation2 + $0xa0] sm:$0xfe] }
 0x57f   : > { %v11322_v62 = vrot.slane %v19124_v11, 1  ;;  %v11325_v31 = vrot.slane %v19132_v35, 1  ;;  %v11327_v56 = vrot.slane %v11273_v15, 1 }
 0x581   : > { %14323 = vmatmul.mubr.msk.bf16.gmra.mrb[88].mxu1 %vm1168_vm3, %v19110_v32  ;;  %v11329_v11 = vsel %vm9398_vm9, %v11327_v56, %v11328_v34 }
 0x582   : > { %14328 = vmatprep.mubr.msk.bf16.mxu1 %vm1168_vm3, %v10890_v53  ;;  %v10976_v53 = vshrl.u32 %v10867_v38, 16  ;;  %v11310_v38 = vrot.slane %v19101_v39, 1  ;;  %v11317_v39 = vsel %vm9398_vm9, %v11315_v26, %v11316_v23 }
 0x584   : > { %v10981_v8 = vor.u32 %v10980_v19, %v10976_v53  ;;  %v11311_v36 = vsel %vm9398_vm9, %v11309_v13, %v11310_v38  ;;  %v11324_v53 = vrot.slane %v11272_v59, 1 }
 0x589   : > { %14329 = vmatmul.mubr.msk.bf16.vlgmr.msra.gmra.mrb[64].mxu1 %vm1168_vm3, %v10902_v18  ;;  %v10995_v18 = vshll.u32 %v19153_v28, 16 }
 0x58a   : > { %14357 = vmatpush3.bf16.msra.mxu1 %v11396_v10  ;;  %14332 = vmatprep.mubr.msk.bf16.mxu1 %vm1168_vm3, %v10914_v47  ;;  %v10986_v10 = vsel %vm8819_vm8, %v10981_v8, %v10985_v60  ;;  %v10993_v47 = vor.u32 %v10992_v6, %v10988_v40  ;;  %v11274_v8 = vld [vmem:[#allocation2 + $0x90] sm:$0xfe]  ;;  %v11333_v6 = vrot.slane %v11275_v4, 1 }
 0x58b   : > { %v10997_v57 = vrot.slane %v10995_v18, 1  ;;  %v11330_v60 = vrot.slane %v11274_v8, 1  ;;  %v11276_v40 = vld [vmem:[#allocation2 + $0xb0] sm:$0xfe]  ;;  %v11277_v18 = vld [vmem:[#allocation2 + $0xc0] sm:$0xfe] }
 0x58c   : > { %v11336_v46 = vrot.slane %v11276_v40, 1 }
 0x58d   : > { %v10998_v16 = vsel %vm8819_vm8, %v10993_v47, %v10997_v57  ;;  %v11337_v47 = vrot.slane %v19153_v28, 1  ;;  %v11339_v57 = vrot.slane %v11277_v18, 1 }
 0x591   : > { %14333 = vmatmul.mubr.msk.bf16.gmra.mrb[68].mxu1 %vm1168_vm3, %v10926_v1  ;;  %v11022_v1 = vsel %vm8819_vm8, %v18806_v49, %v11021_v29  ;;  %v11346_v29 = vrot.slane %v19166_v9, 1 }
 0x592   : > { %14336 = vmatprep.mubr.msk.bf16.mxu1 %vm1168_vm3, %v10938_v20  ;;  %v11036_v20 = vshrl.u32 %v19110_v32, 16  ;;  %v11313_v32 = vrot.slane %v19108_v58, 1 }
 0x594   : > { %v11041_v54 = vor.u32 %v11040_v25, %v11036_v20  ;;  %v11314_v55 = vsel %vm9398_vm9, %v11312_v33, %v11313_v32  ;;  %v11349_v25 = vrot.slane %v19175_v30, 1  ;;  %v19237_v20 = vld [vmem:[%s19483_s5] ss:$0 sm:$0xff] }
 0x596   : > { %v11046_v49 = vsel %vm8819_vm8, %v11041_v54, %v11045_v48 }
 0x599   : > { %14337 = vmatmul.mubr.msk.bf16.gmra.mrb[72].mxu1 %vm1168_vm3, %v10950_v0  ;;  %v11271_v0 = vld [vmem:[#allocation2 + $0x60] sm:$0xfe] }
 0x59a   : > { %14340 = vmatprep.mubr.msk.bf16.mxu1 %vm1168_vm3, %v10962_v43  ;;  %v11319_v43 = vrot.slane %v19121_v42, 1  ;;  %v11321_v19 = vrot.slane %v11271_v0, 1  ;;  %v11326_v42 = vsel %vm9398_vm9, %v11324_v53, %v11325_v31 }
 0x59c   : > { %v11320_v58 = vsel %vm9398_vm9, %v11318_v22, %v11319_v43  ;;  %v11323_v3 = vsel %vm9398_vm9, %v11321_v19, %v11322_v62 }
 0x5a1   : > { %14341 = vmatmul.mubr.msk.bf16.gmra.mrb[76].mxu1 %vm1168_vm3, %v10974_v5  ;;  %v11331_v5 = vrot.slane %v19143_v61, 1  ;;  %v11338_v61 = vsel %vm9398_vm9, %v11336_v46, %v11337_v47 }
 0x5a2   : > { %14344 = vmatprep.mubr.msk.bf16.mxu1 %vm1168_vm3, %v10986_v10  ;;  %v11334_v10 = vrot.slane %v19146_v17, 1  ;;  %v11341_v17 = vsel %vm9398_vm9, %v11339_v57, %v11340_v14 }
 0x5a3   : > { %v11332_v35 = vsel %vm9398_vm9, %v11330_v60, %v11331_v5 }
 0x5a4   : > { %v11335_v7 = vsel %vm9398_vm9, %v11333_v6, %v11334_v10 }
 0x5a9   : > { %14345 = vmatmul.mubr.msk.bf16.gmra.mrb[80].mxu1 %vm1168_vm3, %v10998_v16  ;;  %v11278_v16 = vld [vmem:[#allocation2 + $0xd0] sm:$0xfe] }
 0x5aa   : > { %14348 = vmatprep.mubr.msk.bf16.mxu1 %vm1168_vm3, %v11010_v51  ;;  %v11279_v51 = vld [vmem:[#allocation2 + $0xe0] sm:$0xfe]  ;;  %v11342_v44 = vrot.slane %v11278_v16, 1 }
 0x5ab   : > { %v11345_v45 = vrot.slane %v11279_v51, 1 }
 0x5ac   : > { %v11344_v28 = vsel %vm9398_vm9, %v11342_v44, %v11343_v37 }
 0x5ad   : > { %v11347_v63 = vsel %vm9398_vm9, %v11345_v45, %v11346_v29 }
 0x5b1   : > { %14349 = vmatmul.mubr.msk.bf16.gmra.mrb[84].mxu1 %vm1168_vm3, %v11022_v1  ;;  %v11348_v1 = vrot.slane %v11280_v24, 1 }
 0x5b2   : > { %14352 = vmatprep.mubr.msk.bf16.mxu1 %vm1168_vm3, %v11034_v52 }
 0x5b3   : > { %v11350_v52 = vsel %vm9398_vm9, %v11348_v1, %v11349_v25 }
 0x5b9   : > { %14353 = vmatmul.mubr.msk.bf16.gmra.mrb[88].mxu1 %vm1168_vm3, %v11046_v49 }
 0x5ba   : > { %14358 = vmatprep.mubr.msk.bf16.mxu1 %vm1168_vm3, %v11311_v36 }
 0x5c1   : > { %14359 = vmatmul.mubr.msk.bf16.vlgmr.msra.gmra.mrb[64].mxu1 %vm1168_vm3, %v11314_v55 }
 0x5c2   : > { %14362 = vmatprep.mubr.msk.bf16.mxu1 %vm1168_vm3, %v11317_v39 }
 0x5c9   : > { %14363 = vmatmul.mubr.msk.bf16.gmra.mrb[68].mxu1 %vm1168_vm3, %v11320_v58 }
 0x5ca   : > { %14366 = vmatprep.mubr.msk.bf16.mxu1 %vm1168_vm3, %v11323_v3 }
 0x5d1   : > { %14367 = vmatmul.mubr.msk.bf16.gmra.mrb[72].mxu1 %vm1168_vm3, %v11326_v42 }
 0x5d2   : > { %14370 = vmatprep.mubr.msk.bf16.mxu1 %vm1168_vm3, %v11329_v11 }
 0x5d9   : > { %14371 = vmatmul.mubr.msk.bf16.gmra.mrb[76].mxu1 %vm1168_vm3, %v11332_v35 }
 0x5da   : > { %14374 = vmatprep.mubr.msk.bf16.mxu1 %vm1168_vm3, %v11335_v7 }
 0x5e1   : > { %14375 = vmatmul.mubr.msk.bf16.gmra.mrb[80].mxu1 %vm1168_vm3, %v11338_v61 }
 0x5e2   : > { %14378 = vmatprep.mubr.msk.bf16.mxu1 %vm1168_vm3, %v11341_v17 }
 0x5e9   : > { %14379 = vmatmul.mubr.msk.bf16.gmra.mrb[84].mxu1 %vm1168_vm3, %v11344_v28 }
 0x5ea   : > { %14382 = vmatprep.mubr.msk.bf16.mxu1 %vm1168_vm3, %v11347_v63 }
 0x5f1   : > { %14383 = vmatmul.mubr.msk.bf16.gmra.mrb[88].mxu1 %vm1168_vm3, %v11350_v52 }
 0x694   : > { %v14360_v9 = vpop.f32.mrb[64].mxu1 }
 0x695   : > { %v11580_v27 = vmul.f32 %v14360_v9, %v19232_v12  ;;  %v11432_v2 = vpop.f32.mrb[65].mxu1 }
 0x696   : > { %v11578_v30 = vmul.f32 %v19232_v12, %v11432_v2  ;;  %v14361_v54 = vpop.f32.mrb[66].mxu1 }
 0x697   : > { %v19242_v13 = vadd.f32 %v19237_v20, %v11580_v27  ;;  %v11581_v38 = vmul.f32 %v14361_v54, %v19232_v12  ;;  %v11435_v48 = vpop.f32.mrb[67].mxu1 }
 0x698   : > { %v19246_v49 = vadd.f32 %v19237_v20, %v11578_v30  ;;  %v11579_v36 = vmul.f32 %v19232_v12, %v11435_v48 }
 0x699   : > { %v13062_v41 = vmul.f32 -1.442695, %v19242_v13  ;;  %v19251_v50 = vadd.f32 %v19237_v20, %v11581_v38 }
 0x69a   : > { %v13060_v33 = vmul.f32 -1.442695, %v19246_v49  ;;  %v19255_v32 = vadd.f32 %v19237_v20, %v11579_v36 }
 0x69b   : > { %15265 = vpow2.f32 %v13062_v41  ;;  %v13063_v26 = vmul.f32 -1.442695, %v19251_v50 }
 0x69c   : > { %15267 = vpow2.f32 %v13060_v33  ;;  %v13061_v23 = vmul.f32 -1.442695, %v19255_v32  ;;  %v14364_v55 = vpop.f32.mrb[68].mxu1 }
 0x69d   : > { %15269 = vpow2.f32 %v13063_v26  ;;  %v11584_v39 = vmul.f32 %v14364_v55, %v19232_v12  ;;  %v11448_v21 = vpop.f32.mrb[69].mxu1 }
 0x69e   : > { %15271 = vpow2.f32 %v13061_v23  ;;  %v11582_v0 = vmul.f32 %v19232_v12, %v11448_v21  ;;  %v14365_v22 = vpop.f32.mrb[70].mxu1 }
 0x69f   : > { %v19262_v43 = vadd.f32 %v19237_v20, %v11584_v39  ;;  %v11585_v19 = vmul.f32 %v14365_v22, %v19232_v12  ;;  %v11451_v62 = vpop.f32.mrb[71].mxu1 }
 0x6a0   : > { %v19266_v58 = vadd.f32 %v19237_v20, %v11582_v0  ;;  %v11583_v3 = vmul.f32 %v19232_v12, %v11451_v62 }
 0x6a1   : > { %v13066_v59 = vmul.f32 -1.442695, %v19262_v43  ;;  %v19271_v15 = vadd.f32 %v19237_v20, %v11585_v19 }
 0x6a2   : > { %v13064_v53 = vmul.f32 -1.442695, %v19266_v58  ;;  %v19275_v31 = vadd.f32 %v19237_v20, %v11583_v3 }
 0x6a3   : > { %15273 = vpow2.f32 %v13066_v59  ;;  %v13067_v56 = vmul.f32 -1.442695, %v19271_v15 }
 0x6a4   : > { %15275 = vpow2.f32 %v13064_v53  ;;  %v13065_v34 = vmul.f32 -1.442695, %v19275_v31  ;;  %v14368_v42 = vpop.f32.mrb[72].mxu1 }
 0x6a5   : > { %v15266_v11 = vpop.eup %15265  ;;  %15277 = vpow2.f32 %v13067_v56  ;;  %v11588_v8 = vmul.f32 %v14368_v42, %v19232_v12  ;;  %v11464_v4 = vpop.f32.mrb[73].mxu1 }
 0x6a6   : > { %v15268_v60 = vpop.eup %15267  ;;  %v11727_v5 = vadd.f32 1.0, %v15266_v11  ;;  %15279 = vpow2.f32 %v13065_v34  ;;  %v11586_v6 = vmul.f32 %v19232_v12, %v11464_v4  ;;  %v14369_v10 = vpop.f32.mrb[74].mxu1 }
 0x6a7   : > { %v15270_v35 = vpop.eup %15269  ;;  %v11725_v7 = vadd.f32 1.0, %v15268_v60  ;;  %v19282_v40 = vadd.f32 %v19237_v20, %v11588_v8  ;;  %v11589_v18 = vmul.f32 %v14369_v10, %v19232_v12  ;;  %v11467_v46 = vpop.f32.mrb[75].mxu1 }
 0x6a8   : > { %v15272_v47 = vpop.eup %15271  ;;  %15281 = vrcp.f32 %v11727_v5  ;;  %v11728_v57 = vadd.f32 1.0, %v15270_v35  ;;  %v19286_v14 = vadd.f32 %v19237_v20, %v11586_v6  ;;  %v11587_v61 = vmul.f32 %v19232_v12, %v11467_v46 }
 0x6a9   : > { %15283 = vrcp.f32 %v11725_v7  ;;  %v11726_v17 = vadd.f32 1.0, %v15272_v47  ;;  %v13070_v16 = vmul.f32 -1.442695, %v19282_v40  ;;  %v19291_v51 = vadd.f32 %v19237_v20, %v11589_v18 }
 0x6aa   : > { %15285 = vrcp.f32 %v11728_v57  ;;  %v13068_v44 = vmul.f32 -1.442695, %v19286_v14  ;;  %v19295_v37 = vadd.f32 %v19237_v20, %v11587_v61 }
 0x6ab   : > { %15287 = vrcp.f32 %v11726_v17  ;;  %v13071_v45 = vmul.f32 -1.442695, %v19291_v51 }
 0x6ac   : > { %15289 = vpow2.f32 %v13070_v16  ;;  %v13069_v29 = vmul.f32 -1.442695, %v19295_v37  ;;  %v14372_v28 = vpop.f32.mrb[76].mxu1 }
 0x6ad   : > { %v15274_v63 = vpop.eup %15273  ;;  %15291 = vpow2.f32 %v13068_v44  ;;  %v11592_v24 = vmul.f32 %v14372_v28, %v19232_v12  ;;  %v11480_v1 = vpop.f32.mrb[77].mxu1 }
 0x6ae   : > { %v15276_v25 = vpop.eup %15275  ;;  %v11731_v52 = vadd.f32 1.0, %v15274_v63  ;;  %15293 = vpow2.f32 %v13071_v45  ;;  %v11590_v9 = vmul.f32 %v19232_v12, %v11480_v1  ;;  %v14373_v27 = vpop.f32.mrb[78].mxu1 }
 0x6af   : > { %v15278_v2 = vpop.eup %15277  ;;  %v11729_v30 = vadd.f32 1.0, %v15276_v25  ;;  %15295 = vpow2.f32 %v13069_v29  ;;  %v19303_v54 = vadd.f32 %v19237_v20, %v11592_v24  ;;  %v11593_v38 = vmul.f32 %v14373_v27, %v19232_v12  ;;  %v11483_v48 = vpop.f32.mrb[79].mxu1 }
 0x6b0   : > { %v15280_v36 = vpop.eup %15279  ;;  %15297 = vrcp.f32 %v11731_v52  ;;  %v11732_v41 = vadd.f32 1.0, %v15278_v2  ;;  %v19307_v33 = vadd.f32 %v19237_v20, %v11590_v9  ;;  %v11591_v26 = vmul.f32 %v19232_v12, %v11483_v48 }
 0x6b1   : > { %15299 = vrcp.f32 %v11729_v30  ;;  %v11730_v23 = vadd.f32 1.0, %v15280_v36  ;;  %v13074_v55 = vmul.f32 -1.442695, %v19303_v54  ;;  %v19312_v39 = vadd.f32 %v19237_v20, %v11593_v38 }
 0x6b2   : > { %v15282_v21 = vpop.eup %15281  ;;  %15301 = vrcp.f32 %v11732_v41  ;;  %v13072_v0 = vmul.f32 -1.442695, %v19307_v33  ;;  %v19321_v22 = vadd.f32 %v19237_v20, %v11591_v26 }
 0x6b3   : > { %v15284_v19 = vpop.eup %15283  ;;  %v11811_v62 = vmul.f32 %v15282_v21, %v19242_v13  ;;  %15303 = vrcp.f32 %v11730_v23  ;;  %v13075_v3 = vmul.f32 -1.442695, %v19312_v39 }
 0x6b4   : > { %v15286_v59 = vpop.eup %15285  ;;  %v11809_v53 = vmul.f32 %v15284_v19, %v19246_v49  ;;  %15305 = vpow2.f32 %v13074_v55  ;;  %v13073_v56 = vmul.f32 -1.442695, %v19321_v22  ;;  %v14376_v34 = vpop.f32.mrb[80].mxu1 }
 0x6b5   : > { %v15288_v42 = vpop.eup %15287  ;;  %11841 = vst.msk [vmem:[%s19317_s11 + $0x10] sm:$0xff] %vm11837_vm10, %v11811_v62  ;;  %v11812_v11 = vmul.f32 %v15286_v59, %v19251_v50  ;;  %15307 = vpow2.f32 %v13072_v0  ;;  %v11596_v13 = vmul.f32 %v14376_v34, %v19232_v12  ;;  %v11496_v8 = vpop.f32.mrb[81].mxu1 }
 0x6b6   : > { %v15290_v4 = vpop.eup %15289  ;;  %11838 = vst.msk [vmem:[%s19317_s11] sm:$0xff] %vm11837_vm10, %v11809_v53  ;;  %v11810_v49 = vmul.f32 %v15288_v42, %v19255_v32  ;;  %15309 = vpow2.f32 %v13075_v3  ;;  %v11594_v60 = vmul.f32 %v19232_v12, %v11496_v8  ;;  %v14377_v5 = vpop.f32.mrb[82].mxu1 }
 0x6b7   : > { %v15292_v6 = vpop.eup %15291  ;;  %11842 = vst.msk [vmem:[%s19317_s11 + $0x18] sm:$0x3f] %vm11839_vm11, %v11812_v11  ;;  %v11735_v10 = vadd.f32 1.0, %v15290_v4  ;;  %15311 = vpow2.f32 %v13073_v56  ;;  %v19338_v50 = vadd.f32 %v19237_v20, %v11596_v13  ;;  %v11597_v35 = vmul.f32 %v14377_v5, %v19232_v12  ;;  %v11499_v7 = vpop.f32.mrb[83].mxu1 }
 0x6b8   : > { %v15294_v18 = vpop.eup %15293  ;;  %11840 = vst.msk [vmem:[%s19317_s11 + $0x8] sm:$0x3f] %vm11839_vm11, %v11810_v49  ;;  %v11733_v46 = vadd.f32 1.0, %v15292_v6  ;;  %v19344_v32 = vadd.f32 %v19237_v20, %v11594_v60  ;;  %v11595_v47 = vmul.f32 %v19232_v12, %v11499_v7 }
 0x6b9   : > { %v15296_v57 = vpop.eup %15295  ;;  %15313 = vrcp.f32 %v11735_v10  ;;  %v11736_v61 = vadd.f32 1.0, %v15294_v18  ;;  %v13078_v17 = vmul.f32 -1.442695, %v19338_v50  ;;  %v19349_v16 = vadd.f32 %v19237_v20, %v11597_v35 }
 0x6ba   : > { %v15298_v44 = vpop.eup %15297  ;;  %15315 = vrcp.f32 %v11733_v46  ;;  %v11734_v45 = vadd.f32 1.0, %v15296_v57  ;;  %v13076_v29 = vmul.f32 -1.442695, %v19344_v32  ;;  %v19353_v28 = vadd.f32 %v19237_v20, %v11595_v47 }
 0x6bb   : > { %v15300_v63 = vpop.eup %15299  ;;  %v11815_v24 = vmul.f32 %v15298_v44, %v19262_v43  ;;  %15317 = vrcp.f32 %v11736_v61  ;;  %v13079_v1 = vmul.f32 -1.442695, %v19349_v16 }
 0x6bc   : > { %v15302_v25 = vpop.eup %15301  ;;  %v11813_v52 = vmul.f32 %v15300_v63, %v19266_v58  ;;  %15319 = vrcp.f32 %v11734_v45  ;;  %v13077_v9 = vmul.f32 -1.442695, %v19353_v28  ;;  %v14380_v27 = vpop.f32.mrb[84].mxu1 }
 0x6bd   : > { %v15304_v2 = vpop.eup %15303  ;;  %11845 = vst.msk [vmem:[%s19317_s11 + $0x30] sm:$0xff] %vm11837_vm10, %v11815_v24  ;;  %v11816_v30 = vmul.f32 %v15302_v25, %v19271_v15  ;;  %15321 = vpow2.f32 %v13078_v17  ;;  %v11600_v38 = vmul.f32 %v14380_v27, %v19232_v12  ;;  %v11512_v43 = vpop.f32.mrb[85].mxu1 }
 0x6be   : > { %v15306_v48 = vpop.eup %15305  ;;  %11843 = vst.msk [vmem:[%s19317_s11 + $0x20] sm:$0xff] %vm11837_vm10, %v11813_v52  ;;  %v11814_v58 = vmul.f32 %v15304_v2, %v19275_v31  ;;  %15323 = vpow2.f32 %v13076_v29  ;;  %v11598_v36 = vmul.f32 %v19232_v12, %v11512_v43  ;;  %v14381_v41 = vpop.f32.mrb[86].mxu1 }
 0x6bf   : > { %v15308_v26 = vpop.eup %15307  ;;  %11846 = vst.msk [vmem:[%s19317_s11 + $0x38] sm:$0x3f] %vm11839_vm11, %v11816_v30  ;;  %v11739_v23 = vadd.f32 1.0, %v15306_v48  ;;  %15325 = vpow2.f32 %v13079_v1  ;;  %v19370_v15 = vadd.f32 %v19237_v20, %v11600_v38  ;;  %v11601_v55 = vmul.f32 %v14381_v41, %v19232_v12  ;;  %v11515_v21 = vpop.f32.mrb[87].mxu1 }
 0x6c0   : > { %v15310_v0 = vpop.eup %15309  ;;  %11844 = vst.msk [vmem:[%s19317_s11 + $0x28] sm:$0x3f] %vm11839_vm11, %v11814_v58  ;;  %v11737_v19 = vadd.f32 1.0, %v15308_v26  ;;  %15327 = vpow2.f32 %v13077_v9  ;;  %v19376_v31 = vadd.f32 %v19237_v20, %v11598_v36  ;;  %v11599_v62 = vmul.f32 %v19232_v12, %v11515_v21 }
 0x6c1   : > { %v15312_v3 = vpop.eup %15311  ;;  %15329 = vrcp.f32 %v11739_v23  ;;  %v11740_v59 = vadd.f32 1.0, %v15310_v0  ;;  %v13082_v53 = vmul.f32 -1.442695, %v19370_v15  ;;  %v19381_v56 = vadd.f32 %v19237_v20, %v11601_v55 }
 0x6c2   : > { %15331 = vrcp.f32 %v11737_v19  ;;  %v11738_v34 = vadd.f32 1.0, %v15312_v3  ;;  %v13080_v42 = vmul.f32 -1.442695, %v19376_v31  ;;  %v19385_v11 = vadd.f32 %v19237_v20, %v11599_v62 }
 0x6c3   : > { %v15314_v13 = vpop.eup %15313  ;;  %15333 = vrcp.f32 %v11740_v59  ;;  %v13083_v8 = vmul.f32 -1.442695, %v19381_v56 }
 0x6c4   : > { %v15316_v4 = vpop.eup %15315  ;;  %v11819_v49 = vmul.f32 %v15314_v13, %v19282_v40  ;;  %15335 = vrcp.f32 %v11738_v34  ;;  %v13081_v60 = vmul.f32 -1.442695, %v19385_v11  ;;  %v14384_v5 = vpop.f32.mrb[88].mxu1 }
 0x6c5   : > { %v15318_v6 = vpop.eup %15317  ;;  %v11817_v10 = vmul.f32 %v15316_v4, %v19286_v14  ;;  %15337 = vpow2.f32 %v13082_v53  ;;  %v11604_v35 = vmul.f32 %v14384_v5, %v19232_v12  ;;  %v11528_v7 = vpop.f32.mrb[89].mxu1 }
 0x6c6   : > { %v15320_v18 = vpop.eup %15319  ;;  %11849 = vst.msk [vmem:[%s19317_s11 + $0x50] sm:$0xff] %vm11837_vm10, %v11819_v49  ;;  %v11820_v46 = vmul.f32 %v15318_v6, %v19291_v51  ;;  %15339 = vpow2.f32 %v13080_v42  ;;  %v11602_v40 = vmul.f32 %v19232_v12, %v11528_v7  ;;  %v14385_v47 = vpop.f32.mrb[90].mxu1 }
 0x6c7   : > { %v15322_v57 = vpop.eup %15321  ;;  %11847 = vst.msk [vmem:[%s19317_s11 + $0x40] sm:$0xff] %vm11837_vm10, %v11817_v10  ;;  %v11818_v14 = vmul.f32 %v15320_v18, %v19295_v37  ;;  %15341 = vpow2.f32 %v13083_v8  ;;  %v19400_v61 = vadd.f32 %v19237_v20, %v11604_v35  ;;  %v11605_v17 = vmul.f32 %v14385_v47, %v19232_v12  ;;  %v11531_v44 = vpop.f32.mrb[91].mxu1 }
 0x6c8   : > { %v15324_v45 = vpop.eup %15323  ;;  %11850 = vst.msk [vmem:[%s19317_s11 + $0x58] sm:$0x3f] %vm11839_vm11, %v11820_v46  ;;  %v11743_v51 = vadd.f32 1.0, %v15322_v57  ;;  %15343 = vpow2.f32 %v13081_v60  ;;  %v19406_v29 = vadd.f32 %v19237_v20, %v11602_v40  ;;  %v11603_v63 = vmul.f32 %v19232_v12, %v11531_v44 }
 0x6c9   : > { %v15326_v24 = vpop.eup %15325  ;;  %11848 = vst.msk [vmem:[%s19317_s11 + $0x48] sm:$0x3f] %vm11839_vm11, %v11818_v14  ;;  %v11741_v37 = vadd.f32 1.0, %v15324_v45  ;;  %v19412_v1 = vadd.f32 %v19237_v20, %v11605_v17  ;;  %v13086_v9 = vmul.f32 -1.442695, %v19400_v61 }
 0x6ca   : > { %v15328_v25 = vpop.eup %15327  ;;  %15345 = vrcp.f32 %v11743_v51  ;;  %v11744_v52 = vadd.f32 1.0, %v15326_v24  ;;  %v19416_v27 = vadd.f32 %v19237_v20, %v11603_v63  ;;  %v13084_v30 = vmul.f32 -1.442695, %v19406_v29 }
 0x6cb   : > { %v15330_v2 = vpop.eup %15329  ;;  %15347 = vrcp.f32 %v11741_v37  ;;  %v11742_v12 = vadd.f32 1.0, %v15328_v25  ;;  %v13087_v48 = vmul.f32 -1.442695, %v19412_v1 }
 0x6cc   : > { %v15332_v38 = vpop.eup %15331  ;;  %v11823_v43 = vmul.f32 %v15330_v2, %v19303_v54  ;;  %15349 = vrcp.f32 %v11744_v52  ;;  %v13085_v20 = vmul.f32 -1.442695, %v19416_v27 }
 0x6cd   : > { %v15334_v58 = vpop.eup %15333  ;;  %v11821_v36 = vmul.f32 %v15332_v38, %v19307_v33  ;;  %15351 = vrcp.f32 %v11742_v12 }
 0x6ce   : > { %v15336_v41 = vpop.eup %15335  ;;  %11853 = vst.msk [vmem:[%s19317_s11 + $0x70] sm:$0xff] %vm11837_vm10, %v11823_v43  ;;  %v11824_v26 = vmul.f32 %v15334_v58, %v19312_v39  ;;  %15353 = vpow2.f32 %v13086_v9 }
 0x6cf   : > { %v15338_v23 = vpop.eup %15337  ;;  %11851 = vst.msk [vmem:[%s19317_s11 + $0x60] sm:$0xff] %vm11837_vm10, %v11821_v36  ;;  %v11822_v54 = vmul.f32 %v15336_v41, %v19321_v22  ;;  %15355 = vpow2.f32 %v13084_v30 }
 0x6d0   : > { %v15340_v55 = vpop.eup %15339  ;;  %11854 = vst.msk [vmem:[%s19317_s11 + $0x78] sm:$0x3f] %vm11839_vm11, %v11824_v26  ;;  %v11747_v33 = vadd.f32 1.0, %v15338_v23  ;;  %15357 = vpow2.f32 %v13087_v48 }
 0x6d1   : > { %v15342_v21 = vpop.eup %15341  ;;  %11852 = vst.msk [vmem:[%s19317_s11 + $0x68] sm:$0x3f] %vm11839_vm11, %v11822_v54  ;;  %v11745_v0 = vadd.f32 1.0, %v15340_v55  ;;  %15359 = vpow2.f32 %v13085_v20 }
 0x6d2   : > { %v15344_v19 = vpop.eup %15343  ;;  %15361 = vrcp.f32 %v11747_v33  ;;  %v11748_v39 = vadd.f32 1.0, %v15342_v21 }
 0x6d3   : > { %15363 = vrcp.f32 %v11745_v0  ;;  %v11746_v62 = vadd.f32 1.0, %v15344_v19 }
 0x6d4   : > { %v15346_v22 = vpop.eup %15345  ;;  %15365 = vrcp.f32 %v11748_v39 }
 0x6d5   : > { %v15348_v3 = vpop.eup %15347  ;;  %v11827_v59 = vmul.f32 %v15346_v22, %v19338_v50  ;;  %15367 = vrcp.f32 %v11746_v62 }
 0x6d6   : > { %v15350_v53 = vpop.eup %15349  ;;  %v11825_v34 = vmul.f32 %v15348_v3, %v19344_v32 }
 0x6d7   : > { %v15352_v42 = vpop.eup %15351  ;;  %11857 = vst.msk [vmem:[%s19317_s11 + $0x90] sm:$0xff] %vm11837_vm10, %v11827_v59  ;;  %v11828_v13 = vmul.f32 %v15350_v53, %v19349_v16 }
 0x6d8   : > { %v15354_v8 = vpop.eup %15353  ;;  %11855 = vst.msk [vmem:[%s19317_s11 + $0x80] sm:$0xff] %vm11837_vm10, %v11825_v34  ;;  %v11826_v4 = vmul.f32 %v15352_v42, %v19353_v28 }
 0x6d9   : > { %v15356_v49 = vpop.eup %15355  ;;  %11858 = vst.msk [vmem:[%s19317_s11 + $0x98] sm:$0x3f] %vm11839_vm11, %v11828_v13  ;;  %v11751_v60 = vadd.f32 1.0, %v15354_v8 }
 0x6da   : > { %v15358_v5 = vpop.eup %15357  ;;  %11856 = vst.msk [vmem:[%s19317_s11 + $0x88] sm:$0x3f] %vm11839_vm11, %v11826_v4  ;;  %v11749_v50 = vadd.f32 1.0, %v15356_v49 }
 0x6db   : > { %v15360_v32 = vpop.eup %15359  ;;  %15369 = vrcp.f32 %v11751_v60  ;;  %v11752_v6 = vadd.f32 1.0, %v15358_v5 }
 0x6dc   : > { %v15362_v16 = vpop.eup %15361  ;;  %15371 = vrcp.f32 %v11749_v50  ;;  %v11750_v10 = vadd.f32 1.0, %v15360_v32 }
 0x6dd   : > { %v15364_v35 = vpop.eup %15363  ;;  %v11831_v28 = vmul.f32 %v15362_v16, %v19370_v15  ;;  %15373 = vrcp.f32 %v11752_v6 }
 0x6de   : > { %v15366_v7 = vpop.eup %15365  ;;  %v11829_v18 = vmul.f32 %v15364_v35, %v19376_v31  ;;  %15375 = vrcp.f32 %v11750_v10 }
 0x6df   : > { %v15368_v46 = vpop.eup %15367  ;;  %11861 = vst.msk [vmem:[%s19317_s11 + $0xb0] sm:$0xff] %vm11837_vm10, %v11831_v28  ;;  %v11832_v40 = vmul.f32 %v15366_v7, %v19381_v56 }
 0x6e0   : > { %11859 = vst.msk [vmem:[%s19317_s11 + $0xa0] sm:$0xff] %vm11837_vm10, %v11829_v18  ;;  %v11830_v47 = vmul.f32 %v15368_v46, %v19385_v11 }
 0x6e1   : > { %11862 = vst.msk [vmem:[%s19317_s11 + $0xb8] sm:$0x3f] %vm11839_vm11, %v11832_v40 }
 0x6e2   : > { %11860 = vst.msk [vmem:[%s19317_s11 + $0xa8] sm:$0x3f] %vm11839_vm11, %v11830_v47 }
 0x6e5   : > { %v15370_v15 = vpop.eup %15369 }
 0x6e6   : > { %v15372_v57 = vpop.eup %15371  ;;  %v11835_v31 = vmul.f32 %v15370_v15, %v19400_v61 }
 0x6e7   : > { %v15374_v14 = vpop.eup %15373  ;;  %v11833_v17 = vmul.f32 %v15372_v57, %v19406_v29 }
 0x6e8   : > { %v15376_v44 = vpop.eup %15375  ;;  %11865 = vst.msk [vmem:[%s19317_s11 + $0xd0] sm:$0xff] %vm11837_vm10, %v11835_v31  ;;  %v11836_v56 = vmul.f32 %v15374_v14, %v19412_v1 }
 0x6e9   : > { %11863 = vst.msk [vmem:[%s19317_s11 + $0xc0] sm:$0xff] %vm11837_vm10, %v11833_v17  ;;  %v11834_v11 = vmul.f32 %v15376_v44, %v19416_v27 }
 0x6ea   : > { %11866 = vst.msk [vmem:[%s19317_s11 + $0xd8] sm:$0x3f] %vm11839_vm11, %v11836_v56 }
 0x6eb   : > { %11864 = vst.msk [vmem:[%s19317_s11 + $0xc8] sm:$0x3f] %vm11839_vm11, %v11834_v11 }
 0x6ec PF: > { %s16_s23 = sadd.s32 1, %s15584_s23   ;;  %s19571_s21 = smov %s15580_s22 }
 0x6ed   : > { %p13_p5 = scmp.ge.s32.totalorder %s16_s23, 4   ;;  %s19572_s22 = smov %s19574_s24 }
 0x6ef   :  { %15 = sbr.rel (!%p13_p5) target bundleno = 2 (0x2), region = 95 }

</bundles_post_ra>
